<compile_context>
chip_gen: v7x
topology: tpu7x:2x2x1
jax: 0.10.0
libtpu: 0.0.40
codegen_flags: <defaults>
</compile_context>

<pallas_src>
import functools

import jax
import jax.numpy as jnp
from jax.experimental import pallas as pl
from jax.experimental.pallas import tpu as pltpu

# ------------------------------- mini config --------------------------------
IMG = 32
IN_CH = 3
STEM_CH = 32
HEAD_CH = 256
NUM_CLASSES = 18
DTYPE = jnp.float32
BN_EPS = 1e-3

# (expand_ratio, stride, out_channels)
BLOCK_CFG = (
    (1, 1, 16),
    (6, 2, 32),
    (6, 1, 32),
    (6, 2, 64),
    (6, 1, 64),
)


# ------------------------------ small helpers -------------------------------
def _sigmoid(y):
    # numerically stable logistic via tanh (EUP path)
    return 0.5 * (1.0 + jnp.tanh(0.5 * y))


def _silu(y):
    return y * _sigmoid(y)


def _row_tile(m):
    t = m if m <= 128 else 128
    assert m % t == 0, (m, t)
    return t


def _same_pad(size, k, s):
    out = -(-size // s)
    pad = max((out - 1) * s + k - size, 0)
    return out, pad // 2, pad - pad // 2        # TF "SAME": extra pad at end


def _im2col3x3(x, stride):
    """x: (B,H,W,C) -> taps (9, B, Ho*Wo, C) with TF 'SAME' padding."""
    B, H, W, C = x.shape
    Ho, pt, pb = _same_pad(H, 3, stride)
    Wo, pw0, pw1 = _same_pad(W, 3, stride)
    xp = jnp.pad(x, ((0, 0), (pt, pb), (pw0, pw1), (0, 0)))
    taps = []
    for kh in range(3):
        for kw in range(3):
            sl = xp[:, kh:kh + (Ho - 1) * stride + 1:stride,
                    kw:kw + (Wo - 1) * stride + 1:stride, :]
            taps.append(sl.reshape(B, Ho * Wo, C))
    return jnp.stack(taps, axis=0), Ho, Wo


# ------------------------------ Pallas kernels -------------------------------
def _pw_kernel(*refs, act, has_se, has_res):
    """Fused pointwise conv: (SE-scale) -> matmul(bf16) -> +bias -> (SiLU) -> (+res)."""
    it = iter(refs)
    x_ref = next(it)
    w_ref = next(it)
    b_ref = next(it)
    se_ref = next(it) if has_se else None
    res_ref = next(it) if has_res else None
    o_ref = next(it)

    x = x_ref[0].astype(jnp.float32)                   # (T, Cin)
    if has_se:
        x = x * se_ref[0]                              # (1, Cin) broadcast
    y = jnp.dot(x.astype(jnp.bfloat16),
                w_ref[...].astype(jnp.bfloat16),
                preferred_element_type=jnp.float32)
    y = y + b_ref[...]
    if act == "silu":
        y = _silu(y)
    if has_res:
        y = y + res_ref[0].astype(jnp.float32)
    o_ref[0] = y.astype(o_ref.dtype)


def _dw_kernel(x_ref, w_ref, b_ref, o_ref):
    """Fused depthwise 3x3 conv (+folded BN) + SiLU, taps unrolled on the VPU."""
    w = w_ref[...]                                     # (9, C)
    acc = x_ref[0, 0].astype(jnp.float32) * w[0:1, :]
    for k in range(1, 9):
        acc = acc + x_ref[k, 0].astype(jnp.float32) * w[k:k + 1, :]
    y = _silu(acc + b_ref[...])
    o_ref[0] = y.astype(o_ref.dtype)


def _se_kernel(p_ref, w1_ref, b1_ref, w2_ref, b2_ref, o_ref):
    """Fused squeeze-and-excitation gate: fc1 -> SiLU -> fc2 -> sigmoid."""
    p = p_ref[...].astype(jnp.float32)                 # (B, C)
    h = jnp.dot(p, w1_ref[...], preferred_element_type=jnp.float32) + b1_ref[...]
    h = _silu(h)
    s = jnp.dot(h, w2_ref[...], preferred_element_type=jnp.float32) + b2_ref[...]
    o_ref[...] = _sigmoid(s).astype(o_ref.dtype)


def _fc_kernel(x_ref, w_ref, b_ref, o_ref):
    y = jnp.dot(x_ref[...].astype(jnp.bfloat16),
                w_ref[...].astype(jnp.bfloat16),
                preferred_element_type=jnp.float32) + b_ref[...]
    o_ref[...] = y.astype(o_ref.dtype)


# ------------------------------ Pallas wrappers ------------------------------
def conv1x1(x, w, b, *, act=None, se=None, res=None):
    """Fused 1x1 conv (folded BN) + optional SE scale + activation + residual.

    x: (B, M, Cin)   w: (Cin, Cout)   b: (1, Cout)
    se: (B, Cin) or None   res: (B, M, Cout) or None
    """
    B, M, Cin = x.shape
    Cout = w.shape[1]
    T = _row_tile(M)
    grid = (B, M // T)

    in_specs = [
        pl.BlockSpec((1, T, Cin), lambda bb, tt: (bb, tt, 0)),
        pl.BlockSpec((Cin, Cout), lambda bb, tt: (0, 0)),
        pl.BlockSpec((1, Cout), lambda bb, tt: (0, 0)),
    ]
    args = [x, w, b]
    if se is not None:
        in_specs.append(pl.BlockSpec((1, 1, Cin), lambda bb, tt: (bb, 0, 0)))
        args.append(se.reshape(B, 1, Cin))
    if res is not None:
        in_specs.append(pl.BlockSpec((1, T, Cout), lambda bb, tt: (bb, tt, 0)))
        args.append(res)

    return pl.pallas_call(
        functools.partial(_pw_kernel, act=act,
                          has_se=se is not None, has_res=res is not None),
        grid=grid,
        in_specs=in_specs,
        out_specs=pl.BlockSpec((1, T, Cout), lambda bb, tt: (bb, tt, 0)),
        out_shape=jax.ShapeDtypeStruct((B, M, Cout), x.dtype),
        compiler_params=pltpu.CompilerParams(
            dimension_semantics=("parallel", "parallel")),
    )(*args)


def depthwise3x3(x, w, b, *, stride):
    """Fused depthwise 3x3 conv (folded BN) + SiLU.  x: (B, H, W, C)."""
    B, H, W, C = x.shape
    patches, Ho, Wo = _im2col3x3(x, stride)            # (9, B, M, C)
    M = Ho * Wo
    T = _row_tile(M)
    y = pl.pallas_call(
        _dw_kernel,
        grid=(B, M // T),
        in_specs=[
            pl.BlockSpec((9, 1, T, C), lambda bb, tt: (0, bb, tt, 0)),
            pl.BlockSpec((9, C), lambda bb, tt: (0, 0)),
            pl.BlockSpec((1, C), lambda bb, tt: (0, 0)),
        ],
        out_specs=pl.BlockSpec((1, T, C), lambda bb, tt: (bb, tt, 0)),
        out_shape=jax.ShapeDtypeStruct((B, M, C), x.dtype),
        compiler_params=pltpu.CompilerParams(
            dimension_semantics=("parallel", "parallel")),
    )(patches, w, b)
    return y.reshape(B, Ho, Wo, C)


def se_gate(pooled, w1, b1, w2, b2):
    B, C = pooled.shape
    R = w1.shape[1]
    return pl.pallas_call(
        _se_kernel,
        grid=(1,),
        in_specs=[
            pl.BlockSpec((B, C), lambda i: (0, 0)),
            pl.BlockSpec((C, R), lambda i: (0, 0)),
            pl.BlockSpec((1, R), lambda i: (0, 0)),
            pl.BlockSpec((R, C), lambda i: (0, 0)),
            pl.BlockSpec((1, C), lambda i: (0, 0)),
        ],
        out_specs=pl.BlockSpec((B, C), lambda i: (0, 0)),
        out_shape=jax.ShapeDtypeStruct((B, C), pooled.dtype),
    )(pooled, w1, b1, w2, b2)


def classifier(x, w, b):
    B, C = x.shape
    N = w.shape[1]
    return pl.pallas_call(
        _fc_kernel,
        grid=(1,),
        in_specs=[
            pl.BlockSpec((B, C), lambda i: (0, 0)),
            pl.BlockSpec((C, N), lambda i: (0, 0)),
            pl.BlockSpec((1, N), lambda i: (0, 0)),
        ],
        out_specs=pl.BlockSpec((B, N), lambda i: (0, 0)),
        out_shape=jax.ShapeDtypeStruct((B, N), x.dtype),
    )(x, w, b)


# ------------------------------ parameter init -------------------------------
def _fold_bn(w, gamma, beta, mean, var, eps=BN_EPS):
    """Fold inference-time BatchNorm (per output channel) into conv weight+bias."""
    scale = gamma / jnp.sqrt(var + eps)
    return w * scale, (beta - mean * scale)[None, :]


def init_params(key):
    keys = iter(jax.random.split(key, 256))

    def nrm(shape, std=0.05):
        return std * jax.random.normal(next(keys), shape, dtype=DTYPE)

    def bn_params(c):
        gamma = 1.0 + 0.1 * jax.random.normal(next(keys), (c,), DTYPE)
        beta = 0.1 * jax.random.normal(next(keys), (c,), DTYPE)
        mean = 0.1 * jax.random.normal(next(keys), (c,), DTYPE)
        var = 1.0 + 0.1 * jnp.abs(jax.random.normal(next(keys), (c,), DTYPE))
        return gamma, beta, mean, var

    params = {}
    params["stem_w"], params["stem_b"] = _fold_bn(
        nrm((9 * IN_CH, STEM_CH)), *bn_params(STEM_CH))

    blocks = []
    cin = STEM_CH
    for (e, _, cout) in BLOCK_CFG:
        p = {}
        cexp = cin * e
        if e != 1:
            p["expand_w"], p["expand_b"] = _fold_bn(nrm((cin, cexp)),
                                                    *bn_params(cexp))
        p["dw_w"], p["dw_b"] = _fold_bn(nrm((9, cexp)), *bn_params(cexp))
        crd = max(4, cin // 4)                 # SE reduce from *input* channels
        p["se_w1"] = nrm((cexp, crd))
        p["se_b1"] = jnp.zeros((1, crd), DTYPE)
        p["se_w2"] = nrm((crd, cexp))
        p["se_b2"] = jnp.zeros((1, cexp), DTYPE)
        p["project_w"], p["project_b"] = _fold_bn(nrm((cexp, cout)),
                                                  *bn_params(cout))
        blocks.append(p)
        cin = cout
    params["blocks"] = blocks

    params["head_w"], params["head_b"] = _fold_bn(nrm((cin, HEAD_CH)),
                                                  *bn_params(HEAD_CH))
    params["fc_w"] = nrm((HEAD_CH, NUM_CLASSES))
    params["fc_b"] = jnp.zeros((1, NUM_CLASSES), DTYPE)
    return params


# --------------------------------- forward ----------------------------------
def mbconv(x, p, stride):
    B, H, W, Cin = x.shape
    Cout = p["project_w"].shape[1]
    use_res = (stride == 1 and Cin == Cout)

    h = x.reshape(B, H * W, Cin)
    if "expand_w" in p:                          # 1x1 expand + BN + SiLU (fused)
        h = conv1x1(h, p["expand_w"], p["expand_b"], act="silu")
    Cexp = h.shape[-1]

    h = depthwise3x3(h.reshape(B, H, W, Cexp), p["dw_w"], p["dw_b"],
                     stride=stride)              # dw 3x3 + BN + SiLU (fused)
    _, Ho, Wo, _ = h.shape
    hf = h.reshape(B, Ho * Wo, Cexp)

    # squeeze-and-excitation: global average pool (XLA glue) + fused gate kernel
    pooled = hf.mean(axis=1)
    se = se_gate(pooled, p["se_w1"], p["se_b1"], p["se_w2"], p["se_b2"])

    # 1x1 project + BN, with SE channel scaling and residual add fused in-kernel
    res = x.reshape(B, H * W, Cin) if use_res else None
    out = conv1x1(hf, p["project_w"], p["project_b"], act=None, se=se, res=res)
    return out.reshape(B, Ho, Wo, Cout)


def efficientnet_forward(x_nchw, params):
    x = jnp.transpose(x_nchw, (0, 2, 3, 1))                     # NHWC
    B = x.shape[0]

    # stem: 3x3 stride-2 conv (+folded BN) + SiLU as im2col + fused matmul
    taps, Ho, Wo = _im2col3x3(x, 2)                             # (9, B, M, 3)
    M = Ho * Wo
    patches = taps.transpose(1, 2, 0, 3).reshape(B, M, 9 * IN_CH)
    h = conv1x1(patches, params["stem_w"], params["stem_b"], act="silu")
    x = h.reshape(B, Ho, Wo, STEM_CH)

    for p, (_, stride, _) in zip(params["blocks"], BLOCK_CFG):
        x = mbconv(x, p, stride)

    B, H, W, C = x.shape
    h = conv1x1(x.reshape(B, H * W, C), params["head_w"], params["head_b"],
                act="silu")
    pooled = h.mean(axis=1)                                     # global avg pool
    return classifier(pooled, params["fc_w"], params["fc_b"])


# ----------------------------------- main ------------------------------------
if __name__ == "__main__":
    key = jax.random.PRNGKey(0)
    kp, kx = jax.random.split(key)
    params = init_params(kp)
    x = jax.random.normal(kx, (2, IN_CH, IMG, IMG), dtype=DTYPE)  # NCHW like PyTorch

    fwd = jax.jit(efficientnet_forward)
    logits = fwd(x, params)
    logits = jax.block_until_ready(logits)

    assert logits.shape == (2, NUM_CLASSES)
    assert bool(jnp.all(jnp.isfinite(logits)))
    print("KERNEL_OK")
</pallas_src>

<mosaic_0001>
module attributes {stable_mosaic.version = 11 : i64} {
  func.func @_pw_kernel(%arg0: i32, %arg1: i32, %arg2: memref<1x128x27xf32, #tpu.memory_space<vmem>>, %arg3: memref<27x32xf32, #tpu.memory_space<vmem>>, %arg4: memref<1x32xf32, #tpu.memory_space<vmem>>, %arg5: memref<1x128x32xf32, #tpu.memory_space<vmem>>) attributes {dimension_semantics = [#tpu.dimension_semantics<parallel>, #tpu.dimension_semantics<parallel>], iteration_bounds = array<i64: 2, 2>, scalar_prefetch = 0 : i64, scratch_operands = 0 : i64, tpu.core_type = #tpu.core_type<tc>, window_params = [{transform_indices = @transform_0, window_bounds = array<i64: 1, 128, 27>}, {pipeline_mode = #tpu.pipeline_mode<synchronous>, transform_indices = @transform_1, window_bounds = array<i64: 27, 32>}, {pipeline_mode = #tpu.pipeline_mode<synchronous>, transform_indices = @transform_2, window_bounds = array<i64: 1, 32>}, {transform_indices = @transform_3, window_bounds = array<i64: 1, 128, 32>}]} {
    %c0 = arith.constant 0 : index
    %c0_0 = arith.constant 0 : index
    %c0_1 = arith.constant 0 : index
    %0 = vector.load %arg2[%c0, %c0_0, %c0_1] : memref<1x128x27xf32, #tpu.memory_space<vmem>>, vector<1x128x27xf32>
    %1 = vector.shape_cast %0 : vector<1x128x27xf32> to vector<128x27xf32>
    %2 = arith.truncf %1 : vector<128x27xf32> to vector<128x27xbf16>
    %c0_2 = arith.constant 0 : index
    %c0_3 = arith.constant 0 : index
    %3 = vector.load %arg3[%c0_2, %c0_3] : memref<27x32xf32, #tpu.memory_space<vmem>>, vector<27x32xf32>
    %4 = arith.truncf %3 : vector<27x32xf32> to vector<27x32xbf16>
    %cst = arith.constant dense<0.000000e+00> : vector<128x32xf32>
    %5 = tpu.matmul %2, %4, %cst {dimension_numbers = #tpu.dot_dimension_numbers<[1], [0], [0], [1], [0, 0, 1, 1], [], []>} : vector<128x27xbf16>, vector<27x32xbf16>, vector<128x32xf32> -> vector<128x32xf32>
    %c0_4 = arith.constant 0 : index
    %c0_5 = arith.constant 0 : index
    %6 = vector.load %arg4[%c0_4, %c0_5] : memref<1x32xf32, #tpu.memory_space<vmem>>, vector<1x32xf32>
    %7 = vector.broadcast %6 : vector<1x32xf32> to vector<128x32xf32>
    %8 = arith.addf %5, %7 : vector<128x32xf32>
    %cst_6 = arith.constant 5.000000e-01 : f32
    %9 = vector.broadcast %cst_6 : f32 to vector<128x32xf32>
    %10 = arith.mulf %9, %8 : vector<128x32xf32>
    %11 = math.tanh %10 : vector<128x32xf32>
    %cst_7 = arith.constant 1.000000e+00 : f32
    %12 = vector.broadcast %cst_7 : f32 to vector<128x32xf32>
    %13 = arith.addf %12, %11 : vector<128x32xf32>
    %cst_8 = arith.constant 5.000000e-01 : f32
    %14 = vector.broadcast %cst_8 : f32 to vector<128x32xf32>
    %15 = arith.mulf %14, %13 : vector<128x32xf32>
    %16 = arith.mulf %8, %15 : vector<128x32xf32>
    %c0_9 = arith.constant 0 : index
    %c0_10 = arith.constant 0 : index
    %c0_11 = arith.constant 0 : index
    %17 = vector.load %arg5[%c0_9, %c0_10, %c0_11] : memref<1x128x32xf32, #tpu.memory_space<vmem>>, vector<1x128x32xf32>
    %18 = vector.shape_cast %17 : vector<1x128x32xf32> to vector<128x32xf32>
    %19 = vector.shape_cast %16 : vector<128x32xf32> to vector<1x128x32xf32>
    tpu.vector_store %arg5[%c0_9, %c0_10, %c0_11], %19 {strides = array<i32>} : memref<1x128x32xf32, #tpu.memory_space<vmem>>, vector<1x128x32xf32>,
    return
  }
  func.func @transform_0(%arg0: i32, %arg1: i32) -> (i32, i32, i32) {
    %c0_i32 = arith.constant 0 : i32
    %c0_i32_0 = arith.constant 0 : i32
    return %arg0, %arg1, %c0_i32 : i32, i32, i32
  }
  func.func @transform_1(%arg0: i32, %arg1: i32) -> (i32, i32) {
    %c0_i32 = arith.constant 0 : i32
    %c0_i32_0 = arith.constant 0 : i32
    %c0_i32_1 = arith.constant 0 : i32
    return %c0_i32, %c0_i32_0 : i32, i32
  }
  func.func @transform_2(%arg0: i32, %arg1: i32) -> (i32, i32) {
    %c0_i32 = arith.constant 0 : i32
    %c0_i32_0 = arith.constant 0 : i32
    %c0_i32_1 = arith.constant 0 : i32
    return %c0_i32, %c0_i32_0 : i32, i32
  }
  func.func @transform_3(%arg0: i32, %arg1: i32) -> (i32, i32, i32) {
    %c0_i32 = arith.constant 0 : i32
    %c0_i32_0 = arith.constant 0 : i32
    return %arg0, %arg1, %c0_i32 : i32, i32, i32
  }
}

module attributes {stable_mosaic.version = 11 : i64} {
  func.func @_dw_kernel(%arg0: i32, %arg1: i32, %arg2: memref<9x1x128x32xf32, #tpu.memory_space<vmem>>, %arg3: memref<9x32xf32, #tpu.memory_space<vmem>>, %arg4: memref<1x32xf32, #tpu.memory_space<vmem>>, %arg5: memref<1x128x32xf32, #tpu.memory_space<vmem>>) attributes {dimension_semantics = [#tpu.dimension_semantics<parallel>, #tpu.dimension_semantics<parallel>], iteration_bounds = array<i64: 2, 2>, scalar_prefetch = 0 : i64, scratch_operands = 0 : i64, tpu.core_type = #tpu.core_type<tc>, window_params = [{transform_indices = @transform_0, window_bounds = array<i64: 9, 1, 128, 32>}, {pipeline_mode = #tpu.pipeline_mode<synchronous>, transform_indices = @transform_1, window_bounds = array<i64: 9, 32>}, {pipeline_mode = #tpu.pipeline_mode<synchronous>, transform_indices = @transform_2, window_bounds = array<i64: 1, 32>}, {transform_indices = @transform_3, window_bounds = array<i64: 1, 128, 32>}]} {
    %c0 = arith.constant 0 : index
    %c0_0 = arith.constant 0 : index
    %0 = vector.load %arg3[%c0, %c0_0] : memref<9x32xf32, #tpu.memory_space<vmem>>, vector<9x32xf32>
    %c0_1 = arith.constant 0 : index
    %c0_2 = arith.constant 0 : index
    %c0_3 = arith.constant 0 : index
    %c0_4 = arith.constant 0 : index
    %1 = vector.load %arg2[%c0_1, %c0_2, %c0_3, %c0_4] : memref<9x1x128x32xf32, #tpu.memory_space<vmem>>, vector<1x1x128x32xf32>
    %2 = vector.shape_cast %1 : vector<1x1x128x32xf32> to vector<128x32xf32>
    %3 = vector.extract_strided_slice %0 {offsets = [0, 0], sizes = [1, 32], strides = [1, 1]} : vector<9x32xf32> to vector<1x32xf32>
    %4 = vector.broadcast %3 : vector<1x32xf32> to vector<128x32xf32>
    %5 = arith.mulf %2, %4 : vector<128x32xf32>
    %c1 = arith.constant 1 : index
    %c0_5 = arith.constant 0 : index
    %c0_6 = arith.constant 0 : index
    %c0_7 = arith.constant 0 : index
    %6 = vector.load %arg2[%c1, %c0_5, %c0_6, %c0_7] : memref<9x1x128x32xf32, #tpu.memory_space<vmem>>, vector<1x1x128x32xf32>
    %7 = vector.shape_cast %6 : vector<1x1x128x32xf32> to vector<128x32xf32>
    %8 = vector.extract_strided_slice %0 {offsets = [1, 0], sizes = [1, 32], strides = [1, 1]} : vector<9x32xf32> to vector<1x32xf32>
    %9 = vector.broadcast %8 : vector<1x32xf32> to vector<128x32xf32>
    %10 = arith.mulf %7, %9 : vector<128x32xf32>
    %11 = arith.addf %5, %10 : vector<128x32xf32>
    %c2 = arith.constant 2 : index
    %c0_8 = arith.constant 0 : index
    %c0_9 = arith.constant 0 : index
    %c0_10 = arith.constant 0 : index
    %12 = vector.load %arg2[%c2, %c0_8, %c0_9, %c0_10] : memref<9x1x128x32xf32, #tpu.memory_space<vmem>>, vector<1x1x128x32xf32>
    %13 = vector.shape_cast %12 : vector<1x1x128x32xf32> to vector<128x32xf32>
    %14 = vector.extract_strided_slice %0 {offsets = [2, 0], sizes = [1, 32], strides = [1, 1]} : vector<9x32xf32> to vector<1x32xf32>
    %15 = vector.broadcast %14 : vector<1x32xf32> to vector<128x32xf32>
    %16 = arith.mulf %13, %15 : vector<128x32xf32>
    %17 = arith.addf %11, %16 : vector<128x32xf32>
    %c3 = arith.constant 3 : index
    %c0_11 = arith.constant 0 : index
    %c0_12 = arith.constant 0 : index
    %c0_13 = arith.constant 0 : index
    %18 = vector.load %arg2[%c3, %c0_11, %c0_12, %c0_13] : memref<9x1x128x32xf32, #tpu.memory_space<vmem>>, vector<1x1x128x32xf32>
    %19 = vector.shape_cast %18 : vector<1x1x128x32xf32> to vector<128x32xf32>
    %20 = vector.extract_strided_slice %0 {offsets = [3, 0], sizes = [1, 32], strides = [1, 1]} : vector<9x32xf32> to vector<1x32xf32>
    %21 = vector.broadcast %20 : vector<1x32xf32> to vector<128x32xf32>
    %22 = arith.mulf %19, %21 : vector<128x32xf32>
    %23 = arith.addf %17, %22 : vector<128x32xf32>
    %c4 = arith.constant 4 : index
    %c0_14 = arith.constant 0 : index
    %c0_15 = arith.constant 0 : index
    %c0_16 = arith.constant 0 : index
    %24 = vector.load %arg2[%c4, %c0_14, %c0_15, %c0_16] : memref<9x1x128x32xf32, #tpu.memory_space<vmem>>, vector<1x1x128x32xf32>
    %25 = vector.shape_cast %24 : vector<1x1x128x32xf32> to vector<128x32xf32>
    %26 = vector.extract_strided_slice %0 {offsets = [4, 0], sizes = [1, 32], strides = [1, 1]} : vector<9x32xf32> to vector<1x32xf32>
    %27 = vector.broadcast %26 : vector<1x32xf32> to vector<128x32xf32>
    %28 = arith.mulf %25, %27 : vector<128x32xf32>
    %29 = arith.addf %23, %28 : vector<128x32xf32>
    %c5 = arith.constant 5 : index
    %c0_17 = arith.constant 0 : index
    %c0_18 = arith.constant 0 : index
    %c0_19 = arith.constant 0 : index
    %30 = vector.load %arg2[%c5, %c0_17, %c0_18, %c0_19] : memref<9x1x128x32xf32, #tpu.memory_space<vmem>>, vector<1x1x128x32xf32>
    %31 = vector.shape_cast %30 : vector<1x1x128x32xf32> to vector<128x32xf32>
    %32 = vector.extract_strided_slice %0 {offsets = [5, 0], sizes = [1, 32], strides = [1, 1]} : vector<9x32xf32> to vector<1x32xf32>
    %33 = vector.broadcast %32 : vector<1x32xf32> to vector<128x32xf32>
    %34 = arith.mulf %31, %33 : vector<128x32xf32>
    %35 = arith.addf %29, %34 : vector<128x32xf32>
    %c6 = arith.constant 6 : index
    %c0_20 = arith.constant 0 : index
    %c0_21 = arith.constant 0 : index
    %c0_22 = arith.constant 0 : index
    %36 = vector.load %arg2[%c6, %c0_20, %c0_21, %c0_22] : memref<9x1x128x32xf32, #tpu.memory_space<vmem>>, vector<1x1x128x32xf32>
    %37 = vector.shape_cast %36 : vector<1x1x128x32xf32> to vector<128x32xf32>
    %38 = vector.extract_strided_slice %0 {offsets = [6, 0], sizes = [1, 32], strides = [1, 1]} : vector<9x32xf32> to vector<1x32xf32>
    %39 = vector.broadcast %38 : vector<1x32xf32> to vector<128x32xf32>
    %40 = arith.mulf %37, %39 : vector<128x32xf32>
    %41 = arith.addf %35, %40 : vector<128x32xf32>
    %c7 = arith.constant 7 : index
    %c0_23 = arith.constant 0 : index
    %c0_24 = arith.constant 0 : index
    %c0_25 = arith.constant 0 : index
    %42 = vector.load %arg2[%c7, %c0_23, %c0_24, %c0_25] : memref<9x1x128x32xf32, #tpu.memory_space<vmem>>, vector<1x1x128x32xf32>
    %43 = vector.shape_cast %42 : vector<1x1x128x32xf32> to vector<128x32xf32>
    %44 = vector.extract_strided_slice %0 {offsets = [7, 0], sizes = [1, 32], strides = [1, 1]} : vector<9x32xf32> to vector<1x32xf32>
    %45 = vector.broadcast %44 : vector<1x32xf32> to vector<128x32xf32>
    %46 = arith.mulf %43, %45 : vector<128x32xf32>
    %47 = arith.addf %41, %46 : vector<128x32xf32>
    %c8 = arith.constant 8 : index
    %c0_26 = arith.constant 0 : index
    %c0_27 = arith.constant 0 : index
    %c0_28 = arith.constant 0 : index
    %48 = vector.load %arg2[%c8, %c0_26, %c0_27, %c0_28] : memref<9x1x128x32xf32, #tpu.memory_space<vmem>>, vector<1x1x128x32xf32>
    %49 = vector.shape_cast %48 : vector<1x1x128x32xf32> to vector<128x32xf32>
    %50 = vector.extract_strided_slice %0 {offsets = [8, 0], sizes = [1, 32], strides = [1, 1]} : vector<9x32xf32> to vector<1x32xf32>
    %51 = vector.broadcast %50 : vector<1x32xf32> to vector<128x32xf32>
    %52 = arith.mulf %49, %51 : vector<128x32xf32>
    %53 = arith.addf %47, %52 : vector<128x32xf32>
    %c0_29 = arith.constant 0 : index
    %c0_30 = arith.constant 0 : index
    %54 = vector.load %arg4[%c0_29, %c0_30] : memref<1x32xf32, #tpu.memory_space<vmem>>, vector<1x32xf32>
    %55 = vector.broadcast %54 : vector<1x32xf32> to vector<128x32xf32>
    %56 = arith.addf %53, %55 : vector<128x32xf32>
    %cst = arith.constant 5.000000e-01 : f32
    %57 = vector.broadcast %cst : f32 to vector<128x32xf32>
    %58 = arith.mulf %57, %56 : vector<128x32xf32>
    %59 = math.tanh %58 : vector<128x32xf32>
    %cst_31 = arith.constant 1.000000e+00 : f32
    %60 = vector.broadcast %cst_31 : f32 to vector<128x32xf32>
    %61 = arith.addf %60, %59 : vector<128x32xf32>
    %cst_32 = arith.constant 5.000000e-01 : f32
    %62 = vector.broadcast %cst_32 : f32 to vector<128x32xf32>
    %63 = arith.mulf %62, %61 : vector<128x32xf32>
    %64 = arith.mulf %56, %63 : vector<128x32xf32>
    %c0_33 = arith.constant 0 : index
    %c0_34 = arith.constant 0 : index
    %c0_35 = arith.constant 0 : index
    %65 = vector.load %arg5[%c0_33, %c0_34, %c0_35] : memref<1x128x32xf32, #tpu.memory_space<vmem>>, vector<1x128x32xf32>
    %66 = vector.shape_cast %65 : vector<1x128x32xf32> to vector<128x32xf32>
    %67 = vector.shape_cast %64 : vector<128x32xf32> to vector<1x128x32xf32>
    tpu.vector_store %arg5[%c0_33, %c0_34, %c0_35], %67 {strides = array<i32>} : memref<1x128x32xf32, #tpu.memory_space<vmem>>, vector<1x128x32xf32>,
    return
  }
  func.func @transform_0(%arg0: i32, %arg1: i32) -> (i32, i32, i32, i32) {
    %c0_i32 = arith.constant 0 : i32
    %c0_i32_0 = arith.constant 0 : i32
    %c0_i32_1 = arith.constant 0 : i32
    return %c0_i32, %arg0, %arg1, %c0_i32_0 : i32, i32, i32, i32
  }
  func.func @transform_1(%arg0: i32, %arg1: i32) -> (i32, i32) {
    %c0_i32 = arith.constant 0 : i32
    %c0_i32_0 = arith.constant 0 : i32
    %c0_i32_1 = arith.constant 0 : i32
    return %c0_i32, %c0_i32_0 : i32, i32
  }
  func.func @transform_2(%arg0: i32, %arg1: i32) -> (i32, i32) {
    %c0_i32 = arith.constant 0 : i32
    %c0_i32_0 = arith.constant 0 : i32
    %c0_i32_1 = arith.constant 0 : i32
    return %c0_i32, %c0_i32_0 : i32, i32
  }
  func.func @transform_3(%arg0: i32, %arg1: i32) -> (i32, i32, i32) {
    %c0_i32 = arith.constant 0 : i32
    %c0_i32_0 = arith.constant 0 : i32
    return %arg0, %arg1, %c0_i32 : i32, i32, i32
  }
}

module attributes {stable_mosaic.version = 11 : i64} {
  func.func @_pw_kernel(%arg0: i32, %arg1: i32, %arg2: memref<1x128x32xf32, #tpu.memory_space<vmem>>, %arg3: memref<32x16xf32, #tpu.memory_space<vmem>>, %arg4: memref<1x16xf32, #tpu.memory_space<vmem>>, %arg5: memref<1x1x32xf32, #tpu.memory_space<vmem>>, %arg6: memref<1x128x16xf32, #tpu.memory_space<vmem>>) attributes {dimension_semantics = [#tpu.dimension_semantics<parallel>, #tpu.dimension_semantics<parallel>], iteration_bounds = array<i64: 2, 2>, scalar_prefetch = 0 : i64, scratch_operands = 0 : i64, tpu.core_type = #tpu.core_type<tc>, window_params = [{transform_indices = @transform_0, window_bounds = array<i64: 1, 128, 32>}, {pipeline_mode = #tpu.pipeline_mode<synchronous>, transform_indices = @transform_1, window_bounds = array<i64: 32, 16>}, {pipeline_mode = #tpu.pipeline_mode<synchronous>, transform_indices = @transform_2, window_bounds = array<i64: 1, 16>}, {transform_indices = @transform_3, window_bounds = array<i64: 1, 1, 32>}, {transform_indices = @transform_4, window_bounds = array<i64: 1, 128, 16>}]} {
    %c0 = arith.constant 0 : index
    %c0_0 = arith.constant 0 : index
    %c0_1 = arith.constant 0 : index
    %0 = vector.load %arg2[%c0, %c0_0, %c0_1] : memref<1x128x32xf32, #tpu.memory_space<vmem>>, vector<1x128x32xf32>
    %1 = vector.shape_cast %0 : vector<1x128x32xf32> to vector<128x32xf32>
    %c0_2 = arith.constant 0 : index
    %c0_3 = arith.constant 0 : index
    %c0_4 = arith.constant 0 : index
    %2 = vector.load %arg5[%c0_2, %c0_3, %c0_4] : memref<1x1x32xf32, #tpu.memory_space<vmem>>, vector<1x1x32xf32>
    %3 = vector.shape_cast %2 : vector<1x1x32xf32> to vector<1x32xf32>
    %4 = vector.broadcast %3 : vector<1x32xf32> to vector<128x32xf32>
    %5 = arith.mulf %1, %4 : vector<128x32xf32>
    %6 = arith.truncf %5 : vector<128x32xf32> to vector<128x32xbf16>
    %c0_5 = arith.constant 0 : index
    %c0_6 = arith.constant 0 : index
    %7 = vector.load %arg3[%c0_5, %c0_6] : memref<32x16xf32, #tpu.memory_space<vmem>>, vector<32x16xf32>
    %8 = arith.truncf %7 : vector<32x16xf32> to vector<32x16xbf16>
    %cst = arith.constant dense<0.000000e+00> : vector<128x16xf32>
    %9 = tpu.matmul %6, %8, %cst {dimension_numbers = #tpu.dot_dimension_numbers<[1], [0], [0], [1], [0, 0, 1, 1], [], []>} : vector<128x32xbf16>, vector<32x16xbf16>, vector<128x16xf32> -> vector<128x16xf32>
    %c0_7 = arith.constant 0 : index
    %c0_8 = arith.constant 0 : index
    %10 = vector.load %arg4[%c0_7, %c0_8] : memref<1x16xf32, #tpu.memory_space<vmem>>, vector<1x16xf32>
    %11 = vector.broadcast %10 : vector<1x16xf32> to vector<128x16xf32>
    %12 = arith.addf %9, %11 : vector<128x16xf32>
    %c0_9 = arith.constant 0 : index
    %c0_10 = arith.constant 0 : index
    %c0_11 = arith.constant 0 : index
    %13 = vector.load %arg6[%c0_9, %c0_10, %c0_11] : memref<1x128x16xf32, #tpu.memory_space<vmem>>, vector<1x128x16xf32>
    %14 = vector.shape_cast %13 : vector<1x128x16xf32> to vector<128x16xf32>
    %15 = vector.shape_cast %12 : vector<128x16xf32> to vector<1x128x16xf32>
    tpu.vector_store %arg6[%c0_9, %c0_10, %c0_11], %15 {strides = array<i32>} : memref<1x128x16xf32, #tpu.memory_space<vmem>>, vector<1x128x16xf32>,
    return
  }
  func.func @transform_0(%arg0: i32, %arg1: i32) -> (i32, i32, i32) {
    %c0_i32 = arith.constant 0 : i32
    %c0_i32_0 = arith.constant 0 : i32
    return %arg0, %arg1, %c0_i32 : i32, i32, i32
  }
  func.func @transform_1(%arg0: i32, %arg1: i32) -> (i32, i32) {
    %c0_i32 = arith.constant 0 : i32
    %c0_i32_0 = arith.constant 0 : i32
    %c0_i32_1 = arith.constant 0 : i32
    return %c0_i32, %c0_i32_0 : i32, i32
  }
  func.func @transform_2(%arg0: i32, %arg1: i32) -> (i32, i32) {
    %c0_i32 = arith.constant 0 : i32
    %c0_i32_0 = arith.constant 0 : i32
    %c0_i32_1 = arith.constant 0 : i32
    return %c0_i32, %c0_i32_0 : i32, i32
  }
  func.func @transform_3(%arg0: i32, %arg1: i32) -> (i32, i32, i32) {
    %c0_i32 = arith.constant 0 : i32
    %c0_i32_0 = arith.constant 0 : i32
    %c0_i32_1 = arith.constant 0 : i32
    return %arg0, %c0_i32, %c0_i32_0 : i32, i32, i32
  }
  func.func @transform_4(%arg0: i32, %arg1: i32) -> (i32, i32, i32) {
    %c0_i32 = arith.constant 0 : i32
    %c0_i32_0 = arith.constant 0 : i32
    return %arg0, %arg1, %c0_i32 : i32, i32, i32
  }
}

module attributes {stable_mosaic.version = 11 : i64} {
  func.func @_se_kernel(%arg0: i32, %arg1: memref<2x32xf32, #tpu.memory_space<vmem>>, %arg2: memref<32x8xf32, #tpu.memory_space<vmem>>, %arg3: memref<1x8xf32, #tpu.memory_space<vmem>>, %arg4: memref<8x32xf32, #tpu.memory_space<vmem>>, %arg5: memref<1x32xf32, #tpu.memory_space<vmem>>, %arg6: memref<2x32xf32, #tpu.memory_space<vmem>>) attributes {dimension_semantics = [#tpu.dimension_semantics<arbitrary>], iteration_bounds = array<i64: 1>, scalar_prefetch = 0 : i64, scratch_operands = 0 : i64, tpu.core_type = #tpu.core_type<tc>, window_params = [{pipeline_mode = #tpu.pipeline_mode<synchronous>, transform_indices = @transform_0, window_bounds = array<i64: 2, 32>}, {pipeline_mode = #tpu.pipeline_mode<synchronous>, transform_indices = @transform_1, window_bounds = array<i64: 32, 8>}, {pipeline_mode = #tpu.pipeline_mode<synchronous>, transform_indices = @transform_2, window_bounds = array<i64: 1, 8>}, {pipeline_mode = #tpu.pipeline_mode<synchronous>, transform_indices = @transform_3, window_bounds = array<i64: 8, 32>}, {pipeline_mode = #tpu.pipeline_mode<synchronous>, transform_indices = @transform_4, window_bounds = array<i64: 1, 32>}, {pipeline_mode = #tpu.pipeline_mode<synchronous>, transform_indices = @transform_5, window_bounds = array<i64: 2, 32>}]} {
    %c0 = arith.constant 0 : index
    %c0_0 = arith.constant 0 : index
    %0 = vector.load %arg1[%c0, %c0_0] : memref<2x32xf32, #tpu.memory_space<vmem>>, vector<2x32xf32>
    %c0_1 = arith.constant 0 : index
    %c0_2 = arith.constant 0 : index
    %1 = vector.load %arg2[%c0_1, %c0_2] : memref<32x8xf32, #tpu.memory_space<vmem>>, vector<32x8xf32>
    %cst = arith.constant dense<0.000000e+00> : vector<2x8xf32>
    %2 = tpu.matmul %0, %1, %cst {dimension_numbers = #tpu.dot_dimension_numbers<[1], [0], [0], [1], [0, 0, 1, 1], [], []>} : vector<2x32xf32>, vector<32x8xf32>, vector<2x8xf32> -> vector<2x8xf32>
    %c0_3 = arith.constant 0 : index
    %c0_4 = arith.constant 0 : index
    %3 = vector.load %arg3[%c0_3, %c0_4] : memref<1x8xf32, #tpu.memory_space<vmem>>, vector<1x8xf32>
    %4 = vector.broadcast %3 : vector<1x8xf32> to vector<2x8xf32>
    %5 = arith.addf %2, %4 : vector<2x8xf32>
    %cst_5 = arith.constant 5.000000e-01 : f32
    %6 = vector.broadcast %cst_5 : f32 to vector<2x8xf32>
    %7 = arith.mulf %6, %5 : vector<2x8xf32>
    %8 = math.tanh %7 : vector<2x8xf32>
    %cst_6 = arith.constant 1.000000e+00 : f32
    %9 = vector.broadcast %cst_6 : f32 to vector<2x8xf32>
    %10 = arith.addf %9, %8 : vector<2x8xf32>
    %cst_7 = arith.constant 5.000000e-01 : f32
    %11 = vector.broadcast %cst_7 : f32 to vector<2x8xf32>
    %12 = arith.mulf %11, %10 : vector<2x8xf32>
    %13 = arith.mulf %5, %12 : vector<2x8xf32>
    %c0_8 = arith.constant 0 : index
    %c0_9 = arith.constant 0 : index
    %14 = vector.load %arg4[%c0_8, %c0_9] : memref<8x32xf32, #tpu.memory_space<vmem>>, vector<8x32xf32>
    %cst_10 = arith.constant dense<0.000000e+00> : vector<2x32xf32>
    %15 = tpu.matmul %13, %14, %cst_10 {dimension_numbers = #tpu.dot_dimension_numbers<[1], [0], [0], [1], [0, 0, 1, 1], [], []>} : vector<2x8xf32>, vector<8x32xf32>, vector<2x32xf32> -> vector<2x32xf32>
    %c0_11 = arith.constant 0 : index
    %c0_12 = arith.constant 0 : index
    %16 = vector.load %arg5[%c0_11, %c0_12] : memref<1x32xf32, #tpu.memory_space<vmem>>, vector<1x32xf32>
    %17 = vector.broadcast %16 : vector<1x32xf32> to vector<2x32xf32>
    %18 = arith.addf %15, %17 : vector<2x32xf32>
    %cst_13 = arith.constant 5.000000e-01 : f32
    %19 = vector.broadcast %cst_13 : f32 to vector<2x32xf32>
    %20 = arith.mulf %19, %18 : vector<2x32xf32>
    %21 = math.tanh %20 : vector<2x32xf32>
    %cst_14 = arith.constant 1.000000e+00 : f32
    %22 = vector.broadcast %cst_14 : f32 to vector<2x32xf32>
    %23 = arith.addf %22, %21 : vector<2x32xf32>
    %cst_15 = arith.constant 5.000000e-01 : f32
    %24 = vector.broadcast %cst_15 : f32 to vector<2x32xf32>
    %25 = arith.mulf %24, %23 : vector<2x32xf32>
    %c0_16 = arith.constant 0 : index
    %c0_17 = arith.constant 0 : index
    %26 = vector.load %arg6[%c0_16, %c0_17] : memref<2x32xf32, #tpu.memory_space<vmem>>, vector<2x32xf32>
    tpu.vector_store %arg6[%c0_16, %c0_17], %25 {strides = array<i32>} : memref<2x32xf32, #tpu.memory_space<vmem>>, vector<2x32xf32>,
    return
  }
  func.func @transform_0(%arg0: i32) -> (i32, i32) {
    %c0_i32 = arith.constant 0 : i32
    %c0_i32_0 = arith.constant 0 : i32
    %c0_i32_1 = arith.constant 0 : i32
    return %c0_i32, %c0_i32_0 : i32, i32
  }
  func.func @transform_1(%arg0: i32) -> (i32, i32) {
    %c0_i32 = arith.constant 0 : i32
    %c0_i32_0 = arith.constant 0 : i32
    %c0_i32_1 = arith.constant 0 : i32
    return %c0_i32, %c0_i32_0 : i32, i32
  }
  func.func @transform_2(%arg0: i32) -> (i32, i32) {
    %c0_i32 = arith.constant 0 : i32
    %c0_i32_0 = arith.constant 0 : i32
    %c0_i32_1 = arith.constant 0 : i32
    return %c0_i32, %c0_i32_0 : i32, i32
  }
  func.func @transform_3(%arg0: i32) -> (i32, i32) {
    %c0_i32 = arith.constant 0 : i32
    %c0_i32_0 = arith.constant 0 : i32
    %c0_i32_1 = arith.constant 0 : i32
    return %c0_i32, %c0_i32_0 : i32, i32
  }
  func.func @transform_4(%arg0: i32) -> (i32, i32) {
    %c0_i32 = arith.constant 0 : i32
    %c0_i32_0 = arith.constant 0 : i32
    %c0_i32_1 = arith.constant 0 : i32
    return %c0_i32, %c0_i32_0 : i32, i32
  }
  func.func @transform_5(%arg0: i32) -> (i32, i32) {
    %c0_i32 = arith.constant 0 : i32
    %c0_i32_0 = arith.constant 0 : i32
    %c0_i32_1 = arith.constant 0 : i32
    return %c0_i32, %c0_i32_0 : i32, i32
  }
}

module attributes {stable_mosaic.version = 11 : i64} {
  func.func @_pw_kernel(%arg0: i32, %arg1: i32, %arg2: memref<1x128x16xf32, #tpu.memory_space<vmem>>, %arg3: memref<16x96xf32, #tpu.memory_space<vmem>>, %arg4: memref<1x96xf32, #tpu.memory_space<vmem>>, %arg5: memref<1x128x96xf32, #tpu.memory_space<vmem>>) attributes {dimension_semantics = [#tpu.dimension_semantics<parallel>, #tpu.dimension_semantics<parallel>], iteration_bounds = array<i64: 2, 2>, scalar_prefetch = 0 : i64, scratch_operands = 0 : i64, tpu.core_type = #tpu.core_type<tc>, window_params = [{transform_indices = @transform_0, window_bounds = array<i64: 1, 128, 16>}, {pipeline_mode = #tpu.pipeline_mode<synchronous>, transform_indices = @transform_1, window_bounds = array<i64: 16, 96>}, {pipeline_mode = #tpu.pipeline_mode<synchronous>, transform_indices = @transform_2, window_bounds = array<i64: 1, 96>}, {transform_indices = @transform_3, window_bounds = array<i64: 1, 128, 96>}]} {
    %c0 = arith.constant 0 : index
    %c0_0 = arith.constant 0 : index
    %c0_1 = arith.constant 0 : index
    %0 = vector.load %arg2[%c0, %c0_0, %c0_1] : memref<1x128x16xf32, #tpu.memory_space<vmem>>, vector<1x128x16xf32>
    %1 = vector.shape_cast %0 : vector<1x128x16xf32> to vector<128x16xf32>
    %2 = arith.truncf %1 : vector<128x16xf32> to vector<128x16xbf16>
    %c0_2 = arith.constant 0 : index
    %c0_3 = arith.constant 0 : index
    %3 = vector.load %arg3[%c0_2, %c0_3] : memref<16x96xf32, #tpu.memory_space<vmem>>, vector<16x96xf32>
    %4 = arith.truncf %3 : vector<16x96xf32> to vector<16x96xbf16>
    %cst = arith.constant dense<0.000000e+00> : vector<128x96xf32>
    %5 = tpu.matmul %2, %4, %cst {dimension_numbers = #tpu.dot_dimension_numbers<[1], [0], [0], [1], [0, 0, 1, 1], [], []>} : vector<128x16xbf16>, vector<16x96xbf16>, vector<128x96xf32> -> vector<128x96xf32>
    %c0_4 = arith.constant 0 : index
    %c0_5 = arith.constant 0 : index
    %6 = vector.load %arg4[%c0_4, %c0_5] : memref<1x96xf32, #tpu.memory_space<vmem>>, vector<1x96xf32>
    %7 = vector.broadcast %6 : vector<1x96xf32> to vector<128x96xf32>
    %8 = arith.addf %5, %7 : vector<128x96xf32>
    %cst_6 = arith.constant 5.000000e-01 : f32
    %9 = vector.broadcast %cst_6 : f32 to vector<128x96xf32>
    %10 = arith.mulf %9, %8 : vector<128x96xf32>
    %11 = math.tanh %10 : vector<128x96xf32>
    %cst_7 = arith.constant 1.000000e+00 : f32
    %12 = vector.broadcast %cst_7 : f32 to vector<128x96xf32>
    %13 = arith.addf %12, %11 : vector<128x96xf32>
    %cst_8 = arith.constant 5.000000e-01 : f32
    %14 = vector.broadcast %cst_8 : f32 to vector<128x96xf32>
    %15 = arith.mulf %14, %13 : vector<128x96xf32>
    %16 = arith.mulf %8, %15 : vector<128x96xf32>
    %c0_9 = arith.constant 0 : index
    %c0_10 = arith.constant 0 : index
    %c0_11 = arith.constant 0 : index
    %17 = vector.load %arg5[%c0_9, %c0_10, %c0_11] : memref<1x128x96xf32, #tpu.memory_space<vmem>>, vector<1x128x96xf32>
    %18 = vector.shape_cast %17 : vector<1x128x96xf32> to vector<128x96xf32>
    %19 = vector.shape_cast %16 : vector<128x96xf32> to vector<1x128x96xf32>
    tpu.vector_store %arg5[%c0_9, %c0_10, %c0_11], %19 {strides = array<i32>} : memref<1x128x96xf32, #tpu.memory_space<vmem>>, vector<1x128x96xf32>,
    return
  }
  func.func @transform_0(%arg0: i32, %arg1: i32) -> (i32, i32, i32) {
    %c0_i32 = arith.constant 0 : i32
    %c0_i32_0 = arith.constant 0 : i32
    return %arg0, %arg1, %c0_i32 : i32, i32, i32
  }
  func.func @transform_1(%arg0: i32, %arg1: i32) -> (i32, i32) {
    %c0_i32 = arith.constant 0 : i32
    %c0_i32_0 = arith.constant 0 : i32
    %c0_i32_1 = arith.constant 0 : i32
    return %c0_i32, %c0_i32_0 : i32, i32
  }
  func.func @transform_2(%arg0: i32, %arg1: i32) -> (i32, i32) {
    %c0_i32 = arith.constant 0 : i32
    %c0_i32_0 = arith.constant 0 : i32
    %c0_i32_1 = arith.constant 0 : i32
    return %c0_i32, %c0_i32_0 : i32, i32
  }
  func.func @transform_3(%arg0: i32, %arg1: i32) -> (i32, i32, i32) {
    %c0_i32 = arith.constant 0 : i32
    %c0_i32_0 = arith.constant 0 : i32
    return %arg0, %arg1, %c0_i32 : i32, i32, i32
  }
}

module attributes {stable_mosaic.version = 11 : i64} {
  func.func @_dw_kernel(%arg0: i32, %arg1: i32, %arg2: memref<9x1x64x96xf32, #tpu.memory_space<vmem>>, %arg3: memref<9x96xf32, #tpu.memory_space<vmem>>, %arg4: memref<1x96xf32, #tpu.memory_space<vmem>>, %arg5: memref<1x64x96xf32, #tpu.memory_space<vmem>>) attributes {dimension_semantics = [#tpu.dimension_semantics<parallel>, #tpu.dimension_semantics<parallel>], iteration_bounds = array<i64: 2, 1>, scalar_prefetch = 0 : i64, scratch_operands = 0 : i64, tpu.core_type = #tpu.core_type<tc>, window_params = [{transform_indices = @transform_0, window_bounds = array<i64: 9, 1, 64, 96>}, {pipeline_mode = #tpu.pipeline_mode<synchronous>, transform_indices = @transform_1, window_bounds = array<i64: 9, 96>}, {pipeline_mode = #tpu.pipeline_mode<synchronous>, transform_indices = @transform_2, window_bounds = array<i64: 1, 96>}, {transform_indices = @transform_3, window_bounds = array<i64: 1, 64, 96>}]} {
    %c0 = arith.constant 0 : index
    %c0_0 = arith.constant 0 : index
    %0 = vector.load %arg3[%c0, %c0_0] : memref<9x96xf32, #tpu.memory_space<vmem>>, vector<9x96xf32>
    %c0_1 = arith.constant 0 : index
    %c0_2 = arith.constant 0 : index
    %c0_3 = arith.constant 0 : index
    %c0_4 = arith.constant 0 : index
    %1 = vector.load %arg2[%c0_1, %c0_2, %c0_3, %c0_4] : memref<9x1x64x96xf32, #tpu.memory_space<vmem>>, vector<1x1x64x96xf32>
    %2 = vector.shape_cast %1 : vector<1x1x64x96xf32> to vector<64x96xf32>
    %3 = vector.extract_strided_slice %0 {offsets = [0, 0], sizes = [1, 96], strides = [1, 1]} : vector<9x96xf32> to vector<1x96xf32>
    %4 = vector.broadcast %3 : vector<1x96xf32> to vector<64x96xf32>
    %5 = arith.mulf %2, %4 : vector<64x96xf32>
    %c1 = arith.constant 1 : index
    %c0_5 = arith.constant 0 : index
    %c0_6 = arith.constant 0 : index
    %c0_7 = arith.constant 0 : index
    %6 = vector.load %arg2[%c1, %c0_5, %c0_6, %c0_7] : memref<9x1x64x96xf32, #tpu.memory_space<vmem>>, vector<1x1x64x96xf32>
    %7 = vector.shape_cast %6 : vector<1x1x64x96xf32> to vector<64x96xf32>
    %8 = vector.extract_strided_slice %0 {offsets = [1, 0], sizes = [1, 96], strides = [1, 1]} : vector<9x96xf32> to vector<1x96xf32>
    %9 = vector.broadcast %8 : vector<1x96xf32> to vector<64x96xf32>
    %10 = arith.mulf %7, %9 : vector<64x96xf32>
    %11 = arith.addf %5, %10 : vector<64x96xf32>
    %c2 = arith.constant 2 : index
    %c0_8 = arith.constant 0 : index
    %c0_9 = arith.constant 0 : index
    %c0_10 = arith.constant 0 : index
    %12 = vector.load %arg2[%c2, %c0_8, %c0_9, %c0_10] : memref<9x1x64x96xf32, #tpu.memory_space<vmem>>, vector<1x1x64x96xf32>
    %13 = vector.shape_cast %12 : vector<1x1x64x96xf32> to vector<64x96xf32>
    %14 = vector.extract_strided_slice %0 {offsets = [2, 0], sizes = [1, 96], strides = [1, 1]} : vector<9x96xf32> to vector<1x96xf32>
    %15 = vector.broadcast %14 : vector<1x96xf32> to vector<64x96xf32>
    %16 = arith.mulf %13, %15 : vector<64x96xf32>
    %17 = arith.addf %11, %16 : vector<64x96xf32>
    %c3 = arith.constant 3 : index
    %c0_11 = arith.constant 0 : index
    %c0_12 = arith.constant 0 : index
    %c0_13 = arith.constant 0 : index
    %18 = vector.load %arg2[%c3, %c0_11, %c0_12, %c0_13] : memref<9x1x64x96xf32, #tpu.memory_space<vmem>>, vector<1x1x64x96xf32>
    %19 = vector.shape_cast %18 : vector<1x1x64x96xf32> to vector<64x96xf32>
    %20 = vector.extract_strided_slice %0 {offsets = [3, 0], sizes = [1, 96], strides = [1, 1]} : vector<9x96xf32> to vector<1x96xf32>
    %21 = vector.broadcast %20 : vector<1x96xf32> to vector<64x96xf32>
    %22 = arith.mulf %19, %21 : vector<64x96xf32>
    %23 = arith.addf %17, %22 : vector<64x96xf32>
    %c4 = arith.constant 4 : index
    %c0_14 = arith.constant 0 : index
    %c0_15 = arith.constant 0 : index
    %c0_16 = arith.constant 0 : index
    %24 = vector.load %arg2[%c4, %c0_14, %c0_15, %c0_16] : memref<9x1x64x96xf32, #tpu.memory_space<vmem>>, vector<1x1x64x96xf32>
    %25 = vector.shape_cast %24 : vector<1x1x64x96xf32> to vector<64x96xf32>
    %26 = vector.extract_strided_slice %0 {offsets = [4, 0], sizes = [1, 96], strides = [1, 1]} : vector<9x96xf32> to vector<1x96xf32>
    %27 = vector.broadcast %26 : vector<1x96xf32> to vector<64x96xf32>
    %28 = arith.mulf %25, %27 : vector<64x96xf32>
    %29 = arith.addf %23, %28 : vector<64x96xf32>
    %c5 = arith.constant 5 : index
    %c0_17 = arith.constant 0 : index
    %c0_18 = arith.constant 0 : index
    %c0_19 = arith.constant 0 : index
    %30 = vector.load %arg2[%c5, %c0_17, %c0_18, %c0_19] : memref<9x1x64x96xf32, #tpu.memory_space<vmem>>, vector<1x1x64x96xf32>
    %31 = vector.shape_cast %30 : vector<1x1x64x96xf32> to vector<64x96xf32>
    %32 = vector.extract_strided_slice %0 {offsets = [5, 0], sizes = [1, 96], strides = [1, 1]} : vector<9x96xf32> to vector<1x96xf32>
    %33 = vector.broadcast %32 : vector<1x96xf32> to vector<64x96xf32>
    %34 = arith.mulf %31, %33 : vector<64x96xf32>
    %35 = arith.addf %29, %34 : vector<64x96xf32>
    %c6 = arith.constant 6 : index
    %c0_20 = arith.constant 0 : index
    %c0_21 = arith.constant 0 : index
    %c0_22 = arith.constant 0 : index
    %36 = vector.load %arg2[%c6, %c0_20, %c0_21, %c0_22] : memref<9x1x64x96xf32, #tpu.memory_space<vmem>>, vector<1x1x64x96xf32>
    %37 = vector.shape_cast %36 : vector<1x1x64x96xf32> to vector<64x96xf32>
    %38 = vector.extract_strided_slice %0 {offsets = [6, 0], sizes = [1, 96], strides = [1, 1]} : vector<9x96xf32> to vector<1x96xf32>
    %39 = vector.broadcast %38 : vector<1x96xf32> to vector<64x96xf32>
    %40 = arith.mulf %37, %39 : vector<64x96xf32>
    %41 = arith.addf %35, %40 : vector<64x96xf32>
    %c7 = arith.constant 7 : index
    %c0_23 = arith.constant 0 : index
    %c0_24 = arith.constant 0 : index
    %c0_25 = arith.constant 0 : index
    %42 = vector.load %arg2[%c7, %c0_23, %c0_24, %c0_25] : memref<9x1x64x96xf32, #tpu.memory_space<vmem>>, vector<1x1x64x96xf32>
    %43 = vector.shape_cast %42 : vector<1x1x64x96xf32> to vector<64x96xf32>
    %44 = vector.extract_strided_slice %0 {offsets = [7, 0], sizes = [1, 96], strides = [1, 1]} : vector<9x96xf32> to vector<1x96xf32>
    %45 = vector.broadcast %44 : vector<1x96xf32> to vector<64x96xf32>
    %46 = arith.mulf %43, %45 : vector<64x96xf32>
    %47 = arith.addf %41, %46 : vector<64x96xf32>
    %c8 = arith.constant 8 : index
    %c0_26 = arith.constant 0 : index
    %c0_27 = arith.constant 0 : index
    %c0_28 = arith.constant 0 : index
    %48 = vector.load %arg2[%c8, %c0_26, %c0_27, %c0_28] : memref<9x1x64x96xf32, #tpu.memory_space<vmem>>, vector<1x1x64x96xf32>
    %49 = vector.shape_cast %48 : vector<1x1x64x96xf32> to vector<64x96xf32>
    %50 = vector.extract_strided_slice %0 {offsets = [8, 0], sizes = [1, 96], strides = [1, 1]} : vector<9x96xf32> to vector<1x96xf32>
    %51 = vector.broadcast %50 : vector<1x96xf32> to vector<64x96xf32>
    %52 = arith.mulf %49, %51 : vector<64x96xf32>
    %53 = arith.addf %47, %52 : vector<64x96xf32>
    %c0_29 = arith.constant 0 : index
    %c0_30 = arith.constant 0 : index
    %54 = vector.load %arg4[%c0_29, %c0_30] : memref<1x96xf32, #tpu.memory_space<vmem>>, vector<1x96xf32>
    %55 = vector.broadcast %54 : vector<1x96xf32> to vector<64x96xf32>
    %56 = arith.addf %53, %55 : vector<64x96xf32>
    %cst = arith.constant 5.000000e-01 : f32
    %57 = vector.broadcast %cst : f32 to vector<64x96xf32>
    %58 = arith.mulf %57, %56 : vector<64x96xf32>
    %59 = math.tanh %58 : vector<64x96xf32>
    %cst_31 = arith.constant 1.000000e+00 : f32
    %60 = vector.broadcast %cst_31 : f32 to vector<64x96xf32>
    %61 = arith.addf %60, %59 : vector<64x96xf32>
    %cst_32 = arith.constant 5.000000e-01 : f32
    %62 = vector.broadcast %cst_32 : f32 to vector<64x96xf32>
    %63 = arith.mulf %62, %61 : vector<64x96xf32>
    %64 = arith.mulf %56, %63 : vector<64x96xf32>
    %c0_33 = arith.constant 0 : index
    %c0_34 = arith.constant 0 : index
    %c0_35 = arith.constant 0 : index
    %65 = vector.load %arg5[%c0_33, %c0_34, %c0_35] : memref<1x64x96xf32, #tpu.memory_space<vmem>>, vector<1x64x96xf32>
    %66 = vector.shape_cast %65 : vector<1x64x96xf32> to vector<64x96xf32>
    %67 = vector.shape_cast %64 : vector<64x96xf32> to vector<1x64x96xf32>
    tpu.vector_store %arg5[%c0_33, %c0_34, %c0_35], %67 {strides = array<i32>} : memref<1x64x96xf32, #tpu.memory_space<vmem>>, vector<1x64x96xf32>,
    return
  }
  func.func @transform_0(%arg0: i32, %arg1: i32) -> (i32, i32, i32, i32) {
    %c0_i32 = arith.constant 0 : i32
    %c0_i32_0 = arith.constant 0 : i32
    %c0_i32_1 = arith.constant 0 : i32
    return %c0_i32, %arg0, %arg1, %c0_i32_0 : i32, i32, i32, i32
  }
  func.func @transform_1(%arg0: i32, %arg1: i32) -> (i32, i32) {
    %c0_i32 = arith.constant 0 : i32
    %c0_i32_0 = arith.constant 0 : i32
    %c0_i32_1 = arith.constant 0 : i32
    return %c0_i32, %c0_i32_0 : i32, i32
  }
  func.func @transform_2(%arg0: i32, %arg1: i32) -> (i32, i32) {
    %c0_i32 = arith.constant 0 : i32
    %c0_i32_0 = arith.constant 0 : i32
    %c0_i32_1 = arith.constant 0 : i32
    return %c0_i32, %c0_i32_0 : i32, i32
  }
  func.func @transform_3(%arg0: i32, %arg1: i32) -> (i32, i32, i32) {
    %c0_i32 = arith.constant 0 : i32
    %c0_i32_0 = arith.constant 0 : i32
    return %arg0, %arg1, %c0_i32 : i32, i32, i32
  }
}

module attributes {stable_mosaic.version = 11 : i64} {
  func.func @_se_kernel(%arg0: i32, %arg1: memref<2x96xf32, #tpu.memory_space<vmem>>, %arg2: memref<96x4xf32, #tpu.memory_space<vmem>>, %arg3: memref<1x4xf32, #tpu.memory_space<vmem>>, %arg4: memref<4x96xf32, #tpu.memory_space<vmem>>, %arg5: memref<1x96xf32, #tpu.memory_space<vmem>>, %arg6: memref<2x96xf32, #tpu.memory_space<vmem>>) attributes {dimension_semantics = [#tpu.dimension_semantics<arbitrary>], iteration_bounds = array<i64: 1>, scalar_prefetch = 0 : i64, scratch_operands = 0 : i64, tpu.core_type = #tpu.core_type<tc>, window_params = [{pipeline_mode = #tpu.pipeline_mode<synchronous>, transform_indices = @transform_0, window_bounds = array<i64: 2, 96>}, {pipeline_mode = #tpu.pipeline_mode<synchronous>, transform_indices = @transform_1, window_bounds = array<i64: 96, 4>}, {pipeline_mode = #tpu.pipeline_mode<synchronous>, transform_indices = @transform_2, window_bounds = array<i64: 1, 4>}, {pipeline_mode = #tpu.pipeline_mode<synchronous>, transform_indices = @transform_3, window_bounds = array<i64: 4, 96>}, {pipeline_mode = #tpu.pipeline_mode<synchronous>, transform_indices = @transform_4, window_bounds = array<i64: 1, 96>}, {pipeline_mode = #tpu.pipeline_mode<synchronous>, transform_indices = @transform_5, window_bounds = array<i64: 2, 96>}]} {
    %c0 = arith.constant 0 : index
    %c0_0 = arith.constant 0 : index
    %0 = vector.load %arg1[%c0, %c0_0] : memref<2x96xf32, #tpu.memory_space<vmem>>, vector<2x96xf32>
    %c0_1 = arith.constant 0 : index
    %c0_2 = arith.constant 0 : index
    %1 = vector.load %arg2[%c0_1, %c0_2] : memref<96x4xf32, #tpu.memory_space<vmem>>, vector<96x4xf32>
    %cst = arith.constant dense<0.000000e+00> : vector<2x4xf32>
    %2 = tpu.matmul %0, %1, %cst {dimension_numbers = #tpu.dot_dimension_numbers<[1], [0], [0], [1], [0, 0, 1, 1], [], []>} : vector<2x96xf32>, vector<96x4xf32>, vector<2x4xf32> -> vector<2x4xf32>
    %c0_3 = arith.constant 0 : index
    %c0_4 = arith.constant 0 : index
    %3 = vector.load %arg3[%c0_3, %c0_4] : memref<1x4xf32, #tpu.memory_space<vmem>>, vector<1x4xf32>
    %4 = vector.broadcast %3 : vector<1x4xf32> to vector<2x4xf32>
    %5 = arith.addf %2, %4 : vector<2x4xf32>
    %cst_5 = arith.constant 5.000000e-01 : f32
    %6 = vector.broadcast %cst_5 : f32 to vector<2x4xf32>
    %7 = arith.mulf %6, %5 : vector<2x4xf32>
    %8 = math.tanh %7 : vector<2x4xf32>
    %cst_6 = arith.constant 1.000000e+00 : f32
    %9 = vector.broadcast %cst_6 : f32 to vector<2x4xf32>
    %10 = arith.addf %9, %8 : vector<2x4xf32>
    %cst_7 = arith.constant 5.000000e-01 : f32
    %11 = vector.broadcast %cst_7 : f32 to vector<2x4xf32>
    %12 = arith.mulf %11, %10 : vector<2x4xf32>
    %13 = arith.mulf %5, %12 : vector<2x4xf32>
    %c0_8 = arith.constant 0 : index
    %c0_9 = arith.constant 0 : index
    %14 = vector.load %arg4[%c0_8, %c0_9] : memref<4x96xf32, #tpu.memory_space<vmem>>, vector<4x96xf32>
    %cst_10 = arith.constant dense<0.000000e+00> : vector<2x96xf32>
    %15 = tpu.matmul %13, %14, %cst_10 {dimension_numbers = #tpu.dot_dimension_numbers<[1], [0], [0], [1], [0, 0, 1, 1], [], []>} : vector<2x4xf32>, vector<4x96xf32>, vector<2x96xf32> -> vector<2x96xf32>
    %c0_11 = arith.constant 0 : index
    %c0_12 = arith.constant 0 : index
    %16 = vector.load %arg5[%c0_11, %c0_12] : memref<1x96xf32, #tpu.memory_space<vmem>>, vector<1x96xf32>
    %17 = vector.broadcast %16 : vector<1x96xf32> to vector<2x96xf32>
    %18 = arith.addf %15, %17 : vector<2x96xf32>
    %cst_13 = arith.constant 5.000000e-01 : f32
    %19 = vector.broadcast %cst_13 : f32 to vector<2x96xf32>
    %20 = arith.mulf %19, %18 : vector<2x96xf32>
    %21 = math.tanh %20 : vector<2x96xf32>
    %cst_14 = arith.constant 1.000000e+00 : f32
    %22 = vector.broadcast %cst_14 : f32 to vector<2x96xf32>
    %23 = arith.addf %22, %21 : vector<2x96xf32>
    %cst_15 = arith.constant 5.000000e-01 : f32
    %24 = vector.broadcast %cst_15 : f32 to vector<2x96xf32>
    %25 = arith.mulf %24, %23 : vector<2x96xf32>
    %c0_16 = arith.constant 0 : index
    %c0_17 = arith.constant 0 : index
    %26 = vector.load %arg6[%c0_16, %c0_17] : memref<2x96xf32, #tpu.memory_space<vmem>>, vector<2x96xf32>
    tpu.vector_store %arg6[%c0_16, %c0_17], %25 {strides = array<i32>} : memref<2x96xf32, #tpu.memory_space<vmem>>, vector<2x96xf32>,
    return
  }
  func.func @transform_0(%arg0: i32) -> (i32, i32) {
    %c0_i32 = arith.constant 0 : i32
    %c0_i32_0 = arith.constant 0 : i32
    %c0_i32_1 = arith.constant 0 : i32
    return %c0_i32, %c0_i32_0 : i32, i32
  }
  func.func @transform_1(%arg0: i32) -> (i32, i32) {
    %c0_i32 = arith.constant 0 : i32
    %c0_i32_0 = arith.constant 0 : i32
    %c0_i32_1 = arith.constant 0 : i32
    return %c0_i32, %c0_i32_0 : i32, i32
  }
  func.func @transform_2(%arg0: i32) -> (i32, i32) {
    %c0_i32 = arith.constant 0 : i32
    %c0_i32_0 = arith.constant 0 : i32
    %c0_i32_1 = arith.constant 0 : i32
    return %c0_i32, %c0_i32_0 : i32, i32
  }
  func.func @transform_3(%arg0: i32) -> (i32, i32) {
    %c0_i32 = arith.constant 0 : i32
    %c0_i32_0 = arith.constant 0 : i32
    %c0_i32_1 = arith.constant 0 : i32
    return %c0_i32, %c0_i32_0 : i32, i32
  }
  func.func @transform_4(%arg0: i32) -> (i32, i32) {
    %c0_i32 = arith.constant 0 : i32
    %c0_i32_0 = arith.constant 0 : i32
    %c0_i32_1 = arith.constant 0 : i32
    return %c0_i32, %c0_i32_0 : i32, i32
  }
  func.func @transform_5(%arg0: i32) -> (i32, i32) {
    %c0_i32 = arith.constant 0 : i32
    %c0_i32_0 = arith.constant 0 : i32
    %c0_i32_1 = arith.constant 0 : i32
    return %c0_i32, %c0_i32_0 : i32, i32
  }
}

module attributes {stable_mosaic.version = 11 : i64} {
  func.func @_pw_kernel(%arg0: i32, %arg1: i32, %arg2: memref<1x64x96xf32, #tpu.memory_space<vmem>>, %arg3: memref<96x32xf32, #tpu.memory_space<vmem>>, %arg4: memref<1x32xf32, #tpu.memory_space<vmem>>, %arg5: memref<1x1x96xf32, #tpu.memory_space<vmem>>, %arg6: memref<1x64x32xf32, #tpu.memory_space<vmem>>) attributes {dimension_semantics = [#tpu.dimension_semantics<parallel>, #tpu.dimension_semantics<parallel>], iteration_bounds = array<i64: 2, 1>, scalar_prefetch = 0 : i64, scratch_operands = 0 : i64, tpu.core_type = #tpu.core_type<tc>, window_params = [{transform_indices = @transform_0, window_bounds = array<i64: 1, 64, 96>}, {pipeline_mode = #tpu.pipeline_mode<synchronous>, transform_indices = @transform_1, window_bounds = array<i64: 96, 32>}, {pipeline_mode = #tpu.pipeline_mode<synchronous>, transform_indices = @transform_2, window_bounds = array<i64: 1, 32>}, {transform_indices = @transform_3, window_bounds = array<i64: 1, 1, 96>}, {transform_indices = @transform_4, window_bounds = array<i64: 1, 64, 32>}]} {
    %c0 = arith.constant 0 : index
    %c0_0 = arith.constant 0 : index
    %c0_1 = arith.constant 0 : index
    %0 = vector.load %arg2[%c0, %c0_0, %c0_1] : memref<1x64x96xf32, #tpu.memory_space<vmem>>, vector<1x64x96xf32>
    %1 = vector.shape_cast %0 : vector<1x64x96xf32> to vector<64x96xf32>
    %c0_2 = arith.constant 0 : index
    %c0_3 = arith.constant 0 : index
    %c0_4 = arith.constant 0 : index
    %2 = vector.load %arg5[%c0_2, %c0_3, %c0_4] : memref<1x1x96xf32, #tpu.memory_space<vmem>>, vector<1x1x96xf32>
    %3 = vector.shape_cast %2 : vector<1x1x96xf32> to vector<1x96xf32>
    %4 = vector.broadcast %3 : vector<1x96xf32> to vector<64x96xf32>
    %5 = arith.mulf %1, %4 : vector<64x96xf32>
    %6 = arith.truncf %5 : vector<64x96xf32> to vector<64x96xbf16>
    %c0_5 = arith.constant 0 : index
    %c0_6 = arith.constant 0 : index
    %7 = vector.load %arg3[%c0_5, %c0_6] : memref<96x32xf32, #tpu.memory_space<vmem>>, vector<96x32xf32>
    %8 = arith.truncf %7 : vector<96x32xf32> to vector<96x32xbf16>
    %cst = arith.constant dense<0.000000e+00> : vector<64x32xf32>
    %9 = tpu.matmul %6, %8, %cst {dimension_numbers = #tpu.dot_dimension_numbers<[1], [0], [0], [1], [0, 0, 1, 1], [], []>} : vector<64x96xbf16>, vector<96x32xbf16>, vector<64x32xf32> -> vector<64x32xf32>
    %c0_7 = arith.constant 0 : index
    %c0_8 = arith.constant 0 : index
    %10 = vector.load %arg4[%c0_7, %c0_8] : memref<1x32xf32, #tpu.memory_space<vmem>>, vector<1x32xf32>
    %11 = vector.broadcast %10 : vector<1x32xf32> to vector<64x32xf32>
    %12 = arith.addf %9, %11 : vector<64x32xf32>
    %c0_9 = arith.constant 0 : index
    %c0_10 = arith.constant 0 : index
    %c0_11 = arith.constant 0 : index
    %13 = vector.load %arg6[%c0_9, %c0_10, %c0_11] : memref<1x64x32xf32, #tpu.memory_space<vmem>>, vector<1x64x32xf32>
    %14 = vector.shape_cast %13 : vector<1x64x32xf32> to vector<64x32xf32>
    %15 = vector.shape_cast %12 : vector<64x32xf32> to vector<1x64x32xf32>
    tpu.vector_store %arg6[%c0_9, %c0_10, %c0_11], %15 {strides = array<i32>} : memref<1x64x32xf32, #tpu.memory_space<vmem>>, vector<1x64x32xf32>,
    return
  }
  func.func @transform_0(%arg0: i32, %arg1: i32) -> (i32, i32, i32) {
    %c0_i32 = arith.constant 0 : i32
    %c0_i32_0 = arith.constant 0 : i32
    return %arg0, %arg1, %c0_i32 : i32, i32, i32
  }
  func.func @transform_1(%arg0: i32, %arg1: i32) -> (i32, i32) {
    %c0_i32 = arith.constant 0 : i32
    %c0_i32_0 = arith.constant 0 : i32
    %c0_i32_1 = arith.constant 0 : i32
    return %c0_i32, %c0_i32_0 : i32, i32
  }
  func.func @transform_2(%arg0: i32, %arg1: i32) -> (i32, i32) {
    %c0_i32 = arith.constant 0 : i32
    %c0_i32_0 = arith.constant 0 : i32
    %c0_i32_1 = arith.constant 0 : i32
    return %c0_i32, %c0_i32_0 : i32, i32
  }
  func.func @transform_3(%arg0: i32, %arg1: i32) -> (i32, i32, i32) {
    %c0_i32 = arith.constant 0 : i32
    %c0_i32_0 = arith.constant 0 : i32
    %c0_i32_1 = arith.constant 0 : i32
    return %arg0, %c0_i32, %c0_i32_0 : i32, i32, i32
  }
  func.func @transform_4(%arg0: i32, %arg1: i32) -> (i32, i32, i32) {
    %c0_i32 = arith.constant 0 : i32
    %c0_i32_0 = arith.constant 0 : i32
    return %arg0, %arg1, %c0_i32 : i32, i32, i32
  }
}

module attributes {stable_mosaic.version = 11 : i64} {
  func.func @_pw_kernel(%arg0: i32, %arg1: i32, %arg2: memref<1x64x32xf32, #tpu.memory_space<vmem>>, %arg3: memref<32x192xf32, #tpu.memory_space<vmem>>, %arg4: memref<1x192xf32, #tpu.memory_space<vmem>>, %arg5: memref<1x64x192xf32, #tpu.memory_space<vmem>>) attributes {dimension_semantics = [#tpu.dimension_semantics<parallel>, #tpu.dimension_semantics<parallel>], iteration_bounds = array<i64: 2, 1>, scalar_prefetch = 0 : i64, scratch_operands = 0 : i64, tpu.core_type = #tpu.core_type<tc>, window_params = [{transform_indices = @transform_0, window_bounds = array<i64: 1, 64, 32>}, {pipeline_mode = #tpu.pipeline_mode<synchronous>, transform_indices = @transform_1, window_bounds = array<i64: 32, 192>}, {pipeline_mode = #tpu.pipeline_mode<synchronous>, transform_indices = @transform_2, window_bounds = array<i64: 1, 192>}, {transform_indices = @transform_3, window_bounds = array<i64: 1, 64, 192>}]} {
    %c0 = arith.constant 0 : index
    %c0_0 = arith.constant 0 : index
    %c0_1 = arith.constant 0 : index
    %0 = vector.load %arg2[%c0, %c0_0, %c0_1] : memref<1x64x32xf32, #tpu.memory_space<vmem>>, vector<1x64x32xf32>
    %1 = vector.shape_cast %0 : vector<1x64x32xf32> to vector<64x32xf32>
    %2 = arith.truncf %1 : vector<64x32xf32> to vector<64x32xbf16>
    %c0_2 = arith.constant 0 : index
    %c0_3 = arith.constant 0 : index
    %3 = vector.load %arg3[%c0_2, %c0_3] : memref<32x192xf32, #tpu.memory_space<vmem>>, vector<32x192xf32>
    %4 = arith.truncf %3 : vector<32x192xf32> to vector<32x192xbf16>
    %cst = arith.constant dense<0.000000e+00> : vector<64x192xf32>
    %5 = tpu.matmul %2, %4, %cst {dimension_numbers = #tpu.dot_dimension_numbers<[1], [0], [0], [1], [0, 0, 1, 1], [], []>} : vector<64x32xbf16>, vector<32x192xbf16>, vector<64x192xf32> -> vector<64x192xf32>
    %c0_4 = arith.constant 0 : index
    %c0_5 = arith.constant 0 : index
    %6 = vector.load %arg4[%c0_4, %c0_5] : memref<1x192xf32, #tpu.memory_space<vmem>>, vector<1x192xf32>
    %7 = vector.broadcast %6 : vector<1x192xf32> to vector<64x192xf32>
    %8 = arith.addf %5, %7 : vector<64x192xf32>
    %cst_6 = arith.constant 5.000000e-01 : f32
    %9 = vector.broadcast %cst_6 : f32 to vector<64x192xf32>
    %10 = arith.mulf %9, %8 : vector<64x192xf32>
    %11 = math.tanh %10 : vector<64x192xf32>
    %cst_7 = arith.constant 1.000000e+00 : f32
    %12 = vector.broadcast %cst_7 : f32 to vector<64x192xf32>
    %13 = arith.addf %12, %11 : vector<64x192xf32>
    %cst_8 = arith.constant 5.000000e-01 : f32
    %14 = vector.broadcast %cst_8 : f32 to vector<64x192xf32>
    %15 = arith.mulf %14, %13 : vector<64x192xf32>
    %16 = arith.mulf %8, %15 : vector<64x192xf32>
    %c0_9 = arith.constant 0 : index
    %c0_10 = arith.constant 0 : index
    %c0_11 = arith.constant 0 : index
    %17 = vector.load %arg5[%c0_9, %c0_10, %c0_11] : memref<1x64x192xf32, #tpu.memory_space<vmem>>, vector<1x64x192xf32>
    %18 = vector.shape_cast %17 : vector<1x64x192xf32> to vector<64x192xf32>
    %19 = vector.shape_cast %16 : vector<64x192xf32> to vector<1x64x192xf32>
    tpu.vector_store %arg5[%c0_9, %c0_10, %c0_11], %19 {strides = array<i32>} : memref<1x64x192xf32, #tpu.memory_space<vmem>>, vector<1x64x192xf32>,
    return
  }
  func.func @transform_0(%arg0: i32, %arg1: i32) -> (i32, i32, i32) {
    %c0_i32 = arith.constant 0 : i32
    %c0_i32_0 = arith.constant 0 : i32
    return %arg0, %arg1, %c0_i32 : i32, i32, i32
  }
  func.func @transform_1(%arg0: i32, %arg1: i32) -> (i32, i32) {
    %c0_i32 = arith.constant 0 : i32
    %c0_i32_0 = arith.constant 0 : i32
    %c0_i32_1 = arith.constant 0 : i32
    return %c0_i32, %c0_i32_0 : i32, i32
  }
  func.func @transform_2(%arg0: i32, %arg1: i32) -> (i32, i32) {
    %c0_i32 = arith.constant 0 : i32
    %c0_i32_0 = arith.constant 0 : i32
    %c0_i32_1 = arith.constant 0 : i32
    return %c0_i32, %c0_i32_0 : i32, i32
  }
  func.func @transform_3(%arg0: i32, %arg1: i32) -> (i32, i32, i32) {
    %c0_i32 = arith.constant 0 : i32
    %c0_i32_0 = arith.constant 0 : i32
    return %arg0, %arg1, %c0_i32 : i32, i32, i32
  }
}

module attributes {stable_mosaic.version = 11 : i64} {
  func.func @_dw_kernel(%arg0: i32, %arg1: i32, %arg2: memref<9x1x64x192xf32, #tpu.memory_space<vmem>>, %arg3: memref<9x192xf32, #tpu.memory_space<vmem>>, %arg4: memref<1x192xf32, #tpu.memory_space<vmem>>, %arg5: memref<1x64x192xf32, #tpu.memory_space<vmem>>) attributes {dimension_semantics = [#tpu.dimension_semantics<parallel>, #tpu.dimension_semantics<parallel>], iteration_bounds = array<i64: 2, 1>, scalar_prefetch = 0 : i64, scratch_operands = 0 : i64, tpu.core_type = #tpu.core_type<tc>, window_params = [{transform_indices = @transform_0, window_bounds = array<i64: 9, 1, 64, 192>}, {pipeline_mode = #tpu.pipeline_mode<synchronous>, transform_indices = @transform_1, window_bounds = array<i64: 9, 192>}, {pipeline_mode = #tpu.pipeline_mode<synchronous>, transform_indices = @transform_2, window_bounds = array<i64: 1, 192>}, {transform_indices = @transform_3, window_bounds = array<i64: 1, 64, 192>}]} {
    %c0 = arith.constant 0 : index
    %c0_0 = arith.constant 0 : index
    %0 = vector.load %arg3[%c0, %c0_0] : memref<9x192xf32, #tpu.memory_space<vmem>>, vector<9x192xf32>
    %c0_1 = arith.constant 0 : index
    %c0_2 = arith.constant 0 : index
    %c0_3 = arith.constant 0 : index
    %c0_4 = arith.constant 0 : index
    %1 = vector.load %arg2[%c0_1, %c0_2, %c0_3, %c0_4] : memref<9x1x64x192xf32, #tpu.memory_space<vmem>>, vector<1x1x64x192xf32>
    %2 = vector.shape_cast %1 : vector<1x1x64x192xf32> to vector<64x192xf32>
    %3 = vector.extract_strided_slice %0 {offsets = [0, 0], sizes = [1, 192], strides = [1, 1]} : vector<9x192xf32> to vector<1x192xf32>
    %4 = vector.broadcast %3 : vector<1x192xf32> to vector<64x192xf32>
    %5 = arith.mulf %2, %4 : vector<64x192xf32>
    %c1 = arith.constant 1 : index
    %c0_5 = arith.constant 0 : index
    %c0_6 = arith.constant 0 : index
    %c0_7 = arith.constant 0 : index
    %6 = vector.load %arg2[%c1, %c0_5, %c0_6, %c0_7] : memref<9x1x64x192xf32, #tpu.memory_space<vmem>>, vector<1x1x64x192xf32>
    %7 = vector.shape_cast %6 : vector<1x1x64x192xf32> to vector<64x192xf32>
    %8 = vector.extract_strided_slice %0 {offsets = [1, 0], sizes = [1, 192], strides = [1, 1]} : vector<9x192xf32> to vector<1x192xf32>
    %9 = vector.broadcast %8 : vector<1x192xf32> to vector<64x192xf32>
    %10 = arith.mulf %7, %9 : vector<64x192xf32>
    %11 = arith.addf %5, %10 : vector<64x192xf32>
    %c2 = arith.constant 2 : index
    %c0_8 = arith.constant 0 : index
    %c0_9 = arith.constant 0 : index
    %c0_10 = arith.constant 0 : index
    %12 = vector.load %arg2[%c2, %c0_8, %c0_9, %c0_10] : memref<9x1x64x192xf32, #tpu.memory_space<vmem>>, vector<1x1x64x192xf32>
    %13 = vector.shape_cast %12 : vector<1x1x64x192xf32> to vector<64x192xf32>
    %14 = vector.extract_strided_slice %0 {offsets = [2, 0], sizes = [1, 192], strides = [1, 1]} : vector<9x192xf32> to vector<1x192xf32>
    %15 = vector.broadcast %14 : vector<1x192xf32> to vector<64x192xf32>
    %16 = arith.mulf %13, %15 : vector<64x192xf32>
    %17 = arith.addf %11, %16 : vector<64x192xf32>
    %c3 = arith.constant 3 : index
    %c0_11 = arith.constant 0 : index
    %c0_12 = arith.constant 0 : index
    %c0_13 = arith.constant 0 : index
    %18 = vector.load %arg2[%c3, %c0_11, %c0_12, %c0_13] : memref<9x1x64x192xf32, #tpu.memory_space<vmem>>, vector<1x1x64x192xf32>
    %19 = vector.shape_cast %18 : vector<1x1x64x192xf32> to vector<64x192xf32>
    %20 = vector.extract_strided_slice %0 {offsets = [3, 0], sizes = [1, 192], strides = [1, 1]} : vector<9x192xf32> to vector<1x192xf32>
    %21 = vector.broadcast %20 : vector<1x192xf32> to vector<64x192xf32>
    %22 = arith.mulf %19, %21 : vector<64x192xf32>
    %23 = arith.addf %17, %22 : vector<64x192xf32>
    %c4 = arith.constant 4 : index
    %c0_14 = arith.constant 0 : index
    %c0_15 = arith.constant 0 : index
    %c0_16 = arith.constant 0 : index
    %24 = vector.load %arg2[%c4, %c0_14, %c0_15, %c0_16] : memref<9x1x64x192xf32, #tpu.memory_space<vmem>>, vector<1x1x64x192xf32>
    %25 = vector.shape_cast %24 : vector<1x1x64x192xf32> to vector<64x192xf32>
    %26 = vector.extract_strided_slice %0 {offsets = [4, 0], sizes = [1, 192], strides = [1, 1]} : vector<9x192xf32> to vector<1x192xf32>
    %27 = vector.broadcast %26 : vector<1x192xf32> to vector<64x192xf32>
    %28 = arith.mulf %25, %27 : vector<64x192xf32>
    %29 = arith.addf %23, %28 : vector<64x192xf32>
    %c5 = arith.constant 5 : index
    %c0_17 = arith.constant 0 : index
    %c0_18 = arith.constant 0 : index
    %c0_19 = arith.constant 0 : index
    %30 = vector.load %arg2[%c5, %c0_17, %c0_18, %c0_19] : memref<9x1x64x192xf32, #tpu.memory_space<vmem>>, vector<1x1x64x192xf32>
    %31 = vector.shape_cast %30 : vector<1x1x64x192xf32> to vector<64x192xf32>
    %32 = vector.extract_strided_slice %0 {offsets = [5, 0], sizes = [1, 192], strides = [1, 1]} : vector<9x192xf32> to vector<1x192xf32>
    %33 = vector.broadcast %32 : vector<1x192xf32> to vector<64x192xf32>
    %34 = arith.mulf %31, %33 : vector<64x192xf32>
    %35 = arith.addf %29, %34 : vector<64x192xf32>
    %c6 = arith.constant 6 : index
    %c0_20 = arith.constant 0 : index
    %c0_21 = arith.constant 0 : index
    %c0_22 = arith.constant 0 : index
    %36 = vector.load %arg2[%c6, %c0_20, %c0_21, %c0_22] : memref<9x1x64x192xf32, #tpu.memory_space<vmem>>, vector<1x1x64x192xf32>
    %37 = vector.shape_cast %36 : vector<1x1x64x192xf32> to vector<64x192xf32>
    %38 = vector.extract_strided_slice %0 {offsets = [6, 0], sizes = [1, 192], strides = [1, 1]} : vector<9x192xf32> to vector<1x192xf32>
    %39 = vector.broadcast %38 : vector<1x192xf32> to vector<64x192xf32>
    %40 = arith.mulf %37, %39 : vector<64x192xf32>
    %41 = arith.addf %35, %40 : vector<64x192xf32>
    %c7 = arith.constant 7 : index
    %c0_23 = arith.constant 0 : index
    %c0_24 = arith.constant 0 : index
    %c0_25 = arith.constant 0 : index
    %42 = vector.load %arg2[%c7, %c0_23, %c0_24, %c0_25] : memref<9x1x64x192xf32, #tpu.memory_space<vmem>>, vector<1x1x64x192xf32>
    %43 = vector.shape_cast %42 : vector<1x1x64x192xf32> to vector<64x192xf32>
    %44 = vector.extract_strided_slice %0 {offsets = [7, 0], sizes = [1, 192], strides = [1, 1]} : vector<9x192xf32> to vector<1x192xf32>
    %45 = vector.broadcast %44 : vector<1x192xf32> to vector<64x192xf32>
    %46 = arith.mulf %43, %45 : vector<64x192xf32>
    %47 = arith.addf %41, %46 : vector<64x192xf32>
    %c8 = arith.constant 8 : index
    %c0_26 = arith.constant 0 : index
    %c0_27 = arith.constant 0 : index
    %c0_28 = arith.constant 0 : index
    %48 = vector.load %arg2[%c8, %c0_26, %c0_27, %c0_28] : memref<9x1x64x192xf32, #tpu.memory_space<vmem>>, vector<1x1x64x192xf32>
    %49 = vector.shape_cast %48 : vector<1x1x64x192xf32> to vector<64x192xf32>
    %50 = vector.extract_strided_slice %0 {offsets = [8, 0], sizes = [1, 192], strides = [1, 1]} : vector<9x192xf32> to vector<1x192xf32>
    %51 = vector.broadcast %50 : vector<1x192xf32> to vector<64x192xf32>
    %52 = arith.mulf %49, %51 : vector<64x192xf32>
    %53 = arith.addf %47, %52 : vector<64x192xf32>
    %c0_29 = arith.constant 0 : index
    %c0_30 = arith.constant 0 : index
    %54 = vector.load %arg4[%c0_29, %c0_30] : memref<1x192xf32, #tpu.memory_space<vmem>>, vector<1x192xf32>
    %55 = vector.broadcast %54 : vector<1x192xf32> to vector<64x192xf32>
    %56 = arith.addf %53, %55 : vector<64x192xf32>
    %cst = arith.constant 5.000000e-01 : f32
    %57 = vector.broadcast %cst : f32 to vector<64x192xf32>
    %58 = arith.mulf %57, %56 : vector<64x192xf32>
    %59 = math.tanh %58 : vector<64x192xf32>
    %cst_31 = arith.constant 1.000000e+00 : f32
    %60 = vector.broadcast %cst_31 : f32 to vector<64x192xf32>
    %61 = arith.addf %60, %59 : vector<64x192xf32>
    %cst_32 = arith.constant 5.000000e-01 : f32
    %62 = vector.broadcast %cst_32 : f32 to vector<64x192xf32>
    %63 = arith.mulf %62, %61 : vector<64x192xf32>
    %64 = arith.mulf %56, %63 : vector<64x192xf32>
    %c0_33 = arith.constant 0 : index
    %c0_34 = arith.constant 0 : index
    %c0_35 = arith.constant 0 : index
    %65 = vector.load %arg5[%c0_33, %c0_34, %c0_35] : memref<1x64x192xf32, #tpu.memory_space<vmem>>, vector<1x64x192xf32>
    %66 = vector.shape_cast %65 : vector<1x64x192xf32> to vector<64x192xf32>
    %67 = vector.shape_cast %64 : vector<64x192xf32> to vector<1x64x192xf32>
    tpu.vector_store %arg5[%c0_33, %c0_34, %c0_35], %67 {strides = array<i32>} : memref<1x64x192xf32, #tpu.memory_space<vmem>>, vector<1x64x192xf32>,
    return
  }
  func.func @transform_0(%arg0: i32, %arg1: i32) -> (i32, i32, i32, i32) {
    %c0_i32 = arith.constant 0 : i32
    %c0_i32_0 = arith.constant 0 : i32
    %c0_i32_1 = arith.constant 0 : i32
    return %c0_i32, %arg0, %arg1, %c0_i32_0 : i32, i32, i32, i32
  }
  func.func @transform_1(%arg0: i32, %arg1: i32) -> (i32, i32) {
    %c0_i32 = arith.constant 0 : i32
    %c0_i32_0 = arith.constant 0 : i32
    %c0_i32_1 = arith.constant 0 : i32
    return %c0_i32, %c0_i32_0 : i32, i32
  }
  func.func @transform_2(%arg0: i32, %arg1: i32) -> (i32, i32) {
    %c0_i32 = arith.constant 0 : i32
    %c0_i32_0 = arith.constant 0 : i32
    %c0_i32_1 = arith.constant 0 : i32
    return %c0_i32, %c0_i32_0 : i32, i32
  }
  func.func @transform_3(%arg0: i32, %arg1: i32) -> (i32, i32, i32) {
    %c0_i32 = arith.constant 0 : i32
    %c0_i32_0 = arith.constant 0 : i32
    return %arg0, %arg1, %c0_i32 : i32, i32, i32
  }
}

module attributes {stable_mosaic.version = 11 : i64} {
  func.func @_se_kernel(%arg0: i32, %arg1: memref<2x192xf32, #tpu.memory_space<vmem>>, %arg2: memref<192x8xf32, #tpu.memory_space<vmem>>, %arg3: memref<1x8xf32, #tpu.memory_space<vmem>>, %arg4: memref<8x192xf32, #tpu.memory_space<vmem>>, %arg5: memref<1x192xf32, #tpu.memory_space<vmem>>, %arg6: memref<2x192xf32, #tpu.memory_space<vmem>>) attributes {dimension_semantics = [#tpu.dimension_semantics<arbitrary>], iteration_bounds = array<i64: 1>, scalar_prefetch = 0 : i64, scratch_operands = 0 : i64, tpu.core_type = #tpu.core_type<tc>, window_params = [{pipeline_mode = #tpu.pipeline_mode<synchronous>, transform_indices = @transform_0, window_bounds = array<i64: 2, 192>}, {pipeline_mode = #tpu.pipeline_mode<synchronous>, transform_indices = @transform_1, window_bounds = array<i64: 192, 8>}, {pipeline_mode = #tpu.pipeline_mode<synchronous>, transform_indices = @transform_2, window_bounds = array<i64: 1, 8>}, {pipeline_mode = #tpu.pipeline_mode<synchronous>, transform_indices = @transform_3, window_bounds = array<i64: 8, 192>}, {pipeline_mode = #tpu.pipeline_mode<synchronous>, transform_indices = @transform_4, window_bounds = array<i64: 1, 192>}, {pipeline_mode = #tpu.pipeline_mode<synchronous>, transform_indices = @transform_5, window_bounds = array<i64: 2, 192>}]} {
    %c0 = arith.constant 0 : index
    %c0_0 = arith.constant 0 : index
    %0 = vector.load %arg1[%c0, %c0_0] : memref<2x192xf32, #tpu.memory_space<vmem>>, vector<2x192xf32>
    %c0_1 = arith.constant 0 : index
    %c0_2 = arith.constant 0 : index
    %1 = vector.load %arg2[%c0_1, %c0_2] : memref<192x8xf32, #tpu.memory_space<vmem>>, vector<192x8xf32>
    %cst = arith.constant dense<0.000000e+00> : vector<2x8xf32>
    %2 = tpu.matmul %0, %1, %cst {dimension_numbers = #tpu.dot_dimension_numbers<[1], [0], [0], [1], [0, 0, 1, 1], [], []>} : vector<2x192xf32>, vector<192x8xf32>, vector<2x8xf32> -> vector<2x8xf32>
    %c0_3 = arith.constant 0 : index
    %c0_4 = arith.constant 0 : index
    %3 = vector.load %arg3[%c0_3, %c0_4] : memref<1x8xf32, #tpu.memory_space<vmem>>, vector<1x8xf32>
    %4 = vector.broadcast %3 : vector<1x8xf32> to vector<2x8xf32>
    %5 = arith.addf %2, %4 : vector<2x8xf32>
    %cst_5 = arith.constant 5.000000e-01 : f32
    %6 = vector.broadcast %cst_5 : f32 to vector<2x8xf32>
    %7 = arith.mulf %6, %5 : vector<2x8xf32>
    %8 = math.tanh %7 : vector<2x8xf32>
    %cst_6 = arith.constant 1.000000e+00 : f32
    %9 = vector.broadcast %cst_6 : f32 to vector<2x8xf32>
    %10 = arith.addf %9, %8 : vector<2x8xf32>
    %cst_7 = arith.constant 5.000000e-01 : f32
    %11 = vector.broadcast %cst_7 : f32 to vector<2x8xf32>
    %12 = arith.mulf %11, %10 : vector<2x8xf32>
    %13 = arith.mulf %5, %12 : vector<2x8xf32>
    %c0_8 = arith.constant 0 : index
    %c0_9 = arith.constant 0 : index
    %14 = vector.load %arg4[%c0_8, %c0_9] : memref<8x192xf32, #tpu.memory_space<vmem>>, vector<8x192xf32>
    %cst_10 = arith.constant dense<0.000000e+00> : vector<2x192xf32>
    %15 = tpu.matmul %13, %14, %cst_10 {dimension_numbers = #tpu.dot_dimension_numbers<[1], [0], [0], [1], [0, 0, 1, 1], [], []>} : vector<2x8xf32>, vector<8x192xf32>, vector<2x192xf32> -> vector<2x192xf32>
    %c0_11 = arith.constant 0 : index
    %c0_12 = arith.constant 0 : index
    %16 = vector.load %arg5[%c0_11, %c0_12] : memref<1x192xf32, #tpu.memory_space<vmem>>, vector<1x192xf32>
    %17 = vector.broadcast %16 : vector<1x192xf32> to vector<2x192xf32>
    %18 = arith.addf %15, %17 : vector<2x192xf32>
    %cst_13 = arith.constant 5.000000e-01 : f32
    %19 = vector.broadcast %cst_13 : f32 to vector<2x192xf32>
    %20 = arith.mulf %19, %18 : vector<2x192xf32>
    %21 = math.tanh %20 : vector<2x192xf32>
    %cst_14 = arith.constant 1.000000e+00 : f32
    %22 = vector.broadcast %cst_14 : f32 to vector<2x192xf32>
    %23 = arith.addf %22, %21 : vector<2x192xf32>
    %cst_15 = arith.constant 5.000000e-01 : f32
    %24 = vector.broadcast %cst_15 : f32 to vector<2x192xf32>
    %25 = arith.mulf %24, %23 : vector<2x192xf32>
    %c0_16 = arith.constant 0 : index
    %c0_17 = arith.constant 0 : index
    %26 = vector.load %arg6[%c0_16, %c0_17] : memref<2x192xf32, #tpu.memory_space<vmem>>, vector<2x192xf32>
    tpu.vector_store %arg6[%c0_16, %c0_17], %25 {strides = array<i32>} : memref<2x192xf32, #tpu.memory_space<vmem>>, vector<2x192xf32>,
    return
  }
  func.func @transform_0(%arg0: i32) -> (i32, i32) {
    %c0_i32 = arith.constant 0 : i32
    %c0_i32_0 = arith.constant 0 : i32
    %c0_i32_1 = arith.constant 0 : i32
    return %c0_i32, %c0_i32_0 : i32, i32
  }
  func.func @transform_1(%arg0: i32) -> (i32, i32) {
    %c0_i32 = arith.constant 0 : i32
    %c0_i32_0 = arith.constant 0 : i32
    %c0_i32_1 = arith.constant 0 : i32
    return %c0_i32, %c0_i32_0 : i32, i32
  }
  func.func @transform_2(%arg0: i32) -> (i32, i32) {
    %c0_i32 = arith.constant 0 : i32
    %c0_i32_0 = arith.constant 0 : i32
    %c0_i32_1 = arith.constant 0 : i32
    return %c0_i32, %c0_i32_0 : i32, i32
  }
  func.func @transform_3(%arg0: i32) -> (i32, i32) {
    %c0_i32 = arith.constant 0 : i32
    %c0_i32_0 = arith.constant 0 : i32
    %c0_i32_1 = arith.constant 0 : i32
    return %c0_i32, %c0_i32_0 : i32, i32
  }
  func.func @transform_4(%arg0: i32) -> (i32, i32) {
    %c0_i32 = arith.constant 0 : i32
    %c0_i32_0 = arith.constant 0 : i32
    %c0_i32_1 = arith.constant 0 : i32
    return %c0_i32, %c0_i32_0 : i32, i32
  }
  func.func @transform_5(%arg0: i32) -> (i32, i32) {
    %c0_i32 = arith.constant 0 : i32
    %c0_i32_0 = arith.constant 0 : i32
    %c0_i32_1 = arith.constant 0 : i32
    return %c0_i32, %c0_i32_0 : i32, i32
  }
}

module attributes {stable_mosaic.version = 11 : i64} {
  func.func @_pw_kernel(%arg0: i32, %arg1: i32, %arg2: memref<1x64x192xf32, #tpu.memory_space<vmem>>, %arg3: memref<192x32xf32, #tpu.memory_space<vmem>>, %arg4: memref<1x32xf32, #tpu.memory_space<vmem>>, %arg5: memref<1x1x192xf32, #tpu.memory_space<vmem>>, %arg6: memref<1x64x32xf32, #tpu.memory_space<vmem>>, %arg7: memref<1x64x32xf32, #tpu.memory_space<vmem>>) attributes {dimension_semantics = [#tpu.dimension_semantics<parallel>, #tpu.dimension_semantics<parallel>], iteration_bounds = array<i64: 2, 1>, scalar_prefetch = 0 : i64, scratch_operands = 0 : i64, tpu.core_type = #tpu.core_type<tc>, window_params = [{transform_indices = @transform_0, window_bounds = array<i64: 1, 64, 192>}, {pipeline_mode = #tpu.pipeline_mode<synchronous>, transform_indices = @transform_1, window_bounds = array<i64: 192, 32>}, {pipeline_mode = #tpu.pipeline_mode<synchronous>, transform_indices = @transform_2, window_bounds = array<i64: 1, 32>}, {transform_indices = @transform_3, window_bounds = array<i64: 1, 1, 192>}, {transform_indices = @transform_4, window_bounds = array<i64: 1, 64, 32>}, {transform_indices = @transform_5, window_bounds = array<i64: 1, 64, 32>}]} {
    %c0 = arith.constant 0 : index
    %c0_0 = arith.constant 0 : index
    %c0_1 = arith.constant 0 : index
    %0 = vector.load %arg2[%c0, %c0_0, %c0_1] : memref<1x64x192xf32, #tpu.memory_space<vmem>>, vector<1x64x192xf32>
    %1 = vector.shape_cast %0 : vector<1x64x192xf32> to vector<64x192xf32>
    %c0_2 = arith.constant 0 : index
    %c0_3 = arith.constant 0 : index
    %c0_4 = arith.constant 0 : index
    %2 = vector.load %arg5[%c0_2, %c0_3, %c0_4] : memref<1x1x192xf32, #tpu.memory_space<vmem>>, vector<1x1x192xf32>
    %3 = vector.shape_cast %2 : vector<1x1x192xf32> to vector<1x192xf32>
    %4 = vector.broadcast %3 : vector<1x192xf32> to vector<64x192xf32>
    %5 = arith.mulf %1, %4 : vector<64x192xf32>
    %6 = arith.truncf %5 : vector<64x192xf32> to vector<64x192xbf16>
    %c0_5 = arith.constant 0 : index
    %c0_6 = arith.constant 0 : index
    %7 = vector.load %arg3[%c0_5, %c0_6] : memref<192x32xf32, #tpu.memory_space<vmem>>, vector<192x32xf32>
    %8 = arith.truncf %7 : vector<192x32xf32> to vector<192x32xbf16>
    %cst = arith.constant dense<0.000000e+00> : vector<64x32xf32>
    %9 = tpu.matmul %6, %8, %cst {dimension_numbers = #tpu.dot_dimension_numbers<[1], [0], [0], [1], [0, 0, 1, 1], [], []>} : vector<64x192xbf16>, vector<192x32xbf16>, vector<64x32xf32> -> vector<64x32xf32>
    %c0_7 = arith.constant 0 : index
    %c0_8 = arith.constant 0 : index
    %10 = vector.load %arg4[%c0_7, %c0_8] : memref<1x32xf32, #tpu.memory_space<vmem>>, vector<1x32xf32>
    %11 = vector.broadcast %10 : vector<1x32xf32> to vector<64x32xf32>
    %12 = arith.addf %9, %11 : vector<64x32xf32>
    %c0_9 = arith.constant 0 : index
    %c0_10 = arith.constant 0 : index
    %c0_11 = arith.constant 0 : index
    %13 = vector.load %arg6[%c0_9, %c0_10, %c0_11] : memref<1x64x32xf32, #tpu.memory_space<vmem>>, vector<1x64x32xf32>
    %14 = vector.shape_cast %13 : vector<1x64x32xf32> to vector<64x32xf32>
    %15 = arith.addf %12, %14 : vector<64x32xf32>
    %c0_12 = arith.constant 0 : index
    %c0_13 = arith.constant 0 : index
    %c0_14 = arith.constant 0 : index
    %16 = vector.load %arg7[%c0_12, %c0_13, %c0_14] : memref<1x64x32xf32, #tpu.memory_space<vmem>>, vector<1x64x32xf32>
    %17 = vector.shape_cast %16 : vector<1x64x32xf32> to vector<64x32xf32>
    %18 = vector.shape_cast %15 : vector<64x32xf32> to vector<1x64x32xf32>
    tpu.vector_store %arg7[%c0_12, %c0_13, %c0_14], %18 {strides = array<i32>} : memref<1x64x32xf32, #tpu.memory_space<vmem>>, vector<1x64x32xf32>,
    return
  }
  func.func @transform_0(%arg0: i32, %arg1: i32) -> (i32, i32, i32) {
    %c0_i32 = arith.constant 0 : i32
    %c0_i32_0 = arith.constant 0 : i32
    return %arg0, %arg1, %c0_i32 : i32, i32, i32
  }
  func.func @transform_1(%arg0: i32, %arg1: i32) -> (i32, i32) {
    %c0_i32 = arith.constant 0 : i32
    %c0_i32_0 = arith.constant 0 : i32
    %c0_i32_1 = arith.constant 0 : i32
    return %c0_i32, %c0_i32_0 : i32, i32
  }
  func.func @transform_2(%arg0: i32, %arg1: i32) -> (i32, i32) {
    %c0_i32 = arith.constant 0 : i32
    %c0_i32_0 = arith.constant 0 : i32
    %c0_i32_1 = arith.constant 0 : i32
    return %c0_i32, %c0_i32_0 : i32, i32
  }
  func.func @transform_3(%arg0: i32, %arg1: i32) -> (i32, i32, i32) {
    %c0_i32 = arith.constant 0 : i32
    %c0_i32_0 = arith.constant 0 : i32
    %c0_i32_1 = arith.constant 0 : i32
    return %arg0, %c0_i32, %c0_i32_0 : i32, i32, i32
  }
  func.func @transform_4(%arg0: i32, %arg1: i32) -> (i32, i32, i32) {
    %c0_i32 = arith.constant 0 : i32
    %c0_i32_0 = arith.constant 0 : i32
    return %arg0, %arg1, %c0_i32 : i32, i32, i32
  }
  func.func @transform_5(%arg0: i32, %arg1: i32) -> (i32, i32, i32) {
    %c0_i32 = arith.constant 0 : i32
    %c0_i32_0 = arith.constant 0 : i32
    return %arg0, %arg1, %c0_i32 : i32, i32, i32
  }
}

module attributes {stable_mosaic.version = 11 : i64} {
  func.func @_dw_kernel(%arg0: i32, %arg1: i32, %arg2: memref<9x1x16x192xf32, #tpu.memory_space<vmem>>, %arg3: memref<9x192xf32, #tpu.memory_space<vmem>>, %arg4: memref<1x192xf32, #tpu.memory_space<vmem>>, %arg5: memref<1x16x192xf32, #tpu.memory_space<vmem>>) attributes {dimension_semantics = [#tpu.dimension_semantics<parallel>, #tpu.dimension_semantics<parallel>], iteration_bounds = array<i64: 2, 1>, scalar_prefetch = 0 : i64, scratch_operands = 0 : i64, tpu.core_type = #tpu.core_type<tc>, window_params = [{transform_indices = @transform_0, window_bounds = array<i64: 9, 1, 16, 192>}, {pipeline_mode = #tpu.pipeline_mode<synchronous>, transform_indices = @transform_1, window_bounds = array<i64: 9, 192>}, {pipeline_mode = #tpu.pipeline_mode<synchronous>, transform_indices = @transform_2, window_bounds = array<i64: 1, 192>}, {transform_indices = @transform_3, window_bounds = array<i64: 1, 16, 192>}]} {
    %c0 = arith.constant 0 : index
    %c0_0 = arith.constant 0 : index
    %0 = vector.load %arg3[%c0, %c0_0] : memref<9x192xf32, #tpu.memory_space<vmem>>, vector<9x192xf32>
    %c0_1 = arith.constant 0 : index
    %c0_2 = arith.constant 0 : index
    %c0_3 = arith.constant 0 : index
    %c0_4 = arith.constant 0 : index
    %1 = vector.load %arg2[%c0_1, %c0_2, %c0_3, %c0_4] : memref<9x1x16x192xf32, #tpu.memory_space<vmem>>, vector<1x1x16x192xf32>
    %2 = vector.shape_cast %1 : vector<1x1x16x192xf32> to vector<16x192xf32>
    %3 = vector.extract_strided_slice %0 {offsets = [0, 0], sizes = [1, 192], strides = [1, 1]} : vector<9x192xf32> to vector<1x192xf32>
    %4 = vector.broadcast %3 : vector<1x192xf32> to vector<16x192xf32>
    %5 = arith.mulf %2, %4 : vector<16x192xf32>
    %c1 = arith.constant 1 : index
    %c0_5 = arith.constant 0 : index
    %c0_6 = arith.constant 0 : index
    %c0_7 = arith.constant 0 : index
    %6 = vector.load %arg2[%c1, %c0_5, %c0_6, %c0_7] : memref<9x1x16x192xf32, #tpu.memory_space<vmem>>, vector<1x1x16x192xf32>
    %7 = vector.shape_cast %6 : vector<1x1x16x192xf32> to vector<16x192xf32>
    %8 = vector.extract_strided_slice %0 {offsets = [1, 0], sizes = [1, 192], strides = [1, 1]} : vector<9x192xf32> to vector<1x192xf32>
    %9 = vector.broadcast %8 : vector<1x192xf32> to vector<16x192xf32>
    %10 = arith.mulf %7, %9 : vector<16x192xf32>
    %11 = arith.addf %5, %10 : vector<16x192xf32>
    %c2 = arith.constant 2 : index
    %c0_8 = arith.constant 0 : index
    %c0_9 = arith.constant 0 : index
    %c0_10 = arith.constant 0 : index
    %12 = vector.load %arg2[%c2, %c0_8, %c0_9, %c0_10] : memref<9x1x16x192xf32, #tpu.memory_space<vmem>>, vector<1x1x16x192xf32>
    %13 = vector.shape_cast %12 : vector<1x1x16x192xf32> to vector<16x192xf32>
    %14 = vector.extract_strided_slice %0 {offsets = [2, 0], sizes = [1, 192], strides = [1, 1]} : vector<9x192xf32> to vector<1x192xf32>
    %15 = vector.broadcast %14 : vector<1x192xf32> to vector<16x192xf32>
    %16 = arith.mulf %13, %15 : vector<16x192xf32>
    %17 = arith.addf %11, %16 : vector<16x192xf32>
    %c3 = arith.constant 3 : index
    %c0_11 = arith.constant 0 : index
    %c0_12 = arith.constant 0 : index
    %c0_13 = arith.constant 0 : index
    %18 = vector.load %arg2[%c3, %c0_11, %c0_12, %c0_13] : memref<9x1x16x192xf32, #tpu.memory_space<vmem>>, vector<1x1x16x192xf32>
    %19 = vector.shape_cast %18 : vector<1x1x16x192xf32> to vector<16x192xf32>
    %20 = vector.extract_strided_slice %0 {offsets = [3, 0], sizes = [1, 192], strides = [1, 1]} : vector<9x192xf32> to vector<1x192xf32>
    %21 = vector.broadcast %20 : vector<1x192xf32> to vector<16x192xf32>
    %22 = arith.mulf %19, %21 : vector<16x192xf32>
    %23 = arith.addf %17, %22 : vector<16x192xf32>
    %c4 = arith.constant 4 : index
    %c0_14 = arith.constant 0 : index
    %c0_15 = arith.constant 0 : index
    %c0_16 = arith.constant 0 : index
    %24 = vector.load %arg2[%c4, %c0_14, %c0_15, %c0_16] : memref<9x1x16x192xf32, #tpu.memory_space<vmem>>, vector<1x1x16x192xf32>
    %25 = vector.shape_cast %24 : vector<1x1x16x192xf32> to vector<16x192xf32>
    %26 = vector.extract_strided_slice %0 {offsets = [4, 0], sizes = [1, 192], strides = [1, 1]} : vector<9x192xf32> to vector<1x192xf32>
    %27 = vector.broadcast %26 : vector<1x192xf32> to vector<16x192xf32>
    %28 = arith.mulf %25, %27 : vector<16x192xf32>
    %29 = arith.addf %23, %28 : vector<16x192xf32>
    %c5 = arith.constant 5 : index
    %c0_17 = arith.constant 0 : index
    %c0_18 = arith.constant 0 : index
    %c0_19 = arith.constant 0 : index
    %30 = vector.load %arg2[%c5, %c0_17, %c0_18, %c0_19] : memref<9x1x16x192xf32, #tpu.memory_space<vmem>>, vector<1x1x16x192xf32>
    %31 = vector.shape_cast %30 : vector<1x1x16x192xf32> to vector<16x192xf32>
    %32 = vector.extract_strided_slice %0 {offsets = [5, 0], sizes = [1, 192], strides = [1, 1]} : vector<9x192xf32> to vector<1x192xf32>
    %33 = vector.broadcast %32 : vector<1x192xf32> to vector<16x192xf32>
    %34 = arith.mulf %31, %33 : vector<16x192xf32>
    %35 = arith.addf %29, %34 : vector<16x192xf32>
    %c6 = arith.constant 6 : index
    %c0_20 = arith.constant 0 : index
    %c0_21 = arith.constant 0 : index
    %c0_22 = arith.constant 0 : index
    %36 = vector.load %arg2[%c6, %c0_20, %c0_21, %c0_22] : memref<9x1x16x192xf32, #tpu.memory_space<vmem>>, vector<1x1x16x192xf32>
    %37 = vector.shape_cast %36 : vector<1x1x16x192xf32> to vector<16x192xf32>
    %38 = vector.extract_strided_slice %0 {offsets = [6, 0], sizes = [1, 192], strides = [1, 1]} : vector<9x192xf32> to vector<1x192xf32>
    %39 = vector.broadcast %38 : vector<1x192xf32> to vector<16x192xf32>
    %40 = arith.mulf %37, %39 : vector<16x192xf32>
    %41 = arith.addf %35, %40 : vector<16x192xf32>
    %c7 = arith.constant 7 : index
    %c0_23 = arith.constant 0 : index
    %c0_24 = arith.constant 0 : index
    %c0_25 = arith.constant 0 : index
    %42 = vector.load %arg2[%c7, %c0_23, %c0_24, %c0_25] : memref<9x1x16x192xf32, #tpu.memory_space<vmem>>, vector<1x1x16x192xf32>
    %43 = vector.shape_cast %42 : vector<1x1x16x192xf32> to vector<16x192xf32>
    %44 = vector.extract_strided_slice %0 {offsets = [7, 0], sizes = [1, 192], strides = [1, 1]} : vector<9x192xf32> to vector<1x192xf32>
    %45 = vector.broadcast %44 : vector<1x192xf32> to vector<16x192xf32>
    %46 = arith.mulf %43, %45 : vector<16x192xf32>
    %47 = arith.addf %41, %46 : vector<16x192xf32>
    %c8 = arith.constant 8 : index
    %c0_26 = arith.constant 0 : index
    %c0_27 = arith.constant 0 : index
    %c0_28 = arith.constant 0 : index
    %48 = vector.load %arg2[%c8, %c0_26, %c0_27, %c0_28] : memref<9x1x16x192xf32, #tpu.memory_space<vmem>>, vector<1x1x16x192xf32>
    %49 = vector.shape_cast %48 : vector<1x1x16x192xf32> to vector<16x192xf32>
    %50 = vector.extract_strided_slice %0 {offsets = [8, 0], sizes = [1, 192], strides = [1, 1]} : vector<9x192xf32> to vector<1x192xf32>
    %51 = vector.broadcast %50 : vector<1x192xf32> to vector<16x192xf32>
    %52 = arith.mulf %49, %51 : vector<16x192xf32>
    %53 = arith.addf %47, %52 : vector<16x192xf32>
    %c0_29 = arith.constant 0 : index
    %c0_30 = arith.constant 0 : index
    %54 = vector.load %arg4[%c0_29, %c0_30] : memref<1x192xf32, #tpu.memory_space<vmem>>, vector<1x192xf32>
    %55 = vector.broadcast %54 : vector<1x192xf32> to vector<16x192xf32>
    %56 = arith.addf %53, %55 : vector<16x192xf32>
    %cst = arith.constant 5.000000e-01 : f32
    %57 = vector.broadcast %cst : f32 to vector<16x192xf32>
    %58 = arith.mulf %57, %56 : vector<16x192xf32>
    %59 = math.tanh %58 : vector<16x192xf32>
    %cst_31 = arith.constant 1.000000e+00 : f32
    %60 = vector.broadcast %cst_31 : f32 to vector<16x192xf32>
    %61 = arith.addf %60, %59 : vector<16x192xf32>
    %cst_32 = arith.constant 5.000000e-01 : f32
    %62 = vector.broadcast %cst_32 : f32 to vector<16x192xf32>
    %63 = arith.mulf %62, %61 : vector<16x192xf32>
    %64 = arith.mulf %56, %63 : vector<16x192xf32>
    %c0_33 = arith.constant 0 : index
    %c0_34 = arith.constant 0 : index
    %c0_35 = arith.constant 0 : index
    %65 = vector.load %arg5[%c0_33, %c0_34, %c0_35] : memref<1x16x192xf32, #tpu.memory_space<vmem>>, vector<1x16x192xf32>
    %66 = vector.shape_cast %65 : vector<1x16x192xf32> to vector<16x192xf32>
    %67 = vector.shape_cast %64 : vector<16x192xf32> to vector<1x16x192xf32>
    tpu.vector_store %arg5[%c0_33, %c0_34, %c0_35], %67 {strides = array<i32>} : memref<1x16x192xf32, #tpu.memory_space<vmem>>, vector<1x16x192xf32>,
    return
  }
  func.func @transform_0(%arg0: i32, %arg1: i32) -> (i32, i32, i32, i32) {
    %c0_i32 = arith.constant 0 : i32
    %c0_i32_0 = arith.constant 0 : i32
    %c0_i32_1 = arith.constant 0 : i32
    return %c0_i32, %arg0, %arg1, %c0_i32_0 : i32, i32, i32, i32
  }
  func.func @transform_1(%arg0: i32, %arg1: i32) -> (i32, i32) {
    %c0_i32 = arith.constant 0 : i32
    %c0_i32_0 = arith.constant 0 : i32
    %c0_i32_1 = arith.constant 0 : i32
    return %c0_i32, %c0_i32_0 : i32, i32
  }
  func.func @transform_2(%arg0: i32, %arg1: i32) -> (i32, i32) {
    %c0_i32 = arith.constant 0 : i32
    %c0_i32_0 = arith.constant 0 : i32
    %c0_i32_1 = arith.constant 0 : i32
    return %c0_i32, %c0_i32_0 : i32, i32
  }
  func.func @transform_3(%arg0: i32, %arg1: i32) -> (i32, i32, i32) {
    %c0_i32 = arith.constant 0 : i32
    %c0_i32_0 = arith.constant 0 : i32
    return %arg0, %arg1, %c0_i32 : i32, i32, i32
  }
}

module attributes {stable_mosaic.version = 11 : i64} {
  func.func @_pw_kernel(%arg0: i32, %arg1: i32, %arg2: memref<1x16x192xf32, #tpu.memory_space<vmem>>, %arg3: memref<192x64xf32, #tpu.memory_space<vmem>>, %arg4: memref<1x64xf32, #tpu.memory_space<vmem>>, %arg5: memref<1x1x192xf32, #tpu.memory_space<vmem>>, %arg6: memref<1x16x64xf32, #tpu.memory_space<vmem>>) attributes {dimension_semantics = [#tpu.dimension_semantics<parallel>, #tpu.dimension_semantics<parallel>], iteration_bounds = array<i64: 2, 1>, scalar_prefetch = 0 : i64, scratch_operands = 0 : i64, tpu.core_type = #tpu.core_type<tc>, window_params = [{transform_indices = @transform_0, window_bounds = array<i64: 1, 16, 192>}, {pipeline_mode = #tpu.pipeline_mode<synchronous>, transform_indices = @transform_1, window_bounds = array<i64: 192, 64>}, {pipeline_mode = #tpu.pipeline_mode<synchronous>, transform_indices = @transform_2, window_bounds = array<i64: 1, 64>}, {transform_indices = @transform_3, window_bounds = array<i64: 1, 1, 192>}, {transform_indices = @transform_4, window_bounds = array<i64: 1, 16, 64>}]} {
    %c0 = arith.constant 0 : index
    %c0_0 = arith.constant 0 : index
    %c0_1 = arith.constant 0 : index
    %0 = vector.load %arg2[%c0, %c0_0, %c0_1] : memref<1x16x192xf32, #tpu.memory_space<vmem>>, vector<1x16x192xf32>
    %1 = vector.shape_cast %0 : vector<1x16x192xf32> to vector<16x192xf32>
    %c0_2 = arith.constant 0 : index
    %c0_3 = arith.constant 0 : index
    %c0_4 = arith.constant 0 : index
    %2 = vector.load %arg5[%c0_2, %c0_3, %c0_4] : memref<1x1x192xf32, #tpu.memory_space<vmem>>, vector<1x1x192xf32>
    %3 = vector.shape_cast %2 : vector<1x1x192xf32> to vector<1x192xf32>
    %4 = vector.broadcast %3 : vector<1x192xf32> to vector<16x192xf32>
    %5 = arith.mulf %1, %4 : vector<16x192xf32>
    %6 = arith.truncf %5 : vector<16x192xf32> to vector<16x192xbf16>
    %c0_5 = arith.constant 0 : index
    %c0_6 = arith.constant 0 : index
    %7 = vector.load %arg3[%c0_5, %c0_6] : memref<192x64xf32, #tpu.memory_space<vmem>>, vector<192x64xf32>
    %8 = arith.truncf %7 : vector<192x64xf32> to vector<192x64xbf16>
    %cst = arith.constant dense<0.000000e+00> : vector<16x64xf32>
    %9 = tpu.matmul %6, %8, %cst {dimension_numbers = #tpu.dot_dimension_numbers<[1], [0], [0], [1], [0, 0, 1, 1], [], []>} : vector<16x192xbf16>, vector<192x64xbf16>, vector<16x64xf32> -> vector<16x64xf32>
    %c0_7 = arith.constant 0 : index
    %c0_8 = arith.constant 0 : index
    %10 = vector.load %arg4[%c0_7, %c0_8] : memref<1x64xf32, #tpu.memory_space<vmem>>, vector<1x64xf32>
    %11 = vector.broadcast %10 : vector<1x64xf32> to vector<16x64xf32>
    %12 = arith.addf %9, %11 : vector<16x64xf32>
    %c0_9 = arith.constant 0 : index
    %c0_10 = arith.constant 0 : index
    %c0_11 = arith.constant 0 : index
    %13 = vector.load %arg6[%c0_9, %c0_10, %c0_11] : memref<1x16x64xf32, #tpu.memory_space<vmem>>, vector<1x16x64xf32>
    %14 = vector.shape_cast %13 : vector<1x16x64xf32> to vector<16x64xf32>
    %15 = vector.shape_cast %12 : vector<16x64xf32> to vector<1x16x64xf32>
    tpu.vector_store %arg6[%c0_9, %c0_10, %c0_11], %15 {strides = array<i32>} : memref<1x16x64xf32, #tpu.memory_space<vmem>>, vector<1x16x64xf32>,
    return
  }
  func.func @transform_0(%arg0: i32, %arg1: i32) -> (i32, i32, i32) {
    %c0_i32 = arith.constant 0 : i32
    %c0_i32_0 = arith.constant 0 : i32
    return %arg0, %arg1, %c0_i32 : i32, i32, i32
  }
  func.func @transform_1(%arg0: i32, %arg1: i32) -> (i32, i32) {
    %c0_i32 = arith.constant 0 : i32
    %c0_i32_0 = arith.constant 0 : i32
    %c0_i32_1 = arith.constant 0 : i32
    return %c0_i32, %c0_i32_0 : i32, i32
  }
  func.func @transform_2(%arg0: i32, %arg1: i32) -> (i32, i32) {
    %c0_i32 = arith.constant 0 : i32
    %c0_i32_0 = arith.constant 0 : i32
    %c0_i32_1 = arith.constant 0 : i32
    return %c0_i32, %c0_i32_0 : i32, i32
  }
  func.func @transform_3(%arg0: i32, %arg1: i32) -> (i32, i32, i32) {
    %c0_i32 = arith.constant 0 : i32
    %c0_i32_0 = arith.constant 0 : i32
    %c0_i32_1 = arith.constant 0 : i32
    return %arg0, %c0_i32, %c0_i32_0 : i32, i32, i32
  }
  func.func @transform_4(%arg0: i32, %arg1: i32) -> (i32, i32, i32) {
    %c0_i32 = arith.constant 0 : i32
    %c0_i32_0 = arith.constant 0 : i32
    return %arg0, %arg1, %c0_i32 : i32, i32, i32
  }
}

module attributes {stable_mosaic.version = 11 : i64} {
  func.func @_pw_kernel(%arg0: i32, %arg1: i32, %arg2: memref<1x16x64xf32, #tpu.memory_space<vmem>>, %arg3: memref<64x384xf32, #tpu.memory_space<vmem>>, %arg4: memref<1x384xf32, #tpu.memory_space<vmem>>, %arg5: memref<1x16x384xf32, #tpu.memory_space<vmem>>) attributes {dimension_semantics = [#tpu.dimension_semantics<parallel>, #tpu.dimension_semantics<parallel>], iteration_bounds = array<i64: 2, 1>, scalar_prefetch = 0 : i64, scratch_operands = 0 : i64, tpu.core_type = #tpu.core_type<tc>, window_params = [{transform_indices = @transform_0, window_bounds = array<i64: 1, 16, 64>}, {pipeline_mode = #tpu.pipeline_mode<synchronous>, transform_indices = @transform_1, window_bounds = array<i64: 64, 384>}, {pipeline_mode = #tpu.pipeline_mode<synchronous>, transform_indices = @transform_2, window_bounds = array<i64: 1, 384>}, {transform_indices = @transform_3, window_bounds = array<i64: 1, 16, 384>}]} {
    %c0 = arith.constant 0 : index
    %c0_0 = arith.constant 0 : index
    %c0_1 = arith.constant 0 : index
    %0 = vector.load %arg2[%c0, %c0_0, %c0_1] : memref<1x16x64xf32, #tpu.memory_space<vmem>>, vector<1x16x64xf32>
    %1 = vector.shape_cast %0 : vector<1x16x64xf32> to vector<16x64xf32>
    %2 = arith.truncf %1 : vector<16x64xf32> to vector<16x64xbf16>
    %c0_2 = arith.constant 0 : index
    %c0_3 = arith.constant 0 : index
    %3 = vector.load %arg3[%c0_2, %c0_3] : memref<64x384xf32, #tpu.memory_space<vmem>>, vector<64x384xf32>
    %4 = arith.truncf %3 : vector<64x384xf32> to vector<64x384xbf16>
    %cst = arith.constant dense<0.000000e+00> : vector<16x384xf32>
    %5 = tpu.matmul %2, %4, %cst {dimension_numbers = #tpu.dot_dimension_numbers<[1], [0], [0], [1], [0, 0, 1, 1], [], []>} : vector<16x64xbf16>, vector<64x384xbf16>, vector<16x384xf32> -> vector<16x384xf32>
    %c0_4 = arith.constant 0 : index
    %c0_5 = arith.constant 0 : index
    %6 = vector.load %arg4[%c0_4, %c0_5] : memref<1x384xf32, #tpu.memory_space<vmem>>, vector<1x384xf32>
    %7 = vector.broadcast %6 : vector<1x384xf32> to vector<16x384xf32>
    %8 = arith.addf %5, %7 : vector<16x384xf32>
    %cst_6 = arith.constant 5.000000e-01 : f32
    %9 = vector.broadcast %cst_6 : f32 to vector<16x384xf32>
    %10 = arith.mulf %9, %8 : vector<16x384xf32>
    %11 = math.tanh %10 : vector<16x384xf32>
    %cst_7 = arith.constant 1.000000e+00 : f32
    %12 = vector.broadcast %cst_7 : f32 to vector<16x384xf32>
    %13 = arith.addf %12, %11 : vector<16x384xf32>
    %cst_8 = arith.constant 5.000000e-01 : f32
    %14 = vector.broadcast %cst_8 : f32 to vector<16x384xf32>
    %15 = arith.mulf %14, %13 : vector<16x384xf32>
    %16 = arith.mulf %8, %15 : vector<16x384xf32>
    %c0_9 = arith.constant 0 : index
    %c0_10 = arith.constant 0 : index
    %c0_11 = arith.constant 0 : index
    %17 = vector.load %arg5[%c0_9, %c0_10, %c0_11] : memref<1x16x384xf32, #tpu.memory_space<vmem>>, vector<1x16x384xf32>
    %18 = vector.shape_cast %17 : vector<1x16x384xf32> to vector<16x384xf32>
    %19 = vector.shape_cast %16 : vector<16x384xf32> to vector<1x16x384xf32>
    tpu.vector_store %arg5[%c0_9, %c0_10, %c0_11], %19 {strides = array<i32>} : memref<1x16x384xf32, #tpu.memory_space<vmem>>, vector<1x16x384xf32>,
    return
  }
  func.func @transform_0(%arg0: i32, %arg1: i32) -> (i32, i32, i32) {
    %c0_i32 = arith.constant 0 : i32
    %c0_i32_0 = arith.constant 0 : i32
    return %arg0, %arg1, %c0_i32 : i32, i32, i32
  }
  func.func @transform_1(%arg0: i32, %arg1: i32) -> (i32, i32) {
    %c0_i32 = arith.constant 0 : i32
    %c0_i32_0 = arith.constant 0 : i32
    %c0_i32_1 = arith.constant 0 : i32
    return %c0_i32, %c0_i32_0 : i32, i32
  }
  func.func @transform_2(%arg0: i32, %arg1: i32) -> (i32, i32) {
    %c0_i32 = arith.constant 0 : i32
    %c0_i32_0 = arith.constant 0 : i32
    %c0_i32_1 = arith.constant 0 : i32
    return %c0_i32, %c0_i32_0 : i32, i32
  }
  func.func @transform_3(%arg0: i32, %arg1: i32) -> (i32, i32, i32) {
    %c0_i32 = arith.constant 0 : i32
    %c0_i32_0 = arith.constant 0 : i32
    return %arg0, %arg1, %c0_i32 : i32, i32, i32
  }
}

module attributes {stable_mosaic.version = 11 : i64} {
  func.func @_dw_kernel(%arg0: i32, %arg1: i32, %arg2: memref<9x1x16x384xf32, #tpu.memory_space<vmem>>, %arg3: memref<9x384xf32, #tpu.memory_space<vmem>>, %arg4: memref<1x384xf32, #tpu.memory_space<vmem>>, %arg5: memref<1x16x384xf32, #tpu.memory_space<vmem>>) attributes {dimension_semantics = [#tpu.dimension_semantics<parallel>, #tpu.dimension_semantics<parallel>], iteration_bounds = array<i64: 2, 1>, scalar_prefetch = 0 : i64, scratch_operands = 0 : i64, tpu.core_type = #tpu.core_type<tc>, window_params = [{transform_indices = @transform_0, window_bounds = array<i64: 9, 1, 16, 384>}, {pipeline_mode = #tpu.pipeline_mode<synchronous>, transform_indices = @transform_1, window_bounds = array<i64: 9, 384>}, {pipeline_mode = #tpu.pipeline_mode<synchronous>, transform_indices = @transform_2, window_bounds = array<i64: 1, 384>}, {transform_indices = @transform_3, window_bounds = array<i64: 1, 16, 384>}]} {
    %c0 = arith.constant 0 : index
    %c0_0 = arith.constant 0 : index
    %0 = vector.load %arg3[%c0, %c0_0] : memref<9x384xf32, #tpu.memory_space<vmem>>, vector<9x384xf32>
    %c0_1 = arith.constant 0 : index
    %c0_2 = arith.constant 0 : index
    %c0_3 = arith.constant 0 : index
    %c0_4 = arith.constant 0 : index
    %1 = vector.load %arg2[%c0_1, %c0_2, %c0_3, %c0_4] : memref<9x1x16x384xf32, #tpu.memory_space<vmem>>, vector<1x1x16x384xf32>
    %2 = vector.shape_cast %1 : vector<1x1x16x384xf32> to vector<16x384xf32>
    %3 = vector.extract_strided_slice %0 {offsets = [0, 0], sizes = [1, 384], strides = [1, 1]} : vector<9x384xf32> to vector<1x384xf32>
    %4 = vector.broadcast %3 : vector<1x384xf32> to vector<16x384xf32>
    %5 = arith.mulf %2, %4 : vector<16x384xf32>
    %c1 = arith.constant 1 : index
    %c0_5 = arith.constant 0 : index
    %c0_6 = arith.constant 0 : index
    %c0_7 = arith.constant 0 : index
    %6 = vector.load %arg2[%c1, %c0_5, %c0_6, %c0_7] : memref<9x1x16x384xf32, #tpu.memory_space<vmem>>, vector<1x1x16x384xf32>
    %7 = vector.shape_cast %6 : vector<1x1x16x384xf32> to vector<16x384xf32>
    %8 = vector.extract_strided_slice %0 {offsets = [1, 0], sizes = [1, 384], strides = [1, 1]} : vector<9x384xf32> to vector<1x384xf32>
    %9 = vector.broadcast %8 : vector<1x384xf32> to vector<16x384xf32>
    %10 = arith.mulf %7, %9 : vector<16x384xf32>
    %11 = arith.addf %5, %10 : vector<16x384xf32>
    %c2 = arith.constant 2 : index
    %c0_8 = arith.constant 0 : index
    %c0_9 = arith.constant 0 : index
    %c0_10 = arith.constant 0 : index
    %12 = vector.load %arg2[%c2, %c0_8, %c0_9, %c0_10] : memref<9x1x16x384xf32, #tpu.memory_space<vmem>>, vector<1x1x16x384xf32>
    %13 = vector.shape_cast %12 : vector<1x1x16x384xf32> to vector<16x384xf32>
    %14 = vector.extract_strided_slice %0 {offsets = [2, 0], sizes = [1, 384], strides = [1, 1]} : vector<9x384xf32> to vector<1x384xf32>
    %15 = vector.broadcast %14 : vector<1x384xf32> to vector<16x384xf32>
    %16 = arith.mulf %13, %15 : vector<16x384xf32>
    %17 = arith.addf %11, %16 : vector<16x384xf32>
    %c3 = arith.constant 3 : index
    %c0_11 = arith.constant 0 : index
    %c0_12 = arith.constant 0 : index
    %c0_13 = arith.constant 0 : index
    %18 = vector.load %arg2[%c3, %c0_11, %c0_12, %c0_13] : memref<9x1x16x384xf32, #tpu.memory_space<vmem>>, vector<1x1x16x384xf32>
    %19 = vector.shape_cast %18 : vector<1x1x16x384xf32> to vector<16x384xf32>
    %20 = vector.extract_strided_slice %0 {offsets = [3, 0], sizes = [1, 384], strides = [1, 1]} : vector<9x384xf32> to vector<1x384xf32>
    %21 = vector.broadcast %20 : vector<1x384xf32> to vector<16x384xf32>
    %22 = arith.mulf %19, %21 : vector<16x384xf32>
    %23 = arith.addf %17, %22 : vector<16x384xf32>
    %c4 = arith.constant 4 : index
    %c0_14 = arith.constant 0 : index
    %c0_15 = arith.constant 0 : index
    %c0_16 = arith.constant 0 : index
    %24 = vector.load %arg2[%c4, %c0_14, %c0_15, %c0_16] : memref<9x1x16x384xf32, #tpu.memory_space<vmem>>, vector<1x1x16x384xf32>
    %25 = vector.shape_cast %24 : vector<1x1x16x384xf32> to vector<16x384xf32>
    %26 = vector.extract_strided_slice %0 {offsets = [4, 0], sizes = [1, 384], strides = [1, 1]} : vector<9x384xf32> to vector<1x384xf32>
    %27 = vector.broadcast %26 : vector<1x384xf32> to vector<16x384xf32>
    %28 = arith.mulf %25, %27 : vector<16x384xf32>
    %29 = arith.addf %23, %28 : vector<16x384xf32>
    %c5 = arith.constant 5 : index
    %c0_17 = arith.constant 0 : index
    %c0_18 = arith.constant 0 : index
    %c0_19 = arith.constant 0 : index
    %30 = vector.load %arg2[%c5, %c0_17, %c0_18, %c0_19] : memref<9x1x16x384xf32, #tpu.memory_space<vmem>>, vector<1x1x16x384xf32>
    %31 = vector.shape_cast %30 : vector<1x1x16x384xf32> to vector<16x384xf32>
    %32 = vector.extract_strided_slice %0 {offsets = [5, 0], sizes = [1, 384], strides = [1, 1]} : vector<9x384xf32> to vector<1x384xf32>
    %33 = vector.broadcast %32 : vector<1x384xf32> to vector<16x384xf32>
    %34 = arith.mulf %31, %33 : vector<16x384xf32>
    %35 = arith.addf %29, %34 : vector<16x384xf32>
    %c6 = arith.constant 6 : index
    %c0_20 = arith.constant 0 : index
    %c0_21 = arith.constant 0 : index
    %c0_22 = arith.constant 0 : index
    %36 = vector.load %arg2[%c6, %c0_20, %c0_21, %c0_22] : memref<9x1x16x384xf32, #tpu.memory_space<vmem>>, vector<1x1x16x384xf32>
    %37 = vector.shape_cast %36 : vector<1x1x16x384xf32> to vector<16x384xf32>
    %38 = vector.extract_strided_slice %0 {offsets = [6, 0], sizes = [1, 384], strides = [1, 1]} : vector<9x384xf32> to vector<1x384xf32>
    %39 = vector.broadcast %38 : vector<1x384xf32> to vector<16x384xf32>
    %40 = arith.mulf %37, %39 : vector<16x384xf32>
    %41 = arith.addf %35, %40 : vector<16x384xf32>
    %c7 = arith.constant 7 : index
    %c0_23 = arith.constant 0 : index
    %c0_24 = arith.constant 0 : index
    %c0_25 = arith.constant 0 : index
    %42 = vector.load %arg2[%c7, %c0_23, %c0_24, %c0_25] : memref<9x1x16x384xf32, #tpu.memory_space<vmem>>, vector<1x1x16x384xf32>
    %43 = vector.shape_cast %42 : vector<1x1x16x384xf32> to vector<16x384xf32>
    %44 = vector.extract_strided_slice %0 {offsets = [7, 0], sizes = [1, 384], strides = [1, 1]} : vector<9x384xf32> to vector<1x384xf32>
    %45 = vector.broadcast %44 : vector<1x384xf32> to vector<16x384xf32>
    %46 = arith.mulf %43, %45 : vector<16x384xf32>
    %47 = arith.addf %41, %46 : vector<16x384xf32>
    %c8 = arith.constant 8 : index
    %c0_26 = arith.constant 0 : index
    %c0_27 = arith.constant 0 : index
    %c0_28 = arith.constant 0 : index
    %48 = vector.load %arg2[%c8, %c0_26, %c0_27, %c0_28] : memref<9x1x16x384xf32, #tpu.memory_space<vmem>>, vector<1x1x16x384xf32>
    %49 = vector.shape_cast %48 : vector<1x1x16x384xf32> to vector<16x384xf32>
    %50 = vector.extract_strided_slice %0 {offsets = [8, 0], sizes = [1, 384], strides = [1, 1]} : vector<9x384xf32> to vector<1x384xf32>
    %51 = vector.broadcast %50 : vector<1x384xf32> to vector<16x384xf32>
    %52 = arith.mulf %49, %51 : vector<16x384xf32>
    %53 = arith.addf %47, %52 : vector<16x384xf32>
    %c0_29 = arith.constant 0 : index
    %c0_30 = arith.constant 0 : index
    %54 = vector.load %arg4[%c0_29, %c0_30] : memref<1x384xf32, #tpu.memory_space<vmem>>, vector<1x384xf32>
    %55 = vector.broadcast %54 : vector<1x384xf32> to vector<16x384xf32>
    %56 = arith.addf %53, %55 : vector<16x384xf32>
    %cst = arith.constant 5.000000e-01 : f32
    %57 = vector.broadcast %cst : f32 to vector<16x384xf32>
    %58 = arith.mulf %57, %56 : vector<16x384xf32>
    %59 = math.tanh %58 : vector<16x384xf32>
    %cst_31 = arith.constant 1.000000e+00 : f32
    %60 = vector.broadcast %cst_31 : f32 to vector<16x384xf32>
    %61 = arith.addf %60, %59 : vector<16x384xf32>
    %cst_32 = arith.constant 5.000000e-01 : f32
    %62 = vector.broadcast %cst_32 : f32 to vector<16x384xf32>
    %63 = arith.mulf %62, %61 : vector<16x384xf32>
    %64 = arith.mulf %56, %63 : vector<16x384xf32>
    %c0_33 = arith.constant 0 : index
    %c0_34 = arith.constant 0 : index
    %c0_35 = arith.constant 0 : index
    %65 = vector.load %arg5[%c0_33, %c0_34, %c0_35] : memref<1x16x384xf32, #tpu.memory_space<vmem>>, vector<1x16x384xf32>
    %66 = vector.shape_cast %65 : vector<1x16x384xf32> to vector<16x384xf32>
    %67 = vector.shape_cast %64 : vector<16x384xf32> to vector<1x16x384xf32>
    tpu.vector_store %arg5[%c0_33, %c0_34, %c0_35], %67 {strides = array<i32>} : memref<1x16x384xf32, #tpu.memory_space<vmem>>, vector<1x16x384xf32>,
    return
  }
  func.func @transform_0(%arg0: i32, %arg1: i32) -> (i32, i32, i32, i32) {
    %c0_i32 = arith.constant 0 : i32
    %c0_i32_0 = arith.constant 0 : i32
    %c0_i32_1 = arith.constant 0 : i32
    return %c0_i32, %arg0, %arg1, %c0_i32_0 : i32, i32, i32, i32
  }
  func.func @transform_1(%arg0: i32, %arg1: i32) -> (i32, i32) {
    %c0_i32 = arith.constant 0 : i32
    %c0_i32_0 = arith.constant 0 : i32
    %c0_i32_1 = arith.constant 0 : i32
    return %c0_i32, %c0_i32_0 : i32, i32
  }
  func.func @transform_2(%arg0: i32, %arg1: i32) -> (i32, i32) {
    %c0_i32 = arith.constant 0 : i32
    %c0_i32_0 = arith.constant 0 : i32
    %c0_i32_1 = arith.constant 0 : i32
    return %c0_i32, %c0_i32_0 : i32, i32
  }
  func.func @transform_3(%arg0: i32, %arg1: i32) -> (i32, i32, i32) {
    %c0_i32 = arith.constant 0 : i32
    %c0_i32_0 = arith.constant 0 : i32
    return %arg0, %arg1, %c0_i32 : i32, i32, i32
  }
}

module attributes {stable_mosaic.version = 11 : i64} {
  func.func @_se_kernel(%arg0: i32, %arg1: memref<2x384xf32, #tpu.memory_space<vmem>>, %arg2: memref<384x16xf32, #tpu.memory_space<vmem>>, %arg3: memref<1x16xf32, #tpu.memory_space<vmem>>, %arg4: memref<16x384xf32, #tpu.memory_space<vmem>>, %arg5: memref<1x384xf32, #tpu.memory_space<vmem>>, %arg6: memref<2x384xf32, #tpu.memory_space<vmem>>) attributes {dimension_semantics = [#tpu.dimension_semantics<arbitrary>], iteration_bounds = array<i64: 1>, scalar_prefetch = 0 : i64, scratch_operands = 0 : i64, tpu.core_type = #tpu.core_type<tc>, window_params = [{pipeline_mode = #tpu.pipeline_mode<synchronous>, transform_indices = @transform_0, window_bounds = array<i64: 2, 384>}, {pipeline_mode = #tpu.pipeline_mode<synchronous>, transform_indices = @transform_1, window_bounds = array<i64: 384, 16>}, {pipeline_mode = #tpu.pipeline_mode<synchronous>, transform_indices = @transform_2, window_bounds = array<i64: 1, 16>}, {pipeline_mode = #tpu.pipeline_mode<synchronous>, transform_indices = @transform_3, window_bounds = array<i64: 16, 384>}, {pipeline_mode = #tpu.pipeline_mode<synchronous>, transform_indices = @transform_4, window_bounds = array<i64: 1, 384>}, {pipeline_mode = #tpu.pipeline_mode<synchronous>, transform_indices = @transform_5, window_bounds = array<i64: 2, 384>}]} {
    %c0 = arith.constant 0 : index
    %c0_0 = arith.constant 0 : index
    %0 = vector.load %arg1[%c0, %c0_0] : memref<2x384xf32, #tpu.memory_space<vmem>>, vector<2x384xf32>
    %c0_1 = arith.constant 0 : index
    %c0_2 = arith.constant 0 : index
    %1 = vector.load %arg2[%c0_1, %c0_2] : memref<384x16xf32, #tpu.memory_space<vmem>>, vector<384x16xf32>
    %cst = arith.constant dense<0.000000e+00> : vector<2x16xf32>
    %2 = tpu.matmul %0, %1, %cst {dimension_numbers = #tpu.dot_dimension_numbers<[1], [0], [0], [1], [0, 0, 1, 1], [], []>} : vector<2x384xf32>, vector<384x16xf32>, vector<2x16xf32> -> vector<2x16xf32>
    %c0_3 = arith.constant 0 : index
    %c0_4 = arith.constant 0 : index
    %3 = vector.load %arg3[%c0_3, %c0_4] : memref<1x16xf32, #tpu.memory_space<vmem>>, vector<1x16xf32>
    %4 = vector.broadcast %3 : vector<1x16xf32> to vector<2x16xf32>
    %5 = arith.addf %2, %4 : vector<2x16xf32>
    %cst_5 = arith.constant 5.000000e-01 : f32
    %6 = vector.broadcast %cst_5 : f32 to vector<2x16xf32>
    %7 = arith.mulf %6, %5 : vector<2x16xf32>
    %8 = math.tanh %7 : vector<2x16xf32>
    %cst_6 = arith.constant 1.000000e+00 : f32
    %9 = vector.broadcast %cst_6 : f32 to vector<2x16xf32>
    %10 = arith.addf %9, %8 : vector<2x16xf32>
    %cst_7 = arith.constant 5.000000e-01 : f32
    %11 = vector.broadcast %cst_7 : f32 to vector<2x16xf32>
    %12 = arith.mulf %11, %10 : vector<2x16xf32>
    %13 = arith.mulf %5, %12 : vector<2x16xf32>
    %c0_8 = arith.constant 0 : index
    %c0_9 = arith.constant 0 : index
    %14 = vector.load %arg4[%c0_8, %c0_9] : memref<16x384xf32, #tpu.memory_space<vmem>>, vector<16x384xf32>
    %cst_10 = arith.constant dense<0.000000e+00> : vector<2x384xf32>
    %15 = tpu.matmul %13, %14, %cst_10 {dimension_numbers = #tpu.dot_dimension_numbers<[1], [0], [0], [1], [0, 0, 1, 1], [], []>} : vector<2x16xf32>, vector<16x384xf32>, vector<2x384xf32> -> vector<2x384xf32>
    %c0_11 = arith.constant 0 : index
    %c0_12 = arith.constant 0 : index
    %16 = vector.load %arg5[%c0_11, %c0_12] : memref<1x384xf32, #tpu.memory_space<vmem>>, vector<1x384xf32>
    %17 = vector.broadcast %16 : vector<1x384xf32> to vector<2x384xf32>
    %18 = arith.addf %15, %17 : vector<2x384xf32>
    %cst_13 = arith.constant 5.000000e-01 : f32
    %19 = vector.broadcast %cst_13 : f32 to vector<2x384xf32>
    %20 = arith.mulf %19, %18 : vector<2x384xf32>
    %21 = math.tanh %20 : vector<2x384xf32>
    %cst_14 = arith.constant 1.000000e+00 : f32
    %22 = vector.broadcast %cst_14 : f32 to vector<2x384xf32>
    %23 = arith.addf %22, %21 : vector<2x384xf32>
    %cst_15 = arith.constant 5.000000e-01 : f32
    %24 = vector.broadcast %cst_15 : f32 to vector<2x384xf32>
    %25 = arith.mulf %24, %23 : vector<2x384xf32>
    %c0_16 = arith.constant 0 : index
    %c0_17 = arith.constant 0 : index
    %26 = vector.load %arg6[%c0_16, %c0_17] : memref<2x384xf32, #tpu.memory_space<vmem>>, vector<2x384xf32>
    tpu.vector_store %arg6[%c0_16, %c0_17], %25 {strides = array<i32>} : memref<2x384xf32, #tpu.memory_space<vmem>>, vector<2x384xf32>,
    return
  }
  func.func @transform_0(%arg0: i32) -> (i32, i32) {
    %c0_i32 = arith.constant 0 : i32
    %c0_i32_0 = arith.constant 0 : i32
    %c0_i32_1 = arith.constant 0 : i32
    return %c0_i32, %c0_i32_0 : i32, i32
  }
  func.func @transform_1(%arg0: i32) -> (i32, i32) {
    %c0_i32 = arith.constant 0 : i32
    %c0_i32_0 = arith.constant 0 : i32
    %c0_i32_1 = arith.constant 0 : i32
    return %c0_i32, %c0_i32_0 : i32, i32
  }
  func.func @transform_2(%arg0: i32) -> (i32, i32) {
    %c0_i32 = arith.constant 0 : i32
    %c0_i32_0 = arith.constant 0 : i32
    %c0_i32_1 = arith.constant 0 : i32
    return %c0_i32, %c0_i32_0 : i32, i32
  }
  func.func @transform_3(%arg0: i32) -> (i32, i32) {
    %c0_i32 = arith.constant 0 : i32
    %c0_i32_0 = arith.constant 0 : i32
    %c0_i32_1 = arith.constant 0 : i32
    return %c0_i32, %c0_i32_0 : i32, i32
  }
  func.func @transform_4(%arg0: i32) -> (i32, i32) {
    %c0_i32 = arith.constant 0 : i32
    %c0_i32_0 = arith.constant 0 : i32
    %c0_i32_1 = arith.constant 0 : i32
    return %c0_i32, %c0_i32_0 : i32, i32
  }
  func.func @transform_5(%arg0: i32) -> (i32, i32) {
    %c0_i32 = arith.constant 0 : i32
    %c0_i32_0 = arith.constant 0 : i32
    %c0_i32_1 = arith.constant 0 : i32
    return %c0_i32, %c0_i32_0 : i32, i32
  }
}

module attributes {stable_mosaic.version = 11 : i64} {
  func.func @_pw_kernel(%arg0: i32, %arg1: i32, %arg2: memref<1x16x384xf32, #tpu.memory_space<vmem>>, %arg3: memref<384x64xf32, #tpu.memory_space<vmem>>, %arg4: memref<1x64xf32, #tpu.memory_space<vmem>>, %arg5: memref<1x1x384xf32, #tpu.memory_space<vmem>>, %arg6: memref<1x16x64xf32, #tpu.memory_space<vmem>>, %arg7: memref<1x16x64xf32, #tpu.memory_space<vmem>>) attributes {dimension_semantics = [#tpu.dimension_semantics<parallel>, #tpu.dimension_semantics<parallel>], iteration_bounds = array<i64: 2, 1>, scalar_prefetch = 0 : i64, scratch_operands = 0 : i64, tpu.core_type = #tpu.core_type<tc>, window_params = [{transform_indices = @transform_0, window_bounds = array<i64: 1, 16, 384>}, {pipeline_mode = #tpu.pipeline_mode<synchronous>, transform_indices = @transform_1, window_bounds = array<i64: 384, 64>}, {pipeline_mode = #tpu.pipeline_mode<synchronous>, transform_indices = @transform_2, window_bounds = array<i64: 1, 64>}, {transform_indices = @transform_3, window_bounds = array<i64: 1, 1, 384>}, {transform_indices = @transform_4, window_bounds = array<i64: 1, 16, 64>}, {transform_indices = @transform_5, window_bounds = array<i64: 1, 16, 64>}]} {
    %c0 = arith.constant 0 : index
    %c0_0 = arith.constant 0 : index
    %c0_1 = arith.constant 0 : index
    %0 = vector.load %arg2[%c0, %c0_0, %c0_1] : memref<1x16x384xf32, #tpu.memory_space<vmem>>, vector<1x16x384xf32>
    %1 = vector.shape_cast %0 : vector<1x16x384xf32> to vector<16x384xf32>
    %c0_2 = arith.constant 0 : index
    %c0_3 = arith.constant 0 : index
    %c0_4 = arith.constant 0 : index
    %2 = vector.load %arg5[%c0_2, %c0_3, %c0_4] : memref<1x1x384xf32, #tpu.memory_space<vmem>>, vector<1x1x384xf32>
    %3 = vector.shape_cast %2 : vector<1x1x384xf32> to vector<1x384xf32>
    %4 = vector.broadcast %3 : vector<1x384xf32> to vector<16x384xf32>
    %5 = arith.mulf %1, %4 : vector<16x384xf32>
    %6 = arith.truncf %5 : vector<16x384xf32> to vector<16x384xbf16>
    %c0_5 = arith.constant 0 : index
    %c0_6 = arith.constant 0 : index
    %7 = vector.load %arg3[%c0_5, %c0_6] : memref<384x64xf32, #tpu.memory_space<vmem>>, vector<384x64xf32>
    %8 = arith.truncf %7 : vector<384x64xf32> to vector<384x64xbf16>
    %cst = arith.constant dense<0.000000e+00> : vector<16x64xf32>
    %9 = tpu.matmul %6, %8, %cst {dimension_numbers = #tpu.dot_dimension_numbers<[1], [0], [0], [1], [0, 0, 1, 1], [], []>} : vector<16x384xbf16>, vector<384x64xbf16>, vector<16x64xf32> -> vector<16x64xf32>
    %c0_7 = arith.constant 0 : index
    %c0_8 = arith.constant 0 : index
    %10 = vector.load %arg4[%c0_7, %c0_8] : memref<1x64xf32, #tpu.memory_space<vmem>>, vector<1x64xf32>
    %11 = vector.broadcast %10 : vector<1x64xf32> to vector<16x64xf32>
    %12 = arith.addf %9, %11 : vector<16x64xf32>
    %c0_9 = arith.constant 0 : index
    %c0_10 = arith.constant 0 : index
    %c0_11 = arith.constant 0 : index
    %13 = vector.load %arg6[%c0_9, %c0_10, %c0_11] : memref<1x16x64xf32, #tpu.memory_space<vmem>>, vector<1x16x64xf32>
    %14 = vector.shape_cast %13 : vector<1x16x64xf32> to vector<16x64xf32>
    %15 = arith.addf %12, %14 : vector<16x64xf32>
    %c0_12 = arith.constant 0 : index
    %c0_13 = arith.constant 0 : index
    %c0_14 = arith.constant 0 : index
    %16 = vector.load %arg7[%c0_12, %c0_13, %c0_14] : memref<1x16x64xf32, #tpu.memory_space<vmem>>, vector<1x16x64xf32>
    %17 = vector.shape_cast %16 : vector<1x16x64xf32> to vector<16x64xf32>
    %18 = vector.shape_cast %15 : vector<16x64xf32> to vector<1x16x64xf32>
    tpu.vector_store %arg7[%c0_12, %c0_13, %c0_14], %18 {strides = array<i32>} : memref<1x16x64xf32, #tpu.memory_space<vmem>>, vector<1x16x64xf32>,
    return
  }
  func.func @transform_0(%arg0: i32, %arg1: i32) -> (i32, i32, i32) {
    %c0_i32 = arith.constant 0 : i32
    %c0_i32_0 = arith.constant 0 : i32
    return %arg0, %arg1, %c0_i32 : i32, i32, i32
  }
  func.func @transform_1(%arg0: i32, %arg1: i32) -> (i32, i32) {
    %c0_i32 = arith.constant 0 : i32
    %c0_i32_0 = arith.constant 0 : i32
    %c0_i32_1 = arith.constant 0 : i32
    return %c0_i32, %c0_i32_0 : i32, i32
  }
  func.func @transform_2(%arg0: i32, %arg1: i32) -> (i32, i32) {
    %c0_i32 = arith.constant 0 : i32
    %c0_i32_0 = arith.constant 0 : i32
    %c0_i32_1 = arith.constant 0 : i32
    return %c0_i32, %c0_i32_0 : i32, i32
  }
  func.func @transform_3(%arg0: i32, %arg1: i32) -> (i32, i32, i32) {
    %c0_i32 = arith.constant 0 : i32
    %c0_i32_0 = arith.constant 0 : i32
    %c0_i32_1 = arith.constant 0 : i32
    return %arg0, %c0_i32, %c0_i32_0 : i32, i32, i32
  }
  func.func @transform_4(%arg0: i32, %arg1: i32) -> (i32, i32, i32) {
    %c0_i32 = arith.constant 0 : i32
    %c0_i32_0 = arith.constant 0 : i32
    return %arg0, %arg1, %c0_i32 : i32, i32, i32
  }
  func.func @transform_5(%arg0: i32, %arg1: i32) -> (i32, i32, i32) {
    %c0_i32 = arith.constant 0 : i32
    %c0_i32_0 = arith.constant 0 : i32
    return %arg0, %arg1, %c0_i32 : i32, i32, i32
  }
}

module attributes {stable_mosaic.version = 11 : i64} {
  func.func @_pw_kernel(%arg0: i32, %arg1: i32, %arg2: memref<1x16x64xf32, #tpu.memory_space<vmem>>, %arg3: memref<64x256xf32, #tpu.memory_space<vmem>>, %arg4: memref<1x256xf32, #tpu.memory_space<vmem>>, %arg5: memref<1x16x256xf32, #tpu.memory_space<vmem>>) attributes {dimension_semantics = [#tpu.dimension_semantics<parallel>, #tpu.dimension_semantics<parallel>], iteration_bounds = array<i64: 2, 1>, scalar_prefetch = 0 : i64, scratch_operands = 0 : i64, tpu.core_type = #tpu.core_type<tc>, window_params = [{transform_indices = @transform_0, window_bounds = array<i64: 1, 16, 64>}, {pipeline_mode = #tpu.pipeline_mode<synchronous>, transform_indices = @transform_1, window_bounds = array<i64: 64, 256>}, {pipeline_mode = #tpu.pipeline_mode<synchronous>, transform_indices = @transform_2, window_bounds = array<i64: 1, 256>}, {transform_indices = @transform_3, window_bounds = array<i64: 1, 16, 256>}]} {
    %c0 = arith.constant 0 : index
    %c0_0 = arith.constant 0 : index
    %c0_1 = arith.constant 0 : index
    %0 = vector.load %arg2[%c0, %c0_0, %c0_1] : memref<1x16x64xf32, #tpu.memory_space<vmem>>, vector<1x16x64xf32>
    %1 = vector.shape_cast %0 : vector<1x16x64xf32> to vector<16x64xf32>
    %2 = arith.truncf %1 : vector<16x64xf32> to vector<16x64xbf16>
    %c0_2 = arith.constant 0 : index
    %c0_3 = arith.constant 0 : index
    %3 = vector.load %arg3[%c0_2, %c0_3] : memref<64x256xf32, #tpu.memory_space<vmem>>, vector<64x256xf32>
    %4 = arith.truncf %3 : vector<64x256xf32> to vector<64x256xbf16>
    %cst = arith.constant dense<0.000000e+00> : vector<16x256xf32>
    %5 = tpu.matmul %2, %4, %cst {dimension_numbers = #tpu.dot_dimension_numbers<[1], [0], [0], [1], [0, 0, 1, 1], [], []>} : vector<16x64xbf16>, vector<64x256xbf16>, vector<16x256xf32> -> vector<16x256xf32>
    %c0_4 = arith.constant 0 : index
    %c0_5 = arith.constant 0 : index
    %6 = vector.load %arg4[%c0_4, %c0_5] : memref<1x256xf32, #tpu.memory_space<vmem>>, vector<1x256xf32>
    %7 = vector.broadcast %6 : vector<1x256xf32> to vector<16x256xf32>
    %8 = arith.addf %5, %7 : vector<16x256xf32>
    %cst_6 = arith.constant 5.000000e-01 : f32
    %9 = vector.broadcast %cst_6 : f32 to vector<16x256xf32>
    %10 = arith.mulf %9, %8 : vector<16x256xf32>
    %11 = math.tanh %10 : vector<16x256xf32>
    %cst_7 = arith.constant 1.000000e+00 : f32
    %12 = vector.broadcast %cst_7 : f32 to vector<16x256xf32>
    %13 = arith.addf %12, %11 : vector<16x256xf32>
    %cst_8 = arith.constant 5.000000e-01 : f32
    %14 = vector.broadcast %cst_8 : f32 to vector<16x256xf32>
    %15 = arith.mulf %14, %13 : vector<16x256xf32>
    %16 = arith.mulf %8, %15 : vector<16x256xf32>
    %c0_9 = arith.constant 0 : index
    %c0_10 = arith.constant 0 : index
    %c0_11 = arith.constant 0 : index
    %17 = vector.load %arg5[%c0_9, %c0_10, %c0_11] : memref<1x16x256xf32, #tpu.memory_space<vmem>>, vector<1x16x256xf32>
    %18 = vector.shape_cast %17 : vector<1x16x256xf32> to vector<16x256xf32>
    %19 = vector.shape_cast %16 : vector<16x256xf32> to vector<1x16x256xf32>
    tpu.vector_store %arg5[%c0_9, %c0_10, %c0_11], %19 {strides = array<i32>} : memref<1x16x256xf32, #tpu.memory_space<vmem>>, vector<1x16x256xf32>,
    return
  }
  func.func @transform_0(%arg0: i32, %arg1: i32) -> (i32, i32, i32) {
    %c0_i32 = arith.constant 0 : i32
    %c0_i32_0 = arith.constant 0 : i32
    return %arg0, %arg1, %c0_i32 : i32, i32, i32
  }
  func.func @transform_1(%arg0: i32, %arg1: i32) -> (i32, i32) {
    %c0_i32 = arith.constant 0 : i32
    %c0_i32_0 = arith.constant 0 : i32
    %c0_i32_1 = arith.constant 0 : i32
    return %c0_i32, %c0_i32_0 : i32, i32
  }
  func.func @transform_2(%arg0: i32, %arg1: i32) -> (i32, i32) {
    %c0_i32 = arith.constant 0 : i32
    %c0_i32_0 = arith.constant 0 : i32
    %c0_i32_1 = arith.constant 0 : i32
    return %c0_i32, %c0_i32_0 : i32, i32
  }
  func.func @transform_3(%arg0: i32, %arg1: i32) -> (i32, i32, i32) {
    %c0_i32 = arith.constant 0 : i32
    %c0_i32_0 = arith.constant 0 : i32
    return %arg0, %arg1, %c0_i32 : i32, i32, i32
  }
}

module attributes {stable_mosaic.version = 11 : i64} {
  func.func @_fc_kernel(%arg0: i32, %arg1: memref<2x256xf32, #tpu.memory_space<vmem>>, %arg2: memref<256x18xf32, #tpu.memory_space<vmem>>, %arg3: memref<1x18xf32, #tpu.memory_space<vmem>>, %arg4: memref<2x18xf32, #tpu.memory_space<vmem>>) attributes {dimension_semantics = [#tpu.dimension_semantics<arbitrary>], iteration_bounds = array<i64: 1>, scalar_prefetch = 0 : i64, scratch_operands = 0 : i64, tpu.core_type = #tpu.core_type<tc>, window_params = [{pipeline_mode = #tpu.pipeline_mode<synchronous>, transform_indices = @transform_0, window_bounds = array<i64: 2, 256>}, {pipeline_mode = #tpu.pipeline_mode<synchronous>, transform_indices = @transform_1, window_bounds = array<i64: 256, 18>}, {pipeline_mode = #tpu.pipeline_mode<synchronous>, transform_indices = @transform_2, window_bounds = array<i64: 1, 18>}, {pipeline_mode = #tpu.pipeline_mode<synchronous>, transform_indices = @transform_3, window_bounds = array<i64: 2, 18>}]} {
    %c0 = arith.constant 0 : index
    %c0_0 = arith.constant 0 : index
    %0 = vector.load %arg1[%c0, %c0_0] : memref<2x256xf32, #tpu.memory_space<vmem>>, vector<2x256xf32>
    %1 = arith.truncf %0 : vector<2x256xf32> to vector<2x256xbf16>
    %c0_1 = arith.constant 0 : index
    %c0_2 = arith.constant 0 : index
    %2 = vector.load %arg2[%c0_1, %c0_2] : memref<256x18xf32, #tpu.memory_space<vmem>>, vector<256x18xf32>
    %3 = arith.truncf %2 : vector<256x18xf32> to vector<256x18xbf16>
    %cst = arith.constant dense<0.000000e+00> : vector<2x18xf32>
    %4 = tpu.matmul %1, %3, %cst {dimension_numbers = #tpu.dot_dimension_numbers<[1], [0], [0], [1], [0, 0, 1, 1], [], []>} : vector<2x256xbf16>, vector<256x18xbf16>, vector<2x18xf32> -> vector<2x18xf32>
    %c0_3 = arith.constant 0 : index
    %c0_4 = arith.constant 0 : index
    %5 = vector.load %arg3[%c0_3, %c0_4] : memref<1x18xf32, #tpu.memory_space<vmem>>, vector<1x18xf32>
    %6 = vector.broadcast %5 : vector<1x18xf32> to vector<2x18xf32>
    %7 = arith.addf %4, %6 : vector<2x18xf32>
    %c0_5 = arith.constant 0 : index
    %c0_6 = arith.constant 0 : index
    %8 = vector.load %arg4[%c0_5, %c0_6] : memref<2x18xf32, #tpu.memory_space<vmem>>, vector<2x18xf32>
    tpu.vector_store %arg4[%c0_5, %c0_6], %7 {strides = array<i32>} : memref<2x18xf32, #tpu.memory_space<vmem>>, vector<2x18xf32>,
    return
  }
  func.func @transform_0(%arg0: i32) -> (i32, i32) {
    %c0_i32 = arith.constant 0 : i32
    %c0_i32_0 = arith.constant 0 : i32
    %c0_i32_1 = arith.constant 0 : i32
    return %c0_i32, %c0_i32_0 : i32, i32
  }
  func.func @transform_1(%arg0: i32) -> (i32, i32) {
    %c0_i32 = arith.constant 0 : i32
    %c0_i32_0 = arith.constant 0 : i32
    %c0_i32_1 = arith.constant 0 : i32
    return %c0_i32, %c0_i32_0 : i32, i32
  }
  func.func @transform_2(%arg0: i32) -> (i32, i32) {
    %c0_i32 = arith.constant 0 : i32
    %c0_i32_0 = arith.constant 0 : i32
    %c0_i32_1 = arith.constant 0 : i32
    return %c0_i32, %c0_i32_0 : i32, i32
  }
  func.func @transform_3(%arg0: i32) -> (i32, i32) {
    %c0_i32 = arith.constant 0 : i32
    %c0_i32_0 = arith.constant 0 : i32
    %c0_i32_1 = arith.constant 0 : i32
    return %c0_i32, %c0_i32_0 : i32, i32
  }
}

</mosaic_0001>

<bundles_post_ra>
// kernel: efficientnet_forward.22
= control target key start
LH: loop header
LB: loop body
LE: loop exit
PB: predicated region body
PF: predicated region fallthrough
CT: control target
= control target key end

     0   :  { %8 = vsyncpa [#allocation3], 0  ;;  %s1157_s0 = inlined_call_operand.vmem [shape: f32[2,256,27], index: 0, kind: input, shape index: {}]   ;;  %s1158_s1 = inlined_call_operand.hbm [shape: f32[27,32], index: 1, kind: input, shape index: {}]   ;;  %s1159_s2 = inlined_call_operand.hbm [shape: f32[1,32], index: 2, kind: input, shape index: {}]   ;;  %s1160_s3 = inlined_call_operand.vmem [shape: f32[2,256,32], index: 3, kind: output, shape index: {}]  }
   0x1   :  { %9 = vsyncpa [#allocation5], 0  ;;  %s899_s12 = smov 0   ;;  %s901_s13 = smov 0  }
   0x2   :  { %s903_s14 = smov 0   ;;  %s905_s15 = smov 0  }
   0x3   :  { %s907_s16 = smov 0  }
   0x4 LB: > { %s614_s17 = sadd.s32 4294967295, %s872_s16   ;;  %s24_s18 = sadd.s32 1, %s864_s14  ;;  %s872_s16 = sphi %s907_s16, %s15_s16   ;;  %s868_s15 = sphi %s905_s15, %s1172_s15   ;;  %s864_s14 = sphi %s903_s14, %s1171_s14   ;;  %s860_s13 = sphi %s901_s13, %s1170_s13   ;;  %s856_s12 = sphi %s899_s12, %s1169_s12  }
   0x5   : > { %p25_p0 = scmp.ge.s32.totalorder %s24_s18, 2  ;;  %s27_s19 = sadd.s32 1, %s868_s15 }
   0x6   : > { %p616_p1 = scmp.ge.s32.totalorder %s872_s16, 1  ;;  %p130_p2 = scmp.lt.s32.totalorder %s872_s16, 5 }
   0x7   : > { %s1174_s18 = smov (%p25_p0, %s24_s18), 0  ;;  %s1176_s19 = smov (!%p25_p0, %s27_s19), %s868_s15 }
   0x8   : > { %p932_p3 = pnand %p616_p1, %p130_p2  ;;  %p29_p4 = scmp.ge.s32.totalorder %s1176_s19, 2 }
   0x9   : > { %p936_p5 = scmp.eq.s32.totalorder %s614_s17, 0  ;;  %s874_s22 = smov [#allocation2]  }
   0xa   : > { %s1164_s20 = scalar_select %p932_p3, 1, 0 }
   0xb   : > { %s1165_s21 = scalar_select %p936_p5, 1, 0 }
   0xc   : > { %p682_p6 = pneg %p932_p3  ;;  %s1178_s19 = smov (%p29_p4, %s1176_s19), 0 }
   0xd   : > { %s142_s23 = sshll.u32 %s874_s22, 4  ;;  %s770_s27 = scalar_lea.hbm %s1158_s1, 512  ;;  %s143_s23 = int_to_ptr.vmem [resolvable:$true] %s142_s23 }
   0xe   : > { %p946_p7 = pnand %p936_p5, %p682_p6  ;;  %p771_p8 = scmp.ne.s32.totalorder %s1158_s1, %s770_s27 }
   0xf   : > { %p777_p12 = scmp.lt.u32.totalorder %s770_s27, %s1158_s1 }
  0x10   : > { %p772_p9 = pneg %p946_p7 }
  0x12   : > { %p773_p10 = pnand %p772_p9, %p771_p8 }
  0x14   : > { %p774_p11 = pneg %p773_p10 }
  0x16   : > { %p779_p13 = pnand %p777_p12, %p774_p11 }
  0x18   : > { %782 = shalt.err (!%p779_p13)
}
  0x19   : > { %s783_s5 = scalar_lea.vmem %s143_s23, 512  ;;  %p791_p4 = scmp.lt.s32.totalorder %s143_s23, %s143_s23 }
  0x1a   : > { %p784_p0 = scmp.ne.s32.totalorder %s143_s23, %s783_s5  ;;  %p792_p6 = scmp.lt.s32.totalorder %s783_s5, %s783_s5 }
  0x1c   : > { %p786_p1 = pnand %p784_p0, %p772_p9  ;;  %p793_p5 = por %p792_p6, %p791_p4 }
  0x1e   : > { %p787_p2 = pneg %p786_p1 }
  0x20   : > { %p794_p3 = pnand %p793_p5, %p787_p2 }
  0x22   : > { %797 = shalt.err (!%p794_p3)
}
  0x23   : > { %s875_s6 = smov 128   ;;  %s876_s7 = smov 8  }
  0x24   : > { %685 = dma.hbm_to_vmem [thread:$0]  (!%p946_p7), %s1158_s1, 512, %s143_s23, [#allocation3], %s875_s6, %s875_s6, %s876_s7  }
  0x25   : > { %s877_s10 = smov [#allocation4]   ;;  %s798_s25 = scalar_lea.hbm %s1159_s2, 16 }
  0x26   : > { %s156_s11 = sshll.u32 %s877_s10, 4  ;;  %p799_p3 = scmp.ne.s32.totalorder %s1159_s2, %s798_s25  ;;  %s157_s11 = int_to_ptr.vmem [resolvable:$true] %s156_s11 }
  0x27   : > { %p805_p10 = scmp.lt.u32.totalorder %s798_s25, %s1159_s2 }
  0x28   : > { %p801_p5 = pnand %p799_p3, %p772_p9 }
  0x2a   : > { %p802_p8 = pneg %p801_p5 }
  0x2c   : > { %p807_p11 = pnand %p805_p10, %p802_p8 }
  0x2e   : > { %810 = shalt.err (!%p807_p11)
}
  0x2f   : > { %s811_s23 = scalar_lea.vmem %s157_s11, 16  ;;  %s818_s30 = scalar_lea.vmem %s157_s11, 32 }
  0x30   : > { %p812_p12 = scmp.ne.s32.totalorder %s157_s11, %s811_s23  ;;  %p819_p1 = scmp.lt.s32.totalorder %s157_s11, %s157_s11 }
  0x31   : > { %p820_p2 = scmp.lt.s32.totalorder %s818_s30, %s811_s23 }
  0x32   : > { %p814_p13 = pnand %p812_p12, %p772_p9 }
  0x33   : > { %p821_p4 = por %p820_p2, %p819_p1 }
  0x34   : > { %p815_p0 = pneg %p814_p13 }
  0x36   : > { %p822_p6 = pnand %p821_p4, %p815_p0 }
  0x38   : > { %825 = shalt.err (!%p822_p6)
}
  0x39   : > { %688 = dma.hbm_to_vmem [thread:$0]  (!%p946_p7), %s1159_s2, 16, %s157_s11, [#allocation5]  }
  0x3a   : > { %p1167_p3 = scmp.ne.s32.totalorder %s1164_s20, 0 }
  0x3b   : > { %p1168_p5 = scmp.ne.s32.totalorder (!%p1167_p3), %s1165_s21, 0 }
  0x3c   : > { %182 = sbr.rel (%p1167_p3) target bundleno = 331 (0x14b), region = 32 }
  0x43   : > { %847 = dma.done.wait (%p1168_p5), [#allocation3], 512  }
  0x44   : > { %849 = vsyncadd (%p1168_p5), [#allocation3], 4294966784 }
  0x45   : > { %851 = dma.done.wait (%p1168_p5), [#allocation5], 16  }
  0x46   : > { %853 = vsyncadd (%p1168_p5), [#allocation5], 4294967280  ;;  %s623_s24 = sshll.u32 %s856_s12, 4  ;;  %p219_p7 = scmp.lt.s32.totalorder %s860_s13, 1  ;;  %vm301_vm0 = vcmask 1044480   ;;  %vm302_vm1 = vcmask 1045504  }
  0x47   : > { %p221_p9 = scmp.lt.s32.totalorder %s623_s24, 31  ;;  %v878_v0 = vmov 65535   ;;  %v263_v2 = vld [vmem:[#allocation2] sm:$0xff]  ;;  %v264_v3 = vld [vmem:[#allocation2 + $0x8] sm:$0xff]  ;;  %v265_v4 = vld [vmem:[#allocation2 + $0x10] sm:$0xff]  ;;  %vm276_vm2 = vcmask 220160  }
  0x48   : > { %s1180_s13 = smov (!%p219_p7, %s860_s13), 1  ;;  %v303_v1 = vsel %vm301_vm0, 4294967295, %v878_v0  ;;  %v267_v5 = vpack.c.bf16 %v264_v3, %v263_v2  ;;  %v266_v6 = vld [vmem:[#allocation2 + $0x18] sm:$0x7]  ;;  %v629_v34 = vld [vmem:[#allocation4] ss:$0 sm:$0xff] }
  0x49   : > { %s1182_s24 = smov (!%p221_p9, %s623_s24), 31  ;;  %s624_s20 = sshll.u32 %s1180_s13, 5  ;;  %v304_v7 = vsel %vm302_vm1, %v303_v1, 0  ;;  %v268_v8 = vpack.c.bf16 %v266_v6, %v265_v4  ;;  %vm485_vm3 = vcmask 261120  }
  0x4a   : > { %s1005_s6 = sadd.s32 %s624_s20, %s1182_s24  ;;  %650 = vmatprep.subr.bf16.mxu0 %v267_v5  ;;  %670 = vmatprep.subr.bf16.mxu1 %v267_v5 }
  0x4b   : > { %s625_s21 = sshll.u32 %s1005_s6, 3  ;;  %651 = vmatpush3.bf16.msra.mxu0 %v267_v5  ;;  %672 = vmatpush3.bf16.msra.mxu1 %v267_v5  ;;  %v306_v16 = vand.u32 %v304_v7, %v268_v8 }
  0x4c   : > { %s1013_s8 = scalar_lea.vmem %s1157_s0, %s625_s21  ;;  %s1092_s10 = scalar_lea.vmem %s1160_s3, %s625_s21 }
  0x4d   : > { %v239_v9 = vld [vmem:[%s1013_s8] sm:$0xff]  ;;  %v240_v10 = vld [vmem:[%s1013_s8 + $0x8] sm:$0xff]  ;;  %v241_v14 = vld [vmem:[%s1013_s8 + $0x10] sm:$0xff]  ;;  %652 = vmatprep.subr.bf16.mxu0 %v306_v16  ;;  %671 = vmatprep.subr.bf16.mxu1 %v306_v16 }
  0x4e   : > { %v247_v11 = vld [vmem:[%s1013_s8 + $0x40] sm:$0xff]  ;;  %v255_v12 = vpack.c.bf16 %v240_v10, %v239_v9  ;;  %v248_v13 = vld [vmem:[%s1013_s8 + $0x48] sm:$0xff]  ;;  %v242_v15 = vld [vmem:[%s1013_s8 + $0x18] sm:$0xff] }
  0x4f   : > { %v259_v17 = vpack.c.bf16 %v248_v13, %v247_v11  ;;  %v249_v18 = vld [vmem:[%s1013_s8 + $0x50] sm:$0xff]  ;;  %v250_v19 = vld [vmem:[%s1013_s8 + $0x58] sm:$0xff]  ;;  %v243_v20 = vld [vmem:[%s1013_s8 + $0x20] sm:$0xff]  ;;  %v256_v24 = vpack.c.bf16 %v242_v15, %v241_v14  ;;  %653 = vmatpush3.bf16.msra.mxu0 %v306_v16  ;;  %673 = vmatpush3.bf16.msra.mxu1 %v306_v16 }
  0x50   : > { %654 = vmatprep.mubr.msk.bf16.mxu0 %vm276_vm2, %v255_v12  ;;  %v244_v21 = vld [vmem:[%s1013_s8 + $0x28] sm:$0xff]  ;;  %v251_v22 = vld [vmem:[%s1013_s8 + $0x60] sm:$0xff]  ;;  %v260_v25 = vpack.c.bf16 %v250_v19, %v249_v18  ;;  %v245_v28 = vld [vmem:[%s1013_s8 + $0x30] sm:$0xff] }
  0x51   : > { %v252_v23 = vld [vmem:[%s1013_s8 + $0x68] sm:$0xff]  ;;  %662 = vmatprep.mubr.msk.bf16.mxu1 %vm276_vm2, %v259_v17  ;;  %v257_v26 = vpack.c.bf16 %v244_v21, %v243_v20  ;;  %v246_v29 = vld [vmem:[%s1013_s8 + $0x38] sm:$0xff]  ;;  %v253_v30 = vld [vmem:[%s1013_s8 + $0x70] sm:$0xff] }
  0x52   : > { %v261_v27 = vpack.c.bf16 %v252_v23, %v251_v22  ;;  %655 = vmatmul.mubr.msk.bf16.vlgmr.msra.gmra.mrb[0].mxu0 %vm276_vm2, %v256_v24  ;;  %663 = vmatmul.mubr.msk.bf16.vlgmr.msra.gmra.mrb[0].mxu1 %vm276_vm2, %v260_v25  ;;  %v254_v31 = vld [vmem:[%s1013_s8 + $0x78] sm:$0xff]  ;;  %v258_v32 = vpack.c.bf16 %v246_v29, %v245_v28 }
  0x53   : > { %658 = vmatprep.mubr.msk.bf16.mxu0 %vm276_vm2, %v257_v26  ;;  %v262_v33 = vpack.c.bf16 %v254_v31, %v253_v30 }
  0x54   : > { %666 = vmatprep.mubr.msk.bf16.mxu1 %vm276_vm2, %v261_v27 }
  0x5a   : > { %659 = vmatmul.mubr.msk.bf16.gmra.mrb[4].mxu0 %vm276_vm2, %v258_v32  ;;  %667 = vmatmul.mubr.msk.bf16.gmra.mrb[4].mxu1 %vm276_vm2, %v262_v33 }
 0x125   : > { %v656_v35 = vpop.f32.mrb[0].mxu0  ;;  %v664_v36 = vpop.f32.mrb[0].mxu1 }
 0x126   : > { %v1039_v37 = vadd.f32 %v656_v35, %v629_v34  ;;  %v1041_v38 = vadd.f32 %v664_v36, %v629_v34  ;;  %v342_v39 = vpop.f32.mrb[1].mxu0  ;;  %v374_v40 = vpop.f32.mrb[1].mxu1 }
 0x127   : > { %v1043_v41 = vadd.f32 %v629_v34, %v342_v39  ;;  %v1045_v42 = vadd.f32 %v629_v34, %v374_v40  ;;  %v657_v43 = vpop.f32.mrb[2].mxu0  ;;  %v665_v44 = vpop.f32.mrb[2].mxu1 }
 0x128   : > { %v407_v45 = vmul.f32 0.5, %v1039_v37  ;;  %v415_v46 = vmul.f32 0.5, %v1041_v38  ;;  %v1049_v47 = vadd.f32 %v657_v43, %v629_v34  ;;  %v1051_v48 = vadd.f32 %v665_v44, %v629_v34  ;;  %v345_v49 = vpop.f32.mrb[3].mxu0  ;;  %v377_v50 = vpop.f32.mrb[3].mxu1 }
 0x129   : > { %v405_v51 = vmul.f32 0.5, %v1043_v41  ;;  %v413_v52 = vmul.f32 0.5, %v1045_v42  ;;  %v1055_v53 = vadd.f32 %v629_v34, %v345_v49  ;;  %v1057_v54 = vadd.f32 %v629_v34, %v377_v50 }
 0x12a   : > { %738 = vtanh.f32 %v407_v45  ;;  %v408_v55 = vmul.f32 0.5, %v1049_v47  ;;  %v416_v56 = vmul.f32 0.5, %v1051_v48 }
 0x12b   : > { %740 = vtanh.f32 %v415_v46  ;;  %v406_v57 = vmul.f32 0.5, %v1055_v53  ;;  %v414_v58 = vmul.f32 0.5, %v1057_v54 }
 0x12c   : > { %742 = vtanh.f32 %v405_v51 }
 0x12d   : > { %744 = vtanh.f32 %v413_v52  ;;  %v660_v59 = vpop.f32.mrb[4].mxu0  ;;  %v668_v60 = vpop.f32.mrb[4].mxu1 }
 0x12e   : > { %746 = vtanh.f32 %v408_v55  ;;  %v1063_v61 = vadd.f32 %v660_v59, %v629_v34  ;;  %v1065_v62 = vadd.f32 %v668_v60, %v629_v34  ;;  %v358_v63 = vpop.f32.mrb[5].mxu0  ;;  %v390_v0 = vpop.f32.mrb[5].mxu1 }
 0x12f   : > { %748 = vtanh.f32 %v416_v56  ;;  %v1067_v1 = vadd.f32 %v629_v34, %v358_v63  ;;  %v1069_v2 = vadd.f32 %v629_v34, %v390_v0  ;;  %v661_v3 = vpop.f32.mrb[6].mxu0  ;;  %v669_v4 = vpop.f32.mrb[6].mxu1 }
 0x130   : > { %750 = vtanh.f32 %v406_v57  ;;  %v411_v5 = vmul.f32 0.5, %v1063_v61  ;;  %v419_v6 = vmul.f32 0.5, %v1065_v62  ;;  %v1073_v7 = vadd.f32 %v661_v3, %v629_v34  ;;  %v361_v8 = vpop.f32.mrb[7].mxu0  ;;  %v393_v9 = vpop.f32.mrb[7].mxu1 }
 0x131   : > { %752 = vtanh.f32 %v414_v58  ;;  %v409_v10 = vmul.f32 0.5, %v1067_v1  ;;  %v417_v11 = vmul.f32 0.5, %v1069_v2  ;;  %v1077_v12 = vadd.f32 %v669_v4, %v629_v34 }
 0x132   : > { %754 = vtanh.f32 %v411_v5  ;;  %v412_v13 = vmul.f32 0.5, %v1073_v7  ;;  %v1080_v14 = vadd.f32 %v629_v34, %v361_v8  ;;  %v1082_v15 = vadd.f32 %v629_v34, %v393_v9 }
 0x133   : > { %756 = vtanh.f32 %v419_v6  ;;  %v420_v16 = vmul.f32 0.5, %v1077_v12 }
 0x134   : > { %v739_v17 = vpop.eup %738  ;;  %758 = vtanh.f32 %v409_v10  ;;  %v410_v18 = vmul.f32 0.5, %v1080_v14  ;;  %v418_v21 = vmul.f32 0.5, %v1082_v15 }
 0x135   : > { %v741_v19 = vpop.eup %740  ;;  %v439_v20 = vadd.f32 1.0, %v739_v17  ;;  %760 = vtanh.f32 %v417_v11 }
 0x136   : > { %v743_v22 = vpop.eup %742  ;;  %v447_v23 = vadd.f32 1.0, %v741_v19  ;;  %762 = vtanh.f32 %v412_v13 }
 0x137   : > { %v745_v24 = vpop.eup %744  ;;  %v455_v25 = vmul.f32 0.5, %v439_v20  ;;  %v437_v26 = vadd.f32 1.0, %v743_v22  ;;  %764 = vtanh.f32 %v420_v16 }
 0x138   : > { %v747_v27 = vpop.eup %746  ;;  %v463_v28 = vmul.f32 0.5, %v447_v23  ;;  %v445_v29 = vadd.f32 1.0, %v745_v24  ;;  %766 = vtanh.f32 %v410_v18 }
 0x139   : > { %v749_v30 = vpop.eup %748  ;;  %v471_v31 = vmul.f32 %v455_v25, %v1039_v37  ;;  %v453_v32 = vmul.f32 0.5, %v437_v26  ;;  %v440_v33 = vadd.f32 1.0, %v747_v27  ;;  %768 = vtanh.f32 %v418_v21 }
 0x13a   : > { %v751_v34 = vpop.eup %750  ;;  %v479_v35 = vmul.f32 %v463_v28, %v1041_v38  ;;  %v461_v36 = vmul.f32 0.5, %v445_v29  ;;  %v448_v39 = vadd.f32 1.0, %v749_v30 }
 0x13b   : > { %v753_v40 = vpop.eup %752  ;;  %488 = vst.msk [vmem:[%s1092_s10 + $0x10] sm:$0xff] %vm485_vm3, %v471_v31  ;;  %v469_v43 = vmul.f32 %v453_v32, %v1043_v41  ;;  %v456_v44 = vmul.f32 0.5, %v440_v33  ;;  %v438_v45 = vadd.f32 1.0, %v751_v34 }
 0x13c   : > { %v755_v46 = vpop.eup %754  ;;  %496 = vst.msk [vmem:[%s1092_s10 + $0x50] sm:$0xff] %vm485_vm3, %v479_v35  ;;  %v477_v37 = vmul.f32 %v461_v36, %v1045_v42  ;;  %v464_v49 = vmul.f32 0.5, %v448_v39  ;;  %v446_v50 = vadd.f32 1.0, %v753_v40 }
 0x13d   : > { %v757_v51 = vpop.eup %756  ;;  %486 = vst.msk [vmem:[%s1092_s10] sm:$0xff] %vm485_vm3, %v469_v43  ;;  %v472_v38 = vmul.f32 %v456_v44, %v1049_v47  ;;  %v454_v52 = vmul.f32 0.5, %v438_v45  ;;  %v443_v55 = vadd.f32 1.0, %v755_v46 }
 0x13e   : > { %v759_v56 = vpop.eup %758  ;;  %494 = vst.msk [vmem:[%s1092_s10 + $0x40] sm:$0xff] %vm485_vm3, %v477_v37  ;;  %v480_v41 = vmul.f32 %v464_v49, %v1051_v48  ;;  %v462_v57 = vmul.f32 0.5, %v446_v50  ;;  %v451_v58 = vadd.f32 1.0, %v757_v51 }
 0x13f   : > { %v761_v59 = vpop.eup %760  ;;  %489 = vst.msk [vmem:[%s1092_s10 + $0x18] sm:$0xff] %vm485_vm3, %v472_v38  ;;  %v470_v42 = vmul.f32 %v454_v52, %v1055_v53  ;;  %v459_v60 = vmul.f32 0.5, %v443_v55  ;;  %v441_v63 = vadd.f32 1.0, %v759_v56 }
 0x140   : > { %v763_v0 = vpop.eup %762  ;;  %497 = vst.msk [vmem:[%s1092_s10 + $0x58] sm:$0xff] %vm485_vm3, %v480_v41  ;;  %v478_v47 = vmul.f32 %v462_v57, %v1057_v54  ;;  %v467_v3 = vmul.f32 0.5, %v451_v58  ;;  %v449_v4 = vadd.f32 1.0, %v761_v59 }
 0x141   : > { %v765_v48 = vpop.eup %764  ;;  %487 = vst.msk [vmem:[%s1092_s10 + $0x8] sm:$0xff] %vm485_vm3, %v470_v42  ;;  %v475_v5 = vmul.f32 %v459_v60, %v1063_v61  ;;  %v457_v6 = vmul.f32 0.5, %v441_v63  ;;  %v444_v8 = vadd.f32 1.0, %v763_v0 }
 0x142   : > { %v767_v53 = vpop.eup %766  ;;  %495 = vst.msk [vmem:[%s1092_s10 + $0x48] sm:$0xff] %vm485_vm3, %v478_v47  ;;  %v483_v9 = vmul.f32 %v467_v3, %v1065_v62  ;;  %v465_v10 = vmul.f32 0.5, %v449_v4  ;;  %v452_v11 = vadd.f32 1.0, %v765_v48 }
 0x143   : > { %v769_v54 = vpop.eup %768  ;;  %492 = vst.msk [vmem:[%s1092_s10 + $0x30] sm:$0xff] %vm485_vm3, %v475_v5  ;;  %v473_v13 = vmul.f32 %v457_v6, %v1067_v1  ;;  %v460_v16 = vmul.f32 0.5, %v444_v8  ;;  %v442_v61 = vadd.f32 1.0, %v767_v53 }
 0x144   : > { %500 = vst.msk [vmem:[%s1092_s10 + $0x70] sm:$0xff] %vm485_vm3, %v483_v9  ;;  %v481_v17 = vmul.f32 %v465_v10, %v1069_v2  ;;  %v468_v18 = vmul.f32 0.5, %v452_v11  ;;  %v450_v19 = vadd.f32 1.0, %v769_v54 }
 0x145   : > { %490 = vst.msk [vmem:[%s1092_s10 + $0x20] sm:$0xff] %vm485_vm3, %v473_v13  ;;  %v476_v62 = vmul.f32 %v460_v16, %v1073_v7  ;;  %v458_v20 = vmul.f32 0.5, %v442_v61 }
 0x146   : > { %498 = vst.msk [vmem:[%s1092_s10 + $0x60] sm:$0xff] %vm485_vm3, %v481_v17  ;;  %v484_v21 = vmul.f32 %v468_v18, %v1077_v12  ;;  %v466_v1 = vmul.f32 0.5, %v450_v19 }
 0x147   : > { %493 = vst.msk [vmem:[%s1092_s10 + $0x38] sm:$0xff] %vm485_vm3, %v476_v62  ;;  %v474_v22 = vmul.f32 %v458_v20, %v1080_v14 }
 0x148   : > { %501 = vst.msk [vmem:[%s1092_s10 + $0x78] sm:$0xff] %vm485_vm3, %v484_v21  ;;  %v482_v2 = vmul.f32 %v466_v1, %v1082_v15 }
 0x149   : > { %491 = vst.msk [vmem:[%s1092_s10 + $0x28] sm:$0xff] %vm485_vm3, %v474_v22 }
 0x14a   : > { %499 = vst.msk [vmem:[%s1092_s10 + $0x68] sm:$0xff] %vm485_vm3, %v482_v2 }
 0x14b PF: > { %s15_s16 = sadd.s32 1, %s872_s16   ;;  %s1169_s12 = smov %s864_s14 }
 0x14c   : > { %p12_p8 = scmp.ge.s32.totalorder %s15_s16, 6   ;;  %s1170_s13 = smov %s868_s15 }
 0x14d   : > { %s1171_s14 = smov %s1174_s18  ;;  %s1172_s15 = smov %s1178_s19 }
 0x14e   :  { %14 = sbr.rel (!%p12_p8) target bundleno = 4 (0x4), region = 71 }
 0x155   :  { %532 = vsyncpa [#allocation3], 1 }
 0x156   :  { %534 = vsyncpa [#allocation3 + $0x1], 1 }
 0x157   :  { %535 = vsyncpa [#allocation5], 1 }

// kernel: efficientnet_forward.25
= control target key start
LH: loop header
LB: loop body
LE: loop exit
PB: predicated region body
PF: predicated region fallthrough
CT: control target
= control target key end

     0   :  { %s712_s15 = smov 0   ;;  %s714_s16 = smov 0   ;;  %s848_s0 = inlined_call_operand.vmem [shape: f32[2,256,32], index: 0, kind: input, shape index: {}]   ;;  %s849_s1 = inlined_call_operand.vmem [shape: f32[32,16], index: 1, kind: input, shape index: {}]   ;;  %s850_s2 = inlined_call_operand.vmem [shape: f32[1,16], index: 2, kind: input, shape index: {}]   ;;  %s851_s3 = inlined_call_operand.vmem [shape: f32[2,1,32], index: 3, kind: input, shape index: {}]   ;;  %s852_s4 = inlined_call_operand.vmem [shape: f32[2,256,16], index: 4, kind: output, shape index: {}]  }
   0x1   :  { %s716_s17 = smov 0   ;;  %s718_s18 = smov 0  }
   0x2   :  { %s720_s19 = smov 0  }
   0x3 LB: > { %s23_s20 = sadd.s32 1, %s677_s17  ;;  %s26_s21 = sadd.s32 1, %s681_s18  ;;  %s685_s19 = sphi %s720_s19, %s14_s19   ;;  %s681_s18 = sphi %s718_s18, %s856_s18   ;;  %s677_s17 = sphi %s716_s17, %s855_s17   ;;  %s673_s16 = sphi %s714_s16, %s854_s16   ;;  %s669_s15 = sphi %s712_s15, %s853_s15  }
   0x4   : > { %p24_p0 = scmp.ge.s32.totalorder %s23_s20, 2  ;;  %p554_p1 = scmp.ge.s32.totalorder %s685_s19, 1 }
   0x5   : > { %p191_p2 = scmp.lt.s32.totalorder %s685_s19, 5 }
   0x6   : > { %s858_s20 = smov (%p24_p0, %s23_s20), 0  ;;  %s860_s21 = smov (!%p24_p0, %s26_s21), %s681_s18 }
   0x7   : > { %p192_p3 = pnand %p554_p1, %p191_p2  ;;  %p28_p4 = scmp.ge.s32.totalorder %s860_s21, 2 }
   0x8   : > { %v299_v0 = vld [vmem:[%s849_s1] sm:$0xff] (!%p192_p3)  ;;  %v300_v1 = vld [vmem:[%s849_s1 + $0x8] sm:$0xff] (!%p192_p3)  ;;  %v301_v2 = vld [vmem:[%s849_s1 + $0x10] sm:$0xff] (!%p192_p3)  ;;  %s555_s28 = sshll.u32 (!%p192_p3), %s669_s15, 4  ;;  %p229_p5 = scmp.lt.s32.totalorder (!%p192_p3), %s673_s16, 1  ;;  %vm312_vm0 = vcmask (!%p192_p3), 261120  }
   0x9   : > { %s862_s21 = smov (%p28_p4, %s860_s21), 0  ;;  %195 = sbr.rel (%p192_p3) target bundleno = 254 (0xfe), region = 36 }
   0xa   : > { %v303_v3 = vpack.c.bf16 (!%p192_p3), %v300_v1, %v299_v0  ;;  %v302_v4 = vld [vmem:[%s849_s1 + $0x18] sm:$0xff] (!%p192_p3)  ;;  %p231_p6 = scmp.lt.s32.totalorder (!%p192_p3), %s555_s28, 31  ;;  %v562_v47 = vld [vmem:[%s850_s2] ss:$0 sm:$0xff] (!%p192_p3)  ;;  %vm434_vm1 = vcmask (!%p192_p3), 130048  }
   0xb   : > { %v304_v5 = vpack.c.bf16 (!%p192_p3), %v302_v4, %v301_v2 }
   0xc   : > { %583 = vmatprep.subr.bf16.mxu0 (!%p192_p3), %v303_v3  ;;  %603 = vmatprep.subr.bf16.mxu1 (!%p192_p3), %v303_v3 }
   0xd   : > { %584 = vmatpush3.bf16.msra.mxu0 (!%p192_p3), %v303_v3  ;;  %605 = vmatpush3.bf16.msra.mxu1 (!%p192_p3), %v303_v3 }
   0xe   : > { %585 = vmatprep.subr.bf16.mxu0 (!%p192_p3), %v304_v5  ;;  %604 = vmatprep.subr.bf16.mxu1 (!%p192_p3), %v304_v5 }
  0x10   : > { %s864_s16 = smov (!%p229_p5, %s673_s16), 1  ;;  %s866_s28 = smov (!%p231_p6, %s555_s28), 31 }
  0x11   : > { %s556_s5 = sshll.u32 %s864_s16, 5  ;;  %s240_s8 = scalar_lea.vmem %s851_s3, %s864_s16  ;;  %586 = vmatpush3.bf16.msra.mxu0 %v304_v5  ;;  %606 = vmatpush3.bf16.msra.mxu1 %v304_v5 }
  0x12   : > { %s757_s9 = sadd.s32 %s556_s5, %s866_s28  ;;  %v561_v6 = vld [vmem:[%s240_s8] ss:$0 sm:$0xff] }
  0x13   : > { %s557_s10 = sshll.u32 %s757_s9, 3 }
  0x14   : > { %s765_s13 = scalar_lea.vmem %s848_s0, %s557_s10  ;;  %s799_s23 = scalar_lea.vmem %s852_s4, %s557_s10 }
  0x15   : > { %v252_v7 = vld [vmem:[%s765_s13] sm:$0xff]  ;;  %v253_v8 = vld [vmem:[%s765_s13 + $0x8] sm:$0xff]  ;;  %v254_v14 = vld [vmem:[%s765_s13 + $0x10] sm:$0xff] }
  0x16   : > { %v260_v9 = vld [vmem:[%s765_s13 + $0x40] sm:$0xff]  ;;  %v275_v10 = vmul.f32 %v561_v6, %v252_v7  ;;  %v276_v11 = vmul.f32 %v561_v6, %v253_v8  ;;  %v261_v12 = vld [vmem:[%s765_s13 + $0x48] sm:$0xff]  ;;  %v255_v15 = vld [vmem:[%s765_s13 + $0x18] sm:$0xff]  ;;  %v277_v17 = vmul.f32 %v561_v6, %v254_v14 }
  0x17   : > { %v283_v13 = vmul.f32 %v561_v6, %v260_v9  ;;  %v284_v16 = vmul.f32 %v561_v6, %v261_v12  ;;  %v278_v18 = vmul.f32 %v561_v6, %v255_v15  ;;  %v262_v19 = vld [vmem:[%s765_s13 + $0x50] sm:$0xff]  ;;  %v263_v20 = vld [vmem:[%s765_s13 + $0x58] sm:$0xff]  ;;  %v256_v21 = vld [vmem:[%s765_s13 + $0x20] sm:$0xff] }
  0x18   : > { %v291_v22 = vpack.c.bf16 %v276_v11, %v275_v10  ;;  %v285_v23 = vmul.f32 %v561_v6, %v262_v19  ;;  %v286_v24 = vmul.f32 %v561_v6, %v263_v20  ;;  %v257_v25 = vld [vmem:[%s765_s13 + $0x28] sm:$0xff]  ;;  %v279_v26 = vmul.f32 %v561_v6, %v256_v21  ;;  %v264_v27 = vld [vmem:[%s765_s13 + $0x60] sm:$0xff]  ;;  %v258_v33 = vld [vmem:[%s765_s13 + $0x30] sm:$0xff] }
  0x19   : > { %v265_v28 = vld [vmem:[%s765_s13 + $0x68] sm:$0xff]  ;;  %v295_v29 = vpack.c.bf16 %v284_v16, %v283_v13  ;;  %v292_v30 = vpack.c.bf16 %v278_v18, %v277_v17  ;;  %v280_v31 = vmul.f32 %v561_v6, %v257_v25  ;;  %v287_v32 = vmul.f32 %v561_v6, %v264_v27  ;;  %v259_v34 = vld [vmem:[%s765_s13 + $0x38] sm:$0xff]  ;;  %v266_v35 = vld [vmem:[%s765_s13 + $0x70] sm:$0xff] }
  0x1a   : > { %587 = vmatprep.mubr.msk.bf16.mxu0 %vm312_vm0, %v291_v22  ;;  %v296_v36 = vpack.c.bf16 %v286_v24, %v285_v23  ;;  %v288_v37 = vmul.f32 %v561_v6, %v265_v28  ;;  %v267_v38 = vld [vmem:[%s765_s13 + $0x78] sm:$0xff]  ;;  %v281_v40 = vmul.f32 %v561_v6, %v258_v33  ;;  %v282_v41 = vmul.f32 %v561_v6, %v259_v34 }
  0x1b   : > { %595 = vmatprep.mubr.msk.bf16.mxu1 %vm312_vm0, %v295_v29  ;;  %588 = vmatmul.mubr.msk.bf16.vlgmr.msra.gmra.mrb[0].mxu0 %vm312_vm0, %v292_v30  ;;  %v293_v39 = vpack.c.bf16 %v280_v31, %v279_v26  ;;  %v289_v43 = vmul.f32 %v561_v6, %v266_v35  ;;  %v290_v44 = vmul.f32 %v561_v6, %v267_v38 }
  0x1c   : > { %596 = vmatmul.mubr.msk.bf16.vlgmr.msra.gmra.mrb[0].mxu1 %vm312_vm0, %v296_v36  ;;  %v297_v42 = vpack.c.bf16 %v288_v37, %v287_v32  ;;  %v294_v45 = vpack.c.bf16 %v282_v41, %v281_v40 }
  0x1d   : > { %591 = vmatprep.mubr.msk.bf16.mxu0 %vm312_vm0, %v293_v39  ;;  %v298_v46 = vpack.c.bf16 %v290_v44, %v289_v43 }
  0x1e   : > { %599 = vmatprep.mubr.msk.bf16.mxu1 %vm312_vm0, %v297_v42 }
  0x23   : > { %592 = vmatmul.mubr.msk.bf16.gmra.mrb[4].mxu0 %vm312_vm0, %v294_v45 }
  0x24   : > { %600 = vmatmul.mubr.msk.bf16.gmra.mrb[4].mxu1 %vm312_vm0, %v298_v46 }
  0xee   : > { %v589_v48 = vpop.f32.mrb[0].mxu0 }
  0xef   : > { %v380_v49 = vadd.f32 %v589_v48, %v562_v47  ;;  %v597_v50 = vpop.f32.mrb[0].mxu1  ;;  %v371_v51 = vpop.f32.mrb[1].mxu0 }
  0xf0   : > { %v412_v52 = vadd.f32 %v597_v50, %v562_v47  ;;  %v372_v53 = vadd.f32 %v562_v47, %v371_v51  ;;  %v403_v54 = vpop.f32.mrb[1].mxu1  ;;  %v590_v55 = vpop.f32.mrb[2].mxu0 }
  0xf1   : > { %437 = vst.msk [vmem:[%s799_s23 + $0x10] sm:$0xff] %vm434_vm1, %v380_v49  ;;  %v404_v56 = vadd.f32 %v562_v47, %v403_v54  ;;  %v383_v57 = vadd.f32 %v590_v55, %v562_v47  ;;  %v598_v58 = vpop.f32.mrb[2].mxu1  ;;  %v374_v59 = vpop.f32.mrb[3].mxu0 }
  0xf2   : > { %445 = vst.msk [vmem:[%s799_s23 + $0x50] sm:$0xff] %vm434_vm1, %v412_v52  ;;  %435 = vst.msk [vmem:[%s799_s23] sm:$0xff] %vm434_vm1, %v372_v53  ;;  %v415_v60 = vadd.f32 %v598_v58, %v562_v47  ;;  %v375_v61 = vadd.f32 %v562_v47, %v374_v59  ;;  %v406_v62 = vpop.f32.mrb[3].mxu1 }
  0xf3   : > { %443 = vst.msk [vmem:[%s799_s23 + $0x40] sm:$0xff] %vm434_vm1, %v404_v56  ;;  %438 = vst.msk [vmem:[%s799_s23 + $0x18] sm:$0xff] %vm434_vm1, %v383_v57  ;;  %v407_v63 = vadd.f32 %v562_v47, %v406_v62 }
  0xf4   : > { %446 = vst.msk [vmem:[%s799_s23 + $0x58] sm:$0xff] %vm434_vm1, %v415_v60  ;;  %436 = vst.msk [vmem:[%s799_s23 + $0x8] sm:$0xff] %vm434_vm1, %v375_v61 }
  0xf5   : > { %444 = vst.msk [vmem:[%s799_s23 + $0x48] sm:$0xff] %vm434_vm1, %v407_v63 }
  0xf6   : > { %v593_v0 = vpop.f32.mrb[4].mxu0 }
  0xf7   : > { %v396_v1 = vadd.f32 %v593_v0, %v562_v47  ;;  %v601_v2 = vpop.f32.mrb[4].mxu1  ;;  %v387_v3 = vpop.f32.mrb[5].mxu0 }
  0xf8   : > { %v428_v4 = vadd.f32 %v601_v2, %v562_v47  ;;  %v388_v5 = vadd.f32 %v562_v47, %v387_v3  ;;  %v419_v6 = vpop.f32.mrb[5].mxu1  ;;  %v594_v7 = vpop.f32.mrb[6].mxu0 }
  0xf9   : > { %441 = vst.msk [vmem:[%s799_s23 + $0x30] sm:$0xff] %vm434_vm1, %v396_v1  ;;  %v420_v8 = vadd.f32 %v562_v47, %v419_v6  ;;  %v399_v9 = vadd.f32 %v594_v7, %v562_v47  ;;  %v602_v10 = vpop.f32.mrb[6].mxu1  ;;  %v390_v11 = vpop.f32.mrb[7].mxu0 }
  0xfa   : > { %449 = vst.msk [vmem:[%s799_s23 + $0x70] sm:$0xff] %vm434_vm1, %v428_v4  ;;  %439 = vst.msk [vmem:[%s799_s23 + $0x20] sm:$0xff] %vm434_vm1, %v388_v5  ;;  %v431_v12 = vadd.f32 %v602_v10, %v562_v47  ;;  %v391_v13 = vadd.f32 %v562_v47, %v390_v11  ;;  %v422_v14 = vpop.f32.mrb[7].mxu1 }
  0xfb   : > { %447 = vst.msk [vmem:[%s799_s23 + $0x60] sm:$0xff] %vm434_vm1, %v420_v8  ;;  %442 = vst.msk [vmem:[%s799_s23 + $0x38] sm:$0xff] %vm434_vm1, %v399_v9  ;;  %v423_v15 = vadd.f32 %v562_v47, %v422_v14 }
  0xfc   : > { %450 = vst.msk [vmem:[%s799_s23 + $0x78] sm:$0xff] %vm434_vm1, %v431_v12  ;;  %440 = vst.msk [vmem:[%s799_s23 + $0x28] sm:$0xff] %vm434_vm1, %v391_v13 }
  0xfd   : > { %448 = vst.msk [vmem:[%s799_s23 + $0x68] sm:$0xff] %vm434_vm1, %v423_v15 }
  0xfe PF: > { %s14_s19 = sadd.s32 1, %s685_s19   ;;  %s853_s15 = smov %s677_s17 }
  0xff   : > { %p11_p7 = scmp.ge.s32.totalorder %s14_s19, 6   ;;  %s854_s16 = smov %s681_s18 }
 0x100   : > { %s855_s17 = smov %s858_s20  ;;  %s856_s18 = smov %s862_s21 }
 0x101   :  { %13 = sbr.rel (!%p11_p7) target bundleno = 3 (0x3), region = 69 }

// kernel: efficientnet_forward.24
= control target key start
LH: loop header
LB: loop body
LE: loop exit
PB: predicated region body
PF: predicated region fallthrough
CT: control target
= control target key end

     0   :  { %v243_v0 = vmov 0.0|0.0   ;;  %vm244_vm0 = vmmov 0   ;;  %v245_v4 = vmov 0.0   ;;  %vm32_vm1 = vcmask 261120   ;;  %s303_s1 = inlined_call_operand.vmem [shape: f32[32,8], index: 1, kind: input, shape index: {}]   ;;  %s304_s0 = inlined_call_operand.vmem [shape: f32[2,32], index: 0, kind: input, shape index: {}]   ;;  %s305_s3 = inlined_call_operand.vmem [shape: f32[8,32], index: 3, kind: input, shape index: {}]   ;;  %s306_s2 = inlined_call_operand.vmem [shape: f32[1,8], index: 2, kind: input, shape index: {}]   ;;  %s307_s4 = inlined_call_operand.vmem [shape: f32[1,32], index: 4, kind: input, shape index: {}]   ;;  %s308_s5 = inlined_call_operand.vmem [shape: f32[2,32], index: 5, kind: output, shape index: {}]  }
   0x1   :  { %230 = vmatprep.subr.bf16.mxu0 %v243_v0  ;;  %v21_v1 = vld [vmem:[%s303_s1] sm:$0xff]  ;;  %v22_v2 = vld [vmem:[%s303_s1 + $0x8] sm:$0xff]  ;;  %v23_v3 = vld [vmem:[%s303_s1 + $0x10] sm:$0xff]  ;;  %222 = vmatprep.mubr.msk.f32.mxu0 %vm244_vm0, %v245_v4  ;;  %vm119_vm2 = vcmask 64512   ;;  %vm197_vm3 = vcmask 254976  }
   0x2   :  { %v231_v5 = vpack.c.bf16 %v22_v2, %v21_v1  ;;  %v24_v6 = vld [vmem:[%s303_s1 + $0x18] sm:$0xff]  ;;  %225 = vmatprep.subr.mxu1 %v245_v4  ;;  %227 = vmatprep.mubr.msk.f32.mxu1 %vm244_vm0, %v245_v4  ;;  %v20_v8 = vld [vmem:[%s304_s0] sm:$0x3] }
   0x3   :  { %v234_v7 = vpack.c.bf16 %v24_v6, %v23_v3  ;;  %v111_v9 = vld [vmem:[%s305_s3] sm:$0xff] }
   0x4   :  { %232 = vmatpush3.bf16.msra.mxu0 %v231_v5  ;;  %226 = vmatpush3.msra.mxu1 %v111_v9  ;;  %v203_v10 = vld [vmem:[%s306_s2] ss:$0 sm:$0xff] }
   0x5   :  { %233 = vmatprep.subr.bf16.mxu0 %v243_v0  ;;  %v205_v19 = vld [vmem:[%s307_s4] ss:$0 sm:$0xff] }
   0x8   :  { %235 = vmatpush3.bf16.msra.mxu0 %v234_v7 }
   0xb   :  { %223 = vmatmul.mubr.msk.f32.vlgmr.msra.gmra.mrb[0].mxu0 %vm32_vm1, %v20_v8 }
  0xde   :  { %v102_v11 = vpop.f32.mrb[0].mxu0 }
  0xdf   :  { %v103_v12 = vadd.f32 %v203_v10, %v102_v11  ;;  %v224_v13 = vpop.f32.mrb[1].mxu0 }
  0xe1   :  { %v106_v14 = vmul.f32 0.5, %v103_v12 }
  0xe3   :  { %239 = vtanh.f32 %v106_v14 }
  0xed   :  { %v240_v15 = vpop.eup %239 }
  0xee   :  { %v108_v16 = vadd.f32 1.0, %v240_v15 }
  0xf0   :  { %v109_v17 = vmul.f32 0.5, %v108_v16 }
  0xf2   :  { %v110_v18 = vmul.f32 %v109_v17, %v103_v12 }
  0xf4   :  { %228 = vmatmul.mubr.msk.f32.vlgmr.msra.gmra.mrb[0].mxu1 %vm119_vm2, %v110_v18 }
 0x1c7   :  { %v189_v20 = vpop.f32.mrb[0].mxu1 }
 0x1c8   :  { %v190_v21 = vadd.f32 %v205_v19, %v189_v20  ;;  %v229_v22 = vpop.f32.mrb[1].mxu1 }
 0x1ca   :  { %v193_v23 = vmul.f32 0.5, %v190_v21 }
 0x1cc   :  { %241 = vtanh.f32 %v193_v23 }
 0x1d6   :  { %v242_v24 = vpop.eup %241 }
 0x1d7   :  { %v195_v25 = vadd.f32 1.0, %v242_v24 }
 0x1d9   :  { %v196_v26 = vmul.f32 0.5, %v195_v25 }
 0x1db   :  { %198 = vst.msk [vmem:[%s308_s5] sm:$0x3] %vm197_vm3, %v196_v26 }

// kernel: efficientnet_forward.23
= control target key start
LH: loop header
LB: loop body
LE: loop exit
PB: predicated region body
PF: predicated region fallthrough
CT: control target
= control target key end

     0   :  { %s1791_s12 = smov 0   ;;  %s1793_s13 = smov 0   ;;  %s2616_s0 = inlined_call_operand.vmem [shape: f32[9,2,256,32], index: 0, kind: input, shape index: {}]   ;;  %s2617_s1 = inlined_call_operand.vmem [shape: f32[9,32], index: 1, kind: input, shape index: {}]   ;;  %s2618_s2 = inlined_call_operand.vmem [shape: f32[1,32], index: 2, kind: input, shape index: {}]   ;;  %s2619_s3 = inlined_call_operand.vmem [shape: f32[2,256,32], index: 3, kind: output, shape index: {}]  }
   0x1   :  { %s1795_s14 = smov 0   ;;  %s1797_s15 = smov 0  }
   0x2   :  { %s1799_s16 = smov 0   ;;  %s1801_s17 = smov 0  }
   0x3   :  { %s1803_s18 = smov 0  }
   0x4 LB: > { %s22_s19 = sadd.s32 1, %s1761_s16  ;;  %s25_s20 = sadd.s32 1, %s1765_s17  ;;  %s1769_s18 = sphi %s1803_s18, %s13_s18   ;;  %s1765_s17 = sphi %s1801_s17, %s2626_s17   ;;  %s1761_s16 = sphi %s1799_s16, %s2625_s16   ;;  %s1757_s15 = sphi %s1797_s15, %s2624_s15   ;;  %s1753_s14 = sphi %s1795_s14, %s2623_s14   ;;  %s1749_s13 = sphi %s1793_s13, %s2622_s13   ;;  %s1745_s12 = sphi %s1791_s12, %s2621_s12  }
   0x5   : > { %p23_p0 = scmp.ge.s32.totalorder %s22_s19, 2  ;;  %p41_p1 = scmp.ne.s32.totalorder %s1749_s13, %s1745_s12 }
   0x6   : > { %p42_p2 = scmp.eq.s32.totalorder %s1769_s18, 0  ;;  %s34_s24 = sadd.s32 1, %s1749_s13 }
   0x7   : > { %s2628_s19 = smov (%p23_p0, %s22_s19), 0  ;;  %s2630_s20 = smov (!%p23_p0, %s25_s20), %s1765_s17 }
   0x8   : > { %p43_p3 = por %p42_p2, %p41_p1  ;;  %p27_p4 = scmp.ge.s32.totalorder %s2630_s20, 2 }
   0x9   : > { %s30_s21 = ssub.s32 %s1761_s16, %s2628_s19  ;;  %p1484_p6 = scmp.ge.s32.totalorder %s1769_s18, 4 }
   0xa   : > { %s2632_s20 = smov (%p27_p4, %s2630_s20), 0 }
   0xb   : > { %s29_s22 = ssub.s32 %s1765_s17, %s2632_s20  ;;  %143 = sbr.rel (%p1484_p6) target bundleno = 97 (0x61), region = 24 }
   0xc   : > { %s31_s23 = sor.u32 %s30_s21, %s29_s22 }
   0xd   : > { %p32_p5 = scmp.eq.s32.totalorder %s31_s23, 0 }
   0xf   : > { %s1842_s25 = scalar_select %p32_p5, %s1749_s13, %s34_s24  }
  0x12   : > { %146 = sbr.rel (!%p43_p3) target bundleno = 97 (0x61), region = 28  ;;  %s148_s26 = sand.u32 (%p43_p3), 1, %s1749_s13  }
  0x13   : > { %s1485_s27 = sshll.u32 (%p43_p3), %s1761_s16, 4  ;;  %s1624_s28 = smul.u32 (%p43_p3), 1152, %s148_s26 }
  0x14   : > { %s1486_s29 = sshll.u32 (%p43_p3), %s1765_s17, 5 }
  0x15   : > { %s153_s30 = sadd.s32 (%p43_p3), %s1486_s29, %s1485_s27  ;;  %s1856_s8 = scalar_lea.vmem (%p43_p3), [#allocation2], %s1624_s28 }
  0x16   : > { %s1487_s4 = sshll.u32 (%p43_p3), %s153_s30, 3 }
  0x17   : > { %s1851_s7 = scalar_lea.vmem (%p43_p3), %s2616_s0, %s1487_s4 }
  0x18   : > { %v469_v0 = vld [vmem:[%s1851_s7] sm:$0xff] (%p43_p3)  ;;  %v471_v1 = vld [vmem:[%s1851_s7 + $0x8] sm:$0xff] (%p43_p3)  ;;  %v473_v2 = vld [vmem:[%s1851_s7 + $0x10] sm:$0xff] (%p43_p3) }
  0x19   : > { %470 = vst [vmem:[%s1856_s8] sm:$0xff] %v469_v0  ;;  %472 = vst [vmem:[%s1856_s8 + $0x8] sm:$0xff] %v471_v1  ;;  %v475_v3 = vld [vmem:[%s1851_s7 + $0x18] sm:$0xff]  ;;  %v477_v4 = vld [vmem:[%s1851_s7 + $0x20] sm:$0xff] }
  0x1a   : > { %474 = vst [vmem:[%s1856_s8 + $0x10] sm:$0xff] %v473_v2  ;;  %v479_v5 = vld [vmem:[%s1851_s7 + $0x28] sm:$0xff]  ;;  %476 = vst [vmem:[%s1856_s8 + $0x18] sm:$0xff] %v475_v3  ;;  %v481_v6 = vld [vmem:[%s1851_s7 + $0x30] sm:$0xff] }
  0x1b   : > { %478 = vst [vmem:[%s1856_s8 + $0x20] sm:$0xff] %v477_v4  ;;  %480 = vst [vmem:[%s1856_s8 + $0x28] sm:$0xff] %v479_v5  ;;  %v483_v7 = vld [vmem:[%s1851_s7 + $0x38] sm:$0xff]  ;;  %v485_v8 = vld [vmem:[%s1851_s7 + $0x40] sm:$0xff] }
  0x1c   : > { %482 = vst [vmem:[%s1856_s8 + $0x30] sm:$0xff] %v481_v6  ;;  %484 = vst [vmem:[%s1856_s8 + $0x38] sm:$0xff] %v483_v7  ;;  %v487_v9 = vld [vmem:[%s1851_s7 + $0x48] sm:$0xff]  ;;  %v489_v10 = vld [vmem:[%s1851_s7 + $0x50] sm:$0xff] }
  0x1d   : > { %486 = vst [vmem:[%s1856_s8 + $0x40] sm:$0xff] %v485_v8  ;;  %v491_v11 = vld [vmem:[%s1851_s7 + $0x58] sm:$0xff]  ;;  %488 = vst [vmem:[%s1856_s8 + $0x48] sm:$0xff] %v487_v9  ;;  %v493_v12 = vld [vmem:[%s1851_s7 + $0x60] sm:$0xff] }
  0x1e   : > { %490 = vst [vmem:[%s1856_s8 + $0x50] sm:$0xff] %v489_v10  ;;  %492 = vst [vmem:[%s1856_s8 + $0x58] sm:$0xff] %v491_v11  ;;  %v495_v13 = vld [vmem:[%s1851_s7 + $0x68] sm:$0xff]  ;;  %v497_v14 = vld [vmem:[%s1851_s7 + $0x70] sm:$0xff] }
  0x1f   : > { %494 = vst [vmem:[%s1856_s8 + $0x60] sm:$0xff] %v493_v12  ;;  %496 = vst [vmem:[%s1856_s8 + $0x68] sm:$0xff] %v495_v13  ;;  %v499_v15 = vld [vmem:[%s1851_s7 + $0x78] sm:$0xff]  ;;  %v501_v16 = vld [vmem:[%s1851_s7 + $0x200] sm:$0xff] }
  0x20   : > { %498 = vst [vmem:[%s1856_s8 + $0x70] sm:$0xff] %v497_v14  ;;  %v503_v17 = vld [vmem:[%s1851_s7 + $0x208] sm:$0xff]  ;;  %500 = vst [vmem:[%s1856_s8 + $0x78] sm:$0xff] %v499_v15  ;;  %v505_v18 = vld [vmem:[%s1851_s7 + $0x210] sm:$0xff] }
  0x21   : > { %502 = vst [vmem:[%s1856_s8 + $0x80] sm:$0xff] %v501_v16  ;;  %504 = vst [vmem:[%s1856_s8 + $0x88] sm:$0xff] %v503_v17  ;;  %v507_v19 = vld [vmem:[%s1851_s7 + $0x218] sm:$0xff]  ;;  %v509_v20 = vld [vmem:[%s1851_s7 + $0x220] sm:$0xff] }
  0x22   : > { %506 = vst [vmem:[%s1856_s8 + $0x90] sm:$0xff] %v505_v18  ;;  %508 = vst [vmem:[%s1856_s8 + $0x98] sm:$0xff] %v507_v19  ;;  %v511_v21 = vld [vmem:[%s1851_s7 + $0x228] sm:$0xff]  ;;  %v513_v22 = vld [vmem:[%s1851_s7 + $0x230] sm:$0xff] }
  0x23   : > { %510 = vst [vmem:[%s1856_s8 + $0xa0] sm:$0xff] %v509_v20  ;;  %v515_v23 = vld [vmem:[%s1851_s7 + $0x238] sm:$0xff]  ;;  %512 = vst [vmem:[%s1856_s8 + $0xa8] sm:$0xff] %v511_v21  ;;  %v517_v24 = vld [vmem:[%s1851_s7 + $0x240] sm:$0xff] }
  0x24   : > { %514 = vst [vmem:[%s1856_s8 + $0xb0] sm:$0xff] %v513_v22  ;;  %516 = vst [vmem:[%s1856_s8 + $0xb8] sm:$0xff] %v515_v23  ;;  %v519_v25 = vld [vmem:[%s1851_s7 + $0x248] sm:$0xff]  ;;  %v521_v26 = vld [vmem:[%s1851_s7 + $0x250] sm:$0xff] }
  0x25   : > { %518 = vst [vmem:[%s1856_s8 + $0xc0] sm:$0xff] %v517_v24  ;;  %520 = vst [vmem:[%s1856_s8 + $0xc8] sm:$0xff] %v519_v25  ;;  %v523_v27 = vld [vmem:[%s1851_s7 + $0x258] sm:$0xff]  ;;  %v525_v28 = vld [vmem:[%s1851_s7 + $0x260] sm:$0xff] }
  0x26   : > { %522 = vst [vmem:[%s1856_s8 + $0xd0] sm:$0xff] %v521_v26  ;;  %v527_v29 = vld [vmem:[%s1851_s7 + $0x268] sm:$0xff]  ;;  %524 = vst [vmem:[%s1856_s8 + $0xd8] sm:$0xff] %v523_v27  ;;  %v529_v30 = vld [vmem:[%s1851_s7 + $0x270] sm:$0xff] }
  0x27   : > { %526 = vst [vmem:[%s1856_s8 + $0xe0] sm:$0xff] %v525_v28  ;;  %528 = vst [vmem:[%s1856_s8 + $0xe8] sm:$0xff] %v527_v29  ;;  %v531_v31 = vld [vmem:[%s1851_s7 + $0x278] sm:$0xff]  ;;  %v533_v32 = vld [vmem:[%s1851_s7 + $0x400] sm:$0xff] }
  0x28   : > { %530 = vst [vmem:[%s1856_s8 + $0xf0] sm:$0xff] %v529_v30  ;;  %532 = vst [vmem:[%s1856_s8 + $0xf8] sm:$0xff] %v531_v31  ;;  %v535_v33 = vld [vmem:[%s1851_s7 + $0x408] sm:$0xff]  ;;  %v537_v34 = vld [vmem:[%s1851_s7 + $0x410] sm:$0xff] }
  0x29   : > { %534 = vst [vmem:[%s1856_s8 + $0x100] sm:$0xff] %v533_v32  ;;  %v539_v35 = vld [vmem:[%s1851_s7 + $0x418] sm:$0xff]  ;;  %536 = vst [vmem:[%s1856_s8 + $0x108] sm:$0xff] %v535_v33  ;;  %v541_v36 = vld [vmem:[%s1851_s7 + $0x420] sm:$0xff] }
  0x2a   : > { %538 = vst [vmem:[%s1856_s8 + $0x110] sm:$0xff] %v537_v34  ;;  %540 = vst [vmem:[%s1856_s8 + $0x118] sm:$0xff] %v539_v35  ;;  %v543_v37 = vld [vmem:[%s1851_s7 + $0x428] sm:$0xff]  ;;  %v545_v38 = vld [vmem:[%s1851_s7 + $0x430] sm:$0xff] }
  0x2b   : > { %542 = vst [vmem:[%s1856_s8 + $0x120] sm:$0xff] %v541_v36  ;;  %544 = vst [vmem:[%s1856_s8 + $0x128] sm:$0xff] %v543_v37  ;;  %v547_v39 = vld [vmem:[%s1851_s7 + $0x438] sm:$0xff]  ;;  %v549_v40 = vld [vmem:[%s1851_s7 + $0x440] sm:$0xff] }
  0x2c   : > { %546 = vst [vmem:[%s1856_s8 + $0x130] sm:$0xff] %v545_v38  ;;  %v551_v41 = vld [vmem:[%s1851_s7 + $0x448] sm:$0xff]  ;;  %548 = vst [vmem:[%s1856_s8 + $0x138] sm:$0xff] %v547_v39  ;;  %v553_v42 = vld [vmem:[%s1851_s7 + $0x450] sm:$0xff] }
  0x2d   : > { %550 = vst [vmem:[%s1856_s8 + $0x140] sm:$0xff] %v549_v40  ;;  %552 = vst [vmem:[%s1856_s8 + $0x148] sm:$0xff] %v551_v41  ;;  %v555_v43 = vld [vmem:[%s1851_s7 + $0x458] sm:$0xff]  ;;  %v557_v44 = vld [vmem:[%s1851_s7 + $0x460] sm:$0xff] }
  0x2e   : > { %554 = vst [vmem:[%s1856_s8 + $0x150] sm:$0xff] %v553_v42  ;;  %556 = vst [vmem:[%s1856_s8 + $0x158] sm:$0xff] %v555_v43  ;;  %v559_v45 = vld [vmem:[%s1851_s7 + $0x468] sm:$0xff]  ;;  %v561_v46 = vld [vmem:[%s1851_s7 + $0x470] sm:$0xff] }
  0x2f   : > { %558 = vst [vmem:[%s1856_s8 + $0x160] sm:$0xff] %v557_v44  ;;  %v563_v47 = vld [vmem:[%s1851_s7 + $0x478] sm:$0xff]  ;;  %560 = vst [vmem:[%s1856_s8 + $0x168] sm:$0xff] %v559_v45  ;;  %v565_v48 = vld [vmem:[%s1851_s7 + $0x600] sm:$0xff] }
  0x30   : > { %562 = vst [vmem:[%s1856_s8 + $0x170] sm:$0xff] %v561_v46  ;;  %564 = vst [vmem:[%s1856_s8 + $0x178] sm:$0xff] %v563_v47  ;;  %v567_v49 = vld [vmem:[%s1851_s7 + $0x608] sm:$0xff]  ;;  %v569_v50 = vld [vmem:[%s1851_s7 + $0x610] sm:$0xff] }
  0x31   : > { %566 = vst [vmem:[%s1856_s8 + $0x180] sm:$0xff] %v565_v48  ;;  %568 = vst [vmem:[%s1856_s8 + $0x188] sm:$0xff] %v567_v49  ;;  %v571_v51 = vld [vmem:[%s1851_s7 + $0x618] sm:$0xff]  ;;  %v573_v52 = vld [vmem:[%s1851_s7 + $0x620] sm:$0xff] }
  0x32   : > { %570 = vst [vmem:[%s1856_s8 + $0x190] sm:$0xff] %v569_v50  ;;  %v575_v53 = vld [vmem:[%s1851_s7 + $0x628] sm:$0xff]  ;;  %572 = vst [vmem:[%s1856_s8 + $0x198] sm:$0xff] %v571_v51  ;;  %v577_v54 = vld [vmem:[%s1851_s7 + $0x630] sm:$0xff] }
  0x33   : > { %574 = vst [vmem:[%s1856_s8 + $0x1a0] sm:$0xff] %v573_v52  ;;  %576 = vst [vmem:[%s1856_s8 + $0x1a8] sm:$0xff] %v575_v53  ;;  %v579_v55 = vld [vmem:[%s1851_s7 + $0x638] sm:$0xff]  ;;  %v581_v56 = vld [vmem:[%s1851_s7 + $0x640] sm:$0xff] }
  0x34   : > { %578 = vst [vmem:[%s1856_s8 + $0x1b0] sm:$0xff] %v577_v54  ;;  %580 = vst [vmem:[%s1856_s8 + $0x1b8] sm:$0xff] %v579_v55  ;;  %v583_v57 = vld [vmem:[%s1851_s7 + $0x648] sm:$0xff]  ;;  %v585_v58 = vld [vmem:[%s1851_s7 + $0x650] sm:$0xff] }
  0x35   : > { %582 = vst [vmem:[%s1856_s8 + $0x1c0] sm:$0xff] %v581_v56  ;;  %v587_v59 = vld [vmem:[%s1851_s7 + $0x658] sm:$0xff]  ;;  %584 = vst [vmem:[%s1856_s8 + $0x1c8] sm:$0xff] %v583_v57  ;;  %v589_v60 = vld [vmem:[%s1851_s7 + $0x660] sm:$0xff] }
  0x36   : > { %586 = vst [vmem:[%s1856_s8 + $0x1d0] sm:$0xff] %v585_v58  ;;  %588 = vst [vmem:[%s1856_s8 + $0x1d8] sm:$0xff] %v587_v59  ;;  %v591_v61 = vld [vmem:[%s1851_s7 + $0x668] sm:$0xff]  ;;  %v593_v62 = vld [vmem:[%s1851_s7 + $0x670] sm:$0xff] }
  0x37   : > { %590 = vst [vmem:[%s1856_s8 + $0x1e0] sm:$0xff] %v589_v60  ;;  %592 = vst [vmem:[%s1856_s8 + $0x1e8] sm:$0xff] %v591_v61  ;;  %v595_v63 = vld [vmem:[%s1851_s7 + $0x678] sm:$0xff]  ;;  %v597_v0 = vld [vmem:[%s1851_s7 + $0x800] sm:$0xff] }
  0x38   : > { %594 = vst [vmem:[%s1856_s8 + $0x1f0] sm:$0xff] %v593_v62  ;;  %v599_v1 = vld [vmem:[%s1851_s7 + $0x808] sm:$0xff]  ;;  %596 = vst [vmem:[%s1856_s8 + $0x1f8] sm:$0xff] %v595_v63  ;;  %v601_v2 = vld [vmem:[%s1851_s7 + $0x810] sm:$0xff] }
  0x39   : > { %598 = vst [vmem:[%s1856_s8 + $0x200] sm:$0xff] %v597_v0  ;;  %600 = vst [vmem:[%s1856_s8 + $0x208] sm:$0xff] %v599_v1  ;;  %v603_v3 = vld [vmem:[%s1851_s7 + $0x818] sm:$0xff]  ;;  %v605_v4 = vld [vmem:[%s1851_s7 + $0x820] sm:$0xff] }
  0x3a   : > { %602 = vst [vmem:[%s1856_s8 + $0x210] sm:$0xff] %v601_v2  ;;  %604 = vst [vmem:[%s1856_s8 + $0x218] sm:$0xff] %v603_v3  ;;  %v607_v5 = vld [vmem:[%s1851_s7 + $0x828] sm:$0xff]  ;;  %v609_v6 = vld [vmem:[%s1851_s7 + $0x830] sm:$0xff] }
  0x3b   : > { %606 = vst [vmem:[%s1856_s8 + $0x220] sm:$0xff] %v605_v4  ;;  %v611_v7 = vld [vmem:[%s1851_s7 + $0x838] sm:$0xff]  ;;  %608 = vst [vmem:[%s1856_s8 + $0x228] sm:$0xff] %v607_v5  ;;  %v613_v8 = vld [vmem:[%s1851_s7 + $0x840] sm:$0xff] }
  0x3c   : > { %610 = vst [vmem:[%s1856_s8 + $0x230] sm:$0xff] %v609_v6  ;;  %612 = vst [vmem:[%s1856_s8 + $0x238] sm:$0xff] %v611_v7  ;;  %v615_v9 = vld [vmem:[%s1851_s7 + $0x848] sm:$0xff]  ;;  %v617_v10 = vld [vmem:[%s1851_s7 + $0x850] sm:$0xff] }
  0x3d   : > { %614 = vst [vmem:[%s1856_s8 + $0x240] sm:$0xff] %v613_v8  ;;  %616 = vst [vmem:[%s1856_s8 + $0x248] sm:$0xff] %v615_v9  ;;  %v619_v11 = vld [vmem:[%s1851_s7 + $0x858] sm:$0xff]  ;;  %v621_v12 = vld [vmem:[%s1851_s7 + $0x860] sm:$0xff] }
  0x3e   : > { %618 = vst [vmem:[%s1856_s8 + $0x250] sm:$0xff] %v617_v10  ;;  %v623_v13 = vld [vmem:[%s1851_s7 + $0x868] sm:$0xff]  ;;  %620 = vst [vmem:[%s1856_s8 + $0x258] sm:$0xff] %v619_v11  ;;  %v625_v14 = vld [vmem:[%s1851_s7 + $0x870] sm:$0xff] }
  0x3f   : > { %622 = vst [vmem:[%s1856_s8 + $0x260] sm:$0xff] %v621_v12  ;;  %624 = vst [vmem:[%s1856_s8 + $0x268] sm:$0xff] %v623_v13  ;;  %v627_v15 = vld [vmem:[%s1851_s7 + $0x878] sm:$0xff]  ;;  %v629_v16 = vld [vmem:[%s1851_s7 + $0xa00] sm:$0xff] }
  0x40   : > { %626 = vst [vmem:[%s1856_s8 + $0x270] sm:$0xff] %v625_v14  ;;  %628 = vst [vmem:[%s1856_s8 + $0x278] sm:$0xff] %v627_v15  ;;  %v631_v17 = vld [vmem:[%s1851_s7 + $0xa08] sm:$0xff]  ;;  %v633_v18 = vld [vmem:[%s1851_s7 + $0xa10] sm:$0xff] }
  0x41   : > { %630 = vst [vmem:[%s1856_s8 + $0x280] sm:$0xff] %v629_v16  ;;  %v635_v19 = vld [vmem:[%s1851_s7 + $0xa18] sm:$0xff]  ;;  %632 = vst [vmem:[%s1856_s8 + $0x288] sm:$0xff] %v631_v17  ;;  %v637_v20 = vld [vmem:[%s1851_s7 + $0xa20] sm:$0xff] }
  0x42   : > { %634 = vst [vmem:[%s1856_s8 + $0x290] sm:$0xff] %v633_v18  ;;  %636 = vst [vmem:[%s1856_s8 + $0x298] sm:$0xff] %v635_v19  ;;  %v639_v21 = vld [vmem:[%s1851_s7 + $0xa28] sm:$0xff]  ;;  %v641_v22 = vld [vmem:[%s1851_s7 + $0xa30] sm:$0xff] }
  0x43   : > { %638 = vst [vmem:[%s1856_s8 + $0x2a0] sm:$0xff] %v637_v20  ;;  %640 = vst [vmem:[%s1856_s8 + $0x2a8] sm:$0xff] %v639_v21  ;;  %v643_v23 = vld [vmem:[%s1851_s7 + $0xa38] sm:$0xff]  ;;  %v645_v24 = vld [vmem:[%s1851_s7 + $0xa40] sm:$0xff] }
  0x44   : > { %642 = vst [vmem:[%s1856_s8 + $0x2b0] sm:$0xff] %v641_v22  ;;  %v647_v25 = vld [vmem:[%s1851_s7 + $0xa48] sm:$0xff]  ;;  %644 = vst [vmem:[%s1856_s8 + $0x2b8] sm:$0xff] %v643_v23  ;;  %v649_v26 = vld [vmem:[%s1851_s7 + $0xa50] sm:$0xff] }
  0x45   : > { %646 = vst [vmem:[%s1856_s8 + $0x2c0] sm:$0xff] %v645_v24  ;;  %648 = vst [vmem:[%s1856_s8 + $0x2c8] sm:$0xff] %v647_v25  ;;  %v651_v27 = vld [vmem:[%s1851_s7 + $0xa58] sm:$0xff]  ;;  %v653_v28 = vld [vmem:[%s1851_s7 + $0xa60] sm:$0xff] }
  0x46   : > { %650 = vst [vmem:[%s1856_s8 + $0x2d0] sm:$0xff] %v649_v26  ;;  %652 = vst [vmem:[%s1856_s8 + $0x2d8] sm:$0xff] %v651_v27  ;;  %v655_v29 = vld [vmem:[%s1851_s7 + $0xa68] sm:$0xff]  ;;  %v657_v30 = vld [vmem:[%s1851_s7 + $0xa70] sm:$0xff] }
  0x47   : > { %654 = vst [vmem:[%s1856_s8 + $0x2e0] sm:$0xff] %v653_v28  ;;  %v659_v31 = vld [vmem:[%s1851_s7 + $0xa78] sm:$0xff]  ;;  %656 = vst [vmem:[%s1856_s8 + $0x2e8] sm:$0xff] %v655_v29  ;;  %v661_v32 = vld [vmem:[%s1851_s7 + $0xc00] sm:$0xff] }
  0x48   : > { %658 = vst [vmem:[%s1856_s8 + $0x2f0] sm:$0xff] %v657_v30  ;;  %660 = vst [vmem:[%s1856_s8 + $0x2f8] sm:$0xff] %v659_v31  ;;  %v663_v33 = vld [vmem:[%s1851_s7 + $0xc08] sm:$0xff]  ;;  %v665_v34 = vld [vmem:[%s1851_s7 + $0xc10] sm:$0xff] }
  0x49   : > { %662 = vst [vmem:[%s1856_s8 + $0x300] sm:$0xff] %v661_v32  ;;  %664 = vst [vmem:[%s1856_s8 + $0x308] sm:$0xff] %v663_v33  ;;  %v667_v35 = vld [vmem:[%s1851_s7 + $0xc18] sm:$0xff]  ;;  %v669_v36 = vld [vmem:[%s1851_s7 + $0xc20] sm:$0xff] }
  0x4a   : > { %666 = vst [vmem:[%s1856_s8 + $0x310] sm:$0xff] %v665_v34  ;;  %v671_v37 = vld [vmem:[%s1851_s7 + $0xc28] sm:$0xff]  ;;  %668 = vst [vmem:[%s1856_s8 + $0x318] sm:$0xff] %v667_v35  ;;  %v673_v38 = vld [vmem:[%s1851_s7 + $0xc30] sm:$0xff] }
  0x4b   : > { %670 = vst [vmem:[%s1856_s8 + $0x320] sm:$0xff] %v669_v36  ;;  %672 = vst [vmem:[%s1856_s8 + $0x328] sm:$0xff] %v671_v37  ;;  %v675_v39 = vld [vmem:[%s1851_s7 + $0xc38] sm:$0xff]  ;;  %v677_v40 = vld [vmem:[%s1851_s7 + $0xc40] sm:$0xff] }
  0x4c   : > { %674 = vst [vmem:[%s1856_s8 + $0x330] sm:$0xff] %v673_v38  ;;  %676 = vst [vmem:[%s1856_s8 + $0x338] sm:$0xff] %v675_v39  ;;  %v679_v41 = vld [vmem:[%s1851_s7 + $0xc48] sm:$0xff]  ;;  %v681_v42 = vld [vmem:[%s1851_s7 + $0xc50] sm:$0xff] }
  0x4d   : > { %678 = vst [vmem:[%s1856_s8 + $0x340] sm:$0xff] %v677_v40  ;;  %v683_v43 = vld [vmem:[%s1851_s7 + $0xc58] sm:$0xff]  ;;  %680 = vst [vmem:[%s1856_s8 + $0x348] sm:$0xff] %v679_v41  ;;  %v685_v44 = vld [vmem:[%s1851_s7 + $0xc60] sm:$0xff] }
  0x4e   : > { %682 = vst [vmem:[%s1856_s8 + $0x350] sm:$0xff] %v681_v42  ;;  %684 = vst [vmem:[%s1856_s8 + $0x358] sm:$0xff] %v683_v43  ;;  %v687_v45 = vld [vmem:[%s1851_s7 + $0xc68] sm:$0xff]  ;;  %v689_v46 = vld [vmem:[%s1851_s7 + $0xc70] sm:$0xff] }
  0x4f   : > { %686 = vst [vmem:[%s1856_s8 + $0x360] sm:$0xff] %v685_v44  ;;  %688 = vst [vmem:[%s1856_s8 + $0x368] sm:$0xff] %v687_v45  ;;  %v691_v47 = vld [vmem:[%s1851_s7 + $0xc78] sm:$0xff]  ;;  %v693_v48 = vld [vmem:[%s1851_s7 + $0xe00] sm:$0xff] }
  0x50   : > { %690 = vst [vmem:[%s1856_s8 + $0x370] sm:$0xff] %v689_v46  ;;  %v695_v49 = vld [vmem:[%s1851_s7 + $0xe08] sm:$0xff]  ;;  %692 = vst [vmem:[%s1856_s8 + $0x378] sm:$0xff] %v691_v47  ;;  %v697_v50 = vld [vmem:[%s1851_s7 + $0xe10] sm:$0xff] }
  0x51   : > { %694 = vst [vmem:[%s1856_s8 + $0x380] sm:$0xff] %v693_v48  ;;  %696 = vst [vmem:[%s1856_s8 + $0x388] sm:$0xff] %v695_v49  ;;  %v699_v51 = vld [vmem:[%s1851_s7 + $0xe18] sm:$0xff]  ;;  %v701_v52 = vld [vmem:[%s1851_s7 + $0xe20] sm:$0xff] }
  0x52   : > { %698 = vst [vmem:[%s1856_s8 + $0x390] sm:$0xff] %v697_v50  ;;  %700 = vst [vmem:[%s1856_s8 + $0x398] sm:$0xff] %v699_v51  ;;  %v703_v53 = vld [vmem:[%s1851_s7 + $0xe28] sm:$0xff]  ;;  %v705_v54 = vld [vmem:[%s1851_s7 + $0xe30] sm:$0xff] }
  0x53   : > { %702 = vst [vmem:[%s1856_s8 + $0x3a0] sm:$0xff] %v701_v52  ;;  %v707_v55 = vld [vmem:[%s1851_s7 + $0xe38] sm:$0xff]  ;;  %704 = vst [vmem:[%s1856_s8 + $0x3a8] sm:$0xff] %v703_v53  ;;  %v709_v56 = vld [vmem:[%s1851_s7 + $0xe40] sm:$0xff] }
  0x54   : > { %706 = vst [vmem:[%s1856_s8 + $0x3b0] sm:$0xff] %v705_v54  ;;  %708 = vst [vmem:[%s1856_s8 + $0x3b8] sm:$0xff] %v707_v55  ;;  %v711_v57 = vld [vmem:[%s1851_s7 + $0xe48] sm:$0xff]  ;;  %v713_v58 = vld [vmem:[%s1851_s7 + $0xe50] sm:$0xff] }
  0x55   : > { %710 = vst [vmem:[%s1856_s8 + $0x3c0] sm:$0xff] %v709_v56  ;;  %712 = vst [vmem:[%s1856_s8 + $0x3c8] sm:$0xff] %v711_v57  ;;  %v715_v59 = vld [vmem:[%s1851_s7 + $0xe58] sm:$0xff]  ;;  %v717_v60 = vld [vmem:[%s1851_s7 + $0xe60] sm:$0xff] }
  0x56   : > { %714 = vst [vmem:[%s1856_s8 + $0x3d0] sm:$0xff] %v713_v58  ;;  %v719_v61 = vld [vmem:[%s1851_s7 + $0xe68] sm:$0xff]  ;;  %716 = vst [vmem:[%s1856_s8 + $0x3d8] sm:$0xff] %v715_v59  ;;  %v721_v62 = vld [vmem:[%s1851_s7 + $0xe70] sm:$0xff] }
  0x57   : > { %718 = vst [vmem:[%s1856_s8 + $0x3e0] sm:$0xff] %v717_v60  ;;  %720 = vst [vmem:[%s1856_s8 + $0x3e8] sm:$0xff] %v719_v61  ;;  %v723_v63 = vld [vmem:[%s1851_s7 + $0xe78] sm:$0xff]  ;;  %v725_v0 = vld [vmem:[%s1851_s7 + $0x1000] sm:$0xff] }
  0x58   : > { %722 = vst [vmem:[%s1856_s8 + $0x3f0] sm:$0xff] %v721_v62  ;;  %724 = vst [vmem:[%s1856_s8 + $0x3f8] sm:$0xff] %v723_v63  ;;  %v727_v1 = vld [vmem:[%s1851_s7 + $0x1008] sm:$0xff]  ;;  %v729_v2 = vld [vmem:[%s1851_s7 + $0x1010] sm:$0xff] }
  0x59   : > { %726 = vst [vmem:[%s1856_s8 + $0x400] sm:$0xff] %v725_v0  ;;  %v731_v3 = vld [vmem:[%s1851_s7 + $0x1018] sm:$0xff]  ;;  %728 = vst [vmem:[%s1856_s8 + $0x408] sm:$0xff] %v727_v1  ;;  %v733_v4 = vld [vmem:[%s1851_s7 + $0x1020] sm:$0xff] }
  0x5a   : > { %730 = vst [vmem:[%s1856_s8 + $0x410] sm:$0xff] %v729_v2  ;;  %732 = vst [vmem:[%s1856_s8 + $0x418] sm:$0xff] %v731_v3  ;;  %v735_v5 = vld [vmem:[%s1851_s7 + $0x1028] sm:$0xff]  ;;  %v737_v6 = vld [vmem:[%s1851_s7 + $0x1030] sm:$0xff] }
  0x5b   : > { %734 = vst [vmem:[%s1856_s8 + $0x420] sm:$0xff] %v733_v4  ;;  %736 = vst [vmem:[%s1856_s8 + $0x428] sm:$0xff] %v735_v5  ;;  %v739_v7 = vld [vmem:[%s1851_s7 + $0x1038] sm:$0xff]  ;;  %v741_v8 = vld [vmem:[%s1851_s7 + $0x1040] sm:$0xff] }
  0x5c   : > { %738 = vst [vmem:[%s1856_s8 + $0x430] sm:$0xff] %v737_v6  ;;  %v743_v9 = vld [vmem:[%s1851_s7 + $0x1048] sm:$0xff]  ;;  %740 = vst [vmem:[%s1856_s8 + $0x438] sm:$0xff] %v739_v7  ;;  %v745_v10 = vld [vmem:[%s1851_s7 + $0x1050] sm:$0xff] }
  0x5d   : > { %742 = vst [vmem:[%s1856_s8 + $0x440] sm:$0xff] %v741_v8  ;;  %744 = vst [vmem:[%s1856_s8 + $0x448] sm:$0xff] %v743_v9  ;;  %v747_v11 = vld [vmem:[%s1851_s7 + $0x1058] sm:$0xff]  ;;  %v749_v12 = vld [vmem:[%s1851_s7 + $0x1060] sm:$0xff] }
  0x5e   : > { %746 = vst [vmem:[%s1856_s8 + $0x450] sm:$0xff] %v745_v10  ;;  %748 = vst [vmem:[%s1856_s8 + $0x458] sm:$0xff] %v747_v11  ;;  %v751_v13 = vld [vmem:[%s1851_s7 + $0x1068] sm:$0xff]  ;;  %v753_v14 = vld [vmem:[%s1851_s7 + $0x1070] sm:$0xff] }
  0x5f   : > { %750 = vst [vmem:[%s1856_s8 + $0x460] sm:$0xff] %v749_v12  ;;  %v755_v15 = vld [vmem:[%s1851_s7 + $0x1078] sm:$0xff]  ;;  %752 = vst [vmem:[%s1856_s8 + $0x468] sm:$0xff] %v751_v13 }
  0x60   : > { %754 = vst [vmem:[%s1856_s8 + $0x470] sm:$0xff] %v753_v14  ;;  %756 = vst [vmem:[%s1856_s8 + $0x478] sm:$0xff] %v755_v15 }
  0x61 PF: > { %p1488_p7 = scmp.ge.s32.totalorder %s1769_s18, 1  ;;  %p761_p8 = scmp.lt.s32.totalorder %s1769_s18, 5 }
  0x63   : > { %p762_p9 = pnand %p1488_p7, %p761_p8 }
  0x64   : > { %s768_s9 = sand.u32 (!%p762_p9), 1, %s1745_s12   ;;  %v824_v16 = vlaneseq (!%p762_p9)  ;;  %v806_v18 = vld [vmem:[%s2617_s1] sm:$0xff] (!%p762_p9)  ;;  %v2161_v31 = vld [vmem:[%s2617_s1 + $0x8] ss:$0 sm:$0xff] (!%p762_p9)  ;;  %s1489_s27 = sshll.u32 (!%p762_p9), %s1753_s14, 4  ;;  %vm1371_vm0 = vcmask (!%p762_p9), 261120  }
  0x65   : > { %765 = sbr.rel (%p762_p9) target bundleno = 225 (0xe1), region = 66  ;;  %p797_p10 = scmp.lt.s32.totalorder (!%p762_p9), %s1757_s15, 1 }
  0x66   : > { %s1625_s10 = smul.u32 (!%p762_p9), 1152, %s768_s9  ;;  %v825_v17 = vshrl.u32 (!%p762_p9), %v824_v16, 7  ;;  %p2290_p11 = scmp.lt.s32.totalorder (!%p762_p9), %s1489_s27, 31 }
  0x68   : > { %v826_v19 = vsub.s32 (!%p762_p9), 0, %v825_v17  ;;  %v863_v20 = vsub.s32 (!%p762_p9), 1, %v825_v17  ;;  %s2149_s22 = scalar_lea.vmem (!%p762_p9), [#allocation2], %s1625_s10  ;;  %v916_v23 = vsub.s32 (!%p762_p9), 2, %v825_v17  ;;  %v969_v24 = vsub.s32 (!%p762_p9), 3, %v825_v17 }
  0x69   : > { %v808_v21 = vld [vmem:[%s2149_s22] sm:$0xff] (!%p762_p9)  ;;  %v1022_v25 = vsub.s32 (!%p762_p9), 4, %v825_v17  ;;  %v1075_v29 = vsub.s32 (!%p762_p9), 5, %v825_v17  ;;  %v1128_v30 = vsub.s32 (!%p762_p9), 6, %v825_v17  ;;  %v1181_v38 = vsub.s32 (!%p762_p9), 7, %v825_v17  ;;  %v809_v43 = vld [vmem:[%s2149_s22 + $0x8] sm:$0xff] (!%p762_p9) }
  0x6a   : > { %v1492_v22 = vld [vmem:[%s2149_s22 + $0x80] sm:$0xff] (!%p762_p9)  ;;  %v2153_v26 = vrot.slane (!%p762_p9), %v806_v18, %v826_v19  ;;  %v2155_v27 = vrot.slane (!%p762_p9), %v806_v18, %v863_v20  ;;  %v2163_v32 = vrot.slane (!%p762_p9), %v806_v18, %v916_v23  ;;  %v2166_v34 = vrot.slane (!%p762_p9), %v806_v18, %v969_v24  ;;  %v1493_v44 = vld [vmem:[%s2149_s22 + $0x88] sm:$0xff] (!%p762_p9)  ;;  %v810_v61 = vld [vmem:[%s2149_s22 + $0x10] sm:$0xff] (!%p762_p9) }
  0x6b   : > { %v1508_v28 = vld [vmem:[%s2149_s22 + $0x100] sm:$0xff] (!%p762_p9)  ;;  %v2169_v36 = vrot.slane (!%p762_p9), %v806_v18, %v1022_v25  ;;  %v2174_v41 = vrot.slane (!%p762_p9), %v806_v18, %v1075_v29  ;;  %v2176_v42 = vrot.slane (!%p762_p9), %v806_v18, %v1128_v30  ;;  %v1509_v45 = vld [vmem:[%s2149_s22 + $0x108] sm:$0xff] (!%p762_p9)  ;;  %v2184_v49 = vrot.slane (!%p762_p9), %v806_v18, %v1181_v38  ;;  %v1494_v62 = vld [vmem:[%s2149_s22 + $0x90] sm:$0xff] (!%p762_p9) }
  0x6c   : > { %v1524_v33 = vld [vmem:[%s2149_s22 + $0x180] sm:$0xff]  ;;  %v828_v39 = vmul.f32 %v2153_v26, %v808_v21  ;;  %v865_v40 = vmul.f32 %v1492_v22, %v2155_v27  ;;  %v918_v46 = vmul.f32 %v1508_v28, %v2163_v32  ;;  %v1525_v54 = vld [vmem:[%s2149_s22 + $0x188] sm:$0xff]  ;;  %v829_v58 = vmul.f32 %v2153_v26, %v809_v43  ;;  %v1510_v63 = vld [vmem:[%s2149_s22 + $0x110] sm:$0xff]  ;;  %s2634_s15 = smov (!%p797_p10, %s1757_s15), 1  ;;  %s2636_s27 = smov (!%p2290_p11, %s1489_s27), 31 }
  0x6d   : > { %v1540_v35 = vld [vmem:[%s2149_s22 + $0x200] sm:$0xff]  ;;  %v971_v52 = vmul.f32 %v1524_v33, %v2166_v34  ;;  %v1541_v55 = vld [vmem:[%s2149_s22 + $0x208] sm:$0xff]  ;;  %v866_v59 = vmul.f32 %v1493_v44, %v2155_v27  ;;  %v919_v60 = vmul.f32 %v1509_v45, %v2163_v32  ;;  %v972_v8 = vmul.f32 %v1525_v54, %v2166_v34  ;;  %v1526_v11 = vld [vmem:[%s2149_s22 + $0x190] sm:$0xff]  ;;  %s1490_s29 = sshll.u32 %s2634_s15, 5 }
  0x6e   : > { %v1556_v37 = vld [vmem:[%s2149_s22 + $0x280] sm:$0xff]  ;;  %v881_v51 = vadd.f32 %v865_v40, %v828_v39  ;;  %v1024_v53 = vmul.f32 %v1540_v35, %v2169_v36  ;;  %v1557_v56 = vld [vmem:[%s2149_s22 + $0x288] sm:$0xff]  ;;  %v1025_v9 = vmul.f32 %v1541_v55, %v2169_v36  ;;  %v1542_v12 = vld [vmem:[%s2149_s22 + $0x210] sm:$0xff]  ;;  %v830_v14 = vmul.f32 %v2153_v26, %v810_v61  ;;  %s2339_s14 = sadd.s32 %s1490_s29, %s2636_s27 }
  0x6f   : > { %v1572_v47 = vld [vmem:[%s2149_s22 + $0x300] sm:$0xff]  ;;  %v1077_v57 = vmul.f32 %v1556_v37, %v2174_v41  ;;  %v1573_v4 = vld [vmem:[%s2149_s22 + $0x308] sm:$0xff]  ;;  %v882_v7 = vadd.f32 %v866_v59, %v829_v58  ;;  %v1078_v10 = vmul.f32 %v1557_v56, %v2174_v41  ;;  %v867_v15 = vmul.f32 %v1494_v62, %v2155_v27  ;;  %v1558_v17 = vld [vmem:[%s2149_s22 + $0x290] sm:$0xff]  ;;  %s1491_s15 = sshll.u32 %s2339_s14, 3 }
  0x70   : > { %v1588_v48 = vld [vmem:[%s2149_s22 + $0x380] sm:$0xff]  ;;  %v934_v0 = vadd.f32 %v918_v46, %v881_v51  ;;  %v1130_v1 = vmul.f32 %v1572_v47, %v2176_v42  ;;  %v1589_v5 = vld [vmem:[%s2149_s22 + $0x388] sm:$0xff]  ;;  %v920_v16 = vmul.f32 %v1510_v63, %v2163_v32  ;;  %v811_v18 = vld [vmem:[%s2149_s22 + $0x18] sm:$0xff]  ;;  %v1131_v21 = vmul.f32 %v1573_v4, %v2176_v42  ;;  %s2367_s5 = scalar_lea.vmem %s2619_s3, %s1491_s15 }
  0x71   : > { %v1604_v50 = vld [vmem:[%s2149_s22 + $0x400] sm:$0xff]  ;;  %v1183_v2 = vmul.f32 %v1588_v48, %v2184_v49  ;;  %v1605_v6 = vld [vmem:[%s2149_s22 + $0x408] sm:$0xff]  ;;  %v1495_v19 = vld [vmem:[%s2149_s22 + $0x98] sm:$0xff]  ;;  %v935_v20 = vadd.f32 %v919_v60, %v882_v7  ;;  %v1184_v22 = vmul.f32 %v1589_v5, %v2184_v49  ;;  %v883_v29 = vadd.f32 %v867_v15, %v830_v14 }
  0x72   : > { %v2202_v3 = vmul.f32 %v2161_v31, %v1604_v50  ;;  %v987_v13 = vadd.f32 %v971_v52, %v934_v0  ;;  %v2221_v23 = vmul.f32 %v2161_v31, %v1605_v6  ;;  %v1574_v24 = vld [vmem:[%s2149_s22 + $0x310] sm:$0xff]  ;;  %v1511_v25 = vld [vmem:[%s2149_s22 + $0x118] sm:$0xff]  ;;  %v973_v30 = vmul.f32 %v1526_v11, %v2166_v34  ;;  %v812_v52 = vld [vmem:[%s2149_s22 + $0x20] sm:$0xff] }
  0x73   : > { %v1026_v33 = vmul.f32 %v1542_v12, %v2169_v36  ;;  %v1590_v35 = vld [vmem:[%s2149_s22 + $0x390] sm:$0xff]  ;;  %v1527_v37 = vld [vmem:[%s2149_s22 + $0x198] sm:$0xff]  ;;  %v988_v38 = vadd.f32 %v972_v8, %v935_v20  ;;  %v1079_v39 = vmul.f32 %v1558_v17, %v2174_v41  ;;  %v831_v43 = vmul.f32 %v2153_v26, %v811_v18  ;;  %v1496_v58 = vld [vmem:[%s2149_s22 + $0xa0] sm:$0xff] }
  0x74   : > { %v1040_v28 = vadd.f32 %v1024_v53, %v987_v13  ;;  %v1606_v40 = vld [vmem:[%s2149_s22 + $0x410] sm:$0xff]  ;;  %v868_v44 = vmul.f32 %v1495_v19, %v2155_v27  ;;  %v1543_v45 = vld [vmem:[%s2149_s22 + $0x218] sm:$0xff]  ;;  %v936_v47 = vadd.f32 %v920_v16, %v883_v29  ;;  %v1132_v48 = vmul.f32 %v1574_v24, %v2176_v42  ;;  %v1512_v59 = vld [vmem:[%s2149_s22 + $0x120] sm:$0xff] }
  0x75   : > { %v921_v50 = vmul.f32 %v1511_v25, %v2163_v32  ;;  %v1559_v51 = vld [vmem:[%s2149_s22 + $0x298] sm:$0xff]  ;;  %v1041_v53 = vadd.f32 %v1025_v9, %v988_v38  ;;  %v1185_v54 = vmul.f32 %v1590_v35, %v2184_v49  ;;  %v974_v56 = vmul.f32 %v1527_v37, %v2166_v34  ;;  %v1528_v8 = vld [vmem:[%s2149_s22 + $0x1a0] sm:$0xff]  ;;  %v1497_v29 = vld [vmem:[%s2149_s22 + $0xa8] sm:$0xff] }
  0x76   : > { %v1093_v46 = vadd.f32 %v1077_v57, %v1040_v28  ;;  %v884_v55 = vadd.f32 %v868_v44, %v831_v43  ;;  %v989_v60 = vadd.f32 %v973_v30, %v936_v47  ;;  %v1238_v61 = vmul.f32 %v2161_v31, %v1606_v40  ;;  %v1575_v63 = vld [vmem:[%s2149_s22 + $0x318] sm:$0xff]  ;;  %v1544_v14 = vld [vmem:[%s2149_s22 + $0x220] sm:$0xff]  ;;  %v813_v28 = vld [vmem:[%s2149_s22 + $0x28] sm:$0xff] }
  0x77   : > { %v1027_v62 = vmul.f32 %v1543_v45, %v2169_v36  ;;  %v1591_v0 = vld [vmem:[%s2149_s22 + $0x398] sm:$0xff]  ;;  %v1094_v4 = vadd.f32 %v1078_v10, %v1041_v53  ;;  %v1080_v6 = vmul.f32 %v1559_v51, %v2174_v41  ;;  %v832_v7 = vmul.f32 %v2153_v26, %v812_v52  ;;  %v2256_v10 = vld [vmem:[%s2618_s2] ss:$0 sm:$0xff]  ;;  %v1513_v37 = vld [vmem:[%s2149_s22 + $0x128] sm:$0xff] }
  0x78   : > { %v1146_v57 = vadd.f32 %v1130_v1, %v1093_v46  ;;  %v937_v5 = vadd.f32 %v921_v50, %v884_v55  ;;  %v1042_v11 = vadd.f32 %v1026_v33, %v989_v60  ;;  %v1607_v1 = vld [vmem:[%s2149_s22 + $0x418] sm:$0xff]  ;;  %v869_v12 = vmul.f32 %v1496_v58, %v2155_v27  ;;  %v1560_v18 = vld [vmem:[%s2149_s22 + $0x2a0] sm:$0xff]  ;;  %v1529_v43 = vld [vmem:[%s2149_s22 + $0x1a8] sm:$0xff] }
  0x79   : > { %v922_v13 = vmul.f32 %v1512_v59, %v2163_v32  ;;  %v1147_v15 = vadd.f32 %v1131_v21, %v1094_v4  ;;  %v1133_v17 = vmul.f32 %v1575_v63, %v2176_v42  ;;  %v975_v25 = vmul.f32 %v1528_v8, %v2166_v34  ;;  %v1576_v45 = vld [vmem:[%s2149_s22 + $0x320] sm:$0xff]  ;;  %v1545_v53 = vld [vmem:[%s2149_s22 + $0x228] sm:$0xff] }
  0x7a   : > { %v1199_v9 = vadd.f32 %v1183_v2, %v1146_v57  ;;  %v990_v16 = vadd.f32 %v974_v56, %v937_v5  ;;  %v1186_v2 = vmul.f32 %v1591_v0, %v2184_v49  ;;  %v1095_v20 = vadd.f32 %v1079_v39, %v1042_v11  ;;  %v1592_v56 = vld [vmem:[%s2149_s22 + $0x3a0] sm:$0xff]  ;;  %v1561_v63 = vld [vmem:[%s2149_s22 + $0x2a8] sm:$0xff] }
  0x7b   : > { %v885_v24 = vadd.f32 %v869_v12, %v832_v7  ;;  %v1200_v30 = vadd.f32 %v1184_v22, %v1147_v15  ;;  %v1239_v33 = vmul.f32 %v2161_v31, %v1607_v1  ;;  %v1028_v35 = vmul.f32 %v1544_v14, %v2169_v36  ;;  %v1608_v58 = vld [vmem:[%s2149_s22 + $0x420] sm:$0xff]  ;;  %v814_v7 = vld [vmem:[%s2149_s22 + $0x30] sm:$0xff]  ;;  %v1577_v12 = vld [vmem:[%s2149_s22 + $0x328] sm:$0xff] }
  0x7c   : > { %v1252_v19 = vadd.f32 %v2202_v3, %v1199_v9  ;;  %v1043_v21 = vadd.f32 %v1027_v62, %v990_v16  ;;  %v1148_v3 = vadd.f32 %v1132_v48, %v1095_v20  ;;  %v1081_v40 = vmul.f32 %v1560_v18, %v2174_v41  ;;  %v1609_v20 = vld [vmem:[%s2149_s22 + $0x428] sm:$0xff] }
  0x7d   : > { %v938_v39 = vadd.f32 %v922_v13, %v885_v24  ;;  %v1253_v22 = vadd.f32 %v2221_v23, %v1200_v30  ;;  %v833_v46 = vmul.f32 %v2153_v26, %v813_v28  ;;  %v870_v47 = vmul.f32 %v1497_v29, %v2155_v27  ;;  %v1514_v13 = vld [vmem:[%s2149_s22 + $0x130] sm:$0xff] }
  0x7e   : > { %v2269_v38 = vadd.f32 %v2256_v10, %v1252_v19  ;;  %v1096_v44 = vadd.f32 %v1080_v6, %v1043_v21  ;;  %v1201_v48 = vadd.f32 %v1185_v54, %v1148_v3  ;;  %v923_v52 = vmul.f32 %v1513_v37, %v2163_v32  ;;  %v1593_v19 = vld [vmem:[%s2149_s22 + $0x3a8] sm:$0xff] }
  0x7f   : > { %v991_v51 = vadd.f32 %v975_v25, %v938_v39  ;;  %v2283_v55 = vadd.f32 %v2256_v10, %v1253_v22  ;;  %v886_v59 = vadd.f32 %v870_v47, %v833_v46  ;;  %v976_v57 = vmul.f32 %v1529_v43, %v2166_v34  ;;  %v1499_v43 = vld [vmem:[%s2149_s22 + $0xb8] sm:$0xff]  ;;  %v1578_v47 = vld [vmem:[%s2149_s22 + $0x330] sm:$0xff] }
  0x80   : > { %v1291_v50 = vmul.f32 0.5, %v2269_v38  ;;  %v1149_v23 = vadd.f32 %v1133_v17, %v1096_v44  ;;  %v1254_v54 = vadd.f32 %v1238_v61, %v1201_v48  ;;  %v1134_v62 = vmul.f32 %v1576_v45, %v2176_v42  ;;  %v1498_v61 = vld [vmem:[%s2149_s22 + $0xb0] sm:$0xff] }
  0x81   : > { %v1044_v60 = vadd.f32 %v1028_v35, %v991_v51  ;;  %v1292_v0 = vmul.f32 0.5, %v2283_v55  ;;  %v939_v5 = vadd.f32 %v923_v52, %v886_v59  ;;  %v1029_v6 = vmul.f32 %v1545_v53, %v2169_v36  ;;  %v1530_v17 = vld [vmem:[%s2149_s22 + $0x1b0] sm:$0xff] }
  0x82   : > { %1682 = vtanh.f32 %v1291_v50  ;;  %v1202_v4 = vadd.f32 %v1186_v2, %v1149_v23  ;;  %v2306_v8 = vadd.f32 %v2256_v10, %v1254_v54  ;;  %v1187_v11 = vmul.f32 %v1592_v56, %v2184_v49  ;;  %v1562_v35 = vld [vmem:[%s2149_s22 + $0x2b0] sm:$0xff]  ;;  %v1515_v50 = vld [vmem:[%s2149_s22 + $0x138] sm:$0xff] }
  0x83   : > { %v1097_v9 = vadd.f32 %v1081_v40, %v1044_v60  ;;  %v1240_v1 = vmul.f32 %v2161_v31, %v1608_v58  ;;  %1684 = vtanh.f32 %v1292_v0  ;;  %v992_v15 = vadd.f32 %v976_v57, %v939_v5  ;;  %v815_v40 = vld [vmem:[%s2149_s22 + $0x38] sm:$0xff]  ;;  %v1594_v58 = vld [vmem:[%s2149_s22 + $0x3b0] sm:$0xff] }
  0x84   : > { %v1255_v14 = vadd.f32 %v1239_v33, %v1202_v4  ;;  %v1082_v16 = vmul.f32 %v1561_v63, %v2174_v41  ;;  %v1293_v2 = vmul.f32 0.5, %v2306_v8  ;;  %v834_v24 = vmul.f32 %v2153_v26, %v814_v7  ;;  %v1546_v33 = vld [vmem:[%s2149_s22 + $0x230] sm:$0xff]  ;;  %v1531_v23 = vld [vmem:[%s2149_s22 + $0x1b8] sm:$0xff] }
  0x85   : > { %v1150_v18 = vadd.f32 %v1134_v62, %v1097_v9  ;;  %v871_v25 = vmul.f32 %v1498_v61, %v2155_v27  ;;  %v1045_v29 = vadd.f32 %v1029_v6, %v992_v15  ;;  %v1135_v30 = vmul.f32 %v1577_v12, %v2176_v42  ;;  %v1610_v59 = vld [vmem:[%s2149_s22 + $0x430] sm:$0xff]  ;;  %v1547_v5 = vld [vmem:[%s2149_s22 + $0x238] sm:$0xff]  ;;  %v816_v15 = vld [vmem:[%s2149_s22 + $0x40] sm:$0xff] }
  0x86   : > { %v2325_v28 = vadd.f32 %v2256_v10, %v1255_v14  ;;  %v924_v21 = vmul.f32 %v1514_v13, %v2163_v32  ;;  %1686 = vtanh.f32 %v1293_v2  ;;  %v977_v39 = vmul.f32 %v1530_v17, %v2166_v34 }
  0x87   : > { %v1203_v37 = vadd.f32 %v1187_v11, %v1150_v18  ;;  %v887_v3 = vadd.f32 %v871_v25, %v834_v24  ;;  %v1098_v44 = vadd.f32 %v1082_v16, %v1045_v29  ;;  %v1188_v45 = vmul.f32 %v1593_v19, %v2184_v49  ;;  %v1563_v11 = vld [vmem:[%s2149_s22 + $0x2b8] sm:$0xff]  ;;  %v1516_v24 = vld [vmem:[%s2149_s22 + $0x140] sm:$0xff] }
  0x88   : > { %v1294_v22 = vmul.f32 0.5, %v2325_v28  ;;  %v1241_v46 = vmul.f32 %v2161_v31, %v1609_v20  ;;  %v1030_v52 = vmul.f32 %v1546_v33, %v2169_v36  ;;  %v1083_v53 = vmul.f32 %v1562_v35, %v2174_v41  ;;  %v1500_v20 = vld [vmem:[%s2149_s22 + $0xc0] sm:$0xff] }
  0x89   : > { %v1256_v48 = vadd.f32 %v1240_v1, %v1203_v37  ;;  %v940_v51 = vadd.f32 %v924_v21, %v887_v3  ;;  %v1151_v56 = vadd.f32 %v1135_v30, %v1098_v44  ;;  %v835_v57 = vmul.f32 %v2153_v26, %v815_v40  ;;  %v1579_v21 = vld [vmem:[%s2149_s22 + $0x338] sm:$0xff] }
  0x8a   : > { %1688 = vtanh.f32 %v1294_v22  ;;  %v872_v54 = vmul.f32 %v1499_v43, %v2155_v27  ;;  %v1136_v0 = vmul.f32 %v1578_v47, %v2176_v42  ;;  %v925_v4 = vmul.f32 %v1515_v50, %v2163_v32  ;;  %v1595_v44 = vld [vmem:[%s2149_s22 + $0x3b8] sm:$0xff] }
  0x8b   : > { %v2349_v62 = vadd.f32 %v2256_v10, %v1256_v48  ;;  %v993_v63 = vadd.f32 %v977_v39, %v940_v51  ;;  %v1204_v7 = vadd.f32 %v1188_v45, %v1151_v56  ;;  %v978_v9 = vmul.f32 %v1531_v23, %v2166_v34  ;;  %v1532_v39 = vld [vmem:[%s2149_s22 + $0x1c0] sm:$0xff]  ;;  %v1611_v23 = vld [vmem:[%s2149_s22 + $0x438] sm:$0xff] }
  0x8c   : > { %v1683_v60 = vpop.eup %1682  ;;  %v888_v61 = vadd.f32 %v872_v54, %v835_v57  ;;  %v1189_v13 = vmul.f32 %v1594_v58, %v2184_v49  ;;  %v1242_v14 = vmul.f32 %v2161_v31, %v1610_v59  ;;  %v1031_v19 = vmul.f32 %v1547_v5, %v2169_v36  ;;  %v1548_v51 = vld [vmem:[%s2149_s22 + $0x240] sm:$0xff] }
  0x8d   : > { %v1323_v6 = vadd.f32 1.0, %v1683_v60  ;;  %v1295_v1 = vmul.f32 0.5, %v2349_v62  ;;  %v1046_v12 = vadd.f32 %v1030_v52, %v993_v63  ;;  %v1685_v16 = vpop.eup %1684  ;;  %v1257_v2 = vadd.f32 %v1241_v46, %v1204_v7  ;;  %v1564_v59 = vld [vmem:[%s2149_s22 + $0x2c0] sm:$0xff] }
  0x8e   : > { %v941_v18 = vadd.f32 %v925_v4, %v888_v61  ;;  %v1324_v25 = vadd.f32 1.0, %v1685_v16  ;;  %v1084_v30 = vmul.f32 %v1563_v11, %v2174_v41  ;;  %v836_v3 = vmul.f32 %v2153_v26, %v816_v15  ;;  %v1580_v7 = vld [vmem:[%s2149_s22 + $0x340] sm:$0xff]  ;;  %v1501_v61 = vld [vmem:[%s2149_s22 + $0xc8] sm:$0xff] }
  0x8f   : > { %v1339_v17 = vmul.f32 0.5, %v1323_v6  ;;  %1690 = vtanh.f32 %v1295_v1  ;;  %v1099_v29 = vadd.f32 %v1083_v53, %v1046_v12  ;;  %v2373_v35 = vadd.f32 %v2256_v10, %v1257_v2  ;;  %v1596_v15 = vld [vmem:[%s2149_s22 + $0x3c0] sm:$0xff] }
  0x90   : > { %v994_v37 = vadd.f32 %v978_v9, %v941_v18  ;;  %v1687_v40 = vpop.eup %1686  ;;  %v1340_v43 = vmul.f32 0.5, %v1324_v25  ;;  %v873_v45 = vmul.f32 %v1500_v20, %v2155_v27  ;;  %v926_v46 = vmul.f32 %v1516_v24, %v2163_v32  ;;  %v1517_v9 = vld [vmem:[%s2149_s22 + $0x148] sm:$0xff]  ;;  %v1612_v20 = vld [vmem:[%s2149_s22 + $0x440] sm:$0xff] }
  0x91   : > { %v1355_v33 = vmul.f32 %v1339_v17, %v2269_v38  ;;  %v1152_v22 = vadd.f32 %v1136_v0, %v1099_v29  ;;  %v1325_v38 = vadd.f32 1.0, %v1687_v40  ;;  %v1296_v47 = vmul.f32 0.5, %v2373_v35  ;;  %v817_v0 = vld [vmem:[%s2149_s22 + $0x48] sm:$0xff] }
  0x92   : > { %v1047_v50 = vadd.f32 %v1031_v19, %v994_v37  ;;  %v1137_v48 = vmul.f32 %v1579_v21, %v2176_v42  ;;  %v1356_v52 = vmul.f32 %v1340_v43, %v2283_v55  ;;  %v889_v56 = vadd.f32 %v873_v45, %v836_v3  ;;  %v1533_v18 = vld [vmem:[%s2149_s22 + $0x1c8] sm:$0xff]  ;;  %v818_v45 = vld [vmem:[%s2149_s22 + $0x50] sm:$0xff] }
  0x93   : > { %1372 = vst.msk [vmem:[%s2367_s5] sm:$0xff] %vm1371_vm0, %v1355_v33  ;;  %v1205_v53 = vadd.f32 %v1189_v13, %v1152_v22  ;;  %v979_v58 = vmul.f32 %v1532_v39, %v2166_v34  ;;  %v1341_v54 = vmul.f32 0.5, %v1325_v38  ;;  %1692 = vtanh.f32 %v1296_v47  ;;  %v1549_v29 = vld [vmem:[%s2149_s22 + $0x248] sm:$0xff]  ;;  %v1518_v38 = vld [vmem:[%s2149_s22 + $0x150] sm:$0xff] }
  0x94   : > { %v1689_v57 = vpop.eup %1688  ;;  %v1100_v60 = vadd.f32 %v1084_v30, %v1047_v50  ;;  %v1190_v63 = vmul.f32 %v1595_v44, %v2184_v49  ;;  %1373 = vst.msk [vmem:[%s2367_s5 + $0x8] sm:$0xff] %vm1371_vm0, %v1356_v52  ;;  %v942_v5 = vadd.f32 %v926_v46, %v889_v56  ;;  %v1032_v6 = vmul.f32 %v1548_v51, %v2169_v36  ;;  %v1565_v39 = vld [vmem:[%s2149_s22 + $0x2c8] sm:$0xff]  ;;  %v1502_v46 = vld [vmem:[%s2149_s22 + $0xd0] sm:$0xff] }
  0x95   : > { %v1326_v55 = vadd.f32 1.0, %v1689_v57  ;;  %v1258_v4 = vadd.f32 %v1242_v14, %v1205_v53  ;;  %v1357_v11 = vmul.f32 %v1341_v54, %v2306_v8  ;;  %v1243_v12 = vmul.f32 %v2161_v31, %v1611_v23  ;;  %v1534_v56 = vld [vmem:[%s2149_s22 + $0x1d0] sm:$0xff]  ;;  %v1613_v57 = vld [vmem:[%s2149_s22 + $0x448] sm:$0xff] }
  0x96   : > { %v1153_v1 = vadd.f32 %v1137_v48, %v1100_v60  ;;  %v1085_v13 = vmul.f32 %v1564_v59, %v2174_v41  ;;  %v995_v17 = vadd.f32 %v979_v58, %v942_v5  ;;  %v837_v2 = vmul.f32 %v2153_v26, %v817_v0  ;;  %v1581_v48 = vld [vmem:[%s2149_s22 + $0x348] sm:$0xff] }
  0x97   : > { %v1342_v16 = vmul.f32 0.5, %v1326_v55  ;;  %v2402_v14 = vadd.f32 %v2256_v10, %v1258_v4  ;;  %1374 = vst.msk [vmem:[%s2367_s5 + $0x10] sm:$0xff] %vm1371_vm0, %v1357_v11  ;;  %v1138_v8 = vmul.f32 %v1580_v7, %v2176_v42  ;;  %v874_v24 = vmul.f32 %v1501_v61, %v2155_v27  ;;  %v1597_v59 = vld [vmem:[%s2149_s22 + $0x3c8] sm:$0xff]  ;;  %v1550_v7 = vld [vmem:[%s2149_s22 + $0x250] sm:$0xff] }
  0x98   : > { %v1206_v19 = vadd.f32 %v1190_v63, %v1153_v1  ;;  %v927_v25 = vmul.f32 %v1517_v9, %v2163_v32  ;;  %v1048_v37 = vadd.f32 %v1032_v6, %v995_v17  ;;  %v1191_v3 = vmul.f32 %v1596_v15, %v2184_v49  ;;  %v1503_v15 = vld [vmem:[%s2149_s22 + $0xd8] sm:$0xff] }
  0x99   : > { %v1691_v30 = vpop.eup %1690  ;;  %v1358_v21 = vmul.f32 %v1342_v16, %v2325_v28  ;;  %v1297_v33 = vmul.f32 0.5, %v2402_v14  ;;  %v890_v22 = vadd.f32 %v874_v24, %v837_v2  ;;  %v980_v44 = vmul.f32 %v1533_v18, %v2166_v34  ;;  %v1519_v2 = vld [vmem:[%s2149_s22 + $0x158] sm:$0xff]  ;;  %v1582_v24 = vld [vmem:[%s2149_s22 + $0x350] sm:$0xff] }
  0x9a   : > { %v1327_v40 = vadd.f32 1.0, %v1691_v30  ;;  %v1259_v43 = vadd.f32 %v1243_v12, %v1206_v19  ;;  %v1101_v28 = vadd.f32 %v1085_v13, %v1048_v37  ;;  %v1244_v47 = vmul.f32 %v2161_v31, %v1612_v20  ;;  %v1566_v12 = vld [vmem:[%s2149_s22 + $0x2d0] sm:$0xff]  ;;  %v819_v13 = vld [vmem:[%s2149_s22 + $0x58] sm:$0xff] }
  0x9b   : > { %1375 = vst.msk [vmem:[%s2367_s5 + $0x18] sm:$0xff] %vm1371_vm0, %v1358_v21  ;;  %1694 = vtanh.f32 %v1297_v33  ;;  %v1033_v50 = vmul.f32 %v1549_v29, %v2169_v36  ;;  %v943_v53 = vadd.f32 %v927_v25, %v890_v22  ;;  %v1086_v23 = vmul.f32 %v1565_v39, %v2174_v41  ;;  %v1535_v25 = vld [vmem:[%s2149_s22 + $0x1d8] sm:$0xff]  ;;  %v1598_v21 = vld [vmem:[%s2149_s22 + $0x3d0] sm:$0xff] }
  0x9c   : > { %v1343_v51 = vmul.f32 0.5, %v1327_v40  ;;  %v2427_v52 = vadd.f32 %v2256_v10, %v1259_v43  ;;  %v1154_v58 = vadd.f32 %v1138_v8, %v1101_v28  ;;  %v838_v54 = vmul.f32 %v2153_v26, %v818_v45  ;;  %v1614_v33 = vld [vmem:[%s2149_s22 + $0x450] sm:$0xff] }
  0x9d   : > { %v875_v60 = vmul.f32 %v1502_v46, %v2155_v27  ;;  %v928_v63 = vmul.f32 %v1518_v38, %v2163_v32  ;;  %v1693_v0 = vpop.eup %1692  ;;  %v996_v5 = vadd.f32 %v980_v44, %v943_v53  ;;  %v1139_v6 = vmul.f32 %v1581_v48, %v2176_v42  ;;  %v1551_v44 = vld [vmem:[%s2149_s22 + $0x258] sm:$0xff] }
  0x9e   : > { %v1359_v55 = vmul.f32 %v1343_v51, %v2349_v62  ;;  %v1298_v4 = vmul.f32 0.5, %v2427_v52  ;;  %v1328_v61 = vadd.f32 1.0, %v1693_v0  ;;  %v1207_v9 = vadd.f32 %v1191_v3, %v1154_v58  ;;  %v1536_v0 = vld [vmem:[%s2149_s22 + $0x1e0] sm:$0xff] }
  0x9f   : > { %v891_v11 = vadd.f32 %v875_v60, %v838_v54  ;;  %v981_v1 = vmul.f32 %v1534_v56, %v2166_v34  ;;  %v1049_v62 = vadd.f32 %v1033_v50, %v996_v5  ;;  %v1192_v16 = vmul.f32 %v1597_v59, %v2184_v49  ;;  %v820_v50 = vld [vmem:[%s2149_s22 + $0x60] sm:$0xff]  ;;  %v1583_v60 = vld [vmem:[%s2149_s22 + $0x358] sm:$0xff] }
  0xa0   : > { %1376 = vst.msk [vmem:[%s2367_s5 + $0x20] sm:$0xff] %vm1371_vm0, %v1359_v55  ;;  %1696 = vtanh.f32 %v1298_v4  ;;  %v1245_v17 = vmul.f32 %v2161_v31, %v1613_v57  ;;  %v1344_v18 = vmul.f32 0.5, %v1328_v61  ;;  %v1260_v19 = vadd.f32 %v1244_v47, %v1207_v9  ;;  %v1567_v47 = vld [vmem:[%s2149_s22 + $0x2d8] sm:$0xff]  ;;  %v1504_v56 = vld [vmem:[%s2149_s22 + $0xe0] sm:$0xff] }
  0xa1   : > { %v944_v8 = vadd.f32 %v928_v63, %v891_v11  ;;  %v1034_v20 = vmul.f32 %v1550_v7, %v2169_v36  ;;  %v1102_v29 = vadd.f32 %v1086_v23, %v1049_v62  ;;  %v1087_v30 = vmul.f32 %v1566_v12, %v2174_v41  ;;  %v1520_v63 = vld [vmem:[%s2149_s22 + $0x160] sm:$0xff]  ;;  %v1599_v9 = vld [vmem:[%s2149_s22 + $0x3d8] sm:$0xff] }
  0xa2   : > { %v839_v37 = vmul.f32 %v2153_v26, %v819_v13  ;;  %v876_v3 = vmul.f32 %v1503_v15, %v2155_v27  ;;  %v1360_v39 = vmul.f32 %v1344_v18, %v2373_v35  ;;  %v2459_v40 = vadd.f32 %v2256_v10, %v1260_v19  ;;  %v1615_v11 = vld [vmem:[%s2149_s22 + $0x458] sm:$0xff] }
  0xa3   : > { %v997_v43 = vadd.f32 %v981_v1, %v944_v8  ;;  %v929_v22 = vmul.f32 %v1519_v2, %v2163_v32  ;;  %v1155_v45 = vadd.f32 %v1139_v6, %v1102_v29  ;;  %v1140_v46 = vmul.f32 %v1582_v24, %v2176_v42  ;;  %v821_v24 = vld [vmem:[%s2149_s22 + $0x68] sm:$0xff] }
  0xa4   : > { %v892_v38 = vadd.f32 %v876_v3, %v839_v37  ;;  %v982_v28 = vmul.f32 %v1535_v25, %v2166_v34  ;;  %1377 = vst.msk [vmem:[%s2367_s5 + $0x28] sm:$0xff] %vm1371_vm0, %v1360_v39  ;;  %v1299_v48 = vmul.f32 0.5, %v2459_v40  ;;  %v1193_v53 = vmul.f32 %v1598_v21, %v2184_v49 }
  0xa5   : > { %v1695_v35 = vpop.eup %1694  ;;  %v1050_v51 = vadd.f32 %v1034_v20, %v997_v43  ;;  %v1246_v23 = vmul.f32 %v2161_v31, %v1614_v33  ;;  %v1208_v59 = vadd.f32 %v1192_v16, %v1155_v45  ;;  %v1035_v54 = vmul.f32 %v1551_v44, %v2169_v36  ;;  %v1552_v16 = vld [vmem:[%s2149_s22 + $0x260] sm:$0xff]  ;;  %v1505_v33 = vld [vmem:[%s2149_s22 + $0xe8] sm:$0xff] }
  0xa6   : > { %v1329_v58 = vadd.f32 1.0, %v1695_v35  ;;  %v945_v57 = vadd.f32 %v929_v22, %v892_v38  ;;  %1698 = vtanh.f32 %v1299_v48  ;;  %v1088_v4 = vmul.f32 %v1567_v47, %v2174_v41  ;;  %v1568_v20 = vld [vmem:[%s2149_s22 + $0x2e0] sm:$0xff]  ;;  %v1521_v22 = vld [vmem:[%s2149_s22 + $0x168] sm:$0xff] }
  0xa7   : > { %v1103_v55 = vadd.f32 %v1087_v30, %v1050_v51  ;;  %v840_v5 = vmul.f32 %v2153_v26, %v820_v50  ;;  %v1261_v7 = vadd.f32 %v1245_v17, %v1208_v59  ;;  %v877_v1 = vmul.f32 %v1504_v56, %v2155_v27  ;;  %v1584_v43 = vld [vmem:[%s2149_s22 + $0x360] sm:$0xff] }
  0xa8   : > { %v1345_v6 = vmul.f32 0.5, %v1329_v58  ;;  %v998_v61 = vadd.f32 %v982_v28, %v945_v57  ;;  %v1141_v13 = vmul.f32 %v1583_v60, %v2176_v42  ;;  %v930_v15 = vmul.f32 %v1520_v63, %v2163_v32  ;;  %v1537_v28 = vld [vmem:[%s2149_s22 + $0x1e8] sm:$0xff]  ;;  %v1600_v35 = vld [vmem:[%s2149_s22 + $0x3e0] sm:$0xff] }
  0xa9   : > { %v1156_v12 = vadd.f32 %v1140_v46, %v1103_v55  ;;  %v983_v62 = vmul.f32 %v1536_v0, %v2166_v34  ;;  %v2488_v17 = vadd.f32 %v2256_v10, %v1261_v7  ;;  %v893_v8 = vadd.f32 %v877_v1, %v840_v5  ;;  %v1616_v48 = vld [vmem:[%s2149_s22 + $0x460] sm:$0xff]  ;;  %v1569_v0 = vld [vmem:[%s2149_s22 + $0x2e8] sm:$0xff]  ;;  %v822_v55 = vld [vmem:[%s2149_s22 + $0x70] sm:$0xff] }
  0xaa   : > { %v1697_v2 = vpop.eup %1696  ;;  %v1361_v18 = vmul.f32 %v1345_v6, %v2402_v14  ;;  %v1051_v19 = vadd.f32 %v1035_v54, %v998_v61  ;;  %v1194_v30 = vmul.f32 %v1599_v9, %v2184_v49  ;;  %v1247_v21 = vmul.f32 %v2161_v31, %v1615_v11 }
  0xab   : > { %v1330_v25 = vadd.f32 1.0, %v1697_v2  ;;  %v1209_v29 = vadd.f32 %v1193_v53, %v1156_v12  ;;  %v1300_v14 = vmul.f32 0.5, %v2488_v17  ;;  %v946_v3 = vadd.f32 %v930_v15, %v893_v8  ;;  %v1553_v53 = vld [vmem:[%s2149_s22 + $0x268] sm:$0xff]  ;;  %v1522_v15 = vld [vmem:[%s2149_s22 + $0x170] sm:$0xff] }
  0xac   : > { %1378 = vst.msk [vmem:[%s2367_s5 + $0x30] sm:$0xff] %vm1371_vm0, %v1361_v18  ;;  %v1104_v37 = vadd.f32 %v1088_v4, %v1051_v19  ;;  %v1036_v39 = vmul.f32 %v1552_v16, %v2169_v36  ;;  %v1089_v46 = vmul.f32 %v1568_v20, %v2174_v41  ;;  %v841_v38 = vmul.f32 %v2153_v26, %v821_v24  ;;  %v1506_v4 = vld [vmem:[%s2149_s22 + $0xf0] sm:$0xff] }
  0xad   : > { %v1346_v44 = vmul.f32 0.5, %v1330_v25  ;;  %v1262_v45 = vadd.f32 %v1246_v23, %v1209_v29  ;;  %1700 = vtanh.f32 %v1300_v14  ;;  %v999_v50 = vadd.f32 %v983_v62, %v946_v3  ;;  %v1538_v62 = vld [vmem:[%s2149_s22 + $0x1f0] sm:$0xff]  ;;  %v1601_v25 = vld [vmem:[%s2149_s22 + $0x3e8] sm:$0xff] }
  0xae   : > { %v1157_v47 = vadd.f32 %v1141_v13, %v1104_v37  ;;  %v878_v51 = vmul.f32 %v1505_v33, %v2155_v27  ;;  %v1142_v58 = vmul.f32 %v1584_v43, %v2176_v42  ;;  %v931_v59 = vmul.f32 %v1521_v22, %v2163_v32  ;;  %v1585_v13 = vld [vmem:[%s2149_s22 + $0x368] sm:$0xff]  ;;  %v1570_v3 = vld [vmem:[%s2149_s22 + $0x2f0] sm:$0xff] }
  0xaf   : > { %v1362_v56 = vmul.f32 %v1346_v44, %v2427_v52  ;;  %v2510_v23 = vadd.f32 %v2256_v10, %v1262_v45  ;;  %v1052_v54 = vadd.f32 %v1036_v39, %v999_v50  ;;  %v984_v63 = vmul.f32 %v1537_v28, %v2166_v34  ;;  %v1617_v29 = vld [vmem:[%s2149_s22 + $0x468] sm:$0xff]  ;;  %v823_v45 = vld [vmem:[%s2149_s22 + $0x78] sm:$0xff] }
  0xb0   : > { %v1210_v57 = vadd.f32 %v1194_v30, %v1157_v47  ;;  %v894_v60 = vadd.f32 %v878_v51, %v841_v38  ;;  %v1699_v5 = vpop.eup %1698  ;;  %v1195_v6 = vmul.f32 %v1600_v35, %v2184_v49  ;;  %v1248_v7 = vmul.f32 %v2161_v31, %v1616_v48  ;;  %v1554_v30 = vld [vmem:[%s2149_s22 + $0x270] sm:$0xff]  ;;  %v1523_v48 = vld [vmem:[%s2149_s22 + $0x178] sm:$0xff] }
  0xb1   : > { %1379 = vst.msk [vmem:[%s2367_s5 + $0x38] sm:$0xff] %vm1371_vm0, %v1362_v56  ;;  %v1301_v52 = vmul.f32 0.5, %v2510_v23  ;;  %v1037_v61 = vmul.f32 %v1553_v53, %v2169_v36  ;;  %v1331_v9 = vadd.f32 1.0, %v1699_v5  ;;  %v1105_v1 = vadd.f32 %v1089_v46, %v1052_v54  ;;  %v1507_v46 = vld [vmem:[%s2149_s22 + $0xf8] sm:$0xff]  ;;  %v1586_v35 = vld [vmem:[%s2149_s22 + $0x370] sm:$0xff] }
  0xb2   : > { %v1263_v11 = vadd.f32 %v1247_v21, %v1210_v57  ;;  %v947_v12 = vadd.f32 %v931_v59, %v894_v60  ;;  %v1090_v16 = vmul.f32 %v1569_v0, %v2174_v41  ;;  %v842_v2 = vmul.f32 %v2153_v26, %v822_v55  ;;  %v1602_v54 = vld [vmem:[%s2149_s22 + $0x3f0] sm:$0xff] }
  0xb3   : > { %1702 = vtanh.f32 %v1301_v52  ;;  %v879_v18 = vmul.f32 %v1506_v4, %v2155_v27  ;;  %v1347_v19 = vmul.f32 0.5, %v1331_v9  ;;  %v1158_v20 = vadd.f32 %v1142_v58, %v1105_v1  ;;  %v1539_v58 = vld [vmem:[%s2149_s22 + $0x1f8] sm:$0xff] }
  0xb4   : > { %v2531_v8 = vadd.f32 %v2256_v10, %v1263_v11  ;;  %v1000_v24 = vadd.f32 %v984_v63, %v947_v12  ;;  %v1143_v21 = vmul.f32 %v1585_v13, %v2176_v42  ;;  %v932_v14 = vmul.f32 %v1522_v15, %v2163_v32  ;;  %v1555_v52 = vld [vmem:[%s2149_s22 + $0x278] sm:$0xff] }
  0xb5   : > { %v895_v33 = vadd.f32 %v879_v18, %v842_v2  ;;  %v985_v37 = vmul.f32 %v1538_v62, %v2166_v34  ;;  %v1363_v39 = vmul.f32 %v1347_v19, %v2459_v40  ;;  %v1211_v22 = vadd.f32 %v1195_v6, %v1158_v20  ;;  %v1571_v12 = vld [vmem:[%s2149_s22 + $0x2f8] sm:$0xff] }
  0xb6   : > { %v1302_v43 = vmul.f32 0.5, %v2531_v8  ;;  %v1053_v44 = vadd.f32 %v1037_v61, %v1000_v24  ;;  %v1196_v38 = vmul.f32 %v1601_v25, %v2184_v49  ;;  %v1249_v28 = vmul.f32 %v2161_v31, %v1617_v29  ;;  %v1587_v19 = vld [vmem:[%s2149_s22 + $0x378] sm:$0xff] }
  0xb7   : > { %v948_v47 = vadd.f32 %v932_v14, %v895_v33  ;;  %v1038_v50 = vmul.f32 %v1554_v30, %v2169_v36  ;;  %v1701_v51 = vpop.eup %1700  ;;  %1380 = vst.msk [vmem:[%s2367_s5 + $0x40] sm:$0xff] %vm1371_vm0, %v1363_v39  ;;  %v1264_v40 = vadd.f32 %v1248_v7, %v1211_v22  ;;  %v1091_v56 = vmul.f32 %v1570_v3, %v2174_v41  ;;  %v1603_v30 = vld [vmem:[%s2149_s22 + $0x3f8] sm:$0xff] }
  0xb8   : > { %1704 = vtanh.f32 %v1302_v43  ;;  %v1106_v53 = vadd.f32 %v1090_v16, %v1053_v44  ;;  %v1332_v59 = vadd.f32 1.0, %v1701_v51  ;;  %v843_v60 = vmul.f32 %v2153_v26, %v823_v45  ;;  %v1619_v39 = vld [vmem:[%s2149_s22 + $0x478] sm:$0xff] }
  0xb9   : > { %v1001_v57 = vadd.f32 %v985_v37, %v948_v47  ;;  %v880_v63 = vmul.f32 %v1507_v46, %v2155_v27  ;;  %v1287_v0 = vadd.f32 %v2256_v10, %v1264_v40  ;;  %v1144_v4 = vmul.f32 %v1586_v35, %v2176_v42  ;;  %v1618_v27 = vld [vmem:[%s2149_s22 + $0x470] sm:$0xff] }
  0xba   : > { %v1159_v55 = vadd.f32 %v1143_v21, %v1106_v53  ;;  %v933_v5 = vmul.f32 %v1523_v48, %v2163_v32  ;;  %v1348_v6 = vmul.f32 0.5, %v1332_v59  ;;  %v986_v9 = vmul.f32 %v1539_v58, %v2166_v34 }
  0xbb   : > { %v1054_v7 = vadd.f32 %v1038_v50, %v1001_v57  ;;  %v896_v61 = vadd.f32 %v880_v63, %v843_v60  ;;  %v1303_v11 = vmul.f32 0.5, %v1287_v0  ;;  %v1197_v26 = vmul.f32 %v1602_v54, %v2184_v49 }
  0xbc   : > { %v1212_v1 = vadd.f32 %v1196_v38, %v1159_v55  ;;  %v1364_v15 = vmul.f32 %v1348_v6, %v2488_v17  ;;  %v1039_v16 = vmul.f32 %v1555_v52, %v2169_v36  ;;  %v1250_v20 = vmul.f32 %v2161_v31, %v1618_v27 }
  0xbd   : > { %v1703_v13 = vpop.eup %1702  ;;  %v1107_v62 = vadd.f32 %v1091_v56, %v1054_v7  ;;  %v949_v32 = vadd.f32 %v933_v5, %v896_v61  ;;  %1706 = vtanh.f32 %v1303_v11  ;;  %v1092_v25 = vmul.f32 %v1571_v12, %v2174_v41 }
  0xbe   : > { %v1333_v2 = vadd.f32 1.0, %v1703_v13  ;;  %v1265_v18 = vadd.f32 %v1249_v28, %v1212_v1  ;;  %1381 = vst.msk [vmem:[%s2367_s5 + $0x48] sm:$0xff] %vm1371_vm0, %v1364_v15  ;;  %v1145_v33 = vmul.f32 %v1587_v19, %v2176_v42  ;;  %v1198_v44 = vmul.f32 %v1603_v30, %v2184_v49  ;;  %v1714_v42 = vld [vmem:[%s2617_s1 + $0x8] ss:$0 sm:$0xff] }
  0xbf   : > { %v1160_v34 = vadd.f32 %v1144_v4, %v1107_v62  ;;  %v1002_v24 = vadd.f32 %v986_v9, %v949_v32 }
  0xc0   : > { %v1349_v29 = vmul.f32 0.5, %v1333_v2  ;;  %v1288_v17 = vadd.f32 %v2256_v10, %v1265_v18 }
  0xc1   : > { %v1213_v21 = vadd.f32 %v1197_v26, %v1160_v34  ;;  %v1055_v36 = vadd.f32 %v1039_v16, %v1002_v24 }
  0xc2   : > { %v1705_v14 = vpop.eup %1704  ;;  %v1365_v37 = vmul.f32 %v1349_v29, %v2510_v23  ;;  %v1304_v3 = vmul.f32 0.5, %v1288_v17  ;;  %v1251_v23 = vmul.f32 %v1714_v42, %v1619_v39 }
  0xc3   : > { %v1334_v43 = vadd.f32 1.0, %v1705_v14  ;;  %v1266_v31 = vadd.f32 %v1250_v20, %v1213_v21  ;;  %v1108_v22 = vadd.f32 %v1092_v25, %v1055_v36 }
  0xc4   : > { %1382 = vst.msk [vmem:[%s2367_s5 + $0x50] sm:$0xff] %vm1371_vm0, %v1365_v37  ;;  %1708 = vtanh.f32 %v1304_v3 }
  0xc5   : > { %v1350_v41 = vmul.f32 0.5, %v1334_v43  ;;  %v1289_v45 = vadd.f32 %v2256_v10, %v1266_v31  ;;  %v1161_v46 = vadd.f32 %v1145_v33, %v1108_v22 }
  0xc7   : > { %v1366_v38 = vmul.f32 %v1350_v41, %v2531_v8  ;;  %v1305_v28 = vmul.f32 0.5, %v1289_v45  ;;  %v1214_v47 = vadd.f32 %v1198_v44, %v1161_v46  ;;  %v1707_v50 = vpop.eup %1706 }
  0xc8   : > { %v1335_v49 = vadd.f32 1.0, %v1707_v50 }
  0xc9   : > { %1383 = vst.msk [vmem:[%s2367_s5 + $0x58] sm:$0xff] %vm1371_vm0, %v1366_v38  ;;  %1710 = vtanh.f32 %v1305_v28  ;;  %v1267_v35 = vadd.f32 %v1251_v23, %v1214_v47 }
  0xca   : > { %v1351_v48 = vmul.f32 0.5, %v1335_v49 }
  0xcb   : > { %v1290_v51 = vadd.f32 %v2256_v10, %v1267_v35 }
  0xcc   : > { %v1367_v40 = vmul.f32 %v1351_v48, %v1287_v0 }
  0xcd   : > { %v1306_v53 = vmul.f32 0.5, %v1290_v51 }
  0xce   : > { %v1709_v56 = vpop.eup %1708  ;;  %1384 = vst.msk [vmem:[%s2367_s5 + $0x60] sm:$0xff] %vm1371_vm0, %v1367_v40 }
  0xcf   : > { %v1336_v8 = vadd.f32 1.0, %v1709_v56  ;;  %1712 = vtanh.f32 %v1306_v53 }
  0xd1   : > { %v1352_v58 = vmul.f32 0.5, %v1336_v8 }
  0xd3   : > { %v1711_v59 = vpop.eup %1710  ;;  %v1368_v57 = vmul.f32 %v1352_v58, %v1288_v17 }
  0xd4   : > { %v1337_v54 = vadd.f32 1.0, %v1711_v59 }
  0xd5   : > { %1385 = vst.msk [vmem:[%s2367_s5 + $0x68] sm:$0xff] %vm1371_vm0, %v1368_v57 }
  0xd6   : > { %v1353_v60 = vmul.f32 0.5, %v1337_v54 }
  0xd8   : > { %v1369_v63 = vmul.f32 %v1353_v60, %v1289_v45 }
  0xd9   : > { %v1713_v55 = vpop.eup %1712 }
  0xda   : > { %1386 = vst.msk [vmem:[%s2367_s5 + $0x70] sm:$0xff] %vm1371_vm0, %v1369_v63  ;;  %v1338_v10 = vadd.f32 1.0, %v1713_v55 }
  0xdc   : > { %v1354_v0 = vmul.f32 0.5, %v1338_v10 }
  0xde   : > { %v1370_v4 = vmul.f32 %v1354_v0, %v1290_v51 }
  0xe0   : > { %1387 = vst.msk [vmem:[%s2367_s5 + $0x78] sm:$0xff] %vm1371_vm0, %v1370_v4 }
  0xe1 PF: > { %s13_s18 = sadd.s32 1, %s1769_s18   ;;  %s2621_s12 = smov %s1749_s13 }
  0xe2   : > { %p10_p12 = scmp.ge.s32.totalorder %s13_s18, 6   ;;  %s2622_s13 = smov %s1842_s25 }
  0xe3   : > { %s2623_s14 = smov %s1761_s16  ;;  %s2624_s15 = smov %s1765_s17 }
  0xe4   : > { %s2625_s16 = smov %s2628_s19  ;;  %s2626_s17 = smov %s2632_s20 }
  0xe5   :  { %12 = sbr.rel (!%p10_p12) target bundleno = 4 (0x4), region = 113 }

// kernel: efficientnet_forward.26
= control target key start
LH: loop header
LB: loop body
LE: loop exit
PB: predicated region body
PF: predicated region fallthrough
CT: control target
= control target key end

     0   :  { %s737_s12 = smov 0   ;;  %s739_s13 = smov 0   ;;  %s910_s0 = inlined_call_operand.vmem [shape: f32[2,256,16], index: 0, kind: input, shape index: {}]   ;;  %s911_s1 = inlined_call_operand.vmem [shape: f32[16,96], index: 1, kind: input, shape index: {}]   ;;  %s912_s2 = inlined_call_operand.vmem [shape: f32[1,96], index: 2, kind: input, shape index: {}]   ;;  %s913_s3 = inlined_call_operand.vmem [shape: f32[2,256,96], index: 3, kind: output, shape index: {}]  }
   0x1   :  { %s741_s14 = smov 0   ;;  %s743_s15 = smov 0  }
   0x2   :  { %s745_s16 = smov 0  }
   0x3 LB: > { %s22_s17 = sadd.s32 1, %s707_s14  ;;  %s25_s18 = sadd.s32 1, %s711_s15  ;;  %s715_s16 = sphi %s745_s16, %s13_s16   ;;  %s711_s15 = sphi %s743_s15, %s917_s15   ;;  %s707_s14 = sphi %s741_s14, %s916_s14   ;;  %s703_s13 = sphi %s739_s13, %s915_s13   ;;  %s699_s12 = sphi %s737_s12, %s914_s12  }
   0x4   : > { %p23_p0 = scmp.ge.s32.totalorder %s22_s17, 2  ;;  %p558_p1 = scmp.ge.s32.totalorder %s715_s16, 1 }
   0x5   : > { %p158_p2 = scmp.lt.s32.totalorder %s715_s16, 5 }
   0x6   : > { %s919_s17 = smov (%p23_p0, %s22_s17), 0  ;;  %s921_s18 = smov (!%p23_p0, %s25_s18), %s711_s15 }
   0x7   : > { %p159_p3 = pnand %p558_p1, %p158_p2  ;;  %p27_p4 = scmp.ge.s32.totalorder %s921_s18, 2 }
   0x8   : > { %v235_v0 = vld [vmem:[%s911_s1] sm:$0xff] (!%p159_p3)  ;;  %v236_v1 = vld [vmem:[%s911_s1 + $0x8] sm:$0xff] (!%p159_p3)  ;;  %s559_s23 = sshll.u32 (!%p159_p3), %s699_s12, 4  ;;  %p191_p5 = scmp.lt.s32.totalorder (!%p159_p3), %s703_s13, 1  ;;  %vm245_vm0 = vcmask (!%p159_p3), 130048   ;;  %vm447_vm1 = vcmask (!%p159_p3), 785408  }
   0x9   : > { %s923_s18 = smov (%p27_p4, %s921_s18), 0  ;;  %162 = sbr.rel (%p159_p3) target bundleno = 274 (0x112), region = 32 }
   0xa   : > { %v237_v2 = vpack.c.bf16 (!%p159_p3), %v236_v1, %v235_v0  ;;  %p193_p6 = scmp.lt.s32.totalorder (!%p159_p3), %s559_s23, 31  ;;  %v565_v27 = vld [vmem:[%s912_s2] ss:$0 sm:$0xff] (!%p159_p3) }
   0xc   : > { %585 = vmatprep.subr.bf16.mxu0 (!%p159_p3), %v237_v2  ;;  %603 = vmatprep.subr.bf16.mxu1 (!%p159_p3), %v237_v2 }
   0xd   : > { %586 = vmatpush3.bf16.msra.mxu0 (!%p159_p3), %v237_v2  ;;  %604 = vmatpush3.bf16.msra.mxu1 (!%p159_p3), %v237_v2 }
  0x10   : > { %s925_s13 = smov (!%p191_p5, %s703_s13), 1  ;;  %s927_s23 = smov (!%p193_p6, %s559_s23), 31 }
  0x11   : > { %s560_s24 = sshll.u32 %s925_s13, 5 }
  0x12   : > { %s773_s25 = sadd.s32 %s560_s24, %s927_s23 }
  0x13   : > { %s561_s26 = sshll.u32 %s773_s25, 3 }
  0x14   : > { %s198_s29 = scalar_lea.vmem %s910_s0, %s561_s26  ;;  %s845_s7 = scalar_lea.vmem %s913_s3, %s561_s26 }
  0x15   : > { %v211_v3 = vld [vmem:[%s198_s29] sm:$0xff]  ;;  %v212_v4 = vld [vmem:[%s198_s29 + $0x8] sm:$0xff]  ;;  %v213_v8 = vld [vmem:[%s198_s29 + $0x10] sm:$0xff] }
  0x16   : > { %v219_v5 = vld [vmem:[%s198_s29 + $0x40] sm:$0xff]  ;;  %v227_v6 = vpack.c.bf16 %v212_v4, %v211_v3  ;;  %v220_v7 = vld [vmem:[%s198_s29 + $0x48] sm:$0xff]  ;;  %v214_v9 = vld [vmem:[%s198_s29 + $0x18] sm:$0xff] }
  0x17   : > { %v231_v10 = vpack.c.bf16 %v220_v7, %v219_v5  ;;  %v228_v11 = vpack.c.bf16 %v214_v9, %v213_v8  ;;  %v221_v12 = vld [vmem:[%s198_s29 + $0x50] sm:$0xff]  ;;  %v222_v13 = vld [vmem:[%s198_s29 + $0x58] sm:$0xff]  ;;  %v215_v14 = vld [vmem:[%s198_s29 + $0x20] sm:$0xff] }
  0x18   : > { %587 = vmatprep.mubr.msk.bf16.mxu0 %vm245_vm0, %v227_v6  ;;  %v232_v15 = vpack.c.bf16 %v222_v13, %v221_v12  ;;  %v216_v16 = vld [vmem:[%s198_s29 + $0x28] sm:$0xff]  ;;  %v223_v17 = vld [vmem:[%s198_s29 + $0x60] sm:$0xff]  ;;  %v217_v21 = vld [vmem:[%s198_s29 + $0x30] sm:$0xff] }
  0x19   : > { %v224_v18 = vld [vmem:[%s198_s29 + $0x68] sm:$0xff]  ;;  %595 = vmatprep.mubr.msk.bf16.mxu1 %vm245_vm0, %v231_v10  ;;  %588 = vmatmul.mubr.msk.bf16.vlgmr.msra.gmra.mrb[0].mxu0 %vm245_vm0, %v228_v11  ;;  %v229_v19 = vpack.c.bf16 %v216_v16, %v215_v14  ;;  %v218_v22 = vld [vmem:[%s198_s29 + $0x38] sm:$0xff]  ;;  %v225_v23 = vld [vmem:[%s198_s29 + $0x70] sm:$0xff] }
  0x1a   : > { %v233_v20 = vpack.c.bf16 %v224_v18, %v223_v17  ;;  %596 = vmatmul.mubr.msk.bf16.vlgmr.msra.gmra.mrb[0].mxu1 %vm245_vm0, %v232_v15  ;;  %v226_v24 = vld [vmem:[%s198_s29 + $0x78] sm:$0xff]  ;;  %v230_v25 = vpack.c.bf16 %v218_v22, %v217_v21 }
  0x1b   : > { %591 = vmatprep.mubr.msk.bf16.mxu0 %vm245_vm0, %v229_v19  ;;  %v234_v26 = vpack.c.bf16 %v226_v24, %v225_v23 }
  0x1c   : > { %599 = vmatprep.mubr.msk.bf16.mxu1 %vm245_vm0, %v233_v20 }
  0x21   : > { %592 = vmatmul.mubr.msk.bf16.gmra.mrb[4].mxu0 %vm245_vm0, %v230_v25 }
  0x22   : > { %600 = vmatmul.mubr.msk.bf16.gmra.mrb[4].mxu1 %vm245_vm0, %v234_v26 }
  0xec   : > { %v589_v28 = vpop.f32.mrb[0].mxu0 }
  0xed   : > { %v792_v29 = vadd.f32 %v589_v28, %v565_v27  ;;  %v597_v30 = vpop.f32.mrb[0].mxu1  ;;  %v304_v31 = vpop.f32.mrb[1].mxu0 }
  0xee   : > { %v794_v32 = vadd.f32 %v597_v30, %v565_v27  ;;  %v796_v33 = vadd.f32 %v565_v27, %v304_v31  ;;  %v336_v34 = vpop.f32.mrb[1].mxu1  ;;  %v590_v35 = vpop.f32.mrb[2].mxu0 }
  0xef   : > { %v369_v36 = vmul.f32 0.5, %v792_v29  ;;  %v799_v37 = vadd.f32 %v565_v27, %v336_v34  ;;  %v801_v38 = vadd.f32 %v590_v35, %v565_v27  ;;  %v598_v39 = vpop.f32.mrb[2].mxu1  ;;  %v307_v40 = vpop.f32.mrb[3].mxu0 }
  0xf0   : > { %v377_v41 = vmul.f32 0.5, %v794_v32  ;;  %v367_v42 = vmul.f32 0.5, %v796_v33  ;;  %v805_v43 = vadd.f32 %v598_v39, %v565_v27  ;;  %v807_v44 = vadd.f32 %v565_v27, %v307_v40  ;;  %v339_v45 = vpop.f32.mrb[3].mxu1 }
  0xf1   : > { %645 = vtanh.f32 %v369_v36  ;;  %v375_v46 = vmul.f32 0.5, %v799_v37  ;;  %v370_v47 = vmul.f32 0.5, %v801_v38  ;;  %v811_v48 = vadd.f32 %v565_v27, %v339_v45 }
  0xf2   : > { %647 = vtanh.f32 %v377_v41  ;;  %v378_v49 = vmul.f32 0.5, %v805_v43  ;;  %v368_v50 = vmul.f32 0.5, %v807_v44 }
  0xf3   : > { %649 = vtanh.f32 %v367_v42  ;;  %v376_v51 = vmul.f32 0.5, %v811_v48 }
  0xf4   : > { %651 = vtanh.f32 %v375_v46  ;;  %v593_v52 = vpop.f32.mrb[4].mxu0 }
  0xf5   : > { %653 = vtanh.f32 %v370_v47  ;;  %v816_v53 = vadd.f32 %v593_v52, %v565_v27  ;;  %v601_v54 = vpop.f32.mrb[4].mxu1  ;;  %v320_v55 = vpop.f32.mrb[5].mxu0 }
  0xf6   : > { %655 = vtanh.f32 %v378_v49  ;;  %v818_v56 = vadd.f32 %v601_v54, %v565_v27  ;;  %v820_v57 = vadd.f32 %v565_v27, %v320_v55  ;;  %v352_v58 = vpop.f32.mrb[5].mxu1  ;;  %v594_v59 = vpop.f32.mrb[6].mxu0 }
  0xf7   : > { %657 = vtanh.f32 %v368_v50  ;;  %v373_v60 = vmul.f32 0.5, %v816_v53  ;;  %v823_v61 = vadd.f32 %v565_v27, %v352_v58  ;;  %v825_v62 = vadd.f32 %v594_v59, %v565_v27  ;;  %v602_v63 = vpop.f32.mrb[6].mxu1  ;;  %v323_v0 = vpop.f32.mrb[7].mxu0 }
  0xf8   : > { %659 = vtanh.f32 %v376_v51  ;;  %v381_v1 = vmul.f32 0.5, %v818_v56  ;;  %v371_v2 = vmul.f32 0.5, %v820_v57  ;;  %v829_v3 = vadd.f32 %v602_v63, %v565_v27  ;;  %v355_v4 = vpop.f32.mrb[7].mxu1 }
  0xf9   : > { %661 = vtanh.f32 %v373_v60  ;;  %v379_v5 = vmul.f32 0.5, %v823_v61  ;;  %v374_v6 = vmul.f32 0.5, %v825_v62  ;;  %v833_v7 = vadd.f32 %v565_v27, %v323_v0 }
  0xfa   : > { %663 = vtanh.f32 %v381_v1  ;;  %v382_v8 = vmul.f32 0.5, %v829_v3  ;;  %v836_v9 = vadd.f32 %v565_v27, %v355_v4 }
  0xfb   : > { %v646_v10 = vpop.eup %645  ;;  %665 = vtanh.f32 %v371_v2  ;;  %v372_v11 = vmul.f32 0.5, %v833_v7 }
  0xfc   : > { %v648_v12 = vpop.eup %647  ;;  %v401_v13 = vadd.f32 1.0, %v646_v10  ;;  %667 = vtanh.f32 %v379_v5  ;;  %v380_v14 = vmul.f32 0.5, %v836_v9 }
  0xfd   : > { %v650_v15 = vpop.eup %649  ;;  %v409_v16 = vadd.f32 1.0, %v648_v12  ;;  %669 = vtanh.f32 %v374_v6 }
  0xfe   : > { %v652_v17 = vpop.eup %651  ;;  %v417_v18 = vmul.f32 0.5, %v401_v13  ;;  %v399_v19 = vadd.f32 1.0, %v650_v15  ;;  %671 = vtanh.f32 %v382_v8 }
  0xff   : > { %v654_v20 = vpop.eup %653  ;;  %v425_v21 = vmul.f32 0.5, %v409_v16  ;;  %v407_v22 = vadd.f32 1.0, %v652_v17  ;;  %673 = vtanh.f32 %v372_v11 }
 0x100   : > { %v656_v23 = vpop.eup %655  ;;  %v433_v24 = vmul.f32 %v417_v18, %v792_v29  ;;  %v415_v25 = vmul.f32 0.5, %v399_v19  ;;  %v402_v26 = vadd.f32 1.0, %v654_v20  ;;  %675 = vtanh.f32 %v380_v14 }
 0x101   : > { %v658_v27 = vpop.eup %657  ;;  %v441_v28 = vmul.f32 %v425_v21, %v794_v32  ;;  %v423_v30 = vmul.f32 0.5, %v407_v22  ;;  %v410_v31 = vadd.f32 1.0, %v656_v23 }
 0x102   : > { %v660_v34 = vpop.eup %659  ;;  %450 = vst.msk [vmem:[%s845_s7 + $0x10] sm:$0xff] %vm447_vm1, %v433_v24  ;;  %v431_v35 = vmul.f32 %v415_v25, %v796_v33  ;;  %v418_v36 = vmul.f32 0.5, %v402_v26  ;;  %v400_v39 = vadd.f32 1.0, %v658_v27 }
 0x103   : > { %v662_v40 = vpop.eup %661  ;;  %458 = vst.msk [vmem:[%s845_s7 + $0x50] sm:$0xff] %vm447_vm1, %v441_v28  ;;  %v439_v29 = vmul.f32 %v423_v30, %v799_v37  ;;  %v426_v41 = vmul.f32 0.5, %v410_v31  ;;  %v408_v42 = vadd.f32 1.0, %v660_v34 }
 0x104   : > { %v664_v45 = vpop.eup %663  ;;  %448 = vst.msk [vmem:[%s845_s7] sm:$0xff] %vm447_vm1, %v431_v35  ;;  %v434_v32 = vmul.f32 %v418_v36, %v801_v38  ;;  %v416_v46 = vmul.f32 0.5, %v400_v39  ;;  %v405_v47 = vadd.f32 1.0, %v662_v40 }
 0x105   : > { %v666_v49 = vpop.eup %665  ;;  %456 = vst.msk [vmem:[%s845_s7 + $0x40] sm:$0xff] %vm447_vm1, %v439_v29  ;;  %v442_v33 = vmul.f32 %v426_v41, %v805_v43  ;;  %v424_v50 = vmul.f32 0.5, %v408_v42  ;;  %v413_v51 = vadd.f32 1.0, %v664_v45 }
 0x106   : > { %v668_v52 = vpop.eup %667  ;;  %451 = vst.msk [vmem:[%s845_s7 + $0x18] sm:$0xff] %vm447_vm1, %v434_v32  ;;  %v432_v37 = vmul.f32 %v416_v46, %v807_v44  ;;  %v421_v54 = vmul.f32 0.5, %v405_v47  ;;  %v403_v55 = vadd.f32 1.0, %v666_v49 }
 0x107   : > { %v670_v58 = vpop.eup %669  ;;  %459 = vst.msk [vmem:[%s845_s7 + $0x58] sm:$0xff] %vm447_vm1, %v442_v33  ;;  %v440_v38 = vmul.f32 %v424_v50, %v811_v48  ;;  %v429_v59 = vmul.f32 0.5, %v413_v51  ;;  %v411_v60 = vadd.f32 1.0, %v668_v52 }
 0x108   : > { %v672_v43 = vpop.eup %671  ;;  %449 = vst.msk [vmem:[%s845_s7 + $0x8] sm:$0xff] %vm447_vm1, %v432_v37  ;;  %v437_v63 = vmul.f32 %v421_v54, %v816_v53  ;;  %v419_v0 = vmul.f32 0.5, %v403_v55  ;;  %v406_v1 = vadd.f32 1.0, %v670_v58 }
 0x109   : > { %v674_v44 = vpop.eup %673  ;;  %457 = vst.msk [vmem:[%s845_s7 + $0x48] sm:$0xff] %vm447_vm1, %v440_v38  ;;  %v445_v2 = vmul.f32 %v429_v59, %v818_v56  ;;  %v427_v4 = vmul.f32 0.5, %v411_v60  ;;  %v414_v5 = vadd.f32 1.0, %v672_v43 }
 0x10a   : > { %v676_v48 = vpop.eup %675  ;;  %454 = vst.msk [vmem:[%s845_s7 + $0x30] sm:$0xff] %vm447_vm1, %v437_v63  ;;  %v435_v6 = vmul.f32 %v419_v0, %v820_v57  ;;  %v422_v8 = vmul.f32 0.5, %v406_v1  ;;  %v404_v53 = vadd.f32 1.0, %v674_v44 }
 0x10b   : > { %462 = vst.msk [vmem:[%s845_s7 + $0x70] sm:$0xff] %vm447_vm1, %v445_v2  ;;  %v443_v10 = vmul.f32 %v427_v4, %v823_v61  ;;  %v430_v11 = vmul.f32 0.5, %v414_v5  ;;  %v412_v12 = vadd.f32 1.0, %v676_v48 }
 0x10c   : > { %452 = vst.msk [vmem:[%s845_s7 + $0x20] sm:$0xff] %vm447_vm1, %v435_v6  ;;  %v438_v56 = vmul.f32 %v422_v8, %v825_v62  ;;  %v420_v13 = vmul.f32 0.5, %v404_v53 }
 0x10d   : > { %460 = vst.msk [vmem:[%s845_s7 + $0x60] sm:$0xff] %vm447_vm1, %v443_v10  ;;  %v446_v14 = vmul.f32 %v430_v11, %v829_v3  ;;  %v428_v57 = vmul.f32 0.5, %v412_v12 }
 0x10e   : > { %455 = vst.msk [vmem:[%s845_s7 + $0x38] sm:$0xff] %vm447_vm1, %v438_v56  ;;  %v436_v15 = vmul.f32 %v420_v13, %v833_v7 }
 0x10f   : > { %463 = vst.msk [vmem:[%s845_s7 + $0x78] sm:$0xff] %vm447_vm1, %v446_v14  ;;  %v444_v61 = vmul.f32 %v428_v57, %v836_v9 }
 0x110   : > { %453 = vst.msk [vmem:[%s845_s7 + $0x28] sm:$0xff] %vm447_vm1, %v436_v15 }
 0x111   : > { %461 = vst.msk [vmem:[%s845_s7 + $0x68] sm:$0xff] %vm447_vm1, %v444_v61 }
 0x112 PF: > { %s13_s16 = sadd.s32 1, %s715_s16   ;;  %s914_s12 = smov %s707_s14 }
 0x113   : > { %p10_p7 = scmp.ge.s32.totalorder %s13_s16, 6   ;;  %s915_s13 = smov %s711_s15 }
 0x114   : > { %s916_s14 = smov %s919_s17  ;;  %s917_s15 = smov %s923_s18 }
 0x115   :  { %12 = sbr.rel (!%p10_p7) target bundleno = 3 (0x3), region = 62 }

// kernel: efficientnet_forward.28
= control target key start
LH: loop header
LB: loop body
LE: loop exit
PB: predicated region body
PF: predicated region fallthrough
CT: control target
= control target key end

     0   :  { %v292_v0 = vmov 0.0|0.0   ;;  %vm293_vm0 = vmmov 0   ;;  %v294_v4 = vmov 0.0   ;;  %vm40_vm1 = vcmask 785408   ;;  %s376_s1 = inlined_call_operand.vmem [shape: f32[96,4], index: 1, kind: input, shape index: {}]   ;;  %s377_s0 = inlined_call_operand.vmem [shape: f32[2,96], index: 0, kind: input, shape index: {}]   ;;  %s378_s3 = inlined_call_operand.vmem [shape: f32[4,96], index: 3, kind: input, shape index: {}]   ;;  %s379_s2 = inlined_call_operand.vmem [shape: f32[1,4], index: 2, kind: input, shape index: {}]   ;;  %s380_s4 = inlined_call_operand.vmem [shape: f32[1,96], index: 4, kind: input, shape index: {}]   ;;  %s381_s5 = inlined_call_operand.vmem [shape: f32[2,96], index: 5, kind: output, shape index: {}]  }
   0x1   :  { %267 = vmatprep.subr.bf16.mxu0 %v292_v0  ;;  %v21_v1 = vld [vmem:[%s376_s1] sm:$0xff]  ;;  %v22_v2 = vld [vmem:[%s376_s1 + $0x8] sm:$0xff]  ;;  %v23_v3 = vld [vmem:[%s376_s1 + $0x10] sm:$0xff]  ;;  %259 = vmatprep.mubr.msk.f32.mxu0 %vm293_vm0, %v294_v4  ;;  %vm131_vm2 = vcmask 1043456   ;;  %vm127_vm3 = vcmask 31744   ;;  %vm209_vm4 = vcmask 779264  }
   0x2   :  { %v268_v5 = vpack.c.bf16 %v22_v2, %v21_v1  ;;  %v24_v6 = vld [vmem:[%s376_s1 + $0x18] sm:$0xff]  ;;  %262 = vmatprep.subr.mxu1 %v294_v4  ;;  %264 = vmatprep.mubr.msk.f32.mxu1 %vm293_vm0, %v294_v4  ;;  %v25_v8 = vld [vmem:[%s376_s1 + $0x20] sm:$0xff]  ;;  %v26_v9 = vld [vmem:[%s376_s1 + $0x28] sm:$0xff] }
   0x3   :  { %v271_v7 = vpack.c.bf16 %v24_v6, %v23_v3  ;;  %v274_v10 = vpack.c.bf16 %v26_v9, %v25_v8  ;;  %v27_v11 = vld [vmem:[%s376_s1 + $0x30] sm:$0xff]  ;;  %v28_v12 = vld [vmem:[%s376_s1 + $0x38] sm:$0xff]  ;;  %v29_v14 = vld [vmem:[%s376_s1 + $0x40] sm:$0xff] }
   0x4   :  { %269 = vmatpush3.bf16.msra.mxu0 %v268_v5  ;;  %v277_v13 = vpack.c.bf16 %v28_v12, %v27_v11  ;;  %v30_v15 = vld [vmem:[%s376_s1 + $0x48] sm:$0xff]  ;;  %v31_v17 = vld [vmem:[%s376_s1 + $0x50] sm:$0xff]  ;;  %v32_v18 = vld [vmem:[%s376_s1 + $0x58] sm:$0xff] }
   0x5   :  { %270 = vmatprep.subr.bf16.mxu0 %v292_v0  ;;  %v280_v16 = vpack.c.bf16 %v30_v15, %v29_v14  ;;  %v283_v19 = vpack.c.bf16 %v32_v18, %v31_v17  ;;  %v20_v20 = vld [vmem:[%s377_s0] sm:$0x3] }
   0x6   :  { %v119_v21 = vld [vmem:[%s378_s3] sm:$0xf] }
   0x7   :  { %263 = vmatpush3.msk.msra.mxu1 %vm131_vm2, %v119_v21  ;;  %v215_v22 = vld [vmem:[%s379_s2] ss:$0 sm:$0xff] }
   0x8   :  { %272 = vmatpush3.bf16.msra.mxu0 %v271_v7  ;;  %v217_v31 = vld [vmem:[%s380_s4] ss:$0 sm:$0xff] }
   0x9   :  { %273 = vmatprep.subr.bf16.mxu0 %v292_v0 }
   0xc   :  { %275 = vmatpush3.bf16.msra.mxu0 %v274_v10 }
   0xd   :  { %276 = vmatprep.subr.bf16.mxu0 %v292_v0 }
  0x10   :  { %278 = vmatpush3.bf16.msra.mxu0 %v277_v13 }
  0x11   :  { %279 = vmatprep.subr.bf16.mxu0 %v292_v0 }
  0x14   :  { %281 = vmatpush3.bf16.msra.mxu0 %v280_v16 }
  0x15   :  { %282 = vmatprep.subr.bf16.mxu0 %v292_v0 }
  0x18   :  { %284 = vmatpush3.bf16.msra.mxu0 %v283_v19 }
  0x1b   :  { %260 = vmatmul.mubr.msk.f32.vlgmr.msra.gmra.mrb[0].mxu0 %vm40_vm1, %v20_v20 }
  0xee   :  { %v110_v23 = vpop.f32.mrb[0].mxu0 }
  0xef   :  { %v111_v24 = vadd.f32 %v215_v22, %v110_v23  ;;  %v261_v25 = vpop.f32.mrb[1].mxu0 }
  0xf1   :  { %v114_v26 = vmul.f32 0.5, %v111_v24 }
  0xf3   :  { %288 = vtanh.f32 %v114_v26 }
  0xfd   :  { %v289_v27 = vpop.eup %288 }
  0xfe   :  { %v116_v28 = vadd.f32 1.0, %v289_v27 }
 0x100   :  { %v117_v29 = vmul.f32 0.5, %v116_v28 }
 0x102   :  { %v118_v30 = vmul.f32 %v117_v29, %v111_v24 }
 0x104   :  { %265 = vmatmul.mubr.msk.f32.vlgmr.msra.gmra.mrb[0].mxu1 %vm127_vm3, %v118_v30 }
 0x1d7   :  { %v201_v32 = vpop.f32.mrb[0].mxu1 }
 0x1d8   :  { %v202_v33 = vadd.f32 %v217_v31, %v201_v32  ;;  %v266_v34 = vpop.f32.mrb[1].mxu1 }
 0x1da   :  { %v205_v35 = vmul.f32 0.5, %v202_v33 }
 0x1dc   :  { %290 = vtanh.f32 %v205_v35 }
 0x1e6   :  { %v291_v36 = vpop.eup %290 }
 0x1e7   :  { %v207_v37 = vadd.f32 1.0, %v291_v36 }
 0x1e9   :  { %v208_v38 = vmul.f32 0.5, %v207_v37 }
 0x1eb   :  { %210 = vst.msk [vmem:[%s381_s5] sm:$0x3] %vm209_vm4, %v208_v38 }

// kernel: efficientnet_forward.27
= control target key start
LH: loop header
LB: loop body
LE: loop exit
PB: predicated region body
PF: predicated region fallthrough
CT: control target
= control target key end

     0   :  { %s1123_s12 = smov 0   ;;  %s1125_s13 = smov 0   ;;  %s1569_s0 = inlined_call_operand.vmem [shape: f32[9,2,64,96], index: 0, kind: input, shape index: {}]   ;;  %s1570_s1 = inlined_call_operand.vmem [shape: f32[9,96], index: 1, kind: input, shape index: {}]   ;;  %s1571_s2 = inlined_call_operand.vmem [shape: f32[1,96], index: 2, kind: input, shape index: {}]   ;;  %s1572_s3 = inlined_call_operand.vmem [shape: f32[2,64,96], index: 3, kind: output, shape index: {}]  }
   0x1   :  { %s1127_s14 = smov 0   ;;  %s1129_s15 = smov 0  }
   0x2   :  { %s1131_s16 = smov 0  }
   0x3 LB: > { %s25_s17 = sadd.s32 1, %s1097_s15  ;;  %p41_p1 = scmp.ne.s32.totalorder %s1089_s13, %s1085_s12  ;;  %s1101_s16 = sphi %s1131_s16, %s13_s16   ;;  %s1097_s15 = sphi %s1129_s15, %s1576_s15   ;;  %s1093_s14 = sphi %s1127_s14, %s1575_s14   ;;  %s1089_s13 = sphi %s1125_s13, %s1574_s13   ;;  %s1085_s12 = sphi %s1123_s12, %s1573_s12  }
   0x4   : > { %p27_p0 = scmp.ge.s32.totalorder %s25_s17, 2  ;;  %p42_p2 = scmp.eq.s32.totalorder %s1101_s16, 0 }
   0x5   : > { %s34_s19 = sadd.s32 1, %s1089_s13  ;;  %p929_p5 = scmp.ge.s32.totalorder %s1101_s16, 2 }
   0x6   : > { %s1578_s17 = smov (%p27_p0, %s25_s17), 0  ;;  %p43_p3 = por %p42_p2, %p41_p1 }
   0x7   : > { %s29_s18 = ssub.s32 %s1097_s15, %s1578_s17  ;;  %143 = sbr.rel (%p929_p5) target bundleno = 55 (0x37), region = 24 }
   0x8   : > { %p32_p4 = scmp.eq.s32.totalorder %s29_s18, 0 }
   0xa   : > { %s1158_s20 = scalar_select %p32_p4, %s1089_s13, %s34_s19  }
   0xe   : > { %146 = sbr.rel (!%p43_p3) target bundleno = 55 (0x37), region = 28  ;;  %s148_s21 = sand.u32 (%p43_p3), 1, %s1089_s13  }
   0xf   : > { %s1003_s22 = sshll.u32 (%p43_p3), %s1097_s15, 6  ;;  %s1005_s23 = smul.u32 (%p43_p3), 576, %s148_s21 }
  0x10   : > { %s1166_s26 = scalar_lea.vmem (%p43_p3), %s1569_s0, %s1003_s22 }
  0x11   : > { %v325_v0 = vld [vmem:[%s1166_s26] sm:$0xff] (%p43_p3)  ;;  %v327_v1 = vld [vmem:[%s1166_s26 + $0x8] sm:$0xff] (%p43_p3)  ;;  %v329_v2 = vld [vmem:[%s1166_s26 + $0x10] sm:$0xff] (%p43_p3)  ;;  %s1174_s27 = scalar_lea.vmem (%p43_p3), [#allocation2], %s1005_s23 }
  0x12   : > { %v331_v3 = vld [vmem:[%s1166_s26 + $0x18] sm:$0xff] (%p43_p3)  ;;  %v333_v4 = vld [vmem:[%s1166_s26 + $0x20] sm:$0xff] (%p43_p3)  ;;  %v335_v5 = vld [vmem:[%s1166_s26 + $0x28] sm:$0xff] (%p43_p3)  ;;  %326 = vst [vmem:[%s1174_s27] sm:$0xff] (%p43_p3), %v325_v0 }
  0x13   : > { %328 = vst [vmem:[%s1174_s27 + $0x8] sm:$0xff] (%p43_p3), %v327_v1  ;;  %330 = vst [vmem:[%s1174_s27 + $0x10] sm:$0xff] (%p43_p3), %v329_v2  ;;  %v337_v6 = vld [vmem:[%s1166_s26 + $0x30] sm:$0xff] (%p43_p3)  ;;  %v339_v7 = vld [vmem:[%s1166_s26 + $0x38] sm:$0xff] (%p43_p3) }
  0x14   : > { %332 = vst [vmem:[%s1174_s27 + $0x18] sm:$0xff] (%p43_p3), %v331_v3  ;;  %334 = vst [vmem:[%s1174_s27 + $0x20] sm:$0xff] (%p43_p3), %v333_v4  ;;  %v341_v8 = vld [vmem:[%s1166_s26 + $0x80] sm:$0xff] (%p43_p3)  ;;  %v343_v9 = vld [vmem:[%s1166_s26 + $0x88] sm:$0xff] (%p43_p3) }
  0x15   : > { %336 = vst [vmem:[%s1174_s27 + $0x28] sm:$0xff] %v335_v5  ;;  %338 = vst [vmem:[%s1174_s27 + $0x30] sm:$0xff] %v337_v6  ;;  %v345_v10 = vld [vmem:[%s1166_s26 + $0x90] sm:$0xff]  ;;  %v347_v11 = vld [vmem:[%s1166_s26 + $0x98] sm:$0xff] }
  0x16   : > { %340 = vst [vmem:[%s1174_s27 + $0x38] sm:$0xff] %v339_v7  ;;  %342 = vst [vmem:[%s1174_s27 + $0x40] sm:$0xff] %v341_v8  ;;  %v349_v12 = vld [vmem:[%s1166_s26 + $0xa0] sm:$0xff]  ;;  %v351_v13 = vld [vmem:[%s1166_s26 + $0xa8] sm:$0xff] }
  0x17   : > { %344 = vst [vmem:[%s1174_s27 + $0x48] sm:$0xff] %v343_v9  ;;  %346 = vst [vmem:[%s1174_s27 + $0x50] sm:$0xff] %v345_v10  ;;  %v353_v14 = vld [vmem:[%s1166_s26 + $0xb0] sm:$0xff]  ;;  %v355_v15 = vld [vmem:[%s1166_s26 + $0xb8] sm:$0xff] }
  0x18   : > { %348 = vst [vmem:[%s1174_s27 + $0x58] sm:$0xff] %v347_v11  ;;  %350 = vst [vmem:[%s1174_s27 + $0x60] sm:$0xff] %v349_v12  ;;  %v357_v16 = vld [vmem:[%s1166_s26 + $0x100] sm:$0xff]  ;;  %v359_v17 = vld [vmem:[%s1166_s26 + $0x108] sm:$0xff] }
  0x19   : > { %352 = vst [vmem:[%s1174_s27 + $0x68] sm:$0xff] %v351_v13  ;;  %354 = vst [vmem:[%s1174_s27 + $0x70] sm:$0xff] %v353_v14  ;;  %v361_v18 = vld [vmem:[%s1166_s26 + $0x110] sm:$0xff]  ;;  %v363_v19 = vld [vmem:[%s1166_s26 + $0x118] sm:$0xff] }
  0x1a   : > { %356 = vst [vmem:[%s1174_s27 + $0x78] sm:$0xff] %v355_v15  ;;  %358 = vst [vmem:[%s1174_s27 + $0x80] sm:$0xff] %v357_v16  ;;  %v365_v20 = vld [vmem:[%s1166_s26 + $0x120] sm:$0xff]  ;;  %v367_v21 = vld [vmem:[%s1166_s26 + $0x128] sm:$0xff] }
  0x1b   : > { %360 = vst [vmem:[%s1174_s27 + $0x88] sm:$0xff] %v359_v17  ;;  %362 = vst [vmem:[%s1174_s27 + $0x90] sm:$0xff] %v361_v18  ;;  %v369_v22 = vld [vmem:[%s1166_s26 + $0x130] sm:$0xff]  ;;  %v371_v23 = vld [vmem:[%s1166_s26 + $0x138] sm:$0xff] }
  0x1c   : > { %364 = vst [vmem:[%s1174_s27 + $0x98] sm:$0xff] %v363_v19  ;;  %366 = vst [vmem:[%s1174_s27 + $0xa0] sm:$0xff] %v365_v20  ;;  %v373_v24 = vld [vmem:[%s1166_s26 + $0x180] sm:$0xff]  ;;  %v375_v25 = vld [vmem:[%s1166_s26 + $0x188] sm:$0xff] }
  0x1d   : > { %368 = vst [vmem:[%s1174_s27 + $0xa8] sm:$0xff] %v367_v21  ;;  %370 = vst [vmem:[%s1174_s27 + $0xb0] sm:$0xff] %v369_v22  ;;  %v377_v26 = vld [vmem:[%s1166_s26 + $0x190] sm:$0xff]  ;;  %v379_v27 = vld [vmem:[%s1166_s26 + $0x198] sm:$0xff] }
  0x1e   : > { %372 = vst [vmem:[%s1174_s27 + $0xb8] sm:$0xff] %v371_v23  ;;  %374 = vst [vmem:[%s1174_s27 + $0xc0] sm:$0xff] %v373_v24  ;;  %v381_v28 = vld [vmem:[%s1166_s26 + $0x1a0] sm:$0xff]  ;;  %v383_v29 = vld [vmem:[%s1166_s26 + $0x1a8] sm:$0xff] }
  0x1f   : > { %376 = vst [vmem:[%s1174_s27 + $0xc8] sm:$0xff] %v375_v25  ;;  %378 = vst [vmem:[%s1174_s27 + $0xd0] sm:$0xff] %v377_v26  ;;  %v385_v30 = vld [vmem:[%s1166_s26 + $0x1b0] sm:$0xff]  ;;  %v387_v31 = vld [vmem:[%s1166_s26 + $0x1b8] sm:$0xff] }
  0x20   : > { %380 = vst [vmem:[%s1174_s27 + $0xd8] sm:$0xff] %v379_v27  ;;  %382 = vst [vmem:[%s1174_s27 + $0xe0] sm:$0xff] %v381_v28  ;;  %v389_v32 = vld [vmem:[%s1166_s26 + $0x200] sm:$0xff]  ;;  %v391_v33 = vld [vmem:[%s1166_s26 + $0x208] sm:$0xff] }
  0x21   : > { %384 = vst [vmem:[%s1174_s27 + $0xe8] sm:$0xff] %v383_v29  ;;  %386 = vst [vmem:[%s1174_s27 + $0xf0] sm:$0xff] %v385_v30  ;;  %v393_v34 = vld [vmem:[%s1166_s26 + $0x210] sm:$0xff]  ;;  %v395_v35 = vld [vmem:[%s1166_s26 + $0x218] sm:$0xff] }
  0x22   : > { %388 = vst [vmem:[%s1174_s27 + $0xf8] sm:$0xff] %v387_v31  ;;  %390 = vst [vmem:[%s1174_s27 + $0x100] sm:$0xff] %v389_v32  ;;  %v397_v36 = vld [vmem:[%s1166_s26 + $0x220] sm:$0xff]  ;;  %v399_v37 = vld [vmem:[%s1166_s26 + $0x228] sm:$0xff] }
  0x23   : > { %392 = vst [vmem:[%s1174_s27 + $0x108] sm:$0xff] %v391_v33  ;;  %394 = vst [vmem:[%s1174_s27 + $0x110] sm:$0xff] %v393_v34  ;;  %v401_v38 = vld [vmem:[%s1166_s26 + $0x230] sm:$0xff]  ;;  %v403_v39 = vld [vmem:[%s1166_s26 + $0x238] sm:$0xff] }
  0x24   : > { %396 = vst [vmem:[%s1174_s27 + $0x118] sm:$0xff] %v395_v35  ;;  %398 = vst [vmem:[%s1174_s27 + $0x120] sm:$0xff] %v397_v36  ;;  %v405_v40 = vld [vmem:[%s1166_s26 + $0x280] sm:$0xff]  ;;  %v407_v41 = vld [vmem:[%s1166_s26 + $0x288] sm:$0xff] }
  0x25   : > { %400 = vst [vmem:[%s1174_s27 + $0x128] sm:$0xff] %v399_v37  ;;  %402 = vst [vmem:[%s1174_s27 + $0x130] sm:$0xff] %v401_v38  ;;  %v409_v42 = vld [vmem:[%s1166_s26 + $0x290] sm:$0xff]  ;;  %v411_v43 = vld [vmem:[%s1166_s26 + $0x298] sm:$0xff] }
  0x26   : > { %404 = vst [vmem:[%s1174_s27 + $0x138] sm:$0xff] %v403_v39  ;;  %406 = vst [vmem:[%s1174_s27 + $0x140] sm:$0xff] %v405_v40  ;;  %v413_v44 = vld [vmem:[%s1166_s26 + $0x2a0] sm:$0xff]  ;;  %v415_v45 = vld [vmem:[%s1166_s26 + $0x2a8] sm:$0xff] }
  0x27   : > { %408 = vst [vmem:[%s1174_s27 + $0x148] sm:$0xff] %v407_v41  ;;  %410 = vst [vmem:[%s1174_s27 + $0x150] sm:$0xff] %v409_v42  ;;  %v417_v46 = vld [vmem:[%s1166_s26 + $0x2b0] sm:$0xff]  ;;  %v419_v47 = vld [vmem:[%s1166_s26 + $0x2b8] sm:$0xff] }
  0x28   : > { %412 = vst [vmem:[%s1174_s27 + $0x158] sm:$0xff] %v411_v43  ;;  %414 = vst [vmem:[%s1174_s27 + $0x160] sm:$0xff] %v413_v44  ;;  %v421_v48 = vld [vmem:[%s1166_s26 + $0x300] sm:$0xff]  ;;  %v423_v49 = vld [vmem:[%s1166_s26 + $0x308] sm:$0xff] }
  0x29   : > { %416 = vst [vmem:[%s1174_s27 + $0x168] sm:$0xff] %v415_v45  ;;  %418 = vst [vmem:[%s1174_s27 + $0x170] sm:$0xff] %v417_v46  ;;  %v425_v50 = vld [vmem:[%s1166_s26 + $0x310] sm:$0xff]  ;;  %v427_v51 = vld [vmem:[%s1166_s26 + $0x318] sm:$0xff] }
  0x2a   : > { %420 = vst [vmem:[%s1174_s27 + $0x178] sm:$0xff] %v419_v47  ;;  %422 = vst [vmem:[%s1174_s27 + $0x180] sm:$0xff] %v421_v48  ;;  %v429_v52 = vld [vmem:[%s1166_s26 + $0x320] sm:$0xff]  ;;  %v431_v53 = vld [vmem:[%s1166_s26 + $0x328] sm:$0xff] }
  0x2b   : > { %424 = vst [vmem:[%s1174_s27 + $0x188] sm:$0xff] %v423_v49  ;;  %426 = vst [vmem:[%s1174_s27 + $0x190] sm:$0xff] %v425_v50  ;;  %v433_v54 = vld [vmem:[%s1166_s26 + $0x330] sm:$0xff]  ;;  %v435_v55 = vld [vmem:[%s1166_s26 + $0x338] sm:$0xff] }
  0x2c   : > { %428 = vst [vmem:[%s1174_s27 + $0x198] sm:$0xff] %v427_v51  ;;  %430 = vst [vmem:[%s1174_s27 + $0x1a0] sm:$0xff] %v429_v52  ;;  %v437_v56 = vld [vmem:[%s1166_s26 + $0x380] sm:$0xff]  ;;  %v439_v57 = vld [vmem:[%s1166_s26 + $0x388] sm:$0xff] }
  0x2d   : > { %432 = vst [vmem:[%s1174_s27 + $0x1a8] sm:$0xff] %v431_v53  ;;  %434 = vst [vmem:[%s1174_s27 + $0x1b0] sm:$0xff] %v433_v54  ;;  %v441_v58 = vld [vmem:[%s1166_s26 + $0x390] sm:$0xff]  ;;  %v443_v59 = vld [vmem:[%s1166_s26 + $0x398] sm:$0xff] }
  0x2e   : > { %436 = vst [vmem:[%s1174_s27 + $0x1b8] sm:$0xff] %v435_v55  ;;  %438 = vst [vmem:[%s1174_s27 + $0x1c0] sm:$0xff] %v437_v56  ;;  %v445_v60 = vld [vmem:[%s1166_s26 + $0x3a0] sm:$0xff]  ;;  %v447_v61 = vld [vmem:[%s1166_s26 + $0x3a8] sm:$0xff] }
  0x2f   : > { %440 = vst [vmem:[%s1174_s27 + $0x1c8] sm:$0xff] %v439_v57  ;;  %442 = vst [vmem:[%s1174_s27 + $0x1d0] sm:$0xff] %v441_v58  ;;  %v449_v62 = vld [vmem:[%s1166_s26 + $0x3b0] sm:$0xff]  ;;  %v451_v63 = vld [vmem:[%s1166_s26 + $0x3b8] sm:$0xff] }
  0x30   : > { %444 = vst [vmem:[%s1174_s27 + $0x1d8] sm:$0xff] %v443_v59  ;;  %446 = vst [vmem:[%s1174_s27 + $0x1e0] sm:$0xff] %v445_v60  ;;  %v453_v0 = vld [vmem:[%s1166_s26 + $0x400] sm:$0xff]  ;;  %v455_v1 = vld [vmem:[%s1166_s26 + $0x408] sm:$0xff] }
  0x31   : > { %448 = vst [vmem:[%s1174_s27 + $0x1e8] sm:$0xff] %v447_v61  ;;  %450 = vst [vmem:[%s1174_s27 + $0x1f0] sm:$0xff] %v449_v62  ;;  %v457_v2 = vld [vmem:[%s1166_s26 + $0x410] sm:$0xff]  ;;  %v459_v3 = vld [vmem:[%s1166_s26 + $0x418] sm:$0xff] }
  0x32   : > { %452 = vst [vmem:[%s1174_s27 + $0x1f8] sm:$0xff] %v451_v63  ;;  %454 = vst [vmem:[%s1174_s27 + $0x200] sm:$0xff] %v453_v0  ;;  %v461_v4 = vld [vmem:[%s1166_s26 + $0x420] sm:$0xff]  ;;  %v463_v5 = vld [vmem:[%s1166_s26 + $0x428] sm:$0xff] }
  0x33   : > { %456 = vst [vmem:[%s1174_s27 + $0x208] sm:$0xff] %v455_v1  ;;  %458 = vst [vmem:[%s1174_s27 + $0x210] sm:$0xff] %v457_v2  ;;  %v465_v6 = vld [vmem:[%s1166_s26 + $0x430] sm:$0xff]  ;;  %v467_v7 = vld [vmem:[%s1166_s26 + $0x438] sm:$0xff] }
  0x34   : > { %460 = vst [vmem:[%s1174_s27 + $0x218] sm:$0xff] %v459_v3  ;;  %462 = vst [vmem:[%s1174_s27 + $0x220] sm:$0xff] %v461_v4 }
  0x35   : > { %464 = vst [vmem:[%s1174_s27 + $0x228] sm:$0xff] %v463_v5  ;;  %466 = vst [vmem:[%s1174_s27 + $0x230] sm:$0xff] %v465_v6 }
  0x36   : > { %468 = vst [vmem:[%s1174_s27 + $0x238] sm:$0xff] %v467_v7 }
  0x37 PF: > { %p932_p6 = scmp.ge.s32.totalorder %s1101_s16, 1  ;;  %p473_p7 = scmp.lt.s32.totalorder %s1101_s16, 3 }
  0x39   : > { %p474_p8 = pnand %p932_p6, %p473_p7 }
  0x3a   : > { %s480_s28 = sand.u32 (!%p474_p8), 1, %s1085_s12   ;;  %v528_v8 = vlaneseq (!%p474_p8)  ;;  %v518_v10 = vld [vmem:[%s1570_s1] sm:$0xff] (!%p474_p8)  ;;  %v1332_v23 = vld [vmem:[%s1570_s1 + $0x8] ss:$0 sm:$0xff] (!%p474_p8)  ;;  %p509_p9 = scmp.lt.s32.totalorder (!%p474_p8), %s1093_s14, 1  ;;  %vm827_vm0 = vcmask (!%p474_p8), 785408  }
  0x3b   : > { %477 = sbr.rel (%p474_p8) target bundleno = 136 (0x88), region = 66 }
  0x3c   : > { %s1006_s29 = smul.u32 (!%p474_p8), 576, %s480_s28  ;;  %v529_v9 = vshrl.u32 (!%p474_p8), %v528_v8, 7 }
  0x3e   : > { %v530_v11 = vsub.s32 (!%p474_p8), 0, %v529_v9  ;;  %v551_v12 = vsub.s32 (!%p474_p8), 1, %v529_v9  ;;  %s1320_s5 = scalar_lea.vmem (!%p474_p8), [#allocation2], %s1006_s29  ;;  %v580_v15 = vsub.s32 (!%p474_p8), 2, %v529_v9  ;;  %v609_v16 = vsub.s32 (!%p474_p8), 3, %v529_v9 }
  0x3f   : > { %v520_v13 = vld [vmem:[%s1320_s5] sm:$0xff] (!%p474_p8)  ;;  %v638_v17 = vsub.s32 (!%p474_p8), 4, %v529_v9  ;;  %v667_v21 = vsub.s32 (!%p474_p8), 5, %v529_v9  ;;  %v696_v22 = vsub.s32 (!%p474_p8), 6, %v529_v9  ;;  %v725_v30 = vsub.s32 (!%p474_p8), 7, %v529_v9  ;;  %v521_v35 = vld [vmem:[%s1320_s5 + $0x8] sm:$0xff] (!%p474_p8) }
  0x40   : > { %v935_v14 = vld [vmem:[%s1320_s5 + $0x40] sm:$0xff] (!%p474_p8)  ;;  %v1324_v18 = vrot.slane (!%p474_p8), %v518_v10, %v530_v11  ;;  %v1326_v19 = vrot.slane (!%p474_p8), %v518_v10, %v551_v12  ;;  %v1334_v24 = vrot.slane (!%p474_p8), %v518_v10, %v580_v15  ;;  %v1337_v26 = vrot.slane (!%p474_p8), %v518_v10, %v609_v16  ;;  %v936_v36 = vld [vmem:[%s1320_s5 + $0x48] sm:$0xff] (!%p474_p8)  ;;  %v522_v53 = vld [vmem:[%s1320_s5 + $0x10] sm:$0xff] (!%p474_p8) }
  0x41   : > { %v943_v20 = vld [vmem:[%s1320_s5 + $0x80] sm:$0xff] (!%p474_p8)  ;;  %v1340_v28 = vrot.slane (!%p474_p8), %v518_v10, %v638_v17  ;;  %v1345_v33 = vrot.slane (!%p474_p8), %v518_v10, %v667_v21  ;;  %v1347_v34 = vrot.slane (!%p474_p8), %v518_v10, %v696_v22  ;;  %v944_v37 = vld [vmem:[%s1320_s5 + $0x88] sm:$0xff] (!%p474_p8)  ;;  %v1355_v41 = vrot.slane (!%p474_p8), %v518_v10, %v725_v30  ;;  %v937_v54 = vld [vmem:[%s1320_s5 + $0x50] sm:$0xff] (!%p474_p8) }
  0x42   : > { %v951_v25 = vld [vmem:[%s1320_s5 + $0xc0] sm:$0xff]  ;;  %v532_v31 = vmul.f32 %v1324_v18, %v520_v13  ;;  %v553_v32 = vmul.f32 %v935_v14, %v1326_v19  ;;  %v582_v38 = vmul.f32 %v943_v20, %v1334_v24  ;;  %v952_v46 = vld [vmem:[%s1320_s5 + $0xc8] sm:$0xff]  ;;  %v533_v50 = vmul.f32 %v1324_v18, %v521_v35  ;;  %v945_v55 = vld [vmem:[%s1320_s5 + $0x90] sm:$0xff]  ;;  %s1580_s14 = smov (!%p509_p9, %s1093_s14), 1 }
  0x43   : > { %v959_v27 = vld [vmem:[%s1320_s5 + $0x100] sm:$0xff]  ;;  %v611_v44 = vmul.f32 %v951_v25, %v1337_v26  ;;  %v960_v47 = vld [vmem:[%s1320_s5 + $0x108] sm:$0xff]  ;;  %v554_v51 = vmul.f32 %v936_v36, %v1326_v19  ;;  %v583_v52 = vmul.f32 %v944_v37, %v1334_v24  ;;  %v612_v0 = vmul.f32 %v952_v46, %v1337_v26  ;;  %v953_v3 = vld [vmem:[%s1320_s5 + $0xd0] sm:$0xff]  ;;  %s1004_s10 = sshll.u32 %s1580_s14, 6 }
  0x44   : > { %v967_v29 = vld [vmem:[%s1320_s5 + $0x140] sm:$0xff]  ;;  %v561_v43 = vadd.f32 %v553_v32, %v532_v31  ;;  %v640_v45 = vmul.f32 %v959_v27, %v1340_v28  ;;  %v968_v48 = vld [vmem:[%s1320_s5 + $0x148] sm:$0xff]  ;;  %v641_v1 = vmul.f32 %v960_v47, %v1340_v28  ;;  %v961_v4 = vld [vmem:[%s1320_s5 + $0x110] sm:$0xff]  ;;  %v534_v6 = vmul.f32 %v1324_v18, %v522_v53  ;;  %s1519_s14 = scalar_lea.vmem %s1572_s3, %s1004_s10 }
  0x45   : > { %v975_v39 = vld [vmem:[%s1320_s5 + $0x180] sm:$0xff]  ;;  %v669_v49 = vmul.f32 %v967_v29, %v1345_v33  ;;  %v976_v60 = vld [vmem:[%s1320_s5 + $0x188] sm:$0xff]  ;;  %v562_v63 = vadd.f32 %v554_v51, %v533_v50  ;;  %v670_v2 = vmul.f32 %v968_v48, %v1345_v33  ;;  %v555_v7 = vmul.f32 %v937_v54, %v1326_v19  ;;  %v969_v9 = vld [vmem:[%s1320_s5 + $0x150] sm:$0xff] }
  0x46   : > { %v983_v40 = vld [vmem:[%s1320_s5 + $0x1c0] sm:$0xff]  ;;  %v590_v56 = vadd.f32 %v582_v38, %v561_v43  ;;  %v698_v57 = vmul.f32 %v975_v39, %v1347_v34  ;;  %v984_v61 = vld [vmem:[%s1320_s5 + $0x1c8] sm:$0xff]  ;;  %v584_v8 = vmul.f32 %v945_v55, %v1334_v24  ;;  %v523_v10 = vld [vmem:[%s1320_s5 + $0x18] sm:$0xff]  ;;  %v699_v13 = vmul.f32 %v976_v60, %v1347_v34 }
  0x47   : > { %v991_v42 = vld [vmem:[%s1320_s5 + $0x200] sm:$0xff]  ;;  %v727_v58 = vmul.f32 %v983_v40, %v1355_v41  ;;  %v992_v62 = vld [vmem:[%s1320_s5 + $0x208] sm:$0xff]  ;;  %v938_v11 = vld [vmem:[%s1320_s5 + $0x58] sm:$0xff]  ;;  %v591_v12 = vadd.f32 %v583_v52, %v562_v63  ;;  %v728_v14 = vmul.f32 %v984_v61, %v1355_v41  ;;  %v563_v21 = vadd.f32 %v555_v7, %v534_v6 }
  0x48   : > { %v1373_v59 = vmul.f32 %v1332_v23, %v991_v42  ;;  %v619_v5 = vadd.f32 %v611_v44, %v590_v56  ;;  %v1392_v15 = vmul.f32 %v1332_v23, %v992_v62  ;;  %v977_v16 = vld [vmem:[%s1320_s5 + $0x190] sm:$0xff]  ;;  %v946_v17 = vld [vmem:[%s1320_s5 + $0x98] sm:$0xff]  ;;  %v613_v22 = vmul.f32 %v953_v3, %v1337_v26  ;;  %v524_v44 = vld [vmem:[%s1320_s5 + $0x20] sm:$0xff] }
  0x49   : > { %v642_v25 = vmul.f32 %v961_v4, %v1340_v28  ;;  %v985_v27 = vld [vmem:[%s1320_s5 + $0x1d0] sm:$0xff]  ;;  %v954_v29 = vld [vmem:[%s1320_s5 + $0xd8] sm:$0xff]  ;;  %v620_v30 = vadd.f32 %v612_v0, %v591_v12  ;;  %v671_v31 = vmul.f32 %v969_v9, %v1345_v33  ;;  %v535_v35 = vmul.f32 %v1324_v18, %v523_v10  ;;  %v939_v50 = vld [vmem:[%s1320_s5 + $0x60] sm:$0xff] }
  0x4a   : > { %v648_v20 = vadd.f32 %v640_v45, %v619_v5  ;;  %v993_v32 = vld [vmem:[%s1320_s5 + $0x210] sm:$0xff]  ;;  %v556_v36 = vmul.f32 %v938_v11, %v1326_v19  ;;  %v962_v37 = vld [vmem:[%s1320_s5 + $0x118] sm:$0xff]  ;;  %v592_v39 = vadd.f32 %v584_v8, %v563_v21  ;;  %v700_v40 = vmul.f32 %v977_v16, %v1347_v34  ;;  %v947_v51 = vld [vmem:[%s1320_s5 + $0xa0] sm:$0xff] }
  0x4b   : > { %v585_v42 = vmul.f32 %v946_v17, %v1334_v24  ;;  %v970_v43 = vld [vmem:[%s1320_s5 + $0x158] sm:$0xff]  ;;  %v649_v45 = vadd.f32 %v641_v1, %v620_v30  ;;  %v729_v46 = vmul.f32 %v985_v27, %v1355_v41  ;;  %v614_v48 = vmul.f32 %v954_v29, %v1337_v26  ;;  %v955_v0 = vld [vmem:[%s1320_s5 + $0xe0] sm:$0xff]  ;;  %v940_v21 = vld [vmem:[%s1320_s5 + $0x68] sm:$0xff] }
  0x4c   : > { %v677_v38 = vadd.f32 %v669_v49, %v648_v20  ;;  %v564_v47 = vadd.f32 %v556_v36, %v535_v35  ;;  %v621_v52 = vadd.f32 %v613_v22, %v592_v39  ;;  %v758_v53 = vmul.f32 %v1332_v23, %v993_v32  ;;  %v978_v55 = vld [vmem:[%s1320_s5 + $0x198] sm:$0xff]  ;;  %v963_v6 = vld [vmem:[%s1320_s5 + $0x120] sm:$0xff]  ;;  %v525_v20 = vld [vmem:[%s1320_s5 + $0x28] sm:$0xff] }
  0x4d   : > { %v643_v54 = vmul.f32 %v962_v37, %v1340_v28  ;;  %v986_v56 = vld [vmem:[%s1320_s5 + $0x1d8] sm:$0xff]  ;;  %v678_v60 = vadd.f32 %v670_v2, %v649_v45  ;;  %v672_v62 = vmul.f32 %v970_v43, %v1345_v33  ;;  %v536_v63 = vmul.f32 %v1324_v18, %v524_v44  ;;  %v1427_v2 = vld [vmem:[%s1571_s2] ss:$0 sm:$0xff]  ;;  %v948_v29 = vld [vmem:[%s1320_s5 + $0xa8] sm:$0xff] }
  0x4e   : > { %v706_v49 = vadd.f32 %v698_v57, %v677_v38  ;;  %v593_v61 = vadd.f32 %v585_v42, %v564_v47  ;;  %v650_v3 = vadd.f32 %v642_v25, %v621_v52  ;;  %v994_v57 = vld [vmem:[%s1320_s5 + $0x218] sm:$0xff]  ;;  %v557_v4 = vmul.f32 %v939_v50, %v1326_v19  ;;  %v971_v10 = vld [vmem:[%s1320_s5 + $0x160] sm:$0xff]  ;;  %v956_v35 = vld [vmem:[%s1320_s5 + $0xe8] sm:$0xff] }
  0x4f   : > { %v586_v5 = vmul.f32 %v947_v51, %v1334_v24  ;;  %v707_v7 = vadd.f32 %v699_v13, %v678_v60  ;;  %v701_v9 = vmul.f32 %v978_v55, %v1347_v34  ;;  %v615_v17 = vmul.f32 %v955_v0, %v1337_v26  ;;  %v979_v37 = vld [vmem:[%s1320_s5 + $0x1a0] sm:$0xff]  ;;  %v964_v45 = vld [vmem:[%s1320_s5 + $0x128] sm:$0xff]  ;;  %v941_v0 = vld [vmem:[%s1320_s5 + $0x70] sm:$0xff] }
  0x50   : > { %v735_v1 = vadd.f32 %v727_v58, %v706_v49  ;;  %v622_v8 = vadd.f32 %v614_v48, %v593_v61  ;;  %v730_v58 = vmul.f32 %v986_v56, %v1355_v41  ;;  %v679_v12 = vadd.f32 %v671_v31, %v650_v3  ;;  %v987_v48 = vld [vmem:[%s1320_s5 + $0x1e0] sm:$0xff]  ;;  %v972_v55 = vld [vmem:[%s1320_s5 + $0x168] sm:$0xff] }
  0x51   : > { %v565_v16 = vadd.f32 %v557_v4, %v536_v63  ;;  %v736_v22 = vadd.f32 %v728_v14, %v707_v7  ;;  %v759_v13 = vmul.f32 %v1332_v23, %v994_v57  ;;  %v644_v27 = vmul.f32 %v963_v6, %v1340_v28  ;;  %v995_v50 = vld [vmem:[%s1320_s5 + $0x220] sm:$0xff]  ;;  %v526_v63 = vld [vmem:[%s1320_s5 + $0x30] sm:$0xff]  ;;  %v980_v4 = vld [vmem:[%s1320_s5 + $0x1a8] sm:$0xff] }
  0x52   : > { %v764_v11 = vadd.f32 %v1373_v59, %v735_v1  ;;  %v651_v25 = vadd.f32 %v643_v54, %v622_v8  ;;  %v708_v32 = vadd.f32 %v700_v40, %v679_v12  ;;  %v673_v31 = vmul.f32 %v971_v10, %v1345_v33 }
  0x53   : > { %v594_v59 = vadd.f32 %v586_v5, %v565_v16  ;;  %v765_v36 = vadd.f32 %v1392_v15, %v736_v22  ;;  %v537_v38 = vmul.f32 %v1324_v18, %v525_v20  ;;  %v558_v39 = vmul.f32 %v940_v21, %v1326_v19  ;;  %v949_v5 = vld [vmem:[%s1320_s5 + $0xb0] sm:$0xff]  ;;  %v996_v22 = vld [vmem:[%s1320_s5 + $0x228] sm:$0xff] }
  0x54   : > { %v1440_v30 = vadd.f32 %v1427_v2, %v764_v11  ;;  %v680_v14 = vadd.f32 %v672_v62, %v651_v25  ;;  %v737_v43 = vadd.f32 %v729_v46, %v708_v32  ;;  %v587_v40 = vmul.f32 %v948_v29, %v1334_v24  ;;  %v988_v11 = vld [vmem:[%s1320_s5 + $0x1e8] sm:$0xff] }
  0x55   : > { %v623_v44 = vadd.f32 %v615_v17, %v594_v59  ;;  %v1452_v47 = vadd.f32 %v1427_v2, %v765_v36  ;;  %v566_v51 = vadd.f32 %v558_v39, %v537_v38  ;;  %v616_v49 = vmul.f32 %v956_v35, %v1337_v26  ;;  %v527_v59 = vld [vmem:[%s1320_s5 + $0x38] sm:$0xff] }
  0x56   : > { %v787_v42 = vmul.f32 0.5, %v1440_v30  ;;  %v709_v15 = vadd.f32 %v701_v9, %v680_v14  ;;  %v766_v52 = vadd.f32 %v758_v53, %v737_v43  ;;  %v702_v54 = vmul.f32 %v979_v37, %v1347_v34  ;;  %v957_v9 = vld [vmem:[%s1320_s5 + $0xf0] sm:$0xff]  ;;  %v950_v38 = vld [vmem:[%s1320_s5 + $0xb8] sm:$0xff] }
  0x57   : > { %v652_v46 = vadd.f32 %v644_v27, %v623_v44  ;;  %v788_v56 = vmul.f32 0.5, %v1452_v47  ;;  %v595_v61 = vadd.f32 %v587_v40, %v566_v51  ;;  %v645_v62 = vmul.f32 %v964_v45, %v1340_v28  ;;  %v973_v37 = vld [vmem:[%s1320_s5 + $0x170] sm:$0xff]  ;;  %v958_v40 = vld [vmem:[%s1320_s5 + $0xf8] sm:$0xff] }
  0x58   : > { %1047 = vtanh.f32 %v787_v42  ;;  %v738_v60 = vadd.f32 %v730_v58, %v709_v15  ;;  %v1464_v1 = vadd.f32 %v1427_v2, %v766_v52  ;;  %v731_v53 = vmul.f32 %v987_v48, %v1355_v41  ;;  %v981_v15 = vld [vmem:[%s1320_s5 + $0x1b0] sm:$0xff] }
  0x59   : > { %v681_v3 = vadd.f32 %v673_v31, %v652_v46  ;;  %v760_v57 = vmul.f32 %v1332_v23, %v995_v50  ;;  %1049 = vtanh.f32 %v788_v56  ;;  %v624_v7 = vadd.f32 %v616_v49, %v595_v61  ;;  %v942_v31 = vld [vmem:[%s1320_s5 + $0x78] sm:$0xff]  ;;  %v989_v61 = vld [vmem:[%s1320_s5 + $0x1f0] sm:$0xff] }
  0x5a   : > { %v767_v6 = vadd.f32 %v759_v13, %v738_v60  ;;  %v674_v8 = vmul.f32 %v972_v55, %v1345_v33  ;;  %v789_v58 = vmul.f32 0.5, %v1464_v1  ;;  %v538_v12 = vmul.f32 %v1324_v18, %v526_v63  ;;  %v965_v13 = vld [vmem:[%s1320_s5 + $0x130] sm:$0xff]  ;;  %v966_v55 = vld [vmem:[%s1320_s5 + $0x138] sm:$0xff] }
  0x5b   : > { %v710_v10 = vadd.f32 %v702_v54, %v681_v3  ;;  %v559_v16 = vmul.f32 %v941_v0, %v1326_v19  ;;  %v653_v20 = vadd.f32 %v645_v62, %v624_v7  ;;  %v703_v21 = vmul.f32 %v980_v4, %v1347_v34  ;;  %v974_v3 = vld [vmem:[%s1320_s5 + $0x178] sm:$0xff]  ;;  %v997_v4 = vld [vmem:[%s1320_s5 + $0x230] sm:$0xff] }
  0x5c   : > { %v1478_v17 = vadd.f32 %v1427_v2, %v767_v6  ;;  %v588_v25 = vmul.f32 %v949_v5, %v1334_v24  ;;  %1051 = vtanh.f32 %v789_v58  ;;  %v617_v32 = vmul.f32 %v957_v9, %v1337_v26  ;;  %v982_v9 = vld [vmem:[%s1320_s5 + $0x1b8] sm:$0xff] }
  0x5d   : > { %v739_v27 = vadd.f32 %v731_v53, %v710_v10  ;;  %v567_v29 = vadd.f32 %v559_v16, %v538_v12  ;;  %v682_v36 = vadd.f32 %v674_v8, %v653_v20  ;;  %v732_v14 = vmul.f32 %v988_v11, %v1355_v41 }
  0x5e   : > { %v790_v35 = vmul.f32 0.5, %v1478_v17  ;;  %v761_v42 = vmul.f32 %v1332_v23, %v996_v22  ;;  %v646_v44 = vmul.f32 %v965_v13, %v1340_v28  ;;  %v539_v48 = vmul.f32 %v1324_v18, %v527_v59  ;;  %v990_v22 = vld [vmem:[%s1320_s5 + $0x1f8] sm:$0xff] }
  0x5f   : > { %v768_v39 = vadd.f32 %v760_v57, %v739_v27  ;;  %v596_v43 = vadd.f32 %v588_v25, %v567_v29  ;;  %v711_v45 = vadd.f32 %v703_v21, %v682_v36  ;;  %v560_v50 = vmul.f32 %v942_v31, %v1326_v19  ;;  %v998_v59 = vld [vmem:[%s1320_s5 + $0x238] sm:$0xff] }
  0x60   : > { %1053 = vtanh.f32 %v790_v35  ;;  %v675_v46 = vmul.f32 %v973_v37, %v1345_v33  ;;  %v589_v54 = vmul.f32 %v950_v38, %v1334_v24  ;;  %v618_v18 = vmul.f32 %v958_v40, %v1337_v26 }
  0x61   : > { %v1503_v49 = vadd.f32 %v1427_v2, %v768_v39  ;;  %v625_v52 = vadd.f32 %v617_v32, %v596_v43  ;;  %v740_v60 = vadd.f32 %v732_v14, %v711_v45  ;;  %v568_v62 = vadd.f32 %v560_v50, %v539_v48 }
  0x62   : > { %v1048_v51 = vpop.eup %1047  ;;  %v704_v0 = vmul.f32 %v981_v15, %v1347_v34  ;;  %v647_v6 = vmul.f32 %v966_v55, %v1340_v28  ;;  %v733_v8 = vmul.f32 %v989_v61, %v1355_v41  ;;  %v676_v28 = vmul.f32 %v974_v3, %v1345_v33 }
  0x63   : > { %v803_v56 = vadd.f32 1.0, %v1048_v51  ;;  %v791_v19 = vmul.f32 0.5, %v1503_v49  ;;  %v654_v63 = vadd.f32 %v646_v44, %v625_v52  ;;  %v1050_v53 = vpop.eup %1049  ;;  %v769_v24 = vadd.f32 %v761_v42, %v740_v60 }
  0x64   : > { %v597_v5 = vadd.f32 %v589_v54, %v568_v62  ;;  %v804_v26 = vadd.f32 1.0, %v1050_v53  ;;  %v762_v21 = vmul.f32 %v1332_v23, %v997_v4  ;;  %v734_v36 = vmul.f32 %v990_v22, %v1355_v41 }
  0x65   : > { %v811_v57 = vmul.f32 0.5, %v803_v56  ;;  %1055 = vtanh.f32 %v791_v19  ;;  %v683_v7 = vadd.f32 %v675_v46, %v654_v63  ;;  %v784_v10 = vadd.f32 %v1427_v2, %v769_v24 }
  0x66   : > { %v626_v11 = vadd.f32 %v618_v18, %v597_v5  ;;  %v1052_v12 = vpop.eup %1051  ;;  %v812_v16 = vmul.f32 0.5, %v804_v26 }
  0x67   : > { %v819_v58 = vmul.f32 %v811_v57, %v1440_v30  ;;  %v712_v20 = vadd.f32 %v704_v0, %v683_v7  ;;  %v805_v25 = vadd.f32 1.0, %v1052_v12  ;;  %v792_v13 = vmul.f32 0.5, %v784_v10 }
  0x68   : > { %v655_v27 = vadd.f32 %v647_v6, %v626_v11  ;;  %v705_v30 = vmul.f32 %v982_v9, %v1347_v34  ;;  %v820_v29 = vmul.f32 %v812_v16, %v1452_v47  ;;  %v763_v34 = vmul.f32 %v1332_v23, %v998_v59 }
  0x69   : > { %828 = vst.msk [vmem:[%s1519_s14] sm:$0xff] %vm827_vm0, %v819_v58  ;;  %v741_v32 = vadd.f32 %v733_v8, %v712_v20  ;;  %v813_v31 = vmul.f32 0.5, %v805_v25  ;;  %1057 = vtanh.f32 %v792_v13 }
  0x6a   : > { %v1054_v33 = vpop.eup %1053  ;;  %v684_v35 = vadd.f32 %v676_v28, %v655_v27  ;;  %829 = vst.msk [vmem:[%s1519_s14 + $0x8] sm:$0xff] %vm827_vm0, %v820_v29 }
  0x6b   : > { %v806_v14 = vadd.f32 1.0, %v1054_v33  ;;  %v770_v37 = vadd.f32 %v762_v21, %v741_v32  ;;  %v821_v38 = vmul.f32 %v813_v31, %v1464_v1 }
  0x6c   : > { %v713_v39 = vadd.f32 %v705_v30, %v684_v35 }
  0x6d   : > { %v814_v47 = vmul.f32 0.5, %v806_v14  ;;  %v785_v42 = vadd.f32 %v1427_v2, %v770_v37  ;;  %830 = vst.msk [vmem:[%s1519_s14 + $0x10] sm:$0xff] %vm827_vm0, %v821_v38 }
  0x6e   : > { %v742_v43 = vadd.f32 %v734_v36, %v713_v39 }
  0x6f   : > { %v1056_v44 = vpop.eup %1055  ;;  %v822_v41 = vmul.f32 %v814_v47, %v1478_v17  ;;  %v793_v40 = vmul.f32 0.5, %v785_v42 }
  0x70   : > { %v807_v45 = vadd.f32 1.0, %v1056_v44  ;;  %v771_v15 = vadd.f32 %v763_v34, %v742_v43 }
  0x71   : > { %831 = vst.msk [vmem:[%s1519_s14 + $0x18] sm:$0xff] %vm827_vm0, %v822_v41  ;;  %1059 = vtanh.f32 %v793_v40 }
  0x72   : > { %v815_v1 = vmul.f32 0.5, %v807_v45  ;;  %v786_v23 = vadd.f32 %v1427_v2, %v771_v15 }
  0x73   : > { %v1058_v48 = vpop.eup %1057 }
  0x74   : > { %v823_v50 = vmul.f32 %v815_v1, %v1503_v49  ;;  %v794_v51 = vmul.f32 0.5, %v786_v23  ;;  %v808_v52 = vadd.f32 1.0, %v1058_v48 }
  0x76   : > { %832 = vst.msk [vmem:[%s1519_s14 + $0x20] sm:$0xff] %vm827_vm0, %v823_v50  ;;  %1061 = vtanh.f32 %v794_v51  ;;  %v816_v17 = vmul.f32 0.5, %v808_v52 }
  0x78   : > { %v824_v46 = vmul.f32 %v816_v17, %v784_v10 }
  0x7a   : > { %833 = vst.msk [vmem:[%s1519_s14 + $0x28] sm:$0xff] %vm827_vm0, %v824_v46 }
  0x7b   : > { %v1060_v54 = vpop.eup %1059 }
  0x7c   : > { %v809_v55 = vadd.f32 1.0, %v1060_v54 }
  0x7e   : > { %v817_v56 = vmul.f32 0.5, %v809_v55 }
  0x80   : > { %v1062_v60 = vpop.eup %1061  ;;  %v825_v61 = vmul.f32 %v817_v56, %v785_v42 }
  0x81   : > { %v810_v2 = vadd.f32 1.0, %v1062_v60 }
  0x82   : > { %834 = vst.msk [vmem:[%s1519_s14 + $0x30] sm:$0xff] %vm827_vm0, %v825_v61 }
  0x83   : > { %v818_v62 = vmul.f32 0.5, %v810_v2 }
  0x85   : > { %v826_v49 = vmul.f32 %v818_v62, %v786_v23 }
  0x87   : > { %835 = vst.msk [vmem:[%s1519_s14 + $0x38] sm:$0xff] %vm827_vm0, %v826_v49 }
  0x88 PF: > { %s13_s16 = sadd.s32 1, %s1101_s16   ;;  %s1573_s12 = smov %s1089_s13 }
  0x89   : > { %p10_p10 = scmp.ge.s32.totalorder %s13_s16, 4   ;;  %s1574_s13 = smov %s1158_s20 }
  0x8a   : > { %s1575_s14 = smov %s1097_s15  ;;  %s1576_s15 = smov %s1578_s17 }
  0x8b   :  { %12 = sbr.rel (!%p10_p10) target bundleno = 3 (0x3), region = 113 }

// kernel: efficientnet_forward.29
= control target key start
LH: loop header
LB: loop body
LE: loop exit
PB: predicated region body
PF: predicated region fallthrough
CT: control target
= control target key end

     0   :  { %s621_s15 = smov 0   ;;  %s623_s16 = smov 0   ;;  %s726_s0 = inlined_call_operand.vmem [shape: f32[2,64,96], index: 0, kind: input, shape index: {}]   ;;  %s727_s1 = inlined_call_operand.vmem [shape: f32[96,32], index: 1, kind: input, shape index: {}]   ;;  %s728_s2 = inlined_call_operand.vmem [shape: f32[1,32], index: 2, kind: input, shape index: {}]   ;;  %s729_s3 = inlined_call_operand.vmem [shape: f32[2,1,96], index: 3, kind: input, shape index: {}]   ;;  %s730_s4 = inlined_call_operand.vmem [shape: f32[2,64,32], index: 4, kind: output, shape index: {}]  }
   0x1   :  { %s625_s17 = smov 0  }
   0x2 LB: > { %s26_s18 = sadd.s32 1, %s590_s16  ;;  %p491_p0 = scmp.ge.s32.totalorder %s594_s17, 1  ;;  %s594_s17 = sphi %s625_s17, %s14_s17   ;;  %s590_s16 = sphi %s623_s16, %s732_s16   ;;  %s586_s15 = sphi %s621_s15, %s731_s15  }
   0x3   : > { %p28_p1 = scmp.ge.s32.totalorder %s26_s18, 2  ;;  %p191_p2 = scmp.lt.s32.totalorder %s594_s17, 3 }
   0x5   : > { %s734_s18 = smov (%p28_p1, %s26_s18), 0  ;;  %p192_p3 = pnand %p491_p0, %p191_p2 }
   0x6   : > { %v279_v0 = vld [vmem:[%s727_s1] sm:$0xff] (!%p192_p3)  ;;  %v280_v1 = vld [vmem:[%s727_s1 + $0x8] sm:$0xff] (!%p192_p3)  ;;  %v281_v2 = vld [vmem:[%s727_s1 + $0x10] sm:$0xff] (!%p192_p3)  ;;  %p229_p4 = scmp.lt.s32.totalorder (!%p192_p3), %s586_s15, 1  ;;  %vm304_vm0 = vcmask (!%p192_p3), 785408   ;;  %vm382_vm1 = vcmask (!%p192_p3), 261120  }
   0x7   : > { %195 = sbr.rel (%p192_p3) target bundleno = 252 (0xfc), region = 36  ;;  %v291_v3 = vpack.c.bf16 (!%p192_p3), %v280_v1, %v279_v0  ;;  %v282_v4 = vld [vmem:[%s727_s1 + $0x18] sm:$0xff] (!%p192_p3)  ;;  %v283_v6 = vld [vmem:[%s727_s1 + $0x20] sm:$0xff] (!%p192_p3)  ;;  %v284_v7 = vld [vmem:[%s727_s1 + $0x28] sm:$0xff] (!%p192_p3) }
   0x8   : > { %v292_v5 = vpack.c.bf16 (!%p192_p3), %v282_v4, %v281_v2  ;;  %v293_v8 = vpack.c.bf16 (!%p192_p3), %v284_v7, %v283_v6  ;;  %v285_v9 = vld [vmem:[%s727_s1 + $0x30] sm:$0xff] (!%p192_p3)  ;;  %v286_v10 = vld [vmem:[%s727_s1 + $0x38] sm:$0xff] (!%p192_p3)  ;;  %v287_v22 = vld [vmem:[%s727_s1 + $0x40] sm:$0xff] (!%p192_p3) }
   0x9   : > { %516 = vmatprep.subr.bf16.mxu0 (!%p192_p3), %v291_v3  ;;  %536 = vmatprep.subr.bf16.mxu1 (!%p192_p3), %v291_v3  ;;  %v294_v20 = vpack.c.bf16 (!%p192_p3), %v286_v10, %v285_v9  ;;  %v288_v23 = vld [vmem:[%s727_s1 + $0x48] sm:$0xff] (!%p192_p3)  ;;  %v289_v26 = vld [vmem:[%s727_s1 + $0x50] sm:$0xff] (!%p192_p3)  ;;  %v290_v27 = vld [vmem:[%s727_s1 + $0x58] sm:$0xff] (!%p192_p3) }
   0xa   : > { %517 = vmatpush3.bf16.msra.mxu0 (!%p192_p3), %v291_v3  ;;  %542 = vmatpush3.bf16.msra.mxu1 (!%p192_p3), %v291_v3  ;;  %v295_v25 = vpack.c.bf16 (!%p192_p3), %v288_v23, %v287_v22  ;;  %v296_v32 = vpack.c.bf16 (!%p192_p3), %v290_v27, %v289_v26  ;;  %v497_v39 = vld [vmem:[%s728_s2] ss:$0 sm:$0xff] (!%p192_p3) }
   0xb   : > { %518 = vmatprep.subr.bf16.mxu0 (!%p192_p3), %v292_v5  ;;  %537 = vmatprep.subr.bf16.mxu1 (!%p192_p3), %v292_v5 }
   0xe   : > { %s736_s15 = smov (!%p229_p4, %s586_s15), 1  ;;  %519 = vmatpush3.bf16.msra.mxu0 %v292_v5  ;;  %543 = vmatpush3.bf16.msra.mxu1 %v292_v5 }
   0xf   : > { %s504_s5 = sshll.u32 %s736_s15, 6  ;;  %s240_s8 = scalar_lea.vmem %s729_s3, %s736_s15  ;;  %520 = vmatprep.subr.bf16.mxu0 %v293_v8  ;;  %538 = vmatprep.subr.bf16.mxu1 %v293_v8 }
  0x10   : > { %s675_s19 = scalar_lea.vmem %s726_s0, %s504_s5  ;;  %v496_v11 = vld [vmem:[%s240_s8] ss:$0 sm:$0xff]  ;;  %s249_s7 = scalar_lea.vmem %s730_s4, %s504_s5 }
  0x11   : > { %v252_v12 = vld [vmem:[%s675_s19] sm:$0xff]  ;;  %v253_v13 = vld [vmem:[%s675_s19 + $0x8] sm:$0xff]  ;;  %v254_v28 = vld [vmem:[%s675_s19 + $0x10] sm:$0xff] }
  0x12   : > { %v256_v14 = vld [vmem:[%s675_s19 + $0x20] sm:$0xff]  ;;  %v267_v15 = vmul.f32 %v496_v11, %v252_v12  ;;  %v268_v16 = vmul.f32 %v496_v11, %v253_v13  ;;  %v257_v17 = vld [vmem:[%s675_s19 + $0x28] sm:$0xff]  ;;  %521 = vmatpush3.bf16.msra.mxu0 %v293_v8  ;;  %544 = vmatpush3.bf16.msra.mxu1 %v293_v8  ;;  %v255_v29 = vld [vmem:[%s675_s19 + $0x18] sm:$0xff]  ;;  %v269_v33 = vmul.f32 %v496_v11, %v254_v28 }
  0x13   : > { %v271_v18 = vmul.f32 %v496_v11, %v256_v14  ;;  %v272_v19 = vmul.f32 %v496_v11, %v257_v17  ;;  %522 = vmatprep.subr.bf16.mxu0 %v294_v20  ;;  %539 = vmatprep.subr.bf16.mxu1 %v294_v20  ;;  %v258_v30 = vld [vmem:[%s675_s19 + $0x30] sm:$0xff]  ;;  %v259_v31 = vld [vmem:[%s675_s19 + $0x38] sm:$0xff]  ;;  %v270_v34 = vmul.f32 %v496_v11, %v255_v29 }
  0x14   : > { %v275_v21 = vpack.c.bf16 %v268_v16, %v267_v15  ;;  %v273_v35 = vmul.f32 %v496_v11, %v258_v30  ;;  %v274_v36 = vmul.f32 %v496_v11, %v259_v31 }
  0x15   : > { %v277_v24 = vpack.c.bf16 %v272_v19, %v271_v18  ;;  %v276_v37 = vpack.c.bf16 %v270_v34, %v269_v33 }
  0x16   : > { %528 = vmatprep.mubr.msk.bf16.mxu0 %vm304_vm0, %v275_v21  ;;  %523 = vmatpush3.bf16.msra.mxu0 %v294_v20  ;;  %v278_v38 = vpack.c.bf16 %v274_v36, %v273_v35 }
  0x17   : > { %532 = vmatprep.mubr.msk.bf16.mxu1 %vm304_vm0, %v277_v24  ;;  %545 = vmatpush3.bf16.msra.mxu1 %v294_v20 }
  0x18   : > { %524 = vmatprep.subr.bf16.mxu0 %v295_v25  ;;  %540 = vmatprep.subr.bf16.mxu1 %v295_v25 }
  0x1a   : > { %525 = vmatpush3.bf16.msra.mxu0 %v295_v25 }
  0x1b   : > { %546 = vmatpush3.bf16.msra.mxu1 %v295_v25  ;;  %526 = vmatprep.subr.bf16.mxu0 %v296_v32 }
  0x1c   : > { %541 = vmatprep.subr.bf16.mxu1 %v296_v32 }
  0x1e   : > { %527 = vmatpush3.bf16.msra.mxu0 %v296_v32 }
  0x1f   : > { %547 = vmatpush3.bf16.msra.mxu1 %v296_v32 }
  0x21   : > { %529 = vmatmul.mubr.msk.bf16.vlgmr.msra.gmra.mrb[0].mxu0 %vm304_vm0, %v276_v37 }
  0x22   : > { %533 = vmatmul.mubr.msk.bf16.vlgmr.msra.gmra.mrb[0].mxu1 %vm304_vm0, %v278_v38 }
  0xf4   : > { %v530_v40 = vpop.f32.mrb[0].mxu0 }
  0xf5   : > { %v534_v41 = vpop.f32.mrb[0].mxu1  ;;  %v360_v42 = vadd.f32 %v530_v40, %v497_v39  ;;  %v351_v44 = vpop.f32.mrb[1].mxu0 }
  0xf6   : > { %v376_v43 = vadd.f32 %v534_v41, %v497_v39  ;;  %v367_v45 = vpop.f32.mrb[1].mxu1  ;;  %v352_v46 = vadd.f32 %v497_v39, %v351_v44  ;;  %v531_v48 = vpop.f32.mrb[2].mxu0 }
  0xf7   : > { %v368_v47 = vadd.f32 %v497_v39, %v367_v45  ;;  %v535_v49 = vpop.f32.mrb[2].mxu1  ;;  %385 = vst.msk [vmem:[%s249_s7 + $0x10] sm:$0xff] %vm382_vm1, %v360_v42  ;;  %v363_v50 = vadd.f32 %v531_v48, %v497_v39  ;;  %v354_v52 = vpop.f32.mrb[3].mxu0 }
  0xf8   : > { %389 = vst.msk [vmem:[%s249_s7 + $0x30] sm:$0xff] %vm382_vm1, %v376_v43  ;;  %v379_v51 = vadd.f32 %v535_v49, %v497_v39  ;;  %v370_v53 = vpop.f32.mrb[3].mxu1  ;;  %383 = vst.msk [vmem:[%s249_s7] sm:$0xff] %vm382_vm1, %v352_v46  ;;  %v355_v54 = vadd.f32 %v497_v39, %v354_v52 }
  0xf9   : > { %387 = vst.msk [vmem:[%s249_s7 + $0x20] sm:$0xff] %vm382_vm1, %v368_v47  ;;  %v371_v55 = vadd.f32 %v497_v39, %v370_v53  ;;  %386 = vst.msk [vmem:[%s249_s7 + $0x18] sm:$0xff] %vm382_vm1, %v363_v50 }
  0xfa   : > { %390 = vst.msk [vmem:[%s249_s7 + $0x38] sm:$0xff] %vm382_vm1, %v379_v51  ;;  %384 = vst.msk [vmem:[%s249_s7 + $0x8] sm:$0xff] %vm382_vm1, %v355_v54 }
  0xfb   : > { %388 = vst.msk [vmem:[%s249_s7 + $0x28] sm:$0xff] %vm382_vm1, %v371_v55 }
  0xfc PF: > { %s14_s17 = sadd.s32 1, %s594_s17   ;;  %s731_s15 = smov %s590_s16 }
  0xfd   : > { %p11_p5 = scmp.ge.s32.totalorder %s14_s17, 4   ;;  %s732_s16 = smov %s734_s18 }
  0xff   :  { %13 = sbr.rel (!%p11_p5) target bundleno = 2 (0x2), region = 69 }

// kernel: efficientnet_forward.30
= control target key start
LH: loop header
LB: loop body
LE: loop exit
PB: predicated region body
PF: predicated region fallthrough
CT: control target
= control target key end

     0   :  { %s648_s12 = smov 0   ;;  %s650_s13 = smov 0   ;;  %s802_s0 = inlined_call_operand.vmem [shape: f32[2,64,32], index: 0, kind: input, shape index: {}]   ;;  %s803_s1 = inlined_call_operand.vmem [shape: f32[32,192], index: 1, kind: input, shape index: {}]   ;;  %s804_s2 = inlined_call_operand.vmem [shape: f32[1,192], index: 2, kind: input, shape index: {}]   ;;  %s805_s3 = inlined_call_operand.vmem [shape: f32[2,64,192], index: 3, kind: output, shape index: {}]  }
   0x1   :  { %s652_s14 = smov 0  }
   0x2 LB: > { %s25_s15 = sadd.s32 1, %s621_s13  ;;  %p529_p0 = scmp.ge.s32.totalorder %s625_s14, 1  ;;  %s625_s14 = sphi %s652_s14, %s13_s14   ;;  %s621_s13 = sphi %s650_s13, %s807_s13   ;;  %s617_s12 = sphi %s648_s12, %s806_s12  }
   0x3   : > { %p27_p1 = scmp.ge.s32.totalorder %s25_s15, 2  ;;  %p158_p2 = scmp.lt.s32.totalorder %s625_s14, 3 }
   0x5   : > { %s809_s15 = smov (%p27_p1, %s25_s15), 0  ;;  %p159_p3 = pnand %p529_p0, %p158_p2 }
   0x6   : > { %v226_v0 = vld [vmem:[%s803_s1 + $0x8] sm:$0xff] (!%p159_p3)  ;;  %v228_v1 = vld [vmem:[%s803_s1 + $0x18] sm:$0xff] (!%p159_p3)  ;;  %v225_v2 = vld [vmem:[%s803_s1] sm:$0xff] (!%p159_p3)  ;;  %p192_p4 = scmp.lt.s32.totalorder (!%p159_p3), %s617_s12, 1  ;;  %v627_v7 = vmov (!%p159_p3), 0   ;;  %vm249_vm0 = vcmask (!%p159_p3), 261120   ;;  %v239_v25 = vlaneseq (!%p159_p3) }
   0x7   : > { %162 = sbr.rel (%p159_p3) target bundleno = 269 (0x10d), region = 32  ;;  %v234_v3 = vpack.c.bf16 (!%p159_p3), %v228_v1, %v226_v0  ;;  %v227_v4 = vld [vmem:[%s803_s1 + $0x10] sm:$0xff] (!%p159_p3)  ;;  %v230_v5 = vld [vmem:[%s803_s1 + $0x28] sm:$0xff] (!%p159_p3)  ;;  %v232_v6 = vld [vmem:[%s803_s1 + $0x38] sm:$0xff] (!%p159_p3)  ;;  %294 = vmatprep.mubr.bf16.mxu0 (!%p159_p3), %v627_v7  ;;  %314 = vmatprep.mubr.bf16.mxu1 (!%p159_p3), %v627_v7  ;;  %vm416_vm1 = vcmask (!%p159_p3), 523264  }
   0x8   : > { %v233_v8 = vpack.c.bf16 (!%p159_p3), %v227_v4, %v225_v2  ;;  %v236_v9 = vpack.c.bf16 (!%p159_p3), %v232_v6, %v230_v5  ;;  %v229_v10 = vld [vmem:[%s803_s1 + $0x20] sm:$0xff] (!%p159_p3)  ;;  %v231_v11 = vld [vmem:[%s803_s1 + $0x30] sm:$0xff] (!%p159_p3)  ;;  %v240_v26 = vshrl.u32 (!%p159_p3), %v239_v25, 7 }
   0x9   : > { %262 = vmatprep.subr.bf16.mxu0 (!%p159_p3), %v234_v3  ;;  %542 = vmatprep.subr.bf16.mxu1 (!%p159_p3), %v234_v3  ;;  %v235_v12 = vpack.c.bf16 (!%p159_p3), %v231_v11, %v229_v10  ;;  %v237_v28 = vld [vmem:[%s804_s2] sm:$0x3] (!%p159_p3) }
   0xa   : > { %263 = vmatpush1.bf16.msra.mxu0 (!%p159_p3), %v233_v8  ;;  %544 = vmatpush1.bf16.msra.mxu1 (!%p159_p3), %v233_v8  ;;  %v241_v27 = vsub.s32 (!%p159_p3), 0, %v240_v26  ;;  %v245_v29 = vsub.s32 (!%p159_p3), 1, %v240_v26 }
   0xb   : > { %264 = vmatprep.subr.bf16.mxu0 (!%p159_p3), %v236_v9  ;;  %543 = vmatprep.subr.bf16.mxu1 (!%p159_p3), %v236_v9 }
   0xc   : > { %v242_v30 = vrot.slane (!%p159_p3), %v237_v28, %v241_v27  ;;  %v246_v31 = vrot.slane (!%p159_p3), %v237_v28, %v245_v29 }
   0xe   : > { %s811_s12 = smov (!%p192_p4, %s617_s12), 1  ;;  %265 = vmatpush1.bf16.msra.mxu0 %v235_v12  ;;  %545 = vmatpush1.bf16.msra.mxu1 %v235_v12 }
   0xf   : > { %s540_s5 = sshll.u32 %s811_s12, 6  ;;  %s541_s11 = sshll.u32 %s811_s12, 7 }
  0x10   : > { %s199_s8 = scalar_lea.vmem %s802_s0, %s540_s5  ;;  %s751_s18 = scalar_lea.vmem %s805_s3, %s541_s11 }
  0x11   : > { %v213_v13 = vld [vmem:[%s199_s8] sm:$0xff]  ;;  %v214_v14 = vld [vmem:[%s199_s8 + $0x8] sm:$0xff]  ;;  %v215_v19 = vld [vmem:[%s199_s8 + $0x10] sm:$0xff] }
  0x12   : > { %v217_v15 = vld [vmem:[%s199_s8 + $0x20] sm:$0xff]  ;;  %v221_v16 = vpack.c.bf16 %v214_v14, %v213_v13  ;;  %v218_v17 = vld [vmem:[%s199_s8 + $0x28] sm:$0xff]  ;;  %v216_v20 = vld [vmem:[%s199_s8 + $0x18] sm:$0xff] }
  0x13   : > { %v223_v18 = vpack.c.bf16 %v218_v17, %v217_v15  ;;  %v219_v21 = vld [vmem:[%s199_s8 + $0x30] sm:$0xff]  ;;  %v220_v22 = vld [vmem:[%s199_s8 + $0x38] sm:$0xff]  ;;  %v222_v23 = vpack.c.bf16 %v216_v20, %v215_v19 }
  0x14   : > { %534 = vmatmul.mubr.msk.bf16.vlgmr.msra.gmra.mrb[0].mxu0 %vm249_vm0, %v221_v16  ;;  %v224_v24 = vpack.c.bf16 %v220_v22, %v219_v21 }
  0x15   : > { %536 = vmatmul.mubr.msk.bf16.vlgmr.msra.gmra.mrb[0].mxu1 %vm249_vm0, %v223_v18  ;;  %304 = vmatprep.mubr.bf16.mxu0 %v627_v7 }
  0x16   : > { %324 = vmatprep.mubr.bf16.mxu1 %v627_v7 }
  0x1c   : > { %535 = vmatmul.mubr.msk.bf16.gmra.mrb[4].mxu0 %vm249_vm0, %v222_v23 }
  0x1d   : > { %537 = vmatmul.mubr.msk.bf16.gmra.mrb[4].mxu1 %vm249_vm0, %v224_v24 }
  0xe7   : > { %v296_v32 = vpop.f32.mrb[0].mxu0 }
  0xe8   : > { %v316_v33 = vpop.f32.mrb[0].mxu1  ;;  %v699_v34 = vadd.f32 %v296_v32, %v242_v30  ;;  %v298_v36 = vpop.f32.mrb[1].mxu0 }
  0xe9   : > { %v701_v35 = vadd.f32 %v316_v33, %v242_v30  ;;  %v318_v37 = vpop.f32.mrb[1].mxu1  ;;  %v703_v38 = vadd.f32 %v298_v36, %v246_v31  ;;  %v300_v40 = vpop.f32.mrb[2].mxu0 }
  0xea   : > { %v705_v39 = vadd.f32 %v318_v37, %v246_v31  ;;  %v320_v41 = vpop.f32.mrb[2].mxu1  ;;  %v335_v42 = vmul.f32 0.5, %v699_v34  ;;  %v709_v44 = vadd.f32 %v300_v40, %v242_v30  ;;  %v302_v46 = vpop.f32.mrb[3].mxu0 }
  0xeb   : > { %v343_v43 = vmul.f32 0.5, %v701_v35  ;;  %v711_v45 = vadd.f32 %v320_v41, %v242_v30  ;;  %v322_v47 = vpop.f32.mrb[3].mxu1  ;;  %v336_v48 = vmul.f32 0.5, %v703_v38  ;;  %v715_v50 = vadd.f32 %v302_v46, %v246_v31 }
  0xec   : > { %v344_v49 = vmul.f32 0.5, %v705_v39  ;;  %v717_v51 = vadd.f32 %v322_v47, %v246_v31  ;;  %571 = vtanh.f32 %v335_v42  ;;  %v337_v52 = vmul.f32 0.5, %v709_v44 }
  0xed   : > { %573 = vtanh.f32 %v343_v43  ;;  %v345_v53 = vmul.f32 0.5, %v711_v45  ;;  %v338_v54 = vmul.f32 0.5, %v715_v50 }
  0xee   : > { %575 = vtanh.f32 %v336_v48  ;;  %v346_v55 = vmul.f32 0.5, %v717_v51 }
  0xef   : > { %577 = vtanh.f32 %v344_v49  ;;  %v306_v56 = vpop.f32.mrb[4].mxu0 }
  0xf0   : > { %v326_v57 = vpop.f32.mrb[4].mxu1  ;;  %579 = vtanh.f32 %v337_v52  ;;  %v723_v58 = vadd.f32 %v306_v56, %v242_v30  ;;  %v308_v60 = vpop.f32.mrb[5].mxu0 }
  0xf1   : > { %v725_v59 = vadd.f32 %v326_v57, %v242_v30  ;;  %v328_v61 = vpop.f32.mrb[5].mxu1  ;;  %581 = vtanh.f32 %v345_v53  ;;  %v727_v62 = vadd.f32 %v308_v60, %v246_v31  ;;  %v310_v0 = vpop.f32.mrb[6].mxu0 }
  0xf2   : > { %v729_v63 = vadd.f32 %v328_v61, %v246_v31  ;;  %v330_v1 = vpop.f32.mrb[6].mxu1  ;;  %583 = vtanh.f32 %v338_v54  ;;  %v339_v2 = vmul.f32 0.5, %v723_v58  ;;  %v733_v4 = vadd.f32 %v310_v0, %v242_v30  ;;  %v312_v5 = vpop.f32.mrb[7].mxu0 }
  0xf3   : > { %v347_v3 = vmul.f32 0.5, %v725_v59  ;;  %v332_v6 = vpop.f32.mrb[7].mxu1  ;;  %585 = vtanh.f32 %v346_v55  ;;  %v340_v7 = vmul.f32 0.5, %v727_v62  ;;  %v737_v9 = vadd.f32 %v330_v1, %v242_v30 }
  0xf4   : > { %v348_v8 = vmul.f32 0.5, %v729_v63  ;;  %587 = vtanh.f32 %v339_v2  ;;  %v341_v10 = vmul.f32 0.5, %v733_v4  ;;  %v740_v11 = vadd.f32 %v312_v5, %v246_v31 }
  0xf5   : > { %v742_v12 = vadd.f32 %v332_v6, %v246_v31  ;;  %589 = vtanh.f32 %v347_v3  ;;  %v349_v13 = vmul.f32 0.5, %v737_v9 }
  0xf6   : > { %v572_v14 = vpop.eup %571  ;;  %591 = vtanh.f32 %v340_v7  ;;  %v342_v15 = vmul.f32 0.5, %v740_v11 }
  0xf7   : > { %v574_v16 = vpop.eup %573  ;;  %v367_v17 = vadd.f32 1.0, %v572_v14  ;;  %593 = vtanh.f32 %v348_v8  ;;  %v350_v18 = vmul.f32 0.5, %v742_v12 }
  0xf8   : > { %v576_v19 = vpop.eup %575  ;;  %v375_v20 = vadd.f32 1.0, %v574_v16  ;;  %595 = vtanh.f32 %v341_v10 }
  0xf9   : > { %v578_v21 = vpop.eup %577  ;;  %v383_v22 = vmul.f32 0.5, %v367_v17  ;;  %v368_v23 = vadd.f32 1.0, %v576_v19  ;;  %597 = vtanh.f32 %v349_v13 }
  0xfa   : > { %v580_v24 = vpop.eup %579  ;;  %v391_v25 = vmul.f32 0.5, %v375_v20  ;;  %v376_v26 = vadd.f32 1.0, %v578_v21  ;;  %599 = vtanh.f32 %v342_v15 }
  0xfb   : > { %v582_v27 = vpop.eup %581  ;;  %v399_v28 = vmul.f32 %v383_v22, %v699_v34  ;;  %v384_v29 = vmul.f32 0.5, %v368_v23  ;;  %v369_v30 = vadd.f32 1.0, %v580_v24  ;;  %601 = vtanh.f32 %v350_v18 }
  0xfc   : > { %v584_v31 = vpop.eup %583  ;;  %v407_v32 = vmul.f32 %v391_v25, %v701_v35  ;;  %v392_v33 = vmul.f32 0.5, %v376_v26  ;;  %v377_v36 = vadd.f32 1.0, %v582_v27 }
  0xfd   : > { %v586_v37 = vpop.eup %585  ;;  %415 = vst [vmem:[%s751_s18] sm:$0xff] %v399_v28  ;;  %v400_v40 = vmul.f32 %v384_v29, %v703_v38  ;;  %v385_v41 = vmul.f32 0.5, %v369_v30  ;;  %v370_v42 = vadd.f32 1.0, %v584_v31 }
  0xfe   : > { %v588_v43 = vpop.eup %587  ;;  %424 = vst [vmem:[%s751_s18 + $0x40] sm:$0xff] %v407_v32  ;;  %v408_v34 = vmul.f32 %v392_v33, %v705_v39  ;;  %v393_v46 = vmul.f32 0.5, %v377_v36  ;;  %v378_v47 = vadd.f32 1.0, %v586_v37 }
  0xff   : > { %v590_v48 = vpop.eup %589  ;;  %417 = vst.msk [vmem:[%s751_s18 + $0x8] sm:$0xff] %vm416_vm1, %v400_v40  ;;  %v401_v35 = vmul.f32 %v385_v41, %v709_v44  ;;  %v386_v49 = vmul.f32 0.5, %v370_v42  ;;  %v371_v52 = vadd.f32 1.0, %v588_v43 }
 0x100   : > { %v592_v53 = vpop.eup %591  ;;  %425 = vst.msk [vmem:[%s751_s18 + $0x48] sm:$0xff] %vm416_vm1, %v408_v34  ;;  %v409_v38 = vmul.f32 %v393_v46, %v711_v45  ;;  %v394_v54 = vmul.f32 0.5, %v378_v47  ;;  %v379_v55 = vadd.f32 1.0, %v590_v48 }
 0x101   : > { %v594_v56 = vpop.eup %593  ;;  %418 = vst [vmem:[%s751_s18 + $0x10] sm:$0xff] %v401_v35  ;;  %v402_v39 = vmul.f32 %v386_v49, %v715_v50  ;;  %v387_v57 = vmul.f32 0.5, %v371_v52  ;;  %v372_v60 = vadd.f32 1.0, %v592_v53 }
 0x102   : > { %v596_v61 = vpop.eup %595  ;;  %426 = vst [vmem:[%s751_s18 + $0x50] sm:$0xff] %v409_v38  ;;  %v410_v44 = vmul.f32 %v394_v54, %v717_v51  ;;  %v395_v0 = vmul.f32 0.5, %v379_v55  ;;  %v380_v1 = vadd.f32 1.0, %v594_v56 }
 0x103   : > { %v598_v2 = vpop.eup %597  ;;  %419 = vst.msk [vmem:[%s751_s18 + $0x18] sm:$0xff] %vm416_vm1, %v402_v39  ;;  %v403_v45 = vmul.f32 %v387_v57, %v723_v58  ;;  %v388_v3 = vmul.f32 0.5, %v372_v60  ;;  %v373_v5 = vadd.f32 1.0, %v596_v61 }
 0x104   : > { %v600_v6 = vpop.eup %599  ;;  %427 = vst.msk [vmem:[%s751_s18 + $0x58] sm:$0xff] %vm416_vm1, %v410_v44  ;;  %v411_v50 = vmul.f32 %v395_v0, %v725_v59  ;;  %v396_v7 = vmul.f32 0.5, %v380_v1  ;;  %v381_v8 = vadd.f32 1.0, %v598_v2 }
 0x105   : > { %v602_v51 = vpop.eup %601  ;;  %420 = vst [vmem:[%s751_s18 + $0x20] sm:$0xff] %v403_v45  ;;  %v404_v10 = vmul.f32 %v388_v3, %v727_v62  ;;  %v389_v13 = vmul.f32 0.5, %v373_v5  ;;  %v374_v58 = vadd.f32 1.0, %v600_v6 }
 0x106   : > { %428 = vst [vmem:[%s751_s18 + $0x60] sm:$0xff] %v411_v50  ;;  %v412_v14 = vmul.f32 %v396_v7, %v729_v63  ;;  %v397_v15 = vmul.f32 0.5, %v381_v8  ;;  %v382_v16 = vadd.f32 1.0, %v602_v51 }
 0x107   : > { %421 = vst.msk [vmem:[%s751_s18 + $0x28] sm:$0xff] %vm416_vm1, %v404_v10  ;;  %v405_v59 = vmul.f32 %v389_v13, %v733_v4  ;;  %v390_v17 = vmul.f32 0.5, %v374_v58 }
 0x108   : > { %429 = vst.msk [vmem:[%s751_s18 + $0x68] sm:$0xff] %vm416_vm1, %v412_v14  ;;  %v413_v18 = vmul.f32 %v397_v15, %v737_v9  ;;  %v398_v19 = vmul.f32 0.5, %v382_v16 }
 0x109   : > { %422 = vst [vmem:[%s751_s18 + $0x30] sm:$0xff] %v405_v59  ;;  %v406_v62 = vmul.f32 %v390_v17, %v740_v11 }
 0x10a   : > { %430 = vst [vmem:[%s751_s18 + $0x70] sm:$0xff] %v413_v18  ;;  %v414_v20 = vmul.f32 %v398_v19, %v742_v12 }
 0x10b   : > { %423 = vst.msk [vmem:[%s751_s18 + $0x38] sm:$0xff] %vm416_vm1, %v406_v62 }
 0x10c   : > { %431 = vst.msk [vmem:[%s751_s18 + $0x78] sm:$0xff] %vm416_vm1, %v414_v20 }
 0x10d PF: > { %s13_s14 = sadd.s32 1, %s625_s14   ;;  %s806_s12 = smov %s621_s13 }
 0x10e   : > { %p10_p5 = scmp.ge.s32.totalorder %s13_s14, 4   ;;  %s807_s13 = smov %s809_s15 }
 0x110   :  { %12 = sbr.rel (!%p10_p5) target bundleno = 2 (0x2), region = 62 }

// kernel: efficientnet_forward.32
= control target key start
LH: loop header
LB: loop body
LE: loop exit
PB: predicated region body
PF: predicated region fallthrough
CT: control target
= control target key end

     0   :  { %v305_v0 = vmov 0.0|0.0   ;;  %vm62_vm0 = vcmask 523264   ;;  %v306_v41 = vmov 0.0   ;;  %vm154_vm1 = vcmask 64512   ;;  %s440_s1 = inlined_call_operand.vmem [shape: f32[192,8], index: 1, kind: input, shape index: {}]   ;;  %s441_s0 = inlined_call_operand.vmem [shape: f32[2,192], index: 0, kind: input, shape index: {}]   ;;  %s442_s3 = inlined_call_operand.vmem [shape: f32[8,192], index: 3, kind: input, shape index: {}]   ;;  %s443_s2 = inlined_call_operand.vmem [shape: f32[1,8], index: 2, kind: input, shape index: {}]   ;;  %s444_s4 = inlined_call_operand.vmem [shape: f32[1,192], index: 4, kind: input, shape index: {}]   ;;  %s445_s5 = inlined_call_operand.vmem [shape: f32[2,192], index: 5, kind: output, shape index: {}]  }
   0x1   :  { %260 = vmatprep.subr.bf16.mxu0 %v305_v0  ;;  %v21_v1 = vld [vmem:[%s440_s1] sm:$0xff]  ;;  %v22_v2 = vld [vmem:[%s440_s1 + $0x8] sm:$0xff]  ;;  %v23_v3 = vld [vmem:[%s440_s1 + $0x10] sm:$0xff]  ;;  %222 = vmatprep.mubr.f32.mxu1 %v306_v41  ;;  %v144_v51 = vlaneseq  ;;  %vm248_vm2 = vcmask 1041408   ;;  %vm249_vm3 = vcmask 519170  }
   0x2   :  { %v261_v4 = vpack.c.bf16 %v22_v2, %v21_v1  ;;  %v24_v5 = vld [vmem:[%s440_s1 + $0x18] sm:$0xff]  ;;  %v25_v7 = vld [vmem:[%s440_s1 + $0x20] sm:$0xff]  ;;  %v26_v8 = vld [vmem:[%s440_s1 + $0x28] sm:$0xff] }
   0x3   :  { %v264_v6 = vpack.c.bf16 %v24_v5, %v23_v3  ;;  %v267_v9 = vpack.c.bf16 %v26_v8, %v25_v7  ;;  %v27_v10 = vld [vmem:[%s440_s1 + $0x30] sm:$0xff]  ;;  %v28_v11 = vld [vmem:[%s440_s1 + $0x38] sm:$0xff]  ;;  %v257_v12 = vld.sshfl [vmem:[%s441_s0] sm:$0x33 pattern:$0x76325410] }
   0x4   :  { %262 = vmatpush1.bf16.msra.mxu0 %v261_v4  ;;  %v60_v13 = vcombine.high %v257_v12, %v257_v12  ;;  %v270_v14 = vpack.c.bf16 %v28_v11, %v27_v10  ;;  %v29_v15 = vld [vmem:[%s440_s1 + $0x40] sm:$0xff]  ;;  %v30_v16 = vld [vmem:[%s440_s1 + $0x48] sm:$0xff]  ;;  %v31_v18 = vld [vmem:[%s440_s1 + $0x50] sm:$0xff]  ;;  %v145_v52 = vshrl.u32 %v144_v51, 7 }
   0x5   :  { %263 = vmatprep.subr.bf16.mxu0 %v305_v0  ;;  %v273_v17 = vpack.c.bf16 %v30_v16, %v29_v15  ;;  %v32_v19 = vld [vmem:[%s440_s1 + $0x58] sm:$0xff]  ;;  %v33_v21 = vld [vmem:[%s440_s1 + $0x60] sm:$0xff]  ;;  %v34_v22 = vld [vmem:[%s440_s1 + $0x68] sm:$0xff] }
   0x6   :  { %258 = vmatprep.mubr.msk.f32.mxu0 %vm62_vm0, %v60_v13  ;;  %v276_v20 = vpack.c.bf16 %v32_v19, %v31_v18  ;;  %v279_v23 = vpack.c.bf16 %v34_v22, %v33_v21  ;;  %v35_v24 = vld [vmem:[%s440_s1 + $0x70] sm:$0xff]  ;;  %v36_v25 = vld [vmem:[%s440_s1 + $0x78] sm:$0xff]  ;;  %v37_v27 = vld [vmem:[%s440_s1 + $0x80] sm:$0xff]  ;;  %v146_v53 = vsub.s32 0, %v145_v52  ;;  %v150_v55 = vsub.s32 1, %v145_v52 }
   0x7   :  { %v282_v26 = vpack.c.bf16 %v36_v25, %v35_v24  ;;  %v38_v28 = vld [vmem:[%s440_s1 + $0x88] sm:$0xff]  ;;  %v39_v30 = vld [vmem:[%s440_s1 + $0x90] sm:$0xff]  ;;  %v40_v31 = vld [vmem:[%s440_s1 + $0x98] sm:$0xff] }
   0x8   :  { %265 = vmatpush1.bf16.msra.mxu0 %v264_v6  ;;  %v285_v29 = vpack.c.bf16 %v38_v28, %v37_v27  ;;  %v288_v32 = vpack.c.bf16 %v40_v31, %v39_v30  ;;  %v41_v33 = vld [vmem:[%s440_s1 + $0xa0] sm:$0xff]  ;;  %v42_v34 = vld [vmem:[%s440_s1 + $0xa8] sm:$0xff]  ;;  %v43_v36 = vld [vmem:[%s440_s1 + $0xb0] sm:$0xff] }
   0x9   :  { %266 = vmatprep.subr.bf16.mxu0 %v305_v0  ;;  %v291_v35 = vpack.c.bf16 %v42_v34, %v41_v33  ;;  %v44_v37 = vld [vmem:[%s440_s1 + $0xb8] sm:$0xff]  ;;  %v141_v39 = vld [vmem:[%s442_s3 + $0x8] sm:$0xff]  ;;  %v140_v40 = vld [vmem:[%s442_s3] sm:$0xff] }
   0xa   :  { %v294_v38 = vpack.c.bf16 %v44_v37, %v43_v36  ;;  %158 = vmatprep.subr.mxu1 %v141_v39  ;;  %v256_v42 = vld [vmem:[%s443_s2] ss:$0 sm:$0xff]  ;;  %vm250_vm4 = vmor %vm249_vm3, %vm248_vm2 }
   0xb   :  { %159 = vmatpush1.msra.mxu1 %v140_v40  ;;  %v142_v54 = vld [vmem:[%s444_s4] sm:$0x3] }
   0xc   :  { %268 = vmatpush1.bf16.msra.mxu0 %v267_v9  ;;  %v147_v56 = vrot.slane %v142_v54, %v146_v53  ;;  %v151_v57 = vrot.slane %v142_v54, %v150_v55 }
   0xd   :  { %269 = vmatprep.subr.bf16.mxu0 %v305_v0 }
  0x10   :  { %271 = vmatpush1.bf16.msra.mxu0 %v270_v14 }
  0x11   :  { %272 = vmatprep.subr.bf16.mxu0 %v305_v0 }
  0x14   :  { %274 = vmatpush1.bf16.msra.mxu0 %v273_v17 }
  0x15   :  { %275 = vmatprep.subr.bf16.mxu0 %v305_v0 }
  0x18   :  { %277 = vmatpush1.bf16.msra.mxu0 %v276_v20 }
  0x19   :  { %278 = vmatprep.subr.bf16.mxu0 %v305_v0 }
  0x1c   :  { %280 = vmatpush1.bf16.msra.mxu0 %v279_v23 }
  0x1d   :  { %281 = vmatprep.subr.bf16.mxu0 %v305_v0 }
  0x20   :  { %283 = vmatpush1.bf16.msra.mxu0 %v282_v26 }
  0x21   :  { %284 = vmatprep.subr.bf16.mxu0 %v305_v0 }
  0x24   :  { %286 = vmatpush1.bf16.msra.mxu0 %v285_v29 }
  0x25   :  { %287 = vmatprep.subr.bf16.mxu0 %v305_v0 }
  0x28   :  { %289 = vmatpush1.bf16.msra.mxu0 %v288_v32 }
  0x29   :  { %290 = vmatprep.subr.bf16.mxu0 %v305_v0 }
  0x2c   :  { %292 = vmatpush1.bf16.msra.mxu0 %v291_v35 }
  0x2d   :  { %293 = vmatprep.subr.bf16.mxu0 %v305_v0  ;;  %v307_v0 = vmov 1983009808  }
  0x2e   :  { %v241_v1 = vunpack.c.l.s4 %v307_v0 }
  0x30   :  { %295 = vmatpush1.bf16.msra.mxu0 %v294_v38  ;;  %v242_v3 = vunpack.c.0.s8 %v241_v1 }
  0x32   :  { %v245_v9 = vsub.s32 %v242_v3, %v145_v52 }
  0x33   :  { %130 = vmatmul.mubr.f32.vlgmr.msra.gmra.mrb[0].mxu0 %v257_v12 }
 0x106   :  { %v131_v43 = vpop.f32.mrb[0].mxu0 }
 0x107   :  { %v132_v44 = vadd.f32 %v256_v42, %v131_v43  ;;  %v133_v45 = vpop.f32.mrb[1].mxu0 }
 0x109   :  { %v135_v46 = vmul.f32 0.5, %v132_v44 }
 0x10b   :  { %299 = vtanh.f32 %v135_v46 }
 0x115   :  { %v300_v47 = vpop.eup %299 }
 0x116   :  { %v137_v48 = vadd.f32 1.0, %v300_v47 }
 0x118   :  { %v138_v49 = vmul.f32 0.5, %v137_v48 }
 0x11a   :  { %v139_v50 = vmul.f32 %v138_v49, %v132_v44 }
 0x11c   :  { %259 = vmatmul.mubr.msk.f32.vlgmr.msra.gmra.mrb[0].mxu1 %vm154_vm1, %v139_v50 }
 0x1ef   :  { %v224_v58 = vpop.f32.mrb[0].mxu1 }
 0x1f0   :  { %v225_v59 = vadd.f32 %v224_v58, %v147_v56  ;;  %v226_v60 = vpop.f32.mrb[1].mxu1 }
 0x1f1   :  { %v227_v61 = vadd.f32 %v226_v60, %v151_v57 }
 0x1f2   :  { %v229_v62 = vmul.f32 0.5, %v225_v59 }
 0x1f3   :  { %v230_v63 = vmul.f32 0.5, %v227_v61 }
 0x1f4   :  { %301 = vtanh.f32 %v229_v62 }
 0x1f5   :  { %303 = vtanh.f32 %v230_v63 }
 0x1fe   :  { %v302_v2 = vpop.eup %301 }
 0x1ff   :  { %v304_v4 = vpop.eup %303  ;;  %v233_v5 = vadd.f32 1.0, %v302_v2 }
 0x200   :  { %v234_v6 = vadd.f32 1.0, %v304_v4 }
 0x201   :  { %v235_v7 = vmul.f32 0.5, %v233_v5 }
 0x202   :  { %v236_v8 = vmul.f32 0.5, %v234_v6 }
 0x204   :  { %v239_v10 = vcombine.low %v235_v7, %v236_v8 }
 0x206   :  { %v246_v11 = vrot.slane %v239_v10, %v245_v9 }
 0x208   :  { %251 = vst.msk [vmem:[%s445_s5] sm:$0xf] %vm250_vm4, %v246_v11 }

// kernel: efficientnet_forward.33
= control target key start
LH: loop header
LB: loop body
LE: loop exit
PB: predicated region body
PF: predicated region fallthrough
CT: control target
= control target key end

     0   :  { %s765_s18 = smov 0   ;;  %s767_s19 = smov 0   ;;  %s976_s0 = inlined_call_operand.vmem [shape: f32[2,64,192], index: 0, kind: input, shape index: {}]   ;;  %s977_s1 = inlined_call_operand.vmem [shape: f32[192,32], index: 1, kind: input, shape index: {}]   ;;  %s978_s2 = inlined_call_operand.vmem [shape: f32[1,32], index: 2, kind: input, shape index: {}]   ;;  %s979_s3 = inlined_call_operand.vmem [shape: f32[2,1,192], index: 3, kind: input, shape index: {}]   ;;  %s980_s4 = inlined_call_operand.vmem [shape: f32[2,64,32], index: 4, kind: input, shape index: {}]   ;;  %s981_s5 = inlined_call_operand.vmem [shape: f32[2,64,32], index: 5, kind: output, shape index: {}]  }
   0x1   :  { %s769_s20 = smov 0  }
   0x2 LB: > { %s27_s21 = sadd.s32 1, %s728_s19  ;;  %p643_p0 = scmp.ge.s32.totalorder %s732_s20, 1  ;;  %s732_s20 = sphi %s769_s20, %s15_s20   ;;  %s728_s19 = sphi %s767_s19, %s983_s19   ;;  %s724_s18 = sphi %s765_s18, %s982_s18  }
   0x3   : > { %p29_p1 = scmp.ge.s32.totalorder %s27_s21, 2  ;;  %p235_p2 = scmp.lt.s32.totalorder %s732_s20, 3 }
   0x5   : > { %s985_s21 = smov (%p29_p1, %s27_s21), 0  ;;  %p236_p3 = pnand %p643_p0, %p235_p2 }
   0x6   : > { %v373_v0 = vld [vmem:[%s977_s1] sm:$0xff] (!%p236_p3)  ;;  %v374_v1 = vld [vmem:[%s977_s1 + $0x8] sm:$0xff] (!%p236_p3)  ;;  %v375_v2 = vld [vmem:[%s977_s1 + $0x10] sm:$0xff] (!%p236_p3)  ;;  %p286_p4 = scmp.lt.s32.totalorder (!%p236_p3), %s724_s18, 1  ;;  %v339_v3 = vlaneseq (!%p236_p3)  ;;  %v734_v4 = vmov (!%p236_p3), 0   ;;  %vm416_vm0 = vcmask (!%p236_p3), 523264  }
   0x7   : > { %239 = sbr.rel (%p236_p3) target bundleno = 283 (0x11b), region = 40  ;;  %429 = vmatprep.subr.bf16.mxu0 (!%p236_p3), %v734_v4  ;;  %661 = vmatprep.subr.bf16.mxu1 (!%p236_p3), %v734_v4  ;;  %v397_v5 = vpack.c.bf16 (!%p236_p3), %v374_v1, %v373_v0  ;;  %v376_v6 = vld [vmem:[%s977_s1 + $0x18] sm:$0xff] (!%p236_p3)  ;;  %v377_v9 = vld [vmem:[%s977_s1 + $0x20] sm:$0xff] (!%p236_p3)  ;;  %v378_v10 = vld [vmem:[%s977_s1 + $0x28] sm:$0xff] (!%p236_p3)  ;;  %vm510_vm1 = vcmask (!%p236_p3), 261120  }
   0x8   : > { %v799_v7 = vshrl.u32 (!%p236_p3), %v339_v3, 7  ;;  %v398_v8 = vpack.c.bf16 (!%p236_p3), %v376_v6, %v375_v2  ;;  %v399_v12 = vpack.c.bf16 (!%p236_p3), %v378_v10, %v377_v9  ;;  %v379_v13 = vld [vmem:[%s977_s1 + $0x30] sm:$0xff] (!%p236_p3)  ;;  %v380_v14 = vld [vmem:[%s977_s1 + $0x38] sm:$0xff] (!%p236_p3)  ;;  %v381_v25 = vld [vmem:[%s977_s1 + $0x40] sm:$0xff] (!%p236_p3) }
   0x9   : > { %430 = vmatpush1.bf16.msra.mxu0 (!%p236_p3), %v397_v5  ;;  %673 = vmatpush1.bf16.msra.mxu1 (!%p236_p3), %v397_v5  ;;  %v400_v21 = vpack.c.bf16 (!%p236_p3), %v380_v14, %v379_v13  ;;  %v382_v26 = vld [vmem:[%s977_s1 + $0x48] sm:$0xff] (!%p236_p3)  ;;  %v383_v31 = vld [vmem:[%s977_s1 + $0x50] sm:$0xff] (!%p236_p3)  ;;  %v384_v32 = vld [vmem:[%s977_s1 + $0x58] sm:$0xff] (!%p236_p3) }
   0xa   : > { %431 = vmatprep.subr.bf16.mxu0 (!%p236_p3), %v734_v4  ;;  %662 = vmatprep.subr.bf16.mxu1 (!%p236_p3), %v734_v4  ;;  %v345_v11 = vsub.s32 (!%p236_p3), 1, %v799_v7  ;;  %v401_v30 = vpack.c.bf16 (!%p236_p3), %v382_v26, %v381_v25  ;;  %v402_v33 = vpack.c.bf16 (!%p236_p3), %v384_v32, %v383_v31  ;;  %v385_v34 = vld [vmem:[%s977_s1 + $0x60] sm:$0xff] (!%p236_p3)  ;;  %v386_v35 = vld [vmem:[%s977_s1 + $0x68] sm:$0xff] (!%p236_p3)  ;;  %v387_v37 = vld [vmem:[%s977_s1 + $0x70] sm:$0xff] (!%p236_p3)  ;;  %v341_v45 = vsub.s32 (!%p236_p3), 0, %v799_v7 }
   0xb   : > { %v403_v36 = vpack.c.bf16 (!%p236_p3), %v386_v35, %v385_v34  ;;  %v388_v38 = vld [vmem:[%s977_s1 + $0x78] sm:$0xff] (!%p236_p3)  ;;  %v389_v40 = vld [vmem:[%s977_s1 + $0x80] sm:$0xff] (!%p236_p3)  ;;  %v390_v41 = vld [vmem:[%s977_s1 + $0x88] sm:$0xff] (!%p236_p3) }
   0xc   : > { %v404_v39 = vpack.c.bf16 (!%p236_p3), %v388_v38, %v387_v37  ;;  %v405_v42 = vpack.c.bf16 (!%p236_p3), %v390_v41, %v389_v40  ;;  %v391_v43 = vld [vmem:[%s977_s1 + $0x90] sm:$0xff] (!%p236_p3)  ;;  %v392_v44 = vld [vmem:[%s977_s1 + $0x98] sm:$0xff] (!%p236_p3)  ;;  %v393_v47 = vld [vmem:[%s977_s1 + $0xa0] sm:$0xff] (!%p236_p3) }
   0xd   : > { %432 = vmatpush1.bf16.msra.mxu0 (!%p236_p3), %v398_v8  ;;  %674 = vmatpush1.bf16.msra.mxu1 (!%p236_p3), %v398_v8  ;;  %v406_v46 = vpack.c.bf16 (!%p236_p3), %v392_v44, %v391_v43  ;;  %v394_v48 = vld [vmem:[%s977_s1 + $0xa8] sm:$0xff] (!%p236_p3)  ;;  %v395_v49 = vld [vmem:[%s977_s1 + $0xb0] sm:$0xff] (!%p236_p3)  ;;  %v396_v51 = vld [vmem:[%s977_s1 + $0xb8] sm:$0xff] (!%p236_p3) }
   0xe   : > { %s987_s18 = smov (!%p286_p4, %s724_s18), 1  ;;  %433 = vmatprep.subr.bf16.mxu0 %v734_v4  ;;  %663 = vmatprep.subr.bf16.mxu1 %v734_v4  ;;  %v407_v54 = vpack.c.bf16 %v394_v48, %v393_v47  ;;  %v408_v61 = vpack.c.bf16 %v396_v51, %v395_v49 }
   0xf   : > { %s658_s9 = sshll.u32 %s987_s18, 7  ;;  %s646_s10 = sshll.u32 %s987_s18, 1 }
  0x10   : > { %s814_s13 = scalar_lea.vmem %s976_s0, %s658_s9  ;;  %s299_s16 = scalar_lea.vmem %s979_s3, %s646_s10 }
  0x11   : > { %v322_v15 = vld [vmem:[%s814_s13 + $0x8] sm:$0xff]  ;;  %v324_v16 = vld [vmem:[%s814_s13 + $0x18] sm:$0xff]  ;;  %v830_v17 = vld [vmem:[%s299_s16] sm:$0x3]  ;;  %434 = vmatpush1.bf16.msra.mxu0 %v399_v12  ;;  %675 = vmatpush1.bf16.msra.mxu1 %v399_v12  ;;  %s659_s12 = sshll.u32 %s987_s18, 6 }
  0x12   : > { %v833_v18 = vrot.slane %v830_v17, %v345_v11  ;;  %v330_v19 = vld [vmem:[%s814_s13 + $0x48] sm:$0xff]  ;;  %v332_v20 = vld [vmem:[%s814_s13 + $0x58] sm:$0xff]  ;;  %435 = vmatprep.subr.bf16.mxu0 %v734_v4  ;;  %664 = vmatprep.subr.bf16.mxu1 %v734_v4  ;;  %v342_v50 = vrot.slane %v830_v17, %v341_v45  ;;  %v321_v52 = vld [vmem:[%s814_s13] sm:$0xff]  ;;  %s933_s16 = scalar_lea.vmem %s980_s4, %s659_s12  ;;  %s943_s23 = scalar_lea.vmem %s981_s5, %s659_s12 }
  0x13   : > { %v323_v53 = vld [vmem:[%s814_s13 + $0x10] sm:$0xff]  ;;  %v329_v55 = vld [vmem:[%s814_s13 + $0x40] sm:$0xff]  ;;  %v326_v57 = vld [vmem:[%s814_s13 + $0x28] sm:$0xff] }
  0x14   : > { %v350_v22 = vmul.f32 %v833_v18, %v322_v15  ;;  %v352_v23 = vmul.f32 %v833_v18, %v324_v16  ;;  %v358_v24 = vmul.f32 %v833_v18, %v330_v19  ;;  %v360_v27 = vmul.f32 %v833_v18, %v332_v20  ;;  %v331_v56 = vld [vmem:[%s814_s13 + $0x50] sm:$0xff]  ;;  %v328_v58 = vld [vmem:[%s814_s13 + $0x38] sm:$0xff]  ;;  %v334_v59 = vld [vmem:[%s814_s13 + $0x68] sm:$0xff] }
  0x15   : > { %436 = vmatpush1.bf16.msra.mxu0 %v400_v21  ;;  %676 = vmatpush1.bf16.msra.mxu1 %v400_v21  ;;  %v336_v60 = vld [vmem:[%s814_s13 + $0x78] sm:$0xff]  ;;  %v349_v62 = vmul.f32 %v342_v50, %v321_v52  ;;  %v351_v63 = vmul.f32 %v342_v50, %v323_v53  ;;  %v357_v0 = vmul.f32 %v342_v50, %v329_v55  ;;  %v325_v9 = vld [vmem:[%s814_s13 + $0x20] sm:$0xff]  ;;  %v327_v12 = vld [vmem:[%s814_s13 + $0x30] sm:$0xff] }
  0x16   : > { %v366_v28 = vpack.c.bf16 %v352_v23, %v350_v22  ;;  %v370_v29 = vpack.c.bf16 %v360_v27, %v358_v24  ;;  %437 = vmatprep.subr.bf16.mxu0 %v734_v4  ;;  %665 = vmatprep.subr.bf16.mxu1 %v734_v4  ;;  %v359_v1 = vmul.f32 %v342_v50, %v331_v56  ;;  %v333_v13 = vld [vmem:[%s814_s13 + $0x60] sm:$0xff]  ;;  %v335_v14 = vld [vmem:[%s814_s13 + $0x70] sm:$0xff]  ;;  %v499_v32 = vld [vmem:[%s933_s16 + $0x28] sm:$0xff] }
  0x17   : > { %v354_v2 = vmul.f32 %v833_v18, %v326_v57  ;;  %v356_v3 = vmul.f32 %v833_v18, %v328_v58  ;;  %v362_v5 = vmul.f32 %v833_v18, %v334_v59  ;;  %v364_v6 = vmul.f32 %v833_v18, %v336_v60  ;;  %v651_v20 = vld [vmem:[%s978_s2] ss:$0 sm:$0xff]  ;;  %v500_v44 = vld [vmem:[%s933_s16 + $0x30] sm:$0xff]  ;;  %v501_v52 = vld [vmem:[%s933_s16 + $0x38] sm:$0xff] }
  0x18   : > { %652 = vmatprep.mubr.msk.bf16.mxu0 %vm416_vm0, %v366_v28  ;;  %654 = vmatprep.mubr.msk.bf16.mxu1 %vm416_vm0, %v370_v29  ;;  %v365_v7 = vpack.c.bf16 %v351_v63, %v349_v62  ;;  %v369_v8 = vpack.c.bf16 %v359_v1, %v357_v0  ;;  %v353_v15 = vmul.f32 %v342_v50, %v325_v9  ;;  %v494_v22 = vld [vmem:[%s933_s16] sm:$0xff] }
  0x19   : > { %438 = vmatpush1.bf16.msra.mxu0 %v401_v30  ;;  %677 = vmatpush1.bf16.msra.mxu1 %v401_v30  ;;  %v368_v10 = vpack.c.bf16 %v356_v3, %v354_v2  ;;  %v372_v11 = vpack.c.bf16 %v364_v6, %v362_v5  ;;  %v355_v16 = vmul.f32 %v342_v50, %v327_v12  ;;  %v498_v24 = vld [vmem:[%s933_s16 + $0x20] sm:$0xff]  ;;  %v495_v30 = vld [vmem:[%s933_s16 + $0x8] sm:$0xff] }
  0x1a   : > { %439 = vmatprep.subr.bf16.mxu0 %v734_v4  ;;  %666 = vmatprep.subr.bf16.mxu1 %v734_v4  ;;  %v361_v17 = vmul.f32 %v342_v50, %v333_v13  ;;  %v363_v18 = vmul.f32 %v342_v50, %v335_v14  ;;  %v497_v50 = vld [vmem:[%s933_s16 + $0x18] sm:$0xff] }
  0x1c   : > { %v371_v19 = vpack.c.bf16 %v363_v18, %v361_v17 }
  0x1d   : > { %440 = vmatpush1.bf16.msra.mxu0 %v402_v33  ;;  %678 = vmatpush1.bf16.msra.mxu1 %v402_v33 }
  0x1e   : > { %441 = vmatprep.subr.bf16.mxu0 %v734_v4  ;;  %667 = vmatprep.subr.bf16.mxu1 %v734_v4 }
  0x21   : > { %442 = vmatpush1.bf16.msra.mxu0 %v403_v36  ;;  %679 = vmatpush1.bf16.msra.mxu1 %v403_v36 }
  0x22   : > { %443 = vmatprep.subr.bf16.mxu0 %v734_v4  ;;  %668 = vmatprep.subr.bf16.mxu1 %v734_v4 }
  0x25   : > { %444 = vmatpush1.bf16.msra.mxu0 %v404_v39  ;;  %680 = vmatpush1.bf16.msra.mxu1 %v404_v39 }
  0x26   : > { %445 = vmatprep.subr.bf16.mxu0 %v734_v4  ;;  %669 = vmatprep.subr.bf16.mxu1 %v734_v4 }
  0x29   : > { %446 = vmatpush1.bf16.msra.mxu0 %v405_v42  ;;  %681 = vmatpush1.bf16.msra.mxu1 %v405_v42  ;;  %v496_v42 = vld [vmem:[%s933_s16 + $0x10] sm:$0xff] }
  0x2a   : > { %447 = vmatprep.subr.bf16.mxu0 %v734_v4  ;;  %670 = vmatprep.subr.bf16.mxu1 %v734_v4 }
  0x2d   : > { %448 = vmatpush1.bf16.msra.mxu0 %v406_v46  ;;  %682 = vmatpush1.bf16.msra.mxu1 %v406_v46 }
  0x2e   : > { %449 = vmatprep.subr.bf16.mxu0 %v734_v4  ;;  %671 = vmatprep.subr.bf16.mxu1 %v734_v4 }
  0x31   : > { %450 = vmatpush1.bf16.msra.mxu0 %v407_v54  ;;  %683 = vmatpush1.bf16.msra.mxu1 %v407_v54 }
  0x32   : > { %451 = vmatprep.subr.bf16.mxu0 %v734_v4  ;;  %672 = vmatprep.subr.bf16.mxu1 %v734_v4  ;;  %v367_v4 = vpack.c.bf16 %v355_v16, %v353_v15 }
  0x35   : > { %452 = vmatpush1.bf16.msra.mxu0 %v408_v61  ;;  %684 = vmatpush1.bf16.msra.mxu1 %v408_v61 }
  0x38   : > { %462 = vmatmul.mubr.bf16.vlgmr.msra.gmra.mrb[0].mxu0 %v365_v7  ;;  %478 = vmatmul.mubr.bf16.vlgmr.msra.gmra.mrb[0].mxu1 %v369_v8 }
  0x39   : > { %653 = vmatprep.mubr.msk.bf16.mxu0 %vm416_vm0, %v368_v10  ;;  %655 = vmatprep.mubr.msk.bf16.mxu1 %vm416_vm0, %v372_v11 }
  0x40   : > { %470 = vmatmul.mubr.bf16.gmra.mrb[4].mxu0 %v367_v4  ;;  %486 = vmatmul.mubr.bf16.gmra.mrb[4].mxu1 %v371_v19 }
 0x10b   : > { %v463_v21 = vpop.f32.mrb[0].mxu0  ;;  %v479_v23 = vpop.f32.mrb[0].mxu1 }
 0x10c   : > { %v464_v25 = vadd.f32 %v651_v20, %v463_v21  ;;  %v480_v26 = vadd.f32 %v651_v20, %v479_v23  ;;  %v465_v27 = vpop.f32.mrb[1].mxu0  ;;  %v481_v28 = vpop.f32.mrb[1].mxu1 }
 0x10d   : > { %v466_v29 = vpop.f32.mrb[2].mxu0  ;;  %v482_v31 = vpop.f32.mrb[2].mxu1 }
 0x10e   : > { %v502_v33 = vadd.f32 %v494_v22, %v464_v25  ;;  %v506_v34 = vadd.f32 %v498_v24, %v480_v26  ;;  %v467_v35 = vadd.f32 %v651_v20, %v466_v29  ;;  %v483_v36 = vadd.f32 %v651_v20, %v482_v31  ;;  %v468_v37 = vpop.f32.mrb[3].mxu0  ;;  %v484_v38 = vpop.f32.mrb[3].mxu1 }
 0x110   : > { %511 = vst.msk [vmem:[%s943_s23] sm:$0xff] %vm510_vm1, %v502_v33  ;;  %515 = vst.msk [vmem:[%s943_s23 + $0x20] sm:$0xff] %vm510_vm1, %v506_v34  ;;  %v503_v39 = vadd.f32 %v495_v30, %v467_v35  ;;  %v507_v40 = vadd.f32 %v499_v32, %v483_v36 }
 0x112   : > { %512 = vst.msk [vmem:[%s943_s23 + $0x8] sm:$0xff] %vm510_vm1, %v503_v39  ;;  %516 = vst.msk [vmem:[%s943_s23 + $0x28] sm:$0xff] %vm510_vm1, %v507_v40 }
 0x113   : > { %v471_v41 = vpop.f32.mrb[4].mxu0  ;;  %v487_v43 = vpop.f32.mrb[4].mxu1 }
 0x114   : > { %v472_v45 = vadd.f32 %v651_v20, %v471_v41  ;;  %v488_v46 = vadd.f32 %v651_v20, %v487_v43  ;;  %v473_v47 = vpop.f32.mrb[5].mxu0  ;;  %v489_v48 = vpop.f32.mrb[5].mxu1 }
 0x115   : > { %v474_v49 = vpop.f32.mrb[6].mxu0  ;;  %v490_v51 = vpop.f32.mrb[6].mxu1 }
 0x116   : > { %v504_v53 = vadd.f32 %v496_v42, %v472_v45  ;;  %v508_v54 = vadd.f32 %v500_v44, %v488_v46  ;;  %v475_v55 = vadd.f32 %v651_v20, %v474_v49  ;;  %v491_v56 = vadd.f32 %v651_v20, %v490_v51  ;;  %v476_v57 = vpop.f32.mrb[7].mxu0  ;;  %v492_v58 = vpop.f32.mrb[7].mxu1 }
 0x118   : > { %513 = vst.msk [vmem:[%s943_s23 + $0x10] sm:$0xff] %vm510_vm1, %v504_v53  ;;  %517 = vst.msk [vmem:[%s943_s23 + $0x30] sm:$0xff] %vm510_vm1, %v508_v54  ;;  %v505_v59 = vadd.f32 %v497_v50, %v475_v55  ;;  %v509_v60 = vadd.f32 %v501_v52, %v491_v56 }
 0x11a   : > { %514 = vst.msk [vmem:[%s943_s23 + $0x18] sm:$0xff] %vm510_vm1, %v505_v59  ;;  %518 = vst.msk [vmem:[%s943_s23 + $0x38] sm:$0xff] %vm510_vm1, %v509_v60 }
 0x11b PF: > { %s15_s20 = sadd.s32 1, %s732_s20   ;;  %s982_s18 = smov %s728_s19 }
 0x11c   : > { %p12_p5 = scmp.ge.s32.totalorder %s15_s20, 4   ;;  %s983_s19 = smov %s985_s21 }
 0x11e   :  { %14 = sbr.rel (!%p12_p5) target bundleno = 2 (0x2), region = 76 }

// kernel: efficientnet_forward.31
= control target key start
LH: loop header
LB: loop body
LE: loop exit
PB: predicated region body
PF: predicated region fallthrough
CT: control target
= control target key end

     0   :  { %s1506_s12 = smov 0   ;;  %s1508_s13 = smov 0   ;;  %s2307_s0 = inlined_call_operand.vmem [shape: f32[9,2,64,192], index: 0, kind: input, shape index: {}]   ;;  %s2308_s1 = inlined_call_operand.vmem [shape: f32[9,192], index: 1, kind: input, shape index: {}]   ;;  %s2309_s2 = inlined_call_operand.vmem [shape: f32[1,192], index: 2, kind: input, shape index: {}]   ;;  %s2310_s3 = inlined_call_operand.vmem [shape: f32[2,64,192], index: 3, kind: output, shape index: {}]  }
   0x1   :  { %s1510_s14 = smov 0   ;;  %s1512_s15 = smov 0  }
   0x2   :  { %s1514_s16 = smov 0  }
   0x3 LB: > { %s25_s17 = sadd.s32 1, %s1480_s15  ;;  %p41_p1 = scmp.ne.s32.totalorder %s1472_s13, %s1468_s12  ;;  %s1484_s16 = sphi %s1514_s16, %s13_s16   ;;  %s1480_s15 = sphi %s1512_s15, %s2314_s15   ;;  %s1476_s14 = sphi %s1510_s14, %s2313_s14   ;;  %s1472_s13 = sphi %s1508_s13, %s2312_s13   ;;  %s1468_s12 = sphi %s1506_s12, %s2311_s12  }
   0x4   : > { %p27_p0 = scmp.ge.s32.totalorder %s25_s17, 2  ;;  %p42_p2 = scmp.eq.s32.totalorder %s1484_s16, 0 }
   0x5   : > { %s34_s19 = sadd.s32 1, %s1472_s13  ;;  %p1232_p5 = scmp.ge.s32.totalorder %s1484_s16, 2 }
   0x6   : > { %s2316_s17 = smov (%p27_p0, %s25_s17), 0  ;;  %p43_p3 = por %p42_p2, %p41_p1 }
   0x7   : > { %s29_s18 = ssub.s32 %s1480_s15, %s2316_s17  ;;  %143 = sbr.rel (%p1232_p5) target bundleno = 91 (0x5b), region = 24 }
   0x8   : > { %p32_p4 = scmp.eq.s32.totalorder %s29_s18, 0 }
   0xa   : > { %s1541_s20 = scalar_select %p32_p4, %s1472_s13, %s34_s19  }
   0xe   : > { %146 = sbr.rel (!%p43_p3) target bundleno = 91 (0x5b), region = 28  ;;  %s148_s21 = sand.u32 (%p43_p3), 1, %s1472_s13  }
   0xf   : > { %s1370_s22 = sshll.u32 (%p43_p3), %s1480_s15, 7  ;;  %s1372_s23 = smul.u32 (%p43_p3), 1152, %s148_s21 }
  0x10   : > { %s1549_s26 = scalar_lea.vmem (%p43_p3), %s2307_s0, %s1370_s22 }
  0x11   : > { %v169_v0 = vld [vmem:[%s1549_s26] sm:$0xff] (%p43_p3)  ;;  %v171_v1 = vld [vmem:[%s1549_s26 + $0x8] sm:$0xff] (%p43_p3)  ;;  %v173_v2 = vld [vmem:[%s1549_s26 + $0x10] sm:$0xff] (%p43_p3)  ;;  %s1557_s27 = scalar_lea.vmem (%p43_p3), [#allocation2], %s1372_s23 }
  0x12   : > { %v175_v3 = vld [vmem:[%s1549_s26 + $0x18] sm:$0xff] (%p43_p3)  ;;  %v177_v4 = vld [vmem:[%s1549_s26 + $0x20] sm:$0xff] (%p43_p3)  ;;  %v179_v5 = vld [vmem:[%s1549_s26 + $0x28] sm:$0xff] (%p43_p3)  ;;  %170 = vst [vmem:[%s1557_s27] sm:$0xff] (%p43_p3), %v169_v0 }
  0x13   : > { %172 = vst [vmem:[%s1557_s27 + $0x8] sm:$0xff] (%p43_p3), %v171_v1  ;;  %174 = vst [vmem:[%s1557_s27 + $0x10] sm:$0xff] (%p43_p3), %v173_v2  ;;  %v181_v6 = vld [vmem:[%s1549_s26 + $0x30] sm:$0xff] (%p43_p3)  ;;  %v183_v7 = vld [vmem:[%s1549_s26 + $0x38] sm:$0xff] (%p43_p3) }
  0x14   : > { %176 = vst [vmem:[%s1557_s27 + $0x18] sm:$0xff] (%p43_p3), %v175_v3  ;;  %178 = vst [vmem:[%s1557_s27 + $0x20] sm:$0xff] (%p43_p3), %v177_v4  ;;  %v185_v8 = vld [vmem:[%s1549_s26 + $0x40] sm:$0xff] (%p43_p3)  ;;  %v187_v9 = vld [vmem:[%s1549_s26 + $0x48] sm:$0xff] (%p43_p3) }
  0x15   : > { %180 = vst [vmem:[%s1557_s27 + $0x28] sm:$0xff] %v179_v5  ;;  %182 = vst [vmem:[%s1557_s27 + $0x30] sm:$0xff] %v181_v6  ;;  %v189_v10 = vld [vmem:[%s1549_s26 + $0x50] sm:$0xff]  ;;  %v191_v11 = vld [vmem:[%s1549_s26 + $0x58] sm:$0xff] }
  0x16   : > { %184 = vst [vmem:[%s1557_s27 + $0x38] sm:$0xff] %v183_v7  ;;  %186 = vst [vmem:[%s1557_s27 + $0x40] sm:$0xff] %v185_v8  ;;  %v193_v12 = vld [vmem:[%s1549_s26 + $0x60] sm:$0xff]  ;;  %v195_v13 = vld [vmem:[%s1549_s26 + $0x68] sm:$0xff] }
  0x17   : > { %188 = vst [vmem:[%s1557_s27 + $0x48] sm:$0xff] %v187_v9  ;;  %190 = vst [vmem:[%s1557_s27 + $0x50] sm:$0xff] %v189_v10  ;;  %v197_v14 = vld [vmem:[%s1549_s26 + $0x70] sm:$0xff]  ;;  %v199_v15 = vld [vmem:[%s1549_s26 + $0x78] sm:$0xff] }
  0x18   : > { %192 = vst [vmem:[%s1557_s27 + $0x58] sm:$0xff] %v191_v11  ;;  %194 = vst [vmem:[%s1557_s27 + $0x60] sm:$0xff] %v193_v12  ;;  %v201_v16 = vld [vmem:[%s1549_s26 + $0x100] sm:$0xff]  ;;  %v203_v17 = vld [vmem:[%s1549_s26 + $0x108] sm:$0xff] }
  0x19   : > { %196 = vst [vmem:[%s1557_s27 + $0x68] sm:$0xff] %v195_v13  ;;  %198 = vst [vmem:[%s1557_s27 + $0x70] sm:$0xff] %v197_v14  ;;  %v205_v18 = vld [vmem:[%s1549_s26 + $0x110] sm:$0xff]  ;;  %v207_v19 = vld [vmem:[%s1549_s26 + $0x118] sm:$0xff] }
  0x1a   : > { %200 = vst [vmem:[%s1557_s27 + $0x78] sm:$0xff] %v199_v15  ;;  %202 = vst [vmem:[%s1557_s27 + $0x80] sm:$0xff] %v201_v16  ;;  %v209_v20 = vld [vmem:[%s1549_s26 + $0x120] sm:$0xff]  ;;  %v211_v21 = vld [vmem:[%s1549_s26 + $0x128] sm:$0xff] }
  0x1b   : > { %204 = vst [vmem:[%s1557_s27 + $0x88] sm:$0xff] %v203_v17  ;;  %206 = vst [vmem:[%s1557_s27 + $0x90] sm:$0xff] %v205_v18  ;;  %v213_v22 = vld [vmem:[%s1549_s26 + $0x130] sm:$0xff]  ;;  %v215_v23 = vld [vmem:[%s1549_s26 + $0x138] sm:$0xff] }
  0x1c   : > { %208 = vst [vmem:[%s1557_s27 + $0x98] sm:$0xff] %v207_v19  ;;  %210 = vst [vmem:[%s1557_s27 + $0xa0] sm:$0xff] %v209_v20  ;;  %v217_v24 = vld [vmem:[%s1549_s26 + $0x140] sm:$0xff]  ;;  %v219_v25 = vld [vmem:[%s1549_s26 + $0x148] sm:$0xff] }
  0x1d   : > { %212 = vst [vmem:[%s1557_s27 + $0xa8] sm:$0xff] %v211_v21  ;;  %214 = vst [vmem:[%s1557_s27 + $0xb0] sm:$0xff] %v213_v22  ;;  %v221_v26 = vld [vmem:[%s1549_s26 + $0x150] sm:$0xff]  ;;  %v223_v27 = vld [vmem:[%s1549_s26 + $0x158] sm:$0xff] }
  0x1e   : > { %216 = vst [vmem:[%s1557_s27 + $0xb8] sm:$0xff] %v215_v23  ;;  %218 = vst [vmem:[%s1557_s27 + $0xc0] sm:$0xff] %v217_v24  ;;  %v225_v28 = vld [vmem:[%s1549_s26 + $0x160] sm:$0xff]  ;;  %v227_v29 = vld [vmem:[%s1549_s26 + $0x168] sm:$0xff] }
  0x1f   : > { %220 = vst [vmem:[%s1557_s27 + $0xc8] sm:$0xff] %v219_v25  ;;  %222 = vst [vmem:[%s1557_s27 + $0xd0] sm:$0xff] %v221_v26  ;;  %v229_v30 = vld [vmem:[%s1549_s26 + $0x170] sm:$0xff]  ;;  %v231_v31 = vld [vmem:[%s1549_s26 + $0x178] sm:$0xff] }
  0x20   : > { %224 = vst [vmem:[%s1557_s27 + $0xd8] sm:$0xff] %v223_v27  ;;  %226 = vst [vmem:[%s1557_s27 + $0xe0] sm:$0xff] %v225_v28  ;;  %v233_v32 = vld [vmem:[%s1549_s26 + $0x200] sm:$0xff]  ;;  %v235_v33 = vld [vmem:[%s1549_s26 + $0x208] sm:$0xff] }
  0x21   : > { %228 = vst [vmem:[%s1557_s27 + $0xe8] sm:$0xff] %v227_v29  ;;  %230 = vst [vmem:[%s1557_s27 + $0xf0] sm:$0xff] %v229_v30  ;;  %v237_v34 = vld [vmem:[%s1549_s26 + $0x210] sm:$0xff]  ;;  %v239_v35 = vld [vmem:[%s1549_s26 + $0x218] sm:$0xff] }
  0x22   : > { %232 = vst [vmem:[%s1557_s27 + $0xf8] sm:$0xff] %v231_v31  ;;  %234 = vst [vmem:[%s1557_s27 + $0x100] sm:$0xff] %v233_v32  ;;  %v241_v36 = vld [vmem:[%s1549_s26 + $0x220] sm:$0xff]  ;;  %v243_v37 = vld [vmem:[%s1549_s26 + $0x228] sm:$0xff] }
  0x23   : > { %236 = vst [vmem:[%s1557_s27 + $0x108] sm:$0xff] %v235_v33  ;;  %238 = vst [vmem:[%s1557_s27 + $0x110] sm:$0xff] %v237_v34  ;;  %v245_v38 = vld [vmem:[%s1549_s26 + $0x230] sm:$0xff]  ;;  %v247_v39 = vld [vmem:[%s1549_s26 + $0x238] sm:$0xff] }
  0x24   : > { %240 = vst [vmem:[%s1557_s27 + $0x118] sm:$0xff] %v239_v35  ;;  %242 = vst [vmem:[%s1557_s27 + $0x120] sm:$0xff] %v241_v36  ;;  %v249_v40 = vld [vmem:[%s1549_s26 + $0x240] sm:$0xff]  ;;  %v251_v41 = vld [vmem:[%s1549_s26 + $0x248] sm:$0xff] }
  0x25   : > { %244 = vst [vmem:[%s1557_s27 + $0x128] sm:$0xff] %v243_v37  ;;  %246 = vst [vmem:[%s1557_s27 + $0x130] sm:$0xff] %v245_v38  ;;  %v253_v42 = vld [vmem:[%s1549_s26 + $0x250] sm:$0xff]  ;;  %v255_v43 = vld [vmem:[%s1549_s26 + $0x258] sm:$0xff] }
  0x26   : > { %248 = vst [vmem:[%s1557_s27 + $0x138] sm:$0xff] %v247_v39  ;;  %250 = vst [vmem:[%s1557_s27 + $0x140] sm:$0xff] %v249_v40  ;;  %v257_v44 = vld [vmem:[%s1549_s26 + $0x260] sm:$0xff]  ;;  %v259_v45 = vld [vmem:[%s1549_s26 + $0x268] sm:$0xff] }
  0x27   : > { %252 = vst [vmem:[%s1557_s27 + $0x148] sm:$0xff] %v251_v41  ;;  %254 = vst [vmem:[%s1557_s27 + $0x150] sm:$0xff] %v253_v42  ;;  %v261_v46 = vld [vmem:[%s1549_s26 + $0x270] sm:$0xff]  ;;  %v263_v47 = vld [vmem:[%s1549_s26 + $0x278] sm:$0xff] }
  0x28   : > { %256 = vst [vmem:[%s1557_s27 + $0x158] sm:$0xff] %v255_v43  ;;  %258 = vst [vmem:[%s1557_s27 + $0x160] sm:$0xff] %v257_v44  ;;  %v265_v48 = vld [vmem:[%s1549_s26 + $0x300] sm:$0xff]  ;;  %v267_v49 = vld [vmem:[%s1549_s26 + $0x308] sm:$0xff] }
  0x29   : > { %260 = vst [vmem:[%s1557_s27 + $0x168] sm:$0xff] %v259_v45  ;;  %262 = vst [vmem:[%s1557_s27 + $0x170] sm:$0xff] %v261_v46  ;;  %v269_v50 = vld [vmem:[%s1549_s26 + $0x310] sm:$0xff]  ;;  %v271_v51 = vld [vmem:[%s1549_s26 + $0x318] sm:$0xff] }
  0x2a   : > { %264 = vst [vmem:[%s1557_s27 + $0x178] sm:$0xff] %v263_v47  ;;  %266 = vst [vmem:[%s1557_s27 + $0x180] sm:$0xff] %v265_v48  ;;  %v273_v52 = vld [vmem:[%s1549_s26 + $0x320] sm:$0xff]  ;;  %v275_v53 = vld [vmem:[%s1549_s26 + $0x328] sm:$0xff] }
  0x2b   : > { %268 = vst [vmem:[%s1557_s27 + $0x188] sm:$0xff] %v267_v49  ;;  %270 = vst [vmem:[%s1557_s27 + $0x190] sm:$0xff] %v269_v50  ;;  %v277_v54 = vld [vmem:[%s1549_s26 + $0x330] sm:$0xff]  ;;  %v279_v55 = vld [vmem:[%s1549_s26 + $0x338] sm:$0xff] }
  0x2c   : > { %272 = vst [vmem:[%s1557_s27 + $0x198] sm:$0xff] %v271_v51  ;;  %274 = vst [vmem:[%s1557_s27 + $0x1a0] sm:$0xff] %v273_v52  ;;  %v281_v56 = vld [vmem:[%s1549_s26 + $0x340] sm:$0xff]  ;;  %v283_v57 = vld [vmem:[%s1549_s26 + $0x348] sm:$0xff] }
  0x2d   : > { %276 = vst [vmem:[%s1557_s27 + $0x1a8] sm:$0xff] %v275_v53  ;;  %278 = vst [vmem:[%s1557_s27 + $0x1b0] sm:$0xff] %v277_v54  ;;  %v285_v58 = vld [vmem:[%s1549_s26 + $0x350] sm:$0xff]  ;;  %v287_v59 = vld [vmem:[%s1549_s26 + $0x358] sm:$0xff] }
  0x2e   : > { %280 = vst [vmem:[%s1557_s27 + $0x1b8] sm:$0xff] %v279_v55  ;;  %282 = vst [vmem:[%s1557_s27 + $0x1c0] sm:$0xff] %v281_v56  ;;  %v289_v60 = vld [vmem:[%s1549_s26 + $0x360] sm:$0xff]  ;;  %v291_v61 = vld [vmem:[%s1549_s26 + $0x368] sm:$0xff] }
  0x2f   : > { %284 = vst [vmem:[%s1557_s27 + $0x1c8] sm:$0xff] %v283_v57  ;;  %286 = vst [vmem:[%s1557_s27 + $0x1d0] sm:$0xff] %v285_v58  ;;  %v293_v62 = vld [vmem:[%s1549_s26 + $0x370] sm:$0xff]  ;;  %v295_v63 = vld [vmem:[%s1549_s26 + $0x378] sm:$0xff] }
  0x30   : > { %288 = vst [vmem:[%s1557_s27 + $0x1d8] sm:$0xff] %v287_v59  ;;  %290 = vst [vmem:[%s1557_s27 + $0x1e0] sm:$0xff] %v289_v60  ;;  %v297_v0 = vld [vmem:[%s1549_s26 + $0x400] sm:$0xff]  ;;  %v299_v1 = vld [vmem:[%s1549_s26 + $0x408] sm:$0xff] }
  0x31   : > { %292 = vst [vmem:[%s1557_s27 + $0x1e8] sm:$0xff] %v291_v61  ;;  %294 = vst [vmem:[%s1557_s27 + $0x1f0] sm:$0xff] %v293_v62  ;;  %v301_v2 = vld [vmem:[%s1549_s26 + $0x410] sm:$0xff]  ;;  %v303_v3 = vld [vmem:[%s1549_s26 + $0x418] sm:$0xff] }
  0x32   : > { %296 = vst [vmem:[%s1557_s27 + $0x1f8] sm:$0xff] %v295_v63  ;;  %298 = vst [vmem:[%s1557_s27 + $0x200] sm:$0xff] %v297_v0  ;;  %v305_v4 = vld [vmem:[%s1549_s26 + $0x420] sm:$0xff]  ;;  %v307_v5 = vld [vmem:[%s1549_s26 + $0x428] sm:$0xff] }
  0x33   : > { %300 = vst [vmem:[%s1557_s27 + $0x208] sm:$0xff] %v299_v1  ;;  %302 = vst [vmem:[%s1557_s27 + $0x210] sm:$0xff] %v301_v2  ;;  %v309_v6 = vld [vmem:[%s1549_s26 + $0x430] sm:$0xff]  ;;  %v311_v7 = vld [vmem:[%s1549_s26 + $0x438] sm:$0xff] }
  0x34   : > { %304 = vst [vmem:[%s1557_s27 + $0x218] sm:$0xff] %v303_v3  ;;  %306 = vst [vmem:[%s1557_s27 + $0x220] sm:$0xff] %v305_v4  ;;  %v313_v8 = vld [vmem:[%s1549_s26 + $0x440] sm:$0xff]  ;;  %v315_v9 = vld [vmem:[%s1549_s26 + $0x448] sm:$0xff] }
  0x35   : > { %308 = vst [vmem:[%s1557_s27 + $0x228] sm:$0xff] %v307_v5  ;;  %310 = vst [vmem:[%s1557_s27 + $0x230] sm:$0xff] %v309_v6  ;;  %v317_v10 = vld [vmem:[%s1549_s26 + $0x450] sm:$0xff]  ;;  %v319_v11 = vld [vmem:[%s1549_s26 + $0x458] sm:$0xff] }
  0x36   : > { %312 = vst [vmem:[%s1557_s27 + $0x238] sm:$0xff] %v311_v7  ;;  %314 = vst [vmem:[%s1557_s27 + $0x240] sm:$0xff] %v313_v8  ;;  %v321_v12 = vld [vmem:[%s1549_s26 + $0x460] sm:$0xff]  ;;  %v323_v13 = vld [vmem:[%s1549_s26 + $0x468] sm:$0xff] }
  0x37   : > { %316 = vst [vmem:[%s1557_s27 + $0x248] sm:$0xff] %v315_v9  ;;  %318 = vst [vmem:[%s1557_s27 + $0x250] sm:$0xff] %v317_v10  ;;  %v325_v14 = vld [vmem:[%s1549_s26 + $0x470] sm:$0xff]  ;;  %v327_v15 = vld [vmem:[%s1549_s26 + $0x478] sm:$0xff] }
  0x38   : > { %320 = vst [vmem:[%s1557_s27 + $0x258] sm:$0xff] %v319_v11  ;;  %322 = vst [vmem:[%s1557_s27 + $0x260] sm:$0xff] %v321_v12  ;;  %v329_v16 = vld [vmem:[%s1549_s26 + $0x500] sm:$0xff]  ;;  %v331_v17 = vld [vmem:[%s1549_s26 + $0x508] sm:$0xff] }
  0x39   : > { %324 = vst [vmem:[%s1557_s27 + $0x268] sm:$0xff] %v323_v13  ;;  %326 = vst [vmem:[%s1557_s27 + $0x270] sm:$0xff] %v325_v14  ;;  %v333_v18 = vld [vmem:[%s1549_s26 + $0x510] sm:$0xff]  ;;  %v335_v19 = vld [vmem:[%s1549_s26 + $0x518] sm:$0xff] }
  0x3a   : > { %328 = vst [vmem:[%s1557_s27 + $0x278] sm:$0xff] %v327_v15  ;;  %330 = vst [vmem:[%s1557_s27 + $0x280] sm:$0xff] %v329_v16  ;;  %v337_v20 = vld [vmem:[%s1549_s26 + $0x520] sm:$0xff]  ;;  %v339_v21 = vld [vmem:[%s1549_s26 + $0x528] sm:$0xff] }
  0x3b   : > { %332 = vst [vmem:[%s1557_s27 + $0x288] sm:$0xff] %v331_v17  ;;  %334 = vst [vmem:[%s1557_s27 + $0x290] sm:$0xff] %v333_v18  ;;  %v341_v22 = vld [vmem:[%s1549_s26 + $0x530] sm:$0xff]  ;;  %v343_v23 = vld [vmem:[%s1549_s26 + $0x538] sm:$0xff] }
  0x3c   : > { %336 = vst [vmem:[%s1557_s27 + $0x298] sm:$0xff] %v335_v19  ;;  %338 = vst [vmem:[%s1557_s27 + $0x2a0] sm:$0xff] %v337_v20  ;;  %v345_v24 = vld [vmem:[%s1549_s26 + $0x540] sm:$0xff]  ;;  %v347_v25 = vld [vmem:[%s1549_s26 + $0x548] sm:$0xff] }
  0x3d   : > { %340 = vst [vmem:[%s1557_s27 + $0x2a8] sm:$0xff] %v339_v21  ;;  %342 = vst [vmem:[%s1557_s27 + $0x2b0] sm:$0xff] %v341_v22  ;;  %v349_v26 = vld [vmem:[%s1549_s26 + $0x550] sm:$0xff]  ;;  %v351_v27 = vld [vmem:[%s1549_s26 + $0x558] sm:$0xff] }
  0x3e   : > { %344 = vst [vmem:[%s1557_s27 + $0x2b8] sm:$0xff] %v343_v23  ;;  %346 = vst [vmem:[%s1557_s27 + $0x2c0] sm:$0xff] %v345_v24  ;;  %v353_v28 = vld [vmem:[%s1549_s26 + $0x560] sm:$0xff]  ;;  %v355_v29 = vld [vmem:[%s1549_s26 + $0x568] sm:$0xff] }
  0x3f   : > { %348 = vst [vmem:[%s1557_s27 + $0x2c8] sm:$0xff] %v347_v25  ;;  %350 = vst [vmem:[%s1557_s27 + $0x2d0] sm:$0xff] %v349_v26  ;;  %v357_v30 = vld [vmem:[%s1549_s26 + $0x570] sm:$0xff]  ;;  %v359_v31 = vld [vmem:[%s1549_s26 + $0x578] sm:$0xff] }
  0x40   : > { %352 = vst [vmem:[%s1557_s27 + $0x2d8] sm:$0xff] %v351_v27  ;;  %354 = vst [vmem:[%s1557_s27 + $0x2e0] sm:$0xff] %v353_v28  ;;  %v361_v32 = vld [vmem:[%s1549_s26 + $0x600] sm:$0xff]  ;;  %v363_v33 = vld [vmem:[%s1549_s26 + $0x608] sm:$0xff] }
  0x41   : > { %356 = vst [vmem:[%s1557_s27 + $0x2e8] sm:$0xff] %v355_v29  ;;  %358 = vst [vmem:[%s1557_s27 + $0x2f0] sm:$0xff] %v357_v30  ;;  %v365_v34 = vld [vmem:[%s1549_s26 + $0x610] sm:$0xff]  ;;  %v367_v35 = vld [vmem:[%s1549_s26 + $0x618] sm:$0xff] }
  0x42   : > { %360 = vst [vmem:[%s1557_s27 + $0x2f8] sm:$0xff] %v359_v31  ;;  %362 = vst [vmem:[%s1557_s27 + $0x300] sm:$0xff] %v361_v32  ;;  %v369_v36 = vld [vmem:[%s1549_s26 + $0x620] sm:$0xff]  ;;  %v371_v37 = vld [vmem:[%s1549_s26 + $0x628] sm:$0xff] }
  0x43   : > { %364 = vst [vmem:[%s1557_s27 + $0x308] sm:$0xff] %v363_v33  ;;  %366 = vst [vmem:[%s1557_s27 + $0x310] sm:$0xff] %v365_v34  ;;  %v373_v38 = vld [vmem:[%s1549_s26 + $0x630] sm:$0xff]  ;;  %v375_v39 = vld [vmem:[%s1549_s26 + $0x638] sm:$0xff] }
  0x44   : > { %368 = vst [vmem:[%s1557_s27 + $0x318] sm:$0xff] %v367_v35  ;;  %370 = vst [vmem:[%s1557_s27 + $0x320] sm:$0xff] %v369_v36  ;;  %v377_v40 = vld [vmem:[%s1549_s26 + $0x640] sm:$0xff]  ;;  %v379_v41 = vld [vmem:[%s1549_s26 + $0x648] sm:$0xff] }
  0x45   : > { %372 = vst [vmem:[%s1557_s27 + $0x328] sm:$0xff] %v371_v37  ;;  %374 = vst [vmem:[%s1557_s27 + $0x330] sm:$0xff] %v373_v38  ;;  %v381_v42 = vld [vmem:[%s1549_s26 + $0x650] sm:$0xff]  ;;  %v383_v43 = vld [vmem:[%s1549_s26 + $0x658] sm:$0xff] }
  0x46   : > { %376 = vst [vmem:[%s1557_s27 + $0x338] sm:$0xff] %v375_v39  ;;  %378 = vst [vmem:[%s1557_s27 + $0x340] sm:$0xff] %v377_v40  ;;  %v385_v44 = vld [vmem:[%s1549_s26 + $0x660] sm:$0xff]  ;;  %v387_v45 = vld [vmem:[%s1549_s26 + $0x668] sm:$0xff] }
  0x47   : > { %380 = vst [vmem:[%s1557_s27 + $0x348] sm:$0xff] %v379_v41  ;;  %382 = vst [vmem:[%s1557_s27 + $0x350] sm:$0xff] %v381_v42  ;;  %v389_v46 = vld [vmem:[%s1549_s26 + $0x670] sm:$0xff]  ;;  %v391_v47 = vld [vmem:[%s1549_s26 + $0x678] sm:$0xff] }
  0x48   : > { %384 = vst [vmem:[%s1557_s27 + $0x358] sm:$0xff] %v383_v43  ;;  %386 = vst [vmem:[%s1557_s27 + $0x360] sm:$0xff] %v385_v44  ;;  %v393_v48 = vld [vmem:[%s1549_s26 + $0x700] sm:$0xff]  ;;  %v395_v49 = vld [vmem:[%s1549_s26 + $0x708] sm:$0xff] }
  0x49   : > { %388 = vst [vmem:[%s1557_s27 + $0x368] sm:$0xff] %v387_v45  ;;  %390 = vst [vmem:[%s1557_s27 + $0x370] sm:$0xff] %v389_v46  ;;  %v397_v50 = vld [vmem:[%s1549_s26 + $0x710] sm:$0xff]  ;;  %v399_v51 = vld [vmem:[%s1549_s26 + $0x718] sm:$0xff] }
  0x4a   : > { %392 = vst [vmem:[%s1557_s27 + $0x378] sm:$0xff] %v391_v47  ;;  %394 = vst [vmem:[%s1557_s27 + $0x380] sm:$0xff] %v393_v48  ;;  %v401_v52 = vld [vmem:[%s1549_s26 + $0x720] sm:$0xff]  ;;  %v403_v53 = vld [vmem:[%s1549_s26 + $0x728] sm:$0xff] }
  0x4b   : > { %396 = vst [vmem:[%s1557_s27 + $0x388] sm:$0xff] %v395_v49  ;;  %398 = vst [vmem:[%s1557_s27 + $0x390] sm:$0xff] %v397_v50  ;;  %v405_v54 = vld [vmem:[%s1549_s26 + $0x730] sm:$0xff]  ;;  %v407_v55 = vld [vmem:[%s1549_s26 + $0x738] sm:$0xff] }
  0x4c   : > { %400 = vst [vmem:[%s1557_s27 + $0x398] sm:$0xff] %v399_v51  ;;  %402 = vst [vmem:[%s1557_s27 + $0x3a0] sm:$0xff] %v401_v52  ;;  %v409_v56 = vld [vmem:[%s1549_s26 + $0x740] sm:$0xff]  ;;  %v411_v57 = vld [vmem:[%s1549_s26 + $0x748] sm:$0xff] }
  0x4d   : > { %404 = vst [vmem:[%s1557_s27 + $0x3a8] sm:$0xff] %v403_v53  ;;  %406 = vst [vmem:[%s1557_s27 + $0x3b0] sm:$0xff] %v405_v54  ;;  %v413_v58 = vld [vmem:[%s1549_s26 + $0x750] sm:$0xff]  ;;  %v415_v59 = vld [vmem:[%s1549_s26 + $0x758] sm:$0xff] }
  0x4e   : > { %408 = vst [vmem:[%s1557_s27 + $0x3b8] sm:$0xff] %v407_v55  ;;  %410 = vst [vmem:[%s1557_s27 + $0x3c0] sm:$0xff] %v409_v56  ;;  %v417_v60 = vld [vmem:[%s1549_s26 + $0x760] sm:$0xff]  ;;  %v419_v61 = vld [vmem:[%s1549_s26 + $0x768] sm:$0xff] }
  0x4f   : > { %412 = vst [vmem:[%s1557_s27 + $0x3c8] sm:$0xff] %v411_v57  ;;  %414 = vst [vmem:[%s1557_s27 + $0x3d0] sm:$0xff] %v413_v58  ;;  %v421_v62 = vld [vmem:[%s1549_s26 + $0x770] sm:$0xff]  ;;  %v423_v63 = vld [vmem:[%s1549_s26 + $0x778] sm:$0xff] }
  0x50   : > { %416 = vst [vmem:[%s1557_s27 + $0x3d8] sm:$0xff] %v415_v59  ;;  %418 = vst [vmem:[%s1557_s27 + $0x3e0] sm:$0xff] %v417_v60  ;;  %v425_v0 = vld [vmem:[%s1549_s26 + $0x800] sm:$0xff]  ;;  %v427_v1 = vld [vmem:[%s1549_s26 + $0x808] sm:$0xff] }
  0x51   : > { %420 = vst [vmem:[%s1557_s27 + $0x3e8] sm:$0xff] %v419_v61  ;;  %422 = vst [vmem:[%s1557_s27 + $0x3f0] sm:$0xff] %v421_v62  ;;  %v429_v2 = vld [vmem:[%s1549_s26 + $0x810] sm:$0xff]  ;;  %v431_v3 = vld [vmem:[%s1549_s26 + $0x818] sm:$0xff] }
  0x52   : > { %424 = vst [vmem:[%s1557_s27 + $0x3f8] sm:$0xff] %v423_v63  ;;  %426 = vst [vmem:[%s1557_s27 + $0x400] sm:$0xff] %v425_v0  ;;  %v433_v4 = vld [vmem:[%s1549_s26 + $0x820] sm:$0xff]  ;;  %v435_v5 = vld [vmem:[%s1549_s26 + $0x828] sm:$0xff] }
  0x53   : > { %428 = vst [vmem:[%s1557_s27 + $0x408] sm:$0xff] %v427_v1  ;;  %430 = vst [vmem:[%s1557_s27 + $0x410] sm:$0xff] %v429_v2  ;;  %v437_v6 = vld [vmem:[%s1549_s26 + $0x830] sm:$0xff]  ;;  %v439_v7 = vld [vmem:[%s1549_s26 + $0x838] sm:$0xff] }
  0x54   : > { %432 = vst [vmem:[%s1557_s27 + $0x418] sm:$0xff] %v431_v3  ;;  %434 = vst [vmem:[%s1557_s27 + $0x420] sm:$0xff] %v433_v4  ;;  %v441_v8 = vld [vmem:[%s1549_s26 + $0x840] sm:$0xff]  ;;  %v443_v9 = vld [vmem:[%s1549_s26 + $0x848] sm:$0xff] }
  0x55   : > { %436 = vst [vmem:[%s1557_s27 + $0x428] sm:$0xff] %v435_v5  ;;  %438 = vst [vmem:[%s1557_s27 + $0x430] sm:$0xff] %v437_v6  ;;  %v445_v10 = vld [vmem:[%s1549_s26 + $0x850] sm:$0xff]  ;;  %v447_v11 = vld [vmem:[%s1549_s26 + $0x858] sm:$0xff] }
  0x56   : > { %440 = vst [vmem:[%s1557_s27 + $0x438] sm:$0xff] %v439_v7  ;;  %442 = vst [vmem:[%s1557_s27 + $0x440] sm:$0xff] %v441_v8  ;;  %v449_v12 = vld [vmem:[%s1549_s26 + $0x860] sm:$0xff]  ;;  %v451_v13 = vld [vmem:[%s1549_s26 + $0x868] sm:$0xff] }
  0x57   : > { %444 = vst [vmem:[%s1557_s27 + $0x448] sm:$0xff] %v443_v9  ;;  %446 = vst [vmem:[%s1557_s27 + $0x450] sm:$0xff] %v445_v10  ;;  %v453_v14 = vld [vmem:[%s1549_s26 + $0x870] sm:$0xff]  ;;  %v455_v15 = vld [vmem:[%s1549_s26 + $0x878] sm:$0xff] }
  0x58   : > { %448 = vst [vmem:[%s1557_s27 + $0x458] sm:$0xff] %v447_v11  ;;  %450 = vst [vmem:[%s1557_s27 + $0x460] sm:$0xff] %v449_v12 }
  0x59   : > { %452 = vst [vmem:[%s1557_s27 + $0x468] sm:$0xff] %v451_v13  ;;  %454 = vst [vmem:[%s1557_s27 + $0x470] sm:$0xff] %v453_v14 }
  0x5a   : > { %456 = vst [vmem:[%s1557_s27 + $0x478] sm:$0xff] %v455_v15 }
  0x5b PF: > { %p1235_p6 = scmp.ge.s32.totalorder %s1484_s16, 1  ;;  %p461_p7 = scmp.lt.s32.totalorder %s1484_s16, 3 }
  0x5d   : > { %p462_p8 = pnand %p1235_p6, %p461_p7 }
  0x5e   : > { %s468_s28 = sand.u32 (!%p462_p8), 1, %s1468_s12   ;;  %v528_v16 = vlaneseq (!%p462_p8)  ;;  %v508_v18 = vld [vmem:[%s2308_s1] sm:$0xff] (!%p462_p8)  ;;  %v509_v19 = vld [vmem:[%s2308_s1 + $0x8] sm:$0xff] (!%p462_p8)  ;;  %v1874_v38 = vld [vmem:[%s2308_s1 + $0x10] ss:$0 sm:$0xff] (!%p462_p8)  ;;  %p498_p9 = scmp.lt.s32.totalorder (!%p462_p8), %s1476_s14, 1 }
  0x5f   : > { %465 = sbr.rel (%p462_p8) target bundleno = 221 (0xdd), region = 51  ;;  %v1008_v48 = vld [vmem:[%s2309_s2] sm:$0x3] (!%p462_p8)  ;;  %v1909_v1 = vld [vmem:[%s2308_s1 + $0x18] ss:$0 sm:$0xff] (!%p462_p8)  ;;  %vm1117_vm0 = vcmask (!%p462_p8), 523264  }
  0x60   : > { %s1373_s29 = smul.u32 (!%p462_p8), 1152, %s468_s28  ;;  %v529_v17 = vshrl.u32 (!%p462_p8), %v528_v16, 7 }
  0x62   : > { %v530_v20 = vsub.s32 (!%p462_p8), 0, %v529_v17  ;;  %v571_v21 = vsub.s32 (!%p462_p8), 1, %v529_v17  ;;  %s1850_s7 = scalar_lea.vmem (!%p462_p8), [#allocation2], %s1373_s29  ;;  %v628_v24 = vsub.s32 (!%p462_p8), 2, %v529_v17  ;;  %v685_v25 = vsub.s32 (!%p462_p8), 3, %v529_v17 }
  0x63   : > { %v512_v22 = vld [vmem:[%s1850_s7] sm:$0xff] (!%p462_p8)  ;;  %v742_v26 = vsub.s32 (!%p462_p8), 4, %v529_v17  ;;  %v799_v37 = vsub.s32 (!%p462_p8), 5, %v529_v17  ;;  %v856_v41 = vsub.s32 (!%p462_p8), 6, %v529_v17  ;;  %v913_v42 = vsub.s32 (!%p462_p8), 7, %v529_v17  ;;  %v513_v44 = vld [vmem:[%s1850_s7 + $0x8] sm:$0xff] (!%p462_p8) }
  0x64   : > { %v1238_v23 = vld [vmem:[%s1850_s7 + $0x80] sm:$0xff] (!%p462_p8)  ;;  %v1854_v27 = vrot.slane (!%p462_p8), %v508_v18, %v530_v20  ;;  %v1856_v28 = vrot.slane (!%p462_p8), %v509_v19, %v530_v20  ;;  %v1858_v29 = vrot.slane (!%p462_p8), %v508_v18, %v571_v21  ;;  %v1860_v30 = vrot.slane (!%p462_p8), %v509_v19, %v571_v21  ;;  %v1239_v49 = vld [vmem:[%s1850_s7 + $0x88] sm:$0xff] (!%p462_p8)  ;;  %v514_v12 = vld [vmem:[%s1850_s7 + $0x10] sm:$0xff] (!%p462_p8) }
  0x65   : > { %v1254_v31 = vld [vmem:[%s1850_s7 + $0x100] sm:$0xff] (!%p462_p8)  ;;  %v1863_v32 = vrot.slane (!%p462_p8), %v508_v18, %v628_v24  ;;  %v1866_v34 = vrot.slane (!%p462_p8), %v508_v18, %v685_v25  ;;  %v1869_v36 = vrot.slane (!%p462_p8), %v508_v18, %v742_v26  ;;  %v1882_v47 = vrot.slane (!%p462_p8), %v508_v18, %v799_v37  ;;  %v1255_v62 = vld [vmem:[%s1850_s7 + $0x108] sm:$0xff] (!%p462_p8)  ;;  %v1240_v13 = vld [vmem:[%s1850_s7 + $0x90] sm:$0xff] (!%p462_p8) }
  0x66   : > { %v1270_v33 = vld [vmem:[%s1850_s7 + $0x180] sm:$0xff]  ;;  %v536_v39 = vmul.f32 %v1854_v27, %v512_v22  ;;  %v577_v40 = vmul.f32 %v1238_v23, %v1858_v29  ;;  %v1890_v53 = vrot.slane %v508_v18, %v856_v41  ;;  %v1892_v54 = vrot.slane %v508_v18, %v913_v42  ;;  %v1271_v63 = vld [vmem:[%s1850_s7 + $0x188] sm:$0xff]  ;;  %v1256_v14 = vld [vmem:[%s1850_s7 + $0x110] sm:$0xff]  ;;  %s2318_s14 = smov (!%p498_p9, %s1476_s14), 1 }
  0x67   : > { %v1286_v35 = vld [vmem:[%s1850_s7 + $0x200] sm:$0xff]  ;;  %v634_v45 = vmul.f32 %v1254_v31, %v1863_v32  ;;  %v691_v51 = vmul.f32 %v1270_v33, %v1866_v34  ;;  %v537_v56 = vmul.f32 %v1856_v28, %v513_v44  ;;  %v1900_v60 = vrot.slane %v1008_v48, %v530_v20  ;;  %v1287_v4 = vld [vmem:[%s1850_s7 + $0x208] sm:$0xff]  ;;  %v1288_v31 = vld [vmem:[%s1850_s7 + $0x210] sm:$0xff]  ;;  %s1371_s19 = sshll.u32 %s2318_s14, 7 }
  0x68   : > { %v1350_v43 = vld [vmem:[%s1850_s7 + $0x400] sm:$0xff]  ;;  %v593_v50 = vadd.f32 %v577_v40, %v536_v39  ;;  %v748_v52 = vmul.f32 %v1286_v35, %v1869_v36  ;;  %v578_v61 = vmul.f32 %v1239_v49, %v1860_v30  ;;  %v1911_v2 = vrot.slane %v509_v19, %v628_v24  ;;  %v1303_v6 = vld [vmem:[%s1850_s7 + $0x288] sm:$0xff]  ;;  %v1304_v40 = vld [vmem:[%s1850_s7 + $0x290] sm:$0xff]  ;;  %s2064_s22 = scalar_lea.vmem %s2310_s3, %s1371_s19 }
  0x69   : > { %v1302_v46 = vld [vmem:[%s1850_s7 + $0x280] sm:$0xff]  ;;  %v1895_v55 = vmul.f32 %v1874_v38, %v1350_v43  ;;  %v1913_v3 = vrot.slane %v509_v19, %v685_v25  ;;  %v1916_v5 = vrot.slane %v509_v19, %v742_v26  ;;  %v1919_v7 = vrot.slane %v509_v19, %v799_v37  ;;  %v1319_v20 = vld [vmem:[%s1850_s7 + $0x308] sm:$0xff]  ;;  %v1272_v26 = vld [vmem:[%s1850_s7 + $0x190] sm:$0xff] }
  0x6a   : > { %v650_v57 = vadd.f32 %v634_v45, %v593_v50  ;;  %v805_v58 = vmul.f32 %v1302_v46, %v1882_v47  ;;  %v1318_v59 = vld [vmem:[%s1850_s7 + $0x300] sm:$0xff]  ;;  %v594_v9 = vadd.f32 %v578_v61, %v537_v56  ;;  %v1921_v10 = vrot.slane %v509_v19, %v856_v41  ;;  %v1335_v22 = vld [vmem:[%s1850_s7 + $0x388] sm:$0xff]  ;;  %v515_v41 = vld [vmem:[%s1850_s7 + $0x18] sm:$0xff] }
  0x6b   : > { %v1334_v0 = vld [vmem:[%s1850_s7 + $0x380] sm:$0xff]  ;;  %v1923_v11 = vrot.slane %v509_v19, %v913_v42  ;;  %v862_v15 = vmul.f32 %v1318_v59, %v1890_v53  ;;  %v1929_v16 = vrot.slane %v1008_v48, %v571_v21  ;;  %v635_v17 = vmul.f32 %v1255_v62, %v1911_v2  ;;  %v1351_v23 = vld [vmem:[%s1850_s7 + $0x408] sm:$0xff]  ;;  %v1241_v42 = vld [vmem:[%s1850_s7 + $0x98] sm:$0xff] }
  0x6c   : > { %v707_v8 = vadd.f32 %v691_v51, %v650_v57  ;;  %v692_v18 = vmul.f32 %v1271_v63, %v1913_v3  ;;  %v919_v24 = vmul.f32 %v1334_v0, %v1892_v54  ;;  %v749_v25 = vmul.f32 %v1287_v4, %v1916_v5  ;;  %v1320_v48 = vld [vmem:[%s1850_s7 + $0x310] sm:$0xff]  ;;  %v1257_v49 = vld [vmem:[%s1850_s7 + $0x118] sm:$0xff] }
  0x6d   : > { %v806_v21 = vmul.f32 %v1303_v6, %v1919_v7  ;;  %v651_v33 = vadd.f32 %v635_v17, %v594_v9  ;;  %v538_v35 = vmul.f32 %v1854_v27, %v514_v12  ;;  %v579_v37 = vmul.f32 %v1240_v13, %v1858_v29  ;;  %v1336_v57 = vld [vmem:[%s1850_s7 + $0x390] sm:$0xff]  ;;  %v1273_v59 = vld [vmem:[%s1850_s7 + $0x198] sm:$0xff] }
  0x6e   : > { %v764_v19 = vadd.f32 %v748_v52, %v707_v8  ;;  %v636_v39 = vmul.f32 %v1256_v14, %v1863_v32  ;;  %v863_v44 = vmul.f32 %v1319_v20, %v1921_v10  ;;  %v920_v45 = vmul.f32 %v1335_v22, %v1923_v11  ;;  %v1352_v62 = vld [vmem:[%s1850_s7 + $0x410] sm:$0xff]  ;;  %v1289_v4 = vld [vmem:[%s1850_s7 + $0x218] sm:$0xff]  ;;  %v516_v14 = vld [vmem:[%s1850_s7 + $0x20] sm:$0xff] }
  0x6f   : > { %v977_v46 = vmul.f32 %v1909_v1, %v1351_v23  ;;  %v708_v50 = vadd.f32 %v692_v18, %v651_v33  ;;  %v595_v51 = vadd.f32 %v579_v37, %v538_v35  ;;  %v693_v52 = vmul.f32 %v1272_v26, %v1866_v34  ;;  %v1305_v13 = vld [vmem:[%s1850_s7 + $0x298] sm:$0xff]  ;;  %v1242_v22 = vld [vmem:[%s1850_s7 + $0xa0] sm:$0xff] }
  0x70   : > { %v821_v43 = vadd.f32 %v805_v58, %v764_v19  ;;  %v750_v56 = vmul.f32 %v1288_v31, %v1869_v36  ;;  %v807_v61 = vmul.f32 %v1304_v40, %v1882_v47  ;;  %v539_v63 = vmul.f32 %v1856_v28, %v515_v41  ;;  %v1258_v23 = vld [vmem:[%s1850_s7 + $0x120] sm:$0xff]  ;;  %v1321_v33 = vld [vmem:[%s1850_s7 + $0x318] sm:$0xff] }
  0x71   : > { %v580_v0 = vmul.f32 %v1241_v42, %v1860_v30  ;;  %v765_v6 = vadd.f32 %v749_v25, %v708_v50  ;;  %v652_v8 = vadd.f32 %v636_v39, %v595_v51  ;;  %v864_v9 = vmul.f32 %v1320_v48, %v1890_v53  ;;  %v1337_v35 = vld [vmem:[%s1850_s7 + $0x398] sm:$0xff]  ;;  %v1274_v41 = vld [vmem:[%s1850_s7 + $0x1a0] sm:$0xff] }
  0x72   : > { %v878_v58 = vadd.f32 %v862_v15, %v821_v43  ;;  %v637_v12 = vmul.f32 %v1257_v49, %v1911_v2  ;;  %v921_v17 = vmul.f32 %v1336_v57, %v1892_v54  ;;  %v694_v20 = vmul.f32 %v1273_v59, %v1913_v3  ;;  %v1353_v43 = vld [vmem:[%s1850_s7 + $0x418] sm:$0xff]  ;;  %v1290_v50 = vld [vmem:[%s1850_s7 + $0x220] sm:$0xff] }
  0x73   : > { %v596_v18 = vadd.f32 %v580_v0, %v539_v63  ;;  %v822_v19 = vadd.f32 %v806_v21, %v765_v6  ;;  %v709_v25 = vadd.f32 %v693_v52, %v652_v8  ;;  %v978_v26 = vmul.f32 %v1874_v38, %v1352_v62  ;;  %v1306_v59 = vld [vmem:[%s1850_s7 + $0x2a0] sm:$0xff]  ;;  %v517_v63 = vld [vmem:[%s1850_s7 + $0x28] sm:$0xff] }
  0x74   : > { %v935_v15 = vadd.f32 %v919_v24, %v878_v58  ;;  %v751_v31 = vmul.f32 %v1289_v4, %v1916_v5  ;;  %v808_v39 = vmul.f32 %v1305_v13, %v1919_v7  ;;  %v540_v40 = vmul.f32 %v1854_v27, %v516_v14  ;;  %v1243_v0 = vld [vmem:[%s1850_s7 + $0xa8] sm:$0xff] }
  0x75   : > { %v653_v37 = vadd.f32 %v637_v12, %v596_v18  ;;  %v879_v42 = vadd.f32 %v863_v44, %v822_v19  ;;  %v766_v21 = vadd.f32 %v750_v56, %v709_v25  ;;  %v581_v48 = vmul.f32 %v1242_v22, %v1858_v29  ;;  %v1259_v13 = vld [vmem:[%s1850_s7 + $0x128] sm:$0xff]  ;;  %v1322_v18 = vld [vmem:[%s1850_s7 + $0x320] sm:$0xff] }
  0x76   : > { %v992_v24 = vadd.f32 %v1895_v55, %v935_v15  ;;  %v638_v49 = vmul.f32 %v1258_v23, %v1863_v32  ;;  %v865_v52 = vmul.f32 %v1321_v33, %v1921_v10  ;;  %v922_v57 = vmul.f32 %v1337_v35, %v1923_v11  ;;  %v1338_v23 = vld [vmem:[%s1850_s7 + $0x3a0] sm:$0xff] }
  0x77   : > { %v710_v55 = vadd.f32 %v694_v20, %v653_v37  ;;  %v936_v44 = vadd.f32 %v920_v45, %v879_v42  ;;  %v823_v56 = vadd.f32 %v807_v61, %v766_v21  ;;  %v597_v58 = vadd.f32 %v581_v48, %v540_v40  ;;  %v1275_v20 = vld [vmem:[%s1850_s7 + $0x1a8] sm:$0xff]  ;;  %v1354_v33 = vld [vmem:[%s1850_s7 + $0x420] sm:$0xff] }
  0x78   : > { %v1982_v51 = vadd.f32 %v1900_v60, %v992_v24  ;;  %v695_v62 = vmul.f32 %v1274_v41, %v1866_v34  ;;  %v979_v8 = vmul.f32 %v1909_v1, %v1353_v43  ;;  %v752_v12 = vmul.f32 %v1290_v50, %v1869_v36  ;;  %v1291_v24 = vld [vmem:[%s1850_s7 + $0x228] sm:$0xff]  ;;  %v1244_v50 = vld [vmem:[%s1850_s7 + $0xb0] sm:$0xff] }
  0x79   : > { %v767_v6 = vadd.f32 %v751_v31, %v710_v55  ;;  %v993_v14 = vadd.f32 %v977_v46, %v936_v44  ;;  %v880_v45 = vadd.f32 %v864_v9, %v823_v56  ;;  %v654_v15 = vadd.f32 %v638_v49, %v597_v58  ;;  %v1307_v42 = vld [vmem:[%s1850_s7 + $0x2a8] sm:$0xff]  ;;  %v518_v49 = vld [vmem:[%s1850_s7 + $0x30] sm:$0xff] }
  0x7a   : > { %v1036_v4 = vmul.f32 0.5, %v1982_v51  ;;  %v809_v61 = vmul.f32 %v1306_v59, %v1882_v47  ;;  %v541_v19 = vmul.f32 %v1856_v28, %v517_v63  ;;  %v582_v25 = vmul.f32 %v1243_v0, %v1860_v30  ;;  %v1323_v56 = vld [vmem:[%s1850_s7 + $0x328] sm:$0xff]  ;;  %v1260_v58 = vld [vmem:[%s1850_s7 + $0x130] sm:$0xff] }
  0x7b   : > { %v824_v22 = vadd.f32 %v808_v39, %v767_v6  ;;  %v2001_v31 = vadd.f32 %v1929_v16, %v993_v14  ;;  %v937_v46 = vadd.f32 %v921_v17, %v880_v45  ;;  %v711_v9 = vadd.f32 %v695_v62, %v654_v15  ;;  %v1276_v0 = vld [vmem:[%s1850_s7 + $0x1b0] sm:$0xff]  ;;  %v1339_v6 = vld [vmem:[%s1850_s7 + $0x3a8] sm:$0xff] }
  0x7c   : > { %1414 = vtanh.f32 %v1036_v4  ;;  %v639_v35 = vmul.f32 %v1259_v13, %v1911_v2  ;;  %v866_v39 = vmul.f32 %v1322_v18, %v1890_v53  ;;  %v598_v40 = vadd.f32 %v582_v25, %v541_v19  ;;  %v1292_v18 = vld [vmem:[%s1850_s7 + $0x230] sm:$0xff] }
  0x7d   : > { %v881_v37 = vadd.f32 %v865_v52, %v824_v22  ;;  %v696_v41 = vmul.f32 %v1275_v20, %v1913_v3  ;;  %v1037_v21 = vmul.f32 0.5, %v2001_v31  ;;  %v994_v17 = vadd.f32 %v978_v26, %v937_v46  ;;  %v1308_v25 = vld [vmem:[%s1850_s7 + $0x2b0] sm:$0xff]  ;;  %v519_v46 = vld [vmem:[%s1850_s7 + $0x38] sm:$0xff] }
  0x7e   : > { %v768_v43 = vadd.f32 %v752_v12, %v711_v9  ;;  %v923_v48 = vmul.f32 %v1338_v23, %v1892_v54  ;;  %v980_v52 = vmul.f32 %v1874_v38, %v1354_v33  ;;  %v655_v59 = vadd.f32 %v639_v35, %v598_v40  ;;  %v1355_v12 = vld [vmem:[%s1850_s7 + $0x428] sm:$0xff] }
  0x7f   : > { %v938_v55 = vadd.f32 %v922_v57, %v881_v37  ;;  %v753_v44 = vmul.f32 %v1291_v24, %v1916_v5  ;;  %1416 = vtanh.f32 %v1037_v21  ;;  %v2019_v26 = vadd.f32 %v1900_v60, %v994_v17  ;;  %v1245_v24 = vld [vmem:[%s1850_s7 + $0xb8] sm:$0xff]  ;;  %v1324_v21 = vld [vmem:[%s1850_s7 + $0x330] sm:$0xff] }
  0x80   : > { %v825_v62 = vadd.f32 %v809_v61, %v768_v43  ;;  %v810_v63 = vmul.f32 %v1307_v42, %v1919_v7  ;;  %v712_v57 = vadd.f32 %v696_v41, %v655_v59  ;;  %v542_v13 = vmul.f32 %v1854_v27, %v518_v49  ;;  %v1261_v17 = vld [vmem:[%s1850_s7 + $0x138] sm:$0xff] }
  0x81   : > { %v995_v4 = vadd.f32 %v979_v8, %v938_v55  ;;  %v583_v14 = vmul.f32 %v1244_v50, %v1858_v29  ;;  %v1038_v45 = vmul.f32 0.5, %v2019_v26  ;;  %v867_v61 = vmul.f32 %v1323_v56, %v1921_v10  ;;  %v1277_v55 = vld [vmem:[%s1850_s7 + $0x1b8] sm:$0xff]  ;;  %v1340_v56 = vld [vmem:[%s1850_s7 + $0x3b0] sm:$0xff] }
  0x82   : > { %v882_v15 = vadd.f32 %v866_v39, %v825_v62  ;;  %v640_v8 = vmul.f32 %v1260_v58, %v1863_v32  ;;  %v769_v22 = vadd.f32 %v753_v44, %v712_v57  ;;  %v697_v19 = vmul.f32 %v1276_v0, %v1866_v34  ;;  %v1356_v58 = vld [vmem:[%s1850_s7 + $0x430] sm:$0xff] }
  0x83   : > { %v2037_v20 = vadd.f32 %v1929_v16, %v995_v4  ;;  %v599_v23 = vadd.f32 %v583_v14, %v542_v13  ;;  %1418 = vtanh.f32 %v1038_v45  ;;  %v924_v33 = vmul.f32 %v1339_v6, %v1923_v11  ;;  %v1293_v14 = vld [vmem:[%s1850_s7 + $0x238] sm:$0xff] }
  0x84   : > { %v939_v9 = vadd.f32 %v923_v48, %v882_v15  ;;  %v981_v35 = vmul.f32 %v1909_v1, %v1355_v12  ;;  %v826_v40 = vadd.f32 %v810_v63, %v769_v22  ;;  %v754_v42 = vmul.f32 %v1292_v18, %v1869_v36  ;;  %v1309_v45 = vld [vmem:[%s1850_s7 + $0x2b8] sm:$0xff]  ;;  %v520_v15 = vld [vmem:[%s1850_s7 + $0x40] sm:$0xff] }
  0x85   : > { %v1039_v39 = vmul.f32 0.5, %v2037_v20  ;;  %v656_v41 = vadd.f32 %v640_v8, %v599_v23  ;;  %v811_v49 = vmul.f32 %v1308_v25, %v1882_v47  ;;  %v543_v50 = vmul.f32 %v1856_v28, %v519_v46 }
  0x86   : > { %v1415_v37 = vpop.eup %1414  ;;  %v996_v48 = vadd.f32 %v980_v52, %v939_v9  ;;  %v883_v59 = vadd.f32 %v867_v61, %v826_v40  ;;  %v584_v62 = vmul.f32 %v1245_v24, %v1860_v30  ;;  %v868_v52 = vmul.f32 %v1324_v21, %v1890_v53  ;;  %v1341_v24 = vld [vmem:[%s1850_s7 + $0x3b8] sm:$0xff] }
  0x87   : > { %v1068_v43 = vadd.f32 1.0, %v1415_v37  ;;  %1420 = vtanh.f32 %v1039_v39  ;;  %v713_v44 = vadd.f32 %v697_v19, %v656_v41  ;;  %v641_v4 = vmul.f32 %v1261_v17, %v1911_v2  ;;  %v1325_v19 = vld [vmem:[%s1850_s7 + $0x338] sm:$0xff]  ;;  %v1246_v37 = vld [vmem:[%s1850_s7 + $0xc0] sm:$0xff] }
  0x88   : > { %v2057_v0 = vadd.f32 %v1900_v60, %v996_v48  ;;  %v940_v57 = vadd.f32 %v924_v33, %v883_v59  ;;  %v600_v12 = vadd.f32 %v584_v62, %v543_v50  ;;  %v698_v13 = vmul.f32 %v1277_v55, %v1913_v3  ;;  %v1262_v39 = vld [vmem:[%s1850_s7 + $0x140] sm:$0xff] }
  0x89   : > { %v1084_v63 = vmul.f32 0.5, %v1068_v43  ;;  %v770_v6 = vadd.f32 %v754_v42, %v713_v44  ;;  %v1417_v61 = vpop.eup %1416  ;;  %v925_v22 = vmul.f32 %v1340_v56, %v1892_v54  ;;  %v982_v23 = vmul.f32 %v1874_v38, %v1356_v58  ;;  %v1357_v43 = vld [vmem:[%s1850_s7 + $0x438] sm:$0xff]  ;;  %v1278_v48 = vld [vmem:[%s1850_s7 + $0x1c0] sm:$0xff] }
  0x8a   : > { %v1040_v18 = vmul.f32 0.5, %v2057_v0  ;;  %v1069_v25 = vadd.f32 1.0, %v1417_v61  ;;  %v997_v46 = vadd.f32 %v981_v35, %v940_v57  ;;  %v657_v33 = vadd.f32 %v641_v4, %v600_v12  ;;  %v1294_v56 = vld [vmem:[%s1850_s7 + $0x240] sm:$0xff] }
  0x8b   : > { %v1100_v8 = vmul.f32 %v1084_v63, %v1982_v51  ;;  %v827_v9 = vadd.f32 %v811_v49, %v770_v6  ;;  %v755_v51 = vmul.f32 %v1293_v14, %v1916_v5  ;;  %v812_v40 = vmul.f32 %v1309_v45, %v1919_v7  ;;  %v1310_v4 = vld [vmem:[%s1850_s7 + $0x2c0] sm:$0xff]  ;;  %v521_v14 = vld [vmem:[%s1850_s7 + $0x48] sm:$0xff] }
  0x8c   : > { %1422 = vtanh.f32 %v1040_v18  ;;  %v544_v41 = vmul.f32 %v1854_v27, %v520_v15  ;;  %v1085_v42 = vmul.f32 0.5, %v1069_v25  ;;  %v2083_v21 = vadd.f32 %v1929_v16, %v997_v46  ;;  %v1247_v45 = vld [vmem:[%s1850_s7 + $0xc8] sm:$0xff] }
  0x8d   : > { %1116 = vst [vmem:[%s2064_s22] sm:$0xff] %v1100_v8  ;;  %v884_v35 = vadd.f32 %v868_v52, %v827_v9  ;;  %v714_v17 = vadd.f32 %v698_v13, %v657_v33  ;;  %v1419_v49 = vpop.eup %1418  ;;  %v869_v50 = vmul.f32 %v1325_v19, %v1921_v10  ;;  %v926_v55 = vmul.f32 %v1341_v24, %v1923_v11  ;;  %v1263_v18 = vld [vmem:[%s1850_s7 + $0x148] sm:$0xff]  ;;  %v1326_v9 = vld [vmem:[%s1850_s7 + $0x340] sm:$0xff] }
  0x8e   : > { %v585_v59 = vmul.f32 %v1246_v37, %v1858_v29  ;;  %v642_v44 = vmul.f32 %v1262_v39, %v1863_v32  ;;  %v1101_v58 = vmul.f32 %v1085_v42, %v2001_v31  ;;  %v1070_v62 = vadd.f32 1.0, %v1419_v49  ;;  %v1279_v33 = vld [vmem:[%s1850_s7 + $0x1c8] sm:$0xff] }
  0x8f   : > { %v1041_v63 = vmul.f32 0.5, %v2083_v21  ;;  %v941_v52 = vadd.f32 %v925_v22, %v884_v35  ;;  %v771_v57 = vadd.f32 %v755_v51, %v714_v17  ;;  %v983_v6 = vmul.f32 %v1909_v1, %v1357_v43  ;;  %v1295_v17 = vld [vmem:[%s1850_s7 + $0x248] sm:$0xff] }
  0x90   : > { %v601_v12 = vadd.f32 %v585_v59, %v544_v41  ;;  %v699_v13 = vmul.f32 %v1278_v48, %v1866_v34  ;;  %1118 = vst.msk [vmem:[%s2064_s22 + $0x8] sm:$0xff] %vm1117_vm0, %v1101_v58  ;;  %v1086_v31 = vmul.f32 0.5, %v1070_v62  ;;  %v756_v8 = vmul.f32 %v1294_v56, %v1869_v36  ;;  %v1358_v48 = vld [vmem:[%s1850_s7 + $0x440] sm:$0xff] }
  0x91   : > { %v1421_v15 = vpop.eup %1420  ;;  %1424 = vtanh.f32 %v1041_v63  ;;  %v998_v61 = vadd.f32 %v982_v23, %v941_v52  ;;  %v828_v19 = vadd.f32 %v812_v40, %v771_v57  ;;  %v813_v46 = vmul.f32 %v1310_v4, %v1882_v47  ;;  %v1342_v23 = vld [vmem:[%s1850_s7 + $0x3c0] sm:$0xff]  ;;  %v522_v52 = vld [vmem:[%s1850_s7 + $0x50] sm:$0xff] }
  0x92   : > { %v1071_v22 = vadd.f32 1.0, %v1421_v15  ;;  %v658_v25 = vadd.f32 %v642_v44, %v601_v12  ;;  %v1102_v24 = vmul.f32 %v1086_v31, %v2019_v26  ;;  %v545_v39 = vmul.f32 %v1856_v28, %v521_v14  ;;  %v1311_v44 = vld [vmem:[%s1850_s7 + $0x2c8] sm:$0xff]  ;;  %v1248_v4 = vld [vmem:[%s1850_s7 + $0xd0] sm:$0xff] }
  0x93   : > { %v2108_v37 = vadd.f32 %v1900_v60, %v998_v61  ;;  %v586_v51 = vmul.f32 %v1247_v45, %v1860_v30  ;;  %v885_v42 = vadd.f32 %v869_v50, %v828_v19  ;;  %v643_v35 = vmul.f32 %v1263_v18, %v1911_v2  ;;  %v1327_v14 = vld [vmem:[%s1850_s7 + $0x348] sm:$0xff]  ;;  %v1264_v45 = vld [vmem:[%s1850_s7 + $0x150] sm:$0xff] }
  0x94   : > { %v1087_v41 = vmul.f32 0.5, %v1071_v22  ;;  %v715_v40 = vadd.f32 %v699_v13, %v658_v25  ;;  %1119 = vst [vmem:[%s2064_s22 + $0x10] sm:$0xff] %v1102_v24  ;;  %v870_v43 = vmul.f32 %v1326_v9, %v1890_v53  ;;  %v700_v59 = vmul.f32 %v1279_v33, %v1913_v3  ;;  %v1280_v61 = vld [vmem:[%s1850_s7 + $0x1d0] sm:$0xff]  ;;  %v1343_v22 = vld [vmem:[%s1850_s7 + $0x3c8] sm:$0xff] }
  0x95   : > { %v1042_v26 = vmul.f32 0.5, %v2108_v37  ;;  %v602_v49 = vadd.f32 %v586_v51, %v545_v39  ;;  %v942_v58 = vadd.f32 %v926_v55, %v885_v42  ;;  %v927_v63 = vmul.f32 %v1342_v23, %v1892_v54  ;;  %v1296_v23 = vld [vmem:[%s1850_s7 + $0x250] sm:$0xff] }
  0x96   : > { %v1423_v50 = vpop.eup %1422  ;;  %v1103_v56 = vmul.f32 %v1087_v41, %v2037_v20  ;;  %v772_v62 = vadd.f32 %v756_v8, %v715_v40  ;;  %v757_v13 = vmul.f32 %v1295_v17, %v1916_v5  ;;  %v984_v15 = vmul.f32 %v1874_v38, %v1358_v48 }
  0x97   : > { %v1072_v57 = vadd.f32 1.0, %v1423_v50  ;;  %1426 = vtanh.f32 %v1042_v26  ;;  %v659_v12 = vadd.f32 %v643_v35, %v602_v49  ;;  %v999_v20 = vadd.f32 %v983_v6, %v942_v58  ;;  %v1312_v35 = vld [vmem:[%s1850_s7 + $0x2d0] sm:$0xff]  ;;  %v523_v49 = vld [vmem:[%s1850_s7 + $0x58] sm:$0xff] }
  0x98   : > { %1120 = vst.msk [vmem:[%s2064_s22 + $0x18] sm:$0xff] %vm1117_vm0, %v1103_v56  ;;  %v829_v55 = vadd.f32 %v813_v46, %v772_v62  ;;  %v814_v31 = vmul.f32 %v1311_v44, %v1919_v7  ;;  %v546_v19 = vmul.f32 %v1854_v27, %v522_v52  ;;  %v587_v25 = vmul.f32 %v1248_v4, %v1858_v29  ;;  %v1359_v46 = vld [vmem:[%s1850_s7 + $0x448] sm:$0xff]  ;;  %v1328_v58 = vld [vmem:[%s1850_s7 + $0x350] sm:$0xff]  ;;  %v1265_v62 = vld [vmem:[%s1850_s7 + $0x158] sm:$0xff] }
  0x99   : > { %v1088_v8 = vmul.f32 0.5, %v1072_v57  ;;  %v716_v18 = vadd.f32 %v700_v59, %v659_v12  ;;  %v2137_v9 = vadd.f32 %v1929_v16, %v999_v20  ;;  %v871_v6 = vmul.f32 %v1327_v14, %v1921_v10  ;;  %v1249_v59 = vld [vmem:[%s1850_s7 + $0xd8] sm:$0xff]  ;;  %v1344_v14 = vld [vmem:[%s1850_s7 + $0x3d0] sm:$0xff] }
  0x9a   : > { %v886_v33 = vadd.f32 %v870_v43, %v829_v55  ;;  %v644_v24 = vmul.f32 %v1264_v45, %v1863_v32  ;;  %v603_v42 = vadd.f32 %v587_v25, %v546_v19  ;;  %v701_v40 = vmul.f32 %v1280_v61, %v1866_v34  ;;  %v1281_v57 = vld [vmem:[%s1850_s7 + $0x1d8] sm:$0xff]  ;;  %v1360_v45 = vld [vmem:[%s1850_s7 + $0x450] sm:$0xff] }
  0x9b   : > { %v1425_v39 = vpop.eup %1424  ;;  %v1104_v51 = vmul.f32 %v1088_v8, %v2057_v0  ;;  %v773_v41 = vadd.f32 %v757_v13, %v716_v18  ;;  %v1043_v26 = vmul.f32 0.5, %v2137_v9  ;;  %v928_v48 = vmul.f32 %v1343_v22, %v1923_v11  ;;  %v1297_v18 = vld [vmem:[%s1850_s7 + $0x258] sm:$0xff] }
  0x9c   : > { %v1073_v17 = vadd.f32 1.0, %v1425_v39  ;;  %v943_v43 = vadd.f32 %v927_v63, %v886_v33  ;;  %v985_v44 = vmul.f32 %v1909_v1, %v1359_v46  ;;  %v660_v50 = vadd.f32 %v644_v24, %v603_v42  ;;  %v1313_v46 = vld [vmem:[%s1850_s7 + $0x2d8] sm:$0xff] }
  0x9d   : > { %1121 = vst [vmem:[%s2064_s22 + $0x20] sm:$0xff] %v1104_v51  ;;  %v830_v0 = vadd.f32 %v814_v31, %v773_v41  ;;  %v758_v56 = vmul.f32 %v1296_v23, %v1869_v36  ;;  %1428 = vtanh.f32 %v1043_v26  ;;  %v815_v63 = vmul.f32 %v1312_v35, %v1882_v47  ;;  %v1250_v41 = vld [vmem:[%s1850_s7 + $0xe0] sm:$0xff]  ;;  %v1329_v26 = vld [vmem:[%s1850_s7 + $0x358] sm:$0xff] }
  0x9e   : > { %v1089_v52 = vmul.f32 0.5, %v1073_v17  ;;  %v1000_v4 = vadd.f32 %v984_v15, %v943_v43  ;;  %v717_v13 = vadd.f32 %v701_v40, %v660_v50  ;;  %v547_v20 = vmul.f32 %v1856_v28, %v523_v49  ;;  %v1345_v43 = vld [vmem:[%s1850_s7 + $0x3d8] sm:$0xff] }
  0x9f   : > { %v887_v12 = vadd.f32 %v871_v6, %v830_v0  ;;  %v588_v55 = vmul.f32 %v1249_v59, %v1860_v30  ;;  %v872_v15 = vmul.f32 %v1328_v58, %v1890_v53  ;;  %v645_v8 = vmul.f32 %v1265_v62, %v1911_v2  ;;  %v1361_v0 = vld [vmem:[%s1850_s7 + $0x458] sm:$0xff] }
  0xa0   : > { %v1105_v31 = vmul.f32 %v1089_v52, %v2083_v21  ;;  %v2163_v61 = vadd.f32 %v1900_v60, %v1000_v4  ;;  %v774_v25 = vadd.f32 %v758_v56, %v717_v13  ;;  %v702_v6 = vmul.f32 %v1281_v57, %v1913_v3  ;;  %v524_v21 = vld [vmem:[%s1850_s7 + $0x60] sm:$0xff] }
  0xa1   : > { %v1427_v22 = vpop.eup %1426  ;;  %v944_v19 = vadd.f32 %v928_v48, %v887_v12  ;;  %v604_v33 = vadd.f32 %v588_v55, %v547_v20  ;;  %v929_v39 = vmul.f32 %v1344_v14, %v1892_v54  ;;  %v986_v51 = vmul.f32 %v1874_v38, %v1360_v45  ;;  %v1266_v48 = vld [vmem:[%s1850_s7 + $0x160] sm:$0xff] }
  0xa2   : > { %1122 = vst.msk [vmem:[%s2064_s22 + $0x28] sm:$0xff] %vm1117_vm0, %v1105_v31  ;;  %v1074_v24 = vadd.f32 1.0, %v1427_v22  ;;  %v1044_v23 = vmul.f32 0.5, %v2163_v61  ;;  %v831_v40 = vadd.f32 %v815_v63, %v774_v25  ;;  %v759_v17 = vmul.f32 %v1297_v18, %v1916_v5  ;;  %v1282_v52 = vld [vmem:[%s1850_s7 + $0x1e0] sm:$0xff]  ;;  %v1267_v18 = vld [vmem:[%s1850_s7 + $0x168] sm:$0xff] }
  0xa3   : > { %v1001_v42 = vadd.f32 %v985_v44, %v944_v19  ;;  %v661_v35 = vadd.f32 %v645_v8, %v604_v33  ;;  %v816_v59 = vmul.f32 %v1313_v46, %v1919_v7  ;;  %v548_v50 = vmul.f32 %v1854_v27, %v524_v21  ;;  %v1298_v4 = vld [vmem:[%s1850_s7 + $0x260] sm:$0xff]  ;;  %v1251_v8 = vld [vmem:[%s1850_s7 + $0xe8] sm:$0xff] }
  0xa4   : > { %v1090_v49 = vmul.f32 0.5, %v1074_v24  ;;  %1430 = vtanh.f32 %v1044_v23  ;;  %v888_v56 = vadd.f32 %v872_v15, %v831_v40  ;;  %v589_v62 = vmul.f32 %v1250_v41, %v1858_v29  ;;  %v1314_v63 = vld [vmem:[%s1850_s7 + $0x2e0] sm:$0xff]  ;;  %v525_v15 = vld [vmem:[%s1850_s7 + $0x68] sm:$0xff] }
  0xa5   : > { %v2185_v44 = vadd.f32 %v1929_v16, %v1001_v42  ;;  %v718_v58 = vadd.f32 %v702_v6, %v661_v35  ;;  %v873_v12 = vmul.f32 %v1329_v26, %v1921_v10  ;;  %v930_v13 = vmul.f32 %v1345_v43, %v1923_v11  ;;  %v1330_v6 = vld [vmem:[%s1850_s7 + $0x360] sm:$0xff] }
  0xa6   : > { %v1106_v57 = vmul.f32 %v1090_v49, %v2108_v37  ;;  %v646_v14 = vmul.f32 %v1266_v48, %v1863_v32  ;;  %v945_v20 = vadd.f32 %v929_v39, %v888_v56  ;;  %v605_v31 = vadd.f32 %v589_v62, %v548_v50  ;;  %v1346_v23 = vld [vmem:[%s1850_s7 + $0x3e0] sm:$0xff]  ;;  %v1283_v39 = vld [vmem:[%s1850_s7 + $0x1e8] sm:$0xff]  ;;  %v526_v62 = vld [vmem:[%s1850_s7 + $0x70] sm:$0xff] }
  0xa7   : > { %v1045_v45 = vmul.f32 0.5, %v2185_v44  ;;  %v775_v55 = vadd.f32 %v759_v17, %v718_v58  ;;  %v1429_v22 = vpop.eup %1428  ;;  %v987_v37 = vmul.f32 %v1909_v1, %v1361_v0  ;;  %v703_v19 = vmul.f32 %v1282_v52, %v1866_v34  ;;  %v1362_v42 = vld [vmem:[%s1850_s7 + $0x460] sm:$0xff]  ;;  %v1299_v49 = vld [vmem:[%s1850_s7 + $0x268] sm:$0xff] }
  0xa8   : > { %1123 = vst [vmem:[%s2064_s22 + $0x30] sm:$0xff] %v1106_v57  ;;  %v760_v25 = vmul.f32 %v1298_v4, %v1869_v36  ;;  %v817_v33 = vmul.f32 %v1314_v63, %v1882_v47  ;;  %v1075_v46 = vadd.f32 1.0, %v1429_v22  ;;  %v1002_v21 = vadd.f32 %v986_v51, %v945_v20 }
  0xa9   : > { %1432 = vtanh.f32 %v1045_v45  ;;  %v832_v24 = vadd.f32 %v816_v59, %v775_v55  ;;  %v662_v41 = vadd.f32 %v646_v14, %v605_v31  ;;  %v549_v40 = vmul.f32 %v1856_v28, %v525_v15  ;;  %v1315_v59 = vld [vmem:[%s1850_s7 + $0x2e8] sm:$0xff]  ;;  %v1268_v14 = vld [vmem:[%s1850_s7 + $0x170] sm:$0xff] }
  0xaa   : > { %v590_v35 = vmul.f32 %v1251_v8, %v1860_v30  ;;  %v647_v17 = vmul.f32 %v1267_v18, %v1911_v2  ;;  %v1091_v26 = vmul.f32 0.5, %v1075_v46  ;;  %v2212_v43 = vadd.f32 %v1900_v60, %v1002_v21  ;;  %v1331_v8 = vld [vmem:[%s1850_s7 + $0x368] sm:$0xff] }
  0xab   : > { %v889_v48 = vadd.f32 %v873_v12, %v832_v24  ;;  %v874_v51 = vmul.f32 %v1330_v6, %v1890_v53  ;;  %v719_v0 = vadd.f32 %v703_v19, %v662_v41  ;;  %v931_v50 = vmul.f32 %v1346_v23, %v1892_v54  ;;  %v1252_v12 = vld [vmem:[%s1850_s7 + $0xf0] sm:$0xff]  ;;  %v1347_v18 = vld [vmem:[%s1850_s7 + $0x3e8] sm:$0xff] }
  0xac   : > { %v606_v56 = vadd.f32 %v590_v35, %v549_v40  ;;  %v704_v58 = vmul.f32 %v1283_v39, %v1913_v3  ;;  %v1107_v52 = vmul.f32 %v1091_v26, %v2137_v9  ;;  %v1046_v4 = vmul.f32 0.5, %v2212_v43  ;;  %v1284_v19 = vld [vmem:[%s1850_s7 + $0x1f0] sm:$0xff]  ;;  %v1363_v46 = vld [vmem:[%s1850_s7 + $0x468] sm:$0xff] }
  0xad   : > { %v946_v63 = vadd.f32 %v930_v13, %v889_v48  ;;  %v988_v57 = vmul.f32 %v1874_v38, %v1362_v42  ;;  %v776_v20 = vadd.f32 %v760_v25, %v719_v0  ;;  %v761_v31 = vmul.f32 %v1299_v49, %v1916_v5  ;;  %v1300_v23 = vld [vmem:[%s1850_s7 + $0x270] sm:$0xff] }
  0xae   : > { %v1431_v45 = vpop.eup %1430  ;;  %v663_v55 = vadd.f32 %v647_v17, %v606_v56  ;;  %v818_v15 = vmul.f32 %v1315_v59, %v1919_v7  ;;  %1124 = vst.msk [vmem:[%s2064_s22 + $0x38] sm:$0xff] %vm1117_vm0, %v1107_v52  ;;  %1434 = vtanh.f32 %v1046_v4  ;;  %v550_v22 = vmul.f32 %v1854_v27, %v526_v62  ;;  %v1253_v17 = vld [vmem:[%s1850_s7 + $0xf8] sm:$0xff] }
  0xaf   : > { %v1076_v9 = vadd.f32 1.0, %v1431_v45  ;;  %v1003_v13 = vadd.f32 %v987_v37, %v946_v63  ;;  %v833_v6 = vadd.f32 %v817_v33, %v776_v20  ;;  %v591_v21 = vmul.f32 %v1252_v12, %v1858_v29  ;;  %v1316_v29 = vld [vmem:[%s1850_s7 + $0x2f0] sm:$0xff]  ;;  %v1269_v52 = vld [vmem:[%s1850_s7 + $0x178] sm:$0xff] }
  0xb0   : > { %v720_v25 = vadd.f32 %v704_v58, %v663_v55  ;;  %v648_v24 = vmul.f32 %v1268_v14, %v1863_v32  ;;  %v875_v37 = vmul.f32 %v1331_v8, %v1921_v10  ;;  %v932_v27 = vmul.f32 %v1347_v18, %v1923_v11  ;;  %v527_v32 = vld [vmem:[%s1850_s7 + $0x78] sm:$0xff]  ;;  %v1348_v20 = vld [vmem:[%s1850_s7 + $0x3f0] sm:$0xff] }
  0xb1   : > { %v1092_v39 = vmul.f32 0.5, %v1076_v9  ;;  %v2238_v41 = vadd.f32 %v1929_v16, %v1003_v13  ;;  %v890_v42 = vadd.f32 %v874_v51, %v833_v6  ;;  %v607_v33 = vadd.f32 %v591_v21, %v550_v22  ;;  %v1285_v4 = vld [vmem:[%s1850_s7 + $0x1f8] sm:$0xff] }
  0xb2   : > { %v777_v40 = vadd.f32 %v761_v31, %v720_v25  ;;  %v705_v35 = vmul.f32 %v1284_v19, %v1866_v34  ;;  %v989_v59 = vmul.f32 %v1909_v1, %v1363_v46  ;;  %v762_v51 = vmul.f32 %v1300_v23, %v1869_v36  ;;  %v1332_v34 = vld [vmem:[%s1850_s7 + $0x370] sm:$0xff]  ;;  %v1301_v55 = vld [vmem:[%s1850_s7 + $0x278] sm:$0xff] }
  0xb3   : > { %v1433_v26 = vpop.eup %1432  ;;  %v1108_v48 = vmul.f32 %v1092_v39, %v2163_v61  ;;  %v1047_v49 = vmul.f32 0.5, %v2238_v41  ;;  %v947_v56 = vadd.f32 %v931_v50, %v890_v42  ;;  %v664_v62 = vadd.f32 %v648_v24, %v607_v33  ;;  %v1317_v13 = vld [vmem:[%s1850_s7 + $0x2f8] sm:$0xff] }
  0xb4   : > { %v1077_v0 = vadd.f32 1.0, %v1433_v26  ;;  %v834_v58 = vadd.f32 %v818_v15, %v777_v40  ;;  %v819_v63 = vmul.f32 %v1316_v29, %v1882_v47  ;;  %v551_v61 = vmul.f32 %v1856_v28, %v527_v32  ;;  %v1333_v46 = vld [vmem:[%s1850_s7 + $0x378] sm:$0xff] }
  0xb5   : > { %1125 = vst [vmem:[%s2064_s22 + $0x40] sm:$0xff] %v1108_v48  ;;  %1436 = vtanh.f32 %v1047_v49  ;;  %v592_v12 = vmul.f32 %v1253_v17, %v1860_v30  ;;  %v1004_v14 = vadd.f32 %v988_v57, %v947_v56  ;;  %v721_v50 = vadd.f32 %v705_v35, %v664_v62  ;;  %v1364_v57 = vld [vmem:[%s1850_s7 + $0x470] sm:$0xff]  ;;  %v1365_v29 = vld [vmem:[%s1850_s7 + $0x478] sm:$0xff] }
  0xb6   : > { %v1093_v36 = vmul.f32 0.5, %v1077_v0  ;;  %v891_v45 = vadd.f32 %v875_v37, %v834_v58  ;;  %v876_v31 = vmul.f32 %v1332_v34, %v1890_v53  ;;  %v649_v8 = vmul.f32 %v1269_v52, %v1911_v2 }
  0xb7   : > { %v608_v15 = vadd.f32 %v592_v12, %v551_v61  ;;  %v706_v47 = vmul.f32 %v1285_v4, %v1913_v3  ;;  %v1032_v30 = vadd.f32 %v1900_v60, %v1004_v14  ;;  %v778_v9 = vadd.f32 %v762_v51, %v721_v50 }
  0xb8   : > { %v1109_v28 = vmul.f32 %v1093_v36, %v2185_v44  ;;  %v948_v18 = vadd.f32 %v932_v27, %v891_v45  ;;  %v1435_v22 = vpop.eup %1434  ;;  %v933_v19 = vmul.f32 %v1348_v20, %v1892_v54  ;;  %v763_v53 = vmul.f32 %v1301_v55, %v1916_v5  ;;  %v1349_v5 = vld [vmem:[%s1850_s7 + $0x3f8] sm:$0xff] }
  0xb9   : > { %v665_v6 = vadd.f32 %v649_v8, %v608_v15  ;;  %v1078_v2 = vadd.f32 1.0, %v1435_v22  ;;  %v1048_v3 = vmul.f32 0.5, %v1032_v30  ;;  %v835_v44 = vadd.f32 %v819_v63, %v778_v9 }
  0xba   : > { %1126 = vst.msk [vmem:[%s2064_s22 + $0x48] sm:$0xff] %vm1117_vm0, %v1109_v28  ;;  %v1005_v25 = vadd.f32 %v989_v59, %v948_v18  ;;  %v990_v21 = vmul.f32 %v1874_v38, %v1364_v57  ;;  %v820_v23 = vmul.f32 %v1317_v13, %v1919_v7  ;;  %v877_v42 = vmul.f32 %v1333_v46, %v1921_v10 }
  0xbb   : > { %v722_v24 = vadd.f32 %v706_v47, %v665_v6  ;;  %v1094_v39 = vmul.f32 0.5, %v1078_v2  ;;  %1438 = vtanh.f32 %v1048_v3  ;;  %v892_v37 = vadd.f32 %v876_v31, %v835_v44 }
  0xbc   : > { %v1033_v54 = vadd.f32 %v1929_v16, %v1005_v25  ;;  %v934_v17 = vmul.f32 %v1349_v5, %v1923_v11  ;;  %v991_v49 = vmul.f32 %v1909_v1, %v1365_v29 }
  0xbd   : > { %v779_v27 = vadd.f32 %v763_v53, %v722_v24  ;;  %v1110_v40 = vmul.f32 %v1094_v39, %v2212_v43  ;;  %v949_v35 = vadd.f32 %v933_v19, %v892_v37 }
  0xbe   : > { %v1049_v33 = vmul.f32 0.5, %v1033_v54 }
  0xbf   : > { %v1437_v32 = vpop.eup %1436  ;;  %v836_v38 = vadd.f32 %v820_v23, %v779_v27  ;;  %1127 = vst [vmem:[%s2064_s22 + $0x50] sm:$0xff] %v1110_v40  ;;  %v1006_v26 = vadd.f32 %v990_v21, %v949_v35 }
  0xc0   : > { %v1079_v7 = vadd.f32 1.0, %v1437_v32  ;;  %1440 = vtanh.f32 %v1049_v33 }
  0xc1   : > { %v893_v48 = vadd.f32 %v877_v42, %v836_v38  ;;  %v1034_v10 = vadd.f32 %v1900_v60, %v1006_v26 }
  0xc2   : > { %v1095_v59 = vmul.f32 0.5, %v1079_v7 }
  0xc3   : > { %v950_v43 = vadd.f32 %v934_v17, %v893_v48  ;;  %v1050_v0 = vmul.f32 0.5, %v1034_v10 }
  0xc4   : > { %v1111_v51 = vmul.f32 %v1095_v59, %v2238_v41 }
  0xc5   : > { %v1007_v56 = vadd.f32 %v991_v49, %v950_v43  ;;  %v1439_v58 = vpop.eup %1438  ;;  %1442 = vtanh.f32 %v1050_v0 }
  0xc6   : > { %1128 = vst.msk [vmem:[%s2064_s22 + $0x58] sm:$0xff] %vm1117_vm0, %v1111_v51  ;;  %v1080_v11 = vadd.f32 1.0, %v1439_v58 }
  0xc7   : > { %v1035_v62 = vadd.f32 %v1929_v16, %v1007_v56 }
  0xc8   : > { %v1096_v34 = vmul.f32 0.5, %v1080_v11 }
  0xc9   : > { %v1051_v1 = vmul.f32 0.5, %v1035_v62 }
  0xca   : > { %v1441_v52 = vpop.eup %1440  ;;  %v1112_v4 = vmul.f32 %v1096_v34, %v1032_v30 }
  0xcb   : > { %v1081_v60 = vadd.f32 1.0, %v1441_v52  ;;  %1444 = vtanh.f32 %v1051_v1 }
  0xcc   : > { %1129 = vst [vmem:[%s2064_s22 + $0x60] sm:$0xff] %v1112_v4 }
  0xcd   : > { %v1097_v41 = vmul.f32 0.5, %v1081_v60 }
  0xcf   : > { %v1113_v63 = vmul.f32 %v1097_v41, %v1033_v54  ;;  %v1443_v61 = vpop.eup %1442 }
  0xd0   : > { %v1082_v12 = vadd.f32 1.0, %v1443_v61 }
  0xd1   : > { %1130 = vst.msk [vmem:[%s2064_s22 + $0x68] sm:$0xff] %vm1117_vm0, %v1113_v63 }
  0xd2   : > { %v1098_v36 = vmul.f32 0.5, %v1082_v12 }
  0xd4   : > { %v1114_v45 = vmul.f32 %v1098_v36, %v1034_v10 }
  0xd5   : > { %v1445_v14 = vpop.eup %1444 }
  0xd6   : > { %v1083_v50 = vadd.f32 1.0, %v1445_v14  ;;  %1131 = vst [vmem:[%s2064_s22 + $0x70] sm:$0xff] %v1114_v45 }
  0xd8   : > { %v1099_v16 = vmul.f32 0.5, %v1083_v50 }
  0xda   : > { %v1115_v20 = vmul.f32 %v1099_v16, %v1035_v62 }
  0xdc   : > { %1132 = vst.msk [vmem:[%s2064_s22 + $0x78] sm:$0xff] %vm1117_vm0, %v1115_v20 }
  0xdd PF: > { %s13_s16 = sadd.s32 1, %s1484_s16   ;;  %s2311_s12 = smov %s1472_s13 }
  0xde   : > { %p10_p10 = scmp.ge.s32.totalorder %s13_s16, 4   ;;  %s2312_s13 = smov %s1541_s20 }
  0xdf   : > { %s2313_s14 = smov %s1480_s15  ;;  %s2314_s15 = smov %s2316_s17 }
  0xe0   :  { %12 = sbr.rel (!%p10_p10) target bundleno = 3 (0x3), region = 98 }

// kernel: efficientnet_forward.37
= control target key start
LH: loop header
LB: loop body
LE: loop exit
PB: predicated region body
PF: predicated region fallthrough
CT: control target
= control target key end

     0   :  { %s563_s15 = smov 0   ;;  %s565_s16 = smov 0   ;;  %s700_s0 = inlined_call_operand.vmem [shape: f32[2,16,192], index: 0, kind: input, shape index: {}]   ;;  %s701_s1 = inlined_call_operand.vmem [shape: f32[192,64], index: 1, kind: input, shape index: {}]   ;;  %s702_s2 = inlined_call_operand.vmem [shape: f32[1,64], index: 2, kind: input, shape index: {}]   ;;  %s703_s3 = inlined_call_operand.vmem [shape: f32[2,1,192], index: 3, kind: input, shape index: {}]   ;;  %s704_s4 = inlined_call_operand.vmem [shape: f32[2,16,64], index: 4, kind: output, shape index: {}]  }
   0x1   :  { %s567_s17 = smov 0  }
   0x2 LB: > { %s26_s18 = sadd.s32 1, %s531_s16  ;;  %p476_p0 = scmp.ge.s32.totalorder %s535_s17, 1  ;;  %s535_s17 = sphi %s567_s17, %s14_s17   ;;  %s531_s16 = sphi %s565_s16, %s706_s16   ;;  %s527_s15 = sphi %s563_s15, %s705_s15  }
   0x3   : > { %p28_p1 = scmp.ge.s32.totalorder %s26_s18, 2  ;;  %p193_p2 = scmp.lt.s32.totalorder %s535_s17, 3 }
   0x5   : > { %s708_s18 = smov (%p28_p1, %s26_s18), 0  ;;  %p194_p3 = pnand %p476_p0, %p193_p2 }
   0x6   : > { %v280_v0 = vld [vmem:[%s701_s1] sm:$0xff] (!%p194_p3)  ;;  %v281_v1 = vld [vmem:[%s701_s1 + $0x8] sm:$0xff] (!%p194_p3)  ;;  %v282_v2 = vld [vmem:[%s701_s1 + $0x10] sm:$0xff] (!%p194_p3)  ;;  %p233_p4 = scmp.lt.s32.totalorder (!%p194_p3), %s527_s15, 1  ;;  %v264_v3 = vlaneseq (!%p194_p3)  ;;  %v537_v4 = vmov (!%p194_p3), 0   ;;  %vm323_vm0 = vcmask (!%p194_p3), 523264  }
   0x7   : > { %197 = sbr.rel (%p194_p3) target bundleno = 273 (0x111), region = 36  ;;  %327 = vmatprep.subr.bf16.mxu0 (!%p194_p3), %v537_v4  ;;  %v304_v5 = vpack.c.bf16 (!%p194_p3), %v281_v1, %v280_v0  ;;  %v283_v6 = vld [vmem:[%s701_s1 + $0x18] sm:$0xff] (!%p194_p3)  ;;  %v284_v9 = vld [vmem:[%s701_s1 + $0x20] sm:$0xff] (!%p194_p3)  ;;  %v285_v10 = vld [vmem:[%s701_s1 + $0x28] sm:$0xff] (!%p194_p3) }
   0x8   : > { %v265_v7 = vshrl.u32 (!%p194_p3), %v264_v3, 7  ;;  %v305_v8 = vpack.c.bf16 (!%p194_p3), %v283_v6, %v282_v2  ;;  %v306_v12 = vpack.c.bf16 (!%p194_p3), %v285_v10, %v284_v9  ;;  %v286_v13 = vld [vmem:[%s701_s1 + $0x30] sm:$0xff] (!%p194_p3)  ;;  %v287_v14 = vld [vmem:[%s701_s1 + $0x38] sm:$0xff] (!%p194_p3)  ;;  %v288_v22 = vld [vmem:[%s701_s1 + $0x40] sm:$0xff] (!%p194_p3) }
   0x9   : > { %328 = vmatpush1.bf16.msra.mxu0 (!%p194_p3), %v304_v5  ;;  %v307_v19 = vpack.c.bf16 (!%p194_p3), %v287_v14, %v286_v13  ;;  %v289_v23 = vld [vmem:[%s701_s1 + $0x48] sm:$0xff] (!%p194_p3)  ;;  %v290_v26 = vld [vmem:[%s701_s1 + $0x50] sm:$0xff] (!%p194_p3)  ;;  %v291_v27 = vld [vmem:[%s701_s1 + $0x58] sm:$0xff] (!%p194_p3) }
   0xa   : > { %329 = vmatprep.subr.bf16.mxu0 (!%p194_p3), %v537_v4  ;;  %v270_v11 = vsub.s32 (!%p194_p3), 1, %v265_v7  ;;  %v308_v25 = vpack.c.bf16 (!%p194_p3), %v289_v23, %v288_v22  ;;  %v309_v28 = vpack.c.bf16 (!%p194_p3), %v291_v27, %v290_v26  ;;  %v292_v29 = vld [vmem:[%s701_s1 + $0x60] sm:$0xff] (!%p194_p3)  ;;  %v293_v30 = vld [vmem:[%s701_s1 + $0x68] sm:$0xff] (!%p194_p3)  ;;  %v294_v32 = vld [vmem:[%s701_s1 + $0x70] sm:$0xff] (!%p194_p3)  ;;  %v266_v40 = vsub.s32 (!%p194_p3), 0, %v265_v7 }
   0xb   : > { %v310_v31 = vpack.c.bf16 (!%p194_p3), %v293_v30, %v292_v29  ;;  %v295_v33 = vld [vmem:[%s701_s1 + $0x78] sm:$0xff] (!%p194_p3)  ;;  %v296_v35 = vld [vmem:[%s701_s1 + $0x80] sm:$0xff] (!%p194_p3)  ;;  %v297_v36 = vld [vmem:[%s701_s1 + $0x88] sm:$0xff] (!%p194_p3) }
   0xc   : > { %v311_v34 = vpack.c.bf16 (!%p194_p3), %v295_v33, %v294_v32  ;;  %v312_v37 = vpack.c.bf16 (!%p194_p3), %v297_v36, %v296_v35  ;;  %v298_v38 = vld [vmem:[%s701_s1 + $0x90] sm:$0xff] (!%p194_p3)  ;;  %v299_v39 = vld [vmem:[%s701_s1 + $0x98] sm:$0xff] (!%p194_p3)  ;;  %v300_v42 = vld [vmem:[%s701_s1 + $0xa0] sm:$0xff] (!%p194_p3) }
   0xd   : > { %330 = vmatpush1.bf16.msra.mxu0 (!%p194_p3), %v305_v8  ;;  %v313_v41 = vpack.c.bf16 (!%p194_p3), %v299_v39, %v298_v38  ;;  %v301_v43 = vld [vmem:[%s701_s1 + $0xa8] sm:$0xff] (!%p194_p3)  ;;  %v302_v48 = vld [vmem:[%s701_s1 + $0xb0] sm:$0xff] (!%p194_p3)  ;;  %v303_v49 = vld [vmem:[%s701_s1 + $0xb8] sm:$0xff] (!%p194_p3) }
   0xe   : > { %s710_s15 = smov (!%p233_p4, %s527_s15), 1  ;;  %331 = vmatprep.subr.bf16.mxu0 %v537_v4  ;;  %v314_v45 = vpack.c.bf16 %v301_v43, %v300_v42  ;;  %v315_v52 = vpack.c.bf16 %v303_v49, %v302_v48  ;;  %v482_v54 = vld [vmem:[%s702_s2] ss:$0 sm:$0xff] }
   0xf   : > { %s486_s5 = sshll.u32 %s710_s15, 5  ;;  %s479_s6 = sshll.u32 %s710_s15, 1 }
  0x10   : > { %s608_s9 = scalar_lea.vmem %s700_s0, %s486_s5  ;;  %s246_s12 = scalar_lea.vmem %s703_s3, %s479_s6 }
  0x11   : > { %v259_v15 = vld [vmem:[%s608_s9 + $0x8] sm:$0xff]  ;;  %v261_v16 = vld [vmem:[%s608_s9 + $0x18] sm:$0xff]  ;;  %v262_v17 = vld [vmem:[%s246_s12] sm:$0x3]  ;;  %332 = vmatpush1.bf16.msra.mxu0 %v306_v12 }
  0x12   : > { %v271_v18 = vrot.slane %v262_v17, %v270_v11  ;;  %333 = vmatprep.subr.bf16.mxu0 %v537_v4  ;;  %v267_v44 = vrot.slane %v262_v17, %v266_v40  ;;  %v258_v46 = vld [vmem:[%s608_s9] sm:$0xff]  ;;  %v260_v47 = vld [vmem:[%s608_s9 + $0x10] sm:$0xff]  ;;  %s487_s9 = sshll.u32 %s710_s15, 4 }
  0x13   : > { %s255_s11 = scalar_lea.vmem %s704_s4, %s487_s9 }
  0x14   : > { %v275_v20 = vmul.f32 %v271_v18, %v259_v15  ;;  %v277_v21 = vmul.f32 %v271_v18, %v261_v16  ;;  %v274_v50 = vmul.f32 %v267_v44, %v258_v46  ;;  %v276_v51 = vmul.f32 %v267_v44, %v260_v47 }
  0x15   : > { %334 = vmatpush1.bf16.msra.mxu0 %v307_v19 }
  0x16   : > { %v279_v24 = vpack.c.bf16 %v277_v21, %v275_v20  ;;  %335 = vmatprep.subr.bf16.mxu0 %v537_v4  ;;  %v278_v53 = vpack.c.bf16 %v276_v51, %v274_v50 }
  0x18   : > { %483 = vmatprep.mubr.msk.bf16.mxu0 %vm323_vm0, %v279_v24 }
  0x19   : > { %336 = vmatpush1.bf16.msra.mxu0 %v308_v25 }
  0x1a   : > { %337 = vmatprep.subr.bf16.mxu0 %v537_v4 }
  0x1d   : > { %338 = vmatpush1.bf16.msra.mxu0 %v309_v28 }
  0x1e   : > { %339 = vmatprep.subr.bf16.mxu0 %v537_v4 }
  0x21   : > { %340 = vmatpush1.bf16.msra.mxu0 %v310_v31 }
  0x22   : > { %341 = vmatprep.subr.bf16.mxu0 %v537_v4 }
  0x25   : > { %342 = vmatpush1.bf16.msra.mxu0 %v311_v34 }
  0x26   : > { %343 = vmatprep.subr.bf16.mxu0 %v537_v4 }
  0x29   : > { %344 = vmatpush1.bf16.msra.mxu0 %v312_v37 }
  0x2a   : > { %345 = vmatprep.subr.bf16.mxu0 %v537_v4 }
  0x2d   : > { %346 = vmatpush1.bf16.msra.mxu0 %v313_v41 }
  0x2e   : > { %347 = vmatprep.subr.bf16.mxu0 %v537_v4 }
  0x31   : > { %348 = vmatpush1.bf16.msra.mxu0 %v314_v45 }
  0x32   : > { %349 = vmatprep.subr.bf16.mxu0 %v537_v4 }
  0x35   : > { %350 = vmatpush1.bf16.msra.mxu0 %v315_v52 }
  0x38   : > { %360 = vmatmul.mubr.bf16.vlgmr.msra.gmra.mrb[0].mxu0 %v278_v53 }
 0x10b   : > { %v361_v55 = vpop.f32.mrb[0].mxu0 }
 0x10c   : > { %v362_v56 = vadd.f32 %v482_v54, %v361_v55  ;;  %v363_v57 = vpop.f32.mrb[1].mxu0 }
 0x10d   : > { %v364_v58 = vpop.f32.mrb[2].mxu0 }
 0x10e   : > { %368 = vst.msk [vmem:[%s255_s11] sm:$0xff] %vm323_vm0, %v362_v56  ;;  %v365_v59 = vadd.f32 %v482_v54, %v364_v58  ;;  %v366_v60 = vpop.f32.mrb[3].mxu0 }
 0x110   : > { %369 = vst.msk [vmem:[%s255_s11 + $0x8] sm:$0xff] %vm323_vm0, %v365_v59 }
 0x111 PF: > { %s14_s17 = sadd.s32 1, %s535_s17   ;;  %s705_s15 = smov %s531_s16 }
 0x112   : > { %p11_p5 = scmp.ge.s32.totalorder %s14_s17, 4   ;;  %s706_s16 = smov %s708_s18 }
 0x114   :  { %13 = sbr.rel (!%p11_p5) target bundleno = 2 (0x2), region = 69 }

// kernel: efficientnet_forward.35
= control target key start
LH: loop header
LB: loop body
LE: loop exit
PB: predicated region body
PF: predicated region fallthrough
CT: control target
= control target key end

     0   :  { %s774_s12 = smov 0   ;;  %s776_s13 = smov 0   ;;  %s1011_s0 = inlined_call_operand.vmem [shape: f32[9,2,16,192], index: 0, kind: input, shape index: {}]   ;;  %s1012_s1 = inlined_call_operand.vmem [shape: f32[9,192], index: 1, kind: input, shape index: {}]   ;;  %s1013_s2 = inlined_call_operand.vmem [shape: f32[1,192], index: 2, kind: input, shape index: {}]   ;;  %s1014_s3 = inlined_call_operand.vmem [shape: f32[2,16,192], index: 3, kind: output, shape index: {}]  }
   0x1   :  { %s778_s14 = smov 0   ;;  %s780_s15 = smov 0  }
   0x2   :  { %s782_s16 = smov 0  }
   0x3 LB: > { %s25_s17 = sadd.s32 1, %s748_s15  ;;  %p41_p1 = scmp.ne.s32.totalorder %s740_s13, %s736_s12  ;;  %s752_s16 = sphi %s782_s16, %s13_s16   ;;  %s748_s15 = sphi %s780_s15, %s1018_s15   ;;  %s744_s14 = sphi %s778_s14, %s1017_s14   ;;  %s740_s13 = sphi %s776_s13, %s1016_s13   ;;  %s736_s12 = sphi %s774_s12, %s1015_s12  }
   0x4   : > { %p27_p0 = scmp.ge.s32.totalorder %s25_s17, 2  ;;  %p42_p2 = scmp.eq.s32.totalorder %s752_s16, 0 }
   0x5   : > { %s34_s19 = sadd.s32 1, %s740_s13  ;;  %p620_p5 = scmp.ge.s32.totalorder %s752_s16, 2 }
   0x6   : > { %s1020_s17 = smov (%p27_p0, %s25_s17), 0  ;;  %p43_p3 = por %p42_p2, %p41_p1 }
   0x7   : > { %s29_s18 = ssub.s32 %s748_s15, %s1020_s17  ;;  %143 = sbr.rel (%p620_p5) target bundleno = 37 (0x25), region = 24 }
   0x8   : > { %p32_p4 = scmp.eq.s32.totalorder %s29_s18, 0 }
   0xa   : > { %s809_s20 = scalar_select %p32_p4, %s740_s13, %s34_s19  }
   0xe   : > { %146 = sbr.rel (!%p43_p3) target bundleno = 37 (0x25), region = 28  ;;  %s148_s21 = sand.u32 (%p43_p3), 1, %s740_s13  }
   0xf   : > { %s662_s22 = sshll.u32 (%p43_p3), %s748_s15, 5  ;;  %s664_s23 = smul.u32 (%p43_p3), 288, %s148_s21 }
  0x10   : > { %s817_s26 = scalar_lea.vmem (%p43_p3), %s1011_s0, %s662_s22 }
  0x11   : > { %v169_v0 = vld [vmem:[%s817_s26] sm:$0xff] (%p43_p3)  ;;  %v171_v1 = vld [vmem:[%s817_s26 + $0x8] sm:$0xff] (%p43_p3)  ;;  %v173_v2 = vld [vmem:[%s817_s26 + $0x10] sm:$0xff] (%p43_p3)  ;;  %s825_s27 = scalar_lea.vmem (%p43_p3), [#allocation2], %s664_s23 }
  0x12   : > { %v175_v3 = vld [vmem:[%s817_s26 + $0x18] sm:$0xff] (%p43_p3)  ;;  %v177_v4 = vld [vmem:[%s817_s26 + $0x40] sm:$0xff] (%p43_p3)  ;;  %v179_v5 = vld [vmem:[%s817_s26 + $0x48] sm:$0xff] (%p43_p3)  ;;  %170 = vst [vmem:[%s825_s27] sm:$0xff] (%p43_p3), %v169_v0 }
  0x13   : > { %172 = vst [vmem:[%s825_s27 + $0x8] sm:$0xff] (%p43_p3), %v171_v1  ;;  %174 = vst [vmem:[%s825_s27 + $0x10] sm:$0xff] (%p43_p3), %v173_v2  ;;  %v181_v6 = vld [vmem:[%s817_s26 + $0x50] sm:$0xff] (%p43_p3)  ;;  %v183_v7 = vld [vmem:[%s817_s26 + $0x58] sm:$0xff] (%p43_p3) }
  0x14   : > { %176 = vst [vmem:[%s825_s27 + $0x18] sm:$0xff] (%p43_p3), %v175_v3  ;;  %178 = vst [vmem:[%s825_s27 + $0x20] sm:$0xff] (%p43_p3), %v177_v4  ;;  %v185_v8 = vld [vmem:[%s817_s26 + $0x80] sm:$0xff] (%p43_p3)  ;;  %v187_v9 = vld [vmem:[%s817_s26 + $0x88] sm:$0xff] (%p43_p3) }
  0x15   : > { %180 = vst [vmem:[%s825_s27 + $0x28] sm:$0xff] %v179_v5  ;;  %182 = vst [vmem:[%s825_s27 + $0x30] sm:$0xff] %v181_v6  ;;  %v189_v10 = vld [vmem:[%s817_s26 + $0x90] sm:$0xff]  ;;  %v191_v11 = vld [vmem:[%s817_s26 + $0x98] sm:$0xff] }
  0x16   : > { %184 = vst [vmem:[%s825_s27 + $0x38] sm:$0xff] %v183_v7  ;;  %186 = vst [vmem:[%s825_s27 + $0x40] sm:$0xff] %v185_v8  ;;  %v193_v12 = vld [vmem:[%s817_s26 + $0xc0] sm:$0xff]  ;;  %v195_v13 = vld [vmem:[%s817_s26 + $0xc8] sm:$0xff] }
  0x17   : > { %188 = vst [vmem:[%s825_s27 + $0x48] sm:$0xff] %v187_v9  ;;  %190 = vst [vmem:[%s825_s27 + $0x50] sm:$0xff] %v189_v10  ;;  %v197_v14 = vld [vmem:[%s817_s26 + $0xd0] sm:$0xff]  ;;  %v199_v15 = vld [vmem:[%s817_s26 + $0xd8] sm:$0xff] }
  0x18   : > { %192 = vst [vmem:[%s825_s27 + $0x58] sm:$0xff] %v191_v11  ;;  %194 = vst [vmem:[%s825_s27 + $0x60] sm:$0xff] %v193_v12  ;;  %v201_v16 = vld [vmem:[%s817_s26 + $0x100] sm:$0xff]  ;;  %v203_v17 = vld [vmem:[%s817_s26 + $0x108] sm:$0xff] }
  0x19   : > { %196 = vst [vmem:[%s825_s27 + $0x68] sm:$0xff] %v195_v13  ;;  %198 = vst [vmem:[%s825_s27 + $0x70] sm:$0xff] %v197_v14  ;;  %v205_v18 = vld [vmem:[%s817_s26 + $0x110] sm:$0xff]  ;;  %v207_v19 = vld [vmem:[%s817_s26 + $0x118] sm:$0xff] }
  0x1a   : > { %200 = vst [vmem:[%s825_s27 + $0x78] sm:$0xff] %v199_v15  ;;  %202 = vst [vmem:[%s825_s27 + $0x80] sm:$0xff] %v201_v16  ;;  %v209_v20 = vld [vmem:[%s817_s26 + $0x140] sm:$0xff]  ;;  %v211_v21 = vld [vmem:[%s817_s26 + $0x148] sm:$0xff] }
  0x1b   : > { %204 = vst [vmem:[%s825_s27 + $0x88] sm:$0xff] %v203_v17  ;;  %206 = vst [vmem:[%s825_s27 + $0x90] sm:$0xff] %v205_v18  ;;  %v213_v22 = vld [vmem:[%s817_s26 + $0x150] sm:$0xff]  ;;  %v215_v23 = vld [vmem:[%s817_s26 + $0x158] sm:$0xff] }
  0x1c   : > { %208 = vst [vmem:[%s825_s27 + $0x98] sm:$0xff] %v207_v19  ;;  %210 = vst [vmem:[%s825_s27 + $0xa0] sm:$0xff] %v209_v20  ;;  %v217_v24 = vld [vmem:[%s817_s26 + $0x180] sm:$0xff]  ;;  %v219_v25 = vld [vmem:[%s817_s26 + $0x188] sm:$0xff] }
  0x1d   : > { %212 = vst [vmem:[%s825_s27 + $0xa8] sm:$0xff] %v211_v21  ;;  %214 = vst [vmem:[%s825_s27 + $0xb0] sm:$0xff] %v213_v22  ;;  %v221_v26 = vld [vmem:[%s817_s26 + $0x190] sm:$0xff]  ;;  %v223_v27 = vld [vmem:[%s817_s26 + $0x198] sm:$0xff] }
  0x1e   : > { %216 = vst [vmem:[%s825_s27 + $0xb8] sm:$0xff] %v215_v23  ;;  %218 = vst [vmem:[%s825_s27 + $0xc0] sm:$0xff] %v217_v24  ;;  %v225_v28 = vld [vmem:[%s817_s26 + $0x1c0] sm:$0xff]  ;;  %v227_v29 = vld [vmem:[%s817_s26 + $0x1c8] sm:$0xff] }
  0x1f   : > { %220 = vst [vmem:[%s825_s27 + $0xc8] sm:$0xff] %v219_v25  ;;  %222 = vst [vmem:[%s825_s27 + $0xd0] sm:$0xff] %v221_v26  ;;  %v229_v30 = vld [vmem:[%s817_s26 + $0x1d0] sm:$0xff]  ;;  %v231_v31 = vld [vmem:[%s817_s26 + $0x1d8] sm:$0xff] }
  0x20   : > { %224 = vst [vmem:[%s825_s27 + $0xd8] sm:$0xff] %v223_v27  ;;  %226 = vst [vmem:[%s825_s27 + $0xe0] sm:$0xff] %v225_v28  ;;  %v233_v32 = vld [vmem:[%s817_s26 + $0x200] sm:$0xff]  ;;  %v235_v33 = vld [vmem:[%s817_s26 + $0x208] sm:$0xff] }
  0x21   : > { %228 = vst [vmem:[%s825_s27 + $0xe8] sm:$0xff] %v227_v29  ;;  %230 = vst [vmem:[%s825_s27 + $0xf0] sm:$0xff] %v229_v30  ;;  %v237_v34 = vld [vmem:[%s817_s26 + $0x210] sm:$0xff]  ;;  %v239_v35 = vld [vmem:[%s817_s26 + $0x218] sm:$0xff] }
  0x22   : > { %232 = vst [vmem:[%s825_s27 + $0xf8] sm:$0xff] %v231_v31  ;;  %234 = vst [vmem:[%s825_s27 + $0x100] sm:$0xff] %v233_v32 }
  0x23   : > { %236 = vst [vmem:[%s825_s27 + $0x108] sm:$0xff] %v235_v33  ;;  %238 = vst [vmem:[%s825_s27 + $0x110] sm:$0xff] %v237_v34 }
  0x24   : > { %240 = vst [vmem:[%s825_s27 + $0x118] sm:$0xff] %v239_v35 }
  0x25 PF: > { %p623_p6 = scmp.ge.s32.totalorder %s752_s16, 1  ;;  %p245_p7 = scmp.lt.s32.totalorder %s752_s16, 3 }
  0x27   : > { %p246_p8 = pnand %p623_p6, %p245_p7 }
  0x28   : > { %s252_s28 = sand.u32 (!%p246_p8), 1, %s736_s12   ;;  %v300_v36 = vlaneseq (!%p246_p8)  ;;  %v292_v38 = vld [vmem:[%s1012_s1] sm:$0xff] (!%p246_p8)  ;;  %v904_v39 = vld [vmem:[%s1012_s1 + $0x8] sm:$0xff] (!%p246_p8)  ;;  %v956_v33 = vld [vmem:[%s1012_s1 + $0x10] ss:$0 sm:$0xff] (!%p246_p8)  ;;  %p282_p9 = scmp.lt.s32.totalorder (!%p246_p8), %s744_s14, 1 }
  0x29   : > { %249 = sbr.rel (%p246_p8) target bundleno = 97 (0x61), region = 51  ;;  %vm517_vm0 = vcmask (!%p246_p8), 523264  }
  0x2a   : > { %s665_s29 = smul.u32 (!%p246_p8), 288, %s252_s28  ;;  %v896_v37 = vshrl.u32 (!%p246_p8), %v300_v36, 7 }
  0x2c   : > { %v907_v40 = vsub.s32 (!%p246_p8), 0, %v896_v37  ;;  %v910_v41 = vsub.s32 (!%p246_p8), 1, %v896_v37  ;;  %s912_s7 = scalar_lea.vmem (!%p246_p8), [#allocation2], %s665_s29  ;;  %v340_v43 = vsub.s32 (!%p246_p8), 2, %v896_v37  ;;  %v361_v44 = vsub.s32 (!%p246_p8), 3, %v896_v37 }
  0x2d   : > { %v296_v42 = vld [vmem:[%s912_s7] sm:$0xff] (!%p246_p8)  ;;  %v382_v45 = vsub.s32 (!%p246_p8), 4, %v896_v37  ;;  %v297_v46 = vld [vmem:[%s912_s7 + $0x8] sm:$0xff] (!%p246_p8)  ;;  %v403_v56 = vsub.s32 (!%p246_p8), 5, %v896_v37  ;;  %v298_v57 = vld [vmem:[%s912_s7 + $0x10] sm:$0xff] (!%p246_p8)  ;;  %v424_v13 = vsub.s32 (!%p246_p8), 6, %v896_v37 }
  0x2e   : > { %v303_v47 = vrot.slane (!%p246_p8), %v292_v38, %v907_v40  ;;  %v307_v48 = vrot.slane (!%p246_p8), %v904_v39, %v907_v40  ;;  %v626_v49 = vld [vmem:[%s912_s7 + $0x20] sm:$0xff] (!%p246_p8)  ;;  %v627_v50 = vld [vmem:[%s912_s7 + $0x28] sm:$0xff] (!%p246_p8)  ;;  %v320_v51 = vrot.slane (!%p246_p8), %v292_v38, %v910_v41  ;;  %v324_v52 = vrot.slane (!%p246_p8), %v904_v39, %v910_v41  ;;  %v299_v58 = vld [vmem:[%s912_s7 + $0x18] sm:$0xff] (!%p246_p8) }
  0x2f   : > { %v630_v53 = vld [vmem:[%s912_s7 + $0x40] sm:$0xff] (!%p246_p8)  ;;  %v341_v54 = vrot.slane (!%p246_p8), %v292_v38, %v340_v43  ;;  %v362_v55 = vrot.slane (!%p246_p8), %v292_v38, %v361_v44  ;;  %v628_v62 = vld [vmem:[%s912_s7 + $0x30] sm:$0xff] (!%p246_p8)  ;;  %v629_v63 = vld [vmem:[%s912_s7 + $0x38] sm:$0xff] (!%p246_p8)  ;;  %v383_v2 = vrot.slane (!%p246_p8), %v292_v38, %v382_v45  ;;  %v935_v5 = vrot.slane (!%p246_p8), %v292_v38, %v403_v56 }
  0x30   : > { %v308_v59 = vmul.f32 %v303_v47, %v296_v42  ;;  %v634_v60 = vld [vmem:[%s912_s7 + $0x60] sm:$0xff]  ;;  %v309_v61 = vmul.f32 %v307_v48, %v297_v46  ;;  %v325_v0 = vmul.f32 %v626_v49, %v320_v51  ;;  %v326_v1 = vmul.f32 %v627_v50, %v324_v52  ;;  %v631_v15 = vld [vmem:[%s912_s7 + $0x48] sm:$0xff]  ;;  %v632_v31 = vld [vmem:[%s912_s7 + $0x50] sm:$0xff]  ;;  %s1022_s14 = smov (!%p282_p9, %s744_s14), 1 }
  0x31   : > { %v346_v3 = vmul.f32 %v630_v53, %v341_v54  ;;  %v638_v4 = vld [vmem:[%s912_s7 + $0x80] sm:$0xff]  ;;  %v310_v6 = vmul.f32 %v303_v47, %v298_v57  ;;  %v311_v7 = vmul.f32 %v307_v48, %v299_v58  ;;  %v367_v9 = vmul.f32 %v634_v60, %v362_v55  ;;  %v635_v20 = vld [vmem:[%s912_s7 + $0x68] sm:$0xff]  ;;  %v636_v32 = vld [vmem:[%s912_s7 + $0x70] sm:$0xff]  ;;  %s663_s19 = sshll.u32 %s1022_s14, 5 }
  0x32   : > { %v329_v8 = vadd.f32 %v325_v0, %v308_v59  ;;  %v642_v10 = vld [vmem:[%s912_s7 + $0xa0] sm:$0xff]  ;;  %v327_v11 = vmul.f32 %v628_v62, %v320_v51  ;;  %v328_v12 = vmul.f32 %v629_v63, %v324_v52  ;;  %v445_v14 = vsub.s32 7, %v896_v37  ;;  %v639_v25 = vld [vmem:[%s912_s7 + $0x88] sm:$0xff]  ;;  %v640_v48 = vld [vmem:[%s912_s7 + $0x90] sm:$0xff]  ;;  %s290_s23 = scalar_lea.vmem %s1014_s3, %s663_s19 }
  0x33   : > { %v330_v16 = vadd.f32 %v326_v1, %v309_v61  ;;  %v388_v18 = vmul.f32 %v638_v4, %v383_v2  ;;  %v345_v19 = vrot.slane %v904_v39, %v340_v43  ;;  %v409_v21 = vmul.f32 %v642_v10, %v935_v5  ;;  %v646_v22 = vld [vmem:[%s912_s7 + $0xc0] sm:$0xff]  ;;  %v643_v37 = vld [vmem:[%s912_s7 + $0xa8] sm:$0xff]  ;;  %v644_v62 = vld [vmem:[%s912_s7 + $0xb0] sm:$0xff] }
  0x34   : > { %v350_v17 = vadd.f32 %v346_v3, %v329_v8  ;;  %v425_v23 = vrot.slane %v292_v38, %v424_v13  ;;  %v366_v24 = vrot.slane %v904_v39, %v361_v44  ;;  %v387_v26 = vrot.slane %v904_v39, %v382_v45  ;;  %v650_v35 = vld [vmem:[%s912_s7 + $0xe0] sm:$0xff]  ;;  %v647_v50 = vld [vmem:[%s912_s7 + $0xc8] sm:$0xff]  ;;  %v637_v63 = vld [vmem:[%s912_s7 + $0x78] sm:$0xff] }
  0x35   : > { %v948_v28 = vrot.slane %v292_v38, %v445_v14  ;;  %v347_v29 = vmul.f32 %v631_v15, %v345_v19  ;;  %v408_v30 = vrot.slane %v904_v39, %v403_v56  ;;  %v331_v34 = vadd.f32 %v327_v11, %v310_v6  ;;  %v654_v44 = vld [vmem:[%s912_s7 + $0x100] sm:$0xff]  ;;  %v633_v56 = vld [vmem:[%s912_s7 + $0x58] sm:$0xff]  ;;  %v651_v61 = vld [vmem:[%s912_s7 + $0xe8] sm:$0xff] }
  0x36   : > { %v371_v27 = vadd.f32 %v367_v9, %v350_v17  ;;  %v368_v36 = vmul.f32 %v635_v20, %v366_v24  ;;  %v429_v38 = vrot.slane %v904_v39, %v424_v13  ;;  %v430_v43 = vmul.f32 %v646_v22, %v425_v23  ;;  %v480_v45 = vld [vmem:[%s1013_s2] sm:$0x3]  ;;  %v659_v4 = vld [vmem:[%s1012_s1 + $0x18] ss:$0 sm:$0xff]  ;;  %v655_v8 = vld [vmem:[%s912_s7 + $0x108] sm:$0xff] }
  0x37   : > { %v351_v46 = vadd.f32 %v347_v29, %v330_v16  ;;  %v389_v47 = vmul.f32 %v639_v25, %v387_v26  ;;  %v332_v49 = vadd.f32 %v328_v12, %v311_v7  ;;  %v450_v51 = vrot.slane %v904_v39, %v445_v14  ;;  %v648_v9 = vld [vmem:[%s912_s7 + $0xd0] sm:$0xff]  ;;  %v649_v25 = vld [vmem:[%s912_s7 + $0xd8] sm:$0xff] }
  0x38   : > { %v392_v42 = vadd.f32 %v388_v18, %v371_v27  ;;  %v348_v52 = vmul.f32 %v632_v31, %v341_v54  ;;  %v369_v53 = vmul.f32 %v636_v32, %v362_v55  ;;  %v451_v58 = vmul.f32 %v650_v35, %v948_v28  ;;  %v641_v54 = vld [vmem:[%s912_s7 + $0x98] sm:$0xff]  ;;  %v652_v16 = vld [vmem:[%s912_s7 + $0xf0] sm:$0xff] }
  0x39   : > { %v372_v59 = vadd.f32 %v368_v36, %v351_v46  ;;  %v410_v60 = vmul.f32 %v643_v37, %v408_v30  ;;  %v472_v0 = vmul.f32 %v956_v33, %v654_v44  ;;  %v485_v1 = vrot.slane %v480_v45, %v907_v40  ;;  %v656_v29 = vld [vmem:[%s912_s7 + $0x110] sm:$0xff]  ;;  %v653_v35 = vld [vmem:[%s912_s7 + $0xf8] sm:$0xff] }
  0x3a   : > { %v413_v57 = vadd.f32 %v409_v21, %v392_v42  ;;  %v352_v3 = vadd.f32 %v348_v52, %v331_v34  ;;  %v390_v39 = vmul.f32 %v640_v48, %v383_v2  ;;  %v431_v7 = vmul.f32 %v647_v50, %v429_v38  ;;  %v645_v2 = vld [vmem:[%s912_s7 + $0xb8] sm:$0xff] }
  0x3b   : > { %v393_v6 = vadd.f32 %v389_v47, %v372_v59  ;;  %v349_v10 = vmul.f32 %v633_v56, %v345_v19  ;;  %v452_v11 = vmul.f32 %v651_v61, %v450_v51  ;;  %v411_v40 = vmul.f32 %v644_v62, %v935_v5  ;;  %v657_v44 = vld [vmem:[%s912_s7 + $0x118] sm:$0xff] }
  0x3c   : > { %v434_v55 = vadd.f32 %v430_v43, %v413_v57  ;;  %v373_v12 = vadd.f32 %v369_v53, %v352_v3  ;;  %v370_v13 = vmul.f32 %v637_v63, %v366_v24  ;;  %v391_v18 = vmul.f32 %v641_v54, %v387_v26 }
  0x3d   : > { %v414_v15 = vadd.f32 %v410_v60, %v393_v6  ;;  %v353_v17 = vadd.f32 %v349_v10, %v332_v49  ;;  %v473_v20 = vmul.f32 %v659_v4, %v655_v8  ;;  %v432_v22 = vmul.f32 %v648_v9, %v425_v23 }
  0x3e   : > { %v455_v14 = vadd.f32 %v451_v58, %v434_v55  ;;  %v394_v21 = vadd.f32 %v390_v39, %v373_v12  ;;  %v412_v32 = vmul.f32 %v645_v2, %v408_v30  ;;  %v489_v5 = vrot.slane %v480_v45, %v910_v41 }
  0x3f   : > { %v435_v19 = vadd.f32 %v431_v7, %v414_v15  ;;  %v374_v31 = vadd.f32 %v370_v13, %v353_v17  ;;  %v453_v34 = vmul.f32 %v652_v16, %v948_v28  ;;  %v433_v26 = vmul.f32 %v649_v25, %v429_v38 }
  0x40   : > { %v476_v27 = vadd.f32 %v472_v0, %v455_v14  ;;  %v415_v24 = vadd.f32 %v411_v40, %v394_v21  ;;  %v474_v23 = vmul.f32 %v956_v33, %v656_v29  ;;  %v454_v30 = vmul.f32 %v653_v35, %v450_v51 }
  0x41   : > { %v456_v37 = vadd.f32 %v452_v11, %v435_v19  ;;  %v395_v42 = vadd.f32 %v391_v18, %v374_v31  ;;  %v475_v28 = vmul.f32 %v659_v4, %v657_v44 }
  0x42   : > { %v492_v36 = vadd.f32 %v485_v1, %v476_v27  ;;  %v436_v43 = vadd.f32 %v432_v22, %v415_v24 }
  0x43   : > { %v477_v47 = vadd.f32 %v473_v20, %v456_v37  ;;  %v416_v48 = vadd.f32 %v412_v32, %v395_v42 }
  0x44   : > { %v496_v46 = vmul.f32 0.5, %v492_v36  ;;  %v457_v49 = vadd.f32 %v453_v34, %v436_v43 }
  0x45   : > { %v493_v41 = vadd.f32 %v489_v5, %v477_v47  ;;  %v437_v45 = vadd.f32 %v433_v26, %v416_v48 }
  0x46   : > { %706 = vtanh.f32 %v496_v46  ;;  %v478_v50 = vadd.f32 %v474_v23, %v457_v49 }
  0x47   : > { %v497_v52 = vmul.f32 0.5, %v493_v41  ;;  %v458_v53 = vadd.f32 %v454_v30, %v437_v45 }
  0x48   : > { %v494_v38 = vadd.f32 %v485_v1, %v478_v50 }
  0x49   : > { %708 = vtanh.f32 %v497_v52  ;;  %v479_v56 = vadd.f32 %v475_v28, %v458_v53 }
  0x4a   : > { %v498_v57 = vmul.f32 0.5, %v494_v38 }
  0x4b   : > { %v495_v33 = vadd.f32 %v489_v5, %v479_v56 }
  0x4c   : > { %710 = vtanh.f32 %v498_v57 }
  0x4d   : > { %v499_v58 = vmul.f32 0.5, %v495_v33 }
  0x4f   : > { %712 = vtanh.f32 %v499_v58 }
  0x50   : > { %v707_v59 = vpop.eup %706 }
  0x51   : > { %v504_v51 = vadd.f32 1.0, %v707_v59 }
  0x53   : > { %v508_v60 = vmul.f32 0.5, %v504_v51  ;;  %v709_v61 = vpop.eup %708 }
  0x54   : > { %v505_v63 = vadd.f32 1.0, %v709_v61 }
  0x55   : > { %v512_v62 = vmul.f32 %v508_v60, %v492_v36 }
  0x56   : > { %v711_v0 = vpop.eup %710  ;;  %v509_v1 = vmul.f32 0.5, %v505_v63 }
  0x57   : > { %516 = vst [vmem:[%s290_s23] sm:$0xff] %v512_v62  ;;  %v506_v3 = vadd.f32 1.0, %v711_v0 }
  0x58   : > { %v513_v39 = vmul.f32 %v509_v1, %v493_v41 }
  0x59   : > { %v713_v54 = vpop.eup %712  ;;  %v510_v55 = vmul.f32 0.5, %v506_v3 }
  0x5a   : > { %518 = vst.msk [vmem:[%s290_s23 + $0x8] sm:$0xff] %vm517_vm0, %v513_v39  ;;  %v507_v4 = vadd.f32 1.0, %v713_v54 }
  0x5b   : > { %v514_v6 = vmul.f32 %v510_v55, %v494_v38 }
  0x5c   : > { %v511_v7 = vmul.f32 0.5, %v507_v4 }
  0x5d   : > { %519 = vst [vmem:[%s290_s23 + $0x10] sm:$0xff] %v514_v6 }
  0x5e   : > { %v515_v8 = vmul.f32 %v511_v7, %v495_v33 }
  0x60   : > { %520 = vst.msk [vmem:[%s290_s23 + $0x18] sm:$0xff] %vm517_vm0, %v515_v8 }
  0x61 PF: > { %s13_s16 = sadd.s32 1, %s752_s16   ;;  %s1015_s12 = smov %s740_s13 }
  0x62   : > { %p10_p10 = scmp.ge.s32.totalorder %s13_s16, 4   ;;  %s1016_s13 = smov %s809_s20 }
  0x63   : > { %s1017_s14 = smov %s748_s15  ;;  %s1018_s15 = smov %s1020_s17 }
  0x64   :  { %12 = sbr.rel (!%p10_p10) target bundleno = 3 (0x3), region = 98 }

// kernel: efficientnet_forward.38
= control target key start
LH: loop header
LB: loop body
LE: loop exit
PB: predicated region body
PF: predicated region fallthrough
CT: control target
= control target key end

     0   :  { %s603_s12 = smov 0   ;;  %s605_s13 = smov 0   ;;  %s719_s0 = inlined_call_operand.vmem [shape: f32[2,16,64], index: 0, kind: input, shape index: {}]   ;;  %s720_s1 = inlined_call_operand.vmem [shape: f32[64,384], index: 1, kind: input, shape index: {}]   ;;  %s721_s2 = inlined_call_operand.vmem [shape: f32[1,384], index: 2, kind: input, shape index: {}]   ;;  %s722_s3 = inlined_call_operand.vmem [shape: f32[2,16,384], index: 3, kind: output, shape index: {}]  }
   0x1   :  { %s607_s14 = smov 0  }
   0x2 LB: > { %s25_s15 = sadd.s32 1, %s574_s13  ;;  %p490_p0 = scmp.ge.s32.totalorder %s578_s14, 1  ;;  %s578_s14 = sphi %s607_s14, %s13_s14   ;;  %s574_s13 = sphi %s605_s13, %s724_s13   ;;  %s570_s12 = sphi %s603_s12, %s723_s12  }
   0x3   : > { %p27_p1 = scmp.ge.s32.totalorder %s25_s15, 2  ;;  %p158_p2 = scmp.lt.s32.totalorder %s578_s14, 3 }
   0x5   : > { %s726_s15 = smov (%p27_p1, %s25_s15), 0  ;;  %p159_p3 = pnand %p490_p0, %p158_p2 }
   0x6   : > { %v217_v0 = vld [vmem:[%s720_s1 + $0x8] sm:$0xff] (!%p159_p3)  ;;  %v220_v1 = vld [vmem:[%s720_s1 + $0x20] sm:$0xff] (!%p159_p3)  ;;  %v218_v2 = vld [vmem:[%s720_s1 + $0x10] sm:$0xff] (!%p159_p3)  ;;  %v580_v3 = vmov (!%p159_p3), 0.0   ;;  %vm581_vm0 = vmmov (!%p159_p3), 0   ;;  %p192_p4 = scmp.lt.s32.totalorder (!%p159_p3), %s570_s12, 1  ;;  %v254_v41 = vlaneseq (!%p159_p3) }
   0x7   : > { %162 = sbr.rel (%p159_p3) target bundleno = 264 (0x108), region = 32  ;;  %504 = vmatprep.subr.bf16.mxu1 (!%p159_p3), %v580_v3  ;;  %v241_v4 = vpack.c.bf16 (!%p159_p3), %v220_v1, %v217_v0  ;;  %v221_v5 = vld [vmem:[%s720_s1 + $0x28] sm:$0xff] (!%p159_p3)  ;;  %v216_v6 = vld [vmem:[%s720_s1] sm:$0xff] (!%p159_p3)  ;;  %v219_v7 = vld [vmem:[%s720_s1 + $0x18] sm:$0xff] (!%p159_p3)  ;;  %512 = vmatprep.mubr.msk.bf16.mxu1 (!%p159_p3), %vm581_vm0, %v580_v3  ;;  %v582_v13 = vmov (!%p159_p3), 0   ;;  %vm269_vm1 = vcmask (!%p159_p3), 523264  }
   0x8   : > { %v242_v8 = vpack.c.bf16 (!%p159_p3), %v221_v5, %v218_v2  ;;  %v240_v9 = vpack.c.bf16 (!%p159_p3), %v219_v7, %v216_v6  ;;  %v223_v10 = vld [vmem:[%s720_s1 + $0x38] sm:$0xff] (!%p159_p3)  ;;  %v226_v11 = vld [vmem:[%s720_s1 + $0x50] sm:$0xff] (!%p159_p3)  ;;  %v224_v12 = vld [vmem:[%s720_s1 + $0x40] sm:$0xff] (!%p159_p3)  ;;  %305 = vmatprep.mubr.bf16.mxu0 (!%p159_p3), %v582_v13  ;;  %v255_v42 = vshrl.u32 (!%p159_p3), %v254_v41, 7 }
   0x9   : > { %273 = vmatprep.subr.bf16.mxu0 (!%p159_p3), %v241_v4  ;;  %v244_v14 = vpack.c.bf16 (!%p159_p3), %v226_v11, %v223_v10  ;;  %v227_v15 = vld [vmem:[%s720_s1 + $0x58] sm:$0xff] (!%p159_p3)  ;;  %v222_v16 = vld [vmem:[%s720_s1 + $0x30] sm:$0xff] (!%p159_p3)  ;;  %v225_v17 = vld [vmem:[%s720_s1 + $0x48] sm:$0xff] (!%p159_p3) }
   0xa   : > { %505 = vmatpush3.bf16.msra.mxu1 (!%p159_p3), %v242_v8  ;;  %274 = vmatpush1.bf16.msra.mxu0 (!%p159_p3), %v240_v9  ;;  %v245_v18 = vpack.c.bf16 (!%p159_p3), %v227_v15, %v224_v12  ;;  %v243_v19 = vpack.c.bf16 (!%p159_p3), %v225_v17, %v222_v16  ;;  %v229_v20 = vld [vmem:[%s720_s1 + $0x68] sm:$0xff] (!%p159_p3)  ;;  %v232_v21 = vld [vmem:[%s720_s1 + $0x80] sm:$0xff] (!%p159_p3)  ;;  %v230_v22 = vld [vmem:[%s720_s1 + $0x70] sm:$0xff] (!%p159_p3)  ;;  %v264_v43 = vsub.s32 (!%p159_p3), 2, %v255_v42  ;;  %v256_v44 = vsub.s32 (!%p159_p3), 0, %v255_v42 }
   0xb   : > { %506 = vmatprep.subr.bf16.mxu1 (!%p159_p3), %v580_v3  ;;  %275 = vmatprep.subr.bf16.mxu0 (!%p159_p3), %v244_v14  ;;  %v247_v23 = vpack.c.bf16 (!%p159_p3), %v232_v21, %v229_v20  ;;  %v233_v24 = vld [vmem:[%s720_s1 + $0x88] sm:$0xff] (!%p159_p3)  ;;  %v228_v25 = vld [vmem:[%s720_s1 + $0x60] sm:$0xff] (!%p159_p3)  ;;  %v231_v26 = vld [vmem:[%s720_s1 + $0x78] sm:$0xff] (!%p159_p3)  ;;  %v260_v46 = vsub.s32 (!%p159_p3), 1, %v255_v42 }
   0xc   : > { %v235_v27 = vld [vmem:[%s720_s1 + $0x98] sm:$0xff] (!%p159_p3)  ;;  %v238_v28 = vld [vmem:[%s720_s1 + $0xb0] sm:$0xff] (!%p159_p3)  ;;  %v248_v29 = vpack.c.bf16 (!%p159_p3), %v233_v24, %v230_v22  ;;  %v246_v30 = vpack.c.bf16 (!%p159_p3), %v231_v26, %v228_v25  ;;  %v236_v31 = vld [vmem:[%s720_s1 + $0xa0] sm:$0xff] (!%p159_p3) }
   0xd   : > { %v250_v32 = vpack.c.bf16 (!%p159_p3), %v238_v28, %v235_v27  ;;  %v239_v33 = vld [vmem:[%s720_s1 + $0xb8] sm:$0xff] (!%p159_p3)  ;;  %v234_v34 = vld [vmem:[%s720_s1 + $0x90] sm:$0xff] (!%p159_p3)  ;;  %v237_v35 = vld [vmem:[%s720_s1 + $0xa8] sm:$0xff] (!%p159_p3) }
   0xe   : > { %s728_s12 = smov (!%p192_p4, %s570_s12), 1  ;;  %507 = vmatpush3.bf16.msra.mxu1 %v245_v18  ;;  %276 = vmatpush1.bf16.msra.mxu0 %v243_v19  ;;  %v251_v36 = vpack.c.bf16 %v239_v33, %v236_v31  ;;  %v249_v37 = vpack.c.bf16 %v237_v35, %v234_v34  ;;  %v252_v45 = vld [vmem:[%s721_s2] sm:$0x7] }
   0xf   : > { %s498_s6 = sshll.u32 %s728_s12, 4  ;;  %508 = vmatprep.subr.bf16.mxu1 %v580_v3  ;;  %277 = vmatprep.subr.bf16.mxu0 %v247_v23  ;;  %v265_v47 = vrot.slane %v252_v45, %v264_v43  ;;  %v257_v48 = vrot.slane %v252_v45, %v256_v44  ;;  %v261_v49 = vrot.slane %v252_v45, %v260_v46  ;;  %s516_s24 = smul.u32 48, %s728_s12 }
  0x10   : > { %s199_s21 = scalar_lea.vmem %s719_s0, %s498_s6 }
  0x11   : > { %v213_v38 = vld [vmem:[%s199_s21] sm:$0xff]  ;;  %v214_v39 = vld [vmem:[%s199_s21 + $0x8] sm:$0xff]  ;;  %s210_s27 = scalar_lea.vmem %s722_s3, %s516_s24 }
  0x12   : > { %509 = vmatpush3.bf16.msra.mxu1 %v248_v29  ;;  %278 = vmatpush1.bf16.msra.mxu0 %v246_v30  ;;  %v215_v40 = vpack.c.bf16 %v214_v39, %v213_v38 }
  0x13   : > { %510 = vmatprep.subr.bf16.mxu1 %v580_v3  ;;  %279 = vmatprep.subr.bf16.mxu0 %v250_v32 }
  0x16   : > { %511 = vmatpush3.bf16.msra.mxu1 %v251_v36  ;;  %280 = vmatpush1.bf16.msra.mxu0 %v249_v37 }
  0x19   : > { %513 = vmatmul.mubr.msk.bf16.vlgmr.msra.gmra.mrb[0].mxu1 %vm269_vm1, %v215_v40  ;;  %494 = vmatmul.mubr.msk.bf16.vlgmr.msra.gmra.mrb[0].mxu0 %vm269_vm1, %v215_v40 }
  0xec   : > { %v350_v50 = vpop.f32.mrb[0].mxu1  ;;  %v307_v51 = vpop.f32.mrb[0].mxu0 }
  0xed   : > { %v351_v52 = vadd.f32 %v350_v50, %v265_v47  ;;  %v308_v53 = vadd.f32 %v307_v51, %v257_v48  ;;  %v514_v54 = vpop.f32.mrb[1].mxu1  ;;  %v309_v55 = vpop.f32.mrb[1].mxu0 }
  0xee   : > { %v310_v56 = vadd.f32 %v309_v55, %v261_v49  ;;  %v353_v57 = vpop.f32.mrb[2].mxu1  ;;  %v311_v58 = vpop.f32.mrb[2].mxu0 }
  0xef   : > { %v359_v59 = vmul.f32 0.5, %v351_v52  ;;  %v357_v60 = vmul.f32 0.5, %v308_v53  ;;  %v354_v61 = vadd.f32 %v353_v57, %v265_v47  ;;  %v312_v62 = vadd.f32 %v311_v58, %v257_v48  ;;  %v515_v63 = vpop.f32.mrb[3].mxu1  ;;  %v313_v0 = vpop.f32.mrb[3].mxu0 }
  0xf0   : > { %v358_v1 = vmul.f32 0.5, %v310_v56  ;;  %v314_v2 = vadd.f32 %v313_v0, %v261_v49 }
  0xf1   : > { %544 = vtanh.f32 %v359_v59  ;;  %v362_v3 = vmul.f32 0.5, %v354_v61  ;;  %v360_v4 = vmul.f32 0.5, %v312_v62 }
  0xf2   : > { %546 = vtanh.f32 %v357_v60  ;;  %v361_v5 = vmul.f32 0.5, %v314_v2 }
  0xf3   : > { %548 = vtanh.f32 %v358_v1 }
  0xf4   : > { %550 = vtanh.f32 %v362_v3 }
  0xf5   : > { %552 = vtanh.f32 %v360_v4 }
  0xf6   : > { %554 = vtanh.f32 %v361_v5 }
  0xfb   : > { %v545_v6 = vpop.eup %544 }
  0xfc   : > { %v547_v7 = vpop.eup %546  ;;  %v371_v8 = vadd.f32 1.0, %v545_v6 }
  0xfd   : > { %v549_v9 = vpop.eup %548  ;;  %v369_v10 = vadd.f32 1.0, %v547_v7 }
  0xfe   : > { %v551_v11 = vpop.eup %550  ;;  %v377_v12 = vmul.f32 0.5, %v371_v8  ;;  %v370_v13 = vadd.f32 1.0, %v549_v9 }
  0xff   : > { %v553_v14 = vpop.eup %552  ;;  %v375_v15 = vmul.f32 0.5, %v369_v10  ;;  %v374_v16 = vadd.f32 1.0, %v551_v11 }
 0x100   : > { %v555_v17 = vpop.eup %554  ;;  %v383_v18 = vmul.f32 %v377_v12, %v351_v52  ;;  %v376_v19 = vmul.f32 0.5, %v370_v13  ;;  %v372_v20 = vadd.f32 1.0, %v553_v14 }
 0x101   : > { %v381_v21 = vmul.f32 %v375_v15, %v308_v53  ;;  %v380_v22 = vmul.f32 0.5, %v374_v16  ;;  %v373_v23 = vadd.f32 1.0, %v555_v17 }
 0x102   : > { %389 = vst [vmem:[%s210_s27 + $0x10] sm:$0xff] %v383_v18  ;;  %v382_v24 = vmul.f32 %v376_v19, %v310_v56  ;;  %v378_v25 = vmul.f32 0.5, %v372_v20 }
 0x103   : > { %387 = vst [vmem:[%s210_s27] sm:$0xff] %v381_v21  ;;  %v386_v26 = vmul.f32 %v380_v22, %v354_v61  ;;  %v379_v27 = vmul.f32 0.5, %v373_v23 }
 0x104   : > { %388 = vst [vmem:[%s210_s27 + $0x8] sm:$0xff] %v382_v24  ;;  %v384_v28 = vmul.f32 %v378_v25, %v312_v62 }
 0x105   : > { %392 = vst [vmem:[%s210_s27 + $0x28] sm:$0xff] %v386_v26  ;;  %v385_v29 = vmul.f32 %v379_v27, %v314_v2 }
 0x106   : > { %390 = vst [vmem:[%s210_s27 + $0x18] sm:$0xff] %v384_v28 }
 0x107   : > { %391 = vst [vmem:[%s210_s27 + $0x20] sm:$0xff] %v385_v29 }
 0x108 PF: > { %s13_s14 = sadd.s32 1, %s578_s14   ;;  %s723_s12 = smov %s574_s13 }
 0x109   : > { %p10_p5 = scmp.ge.s32.totalorder %s13_s14, 4   ;;  %s724_s13 = smov %s726_s15 }
 0x10b   :  { %12 = sbr.rel (!%p10_p5) target bundleno = 2 (0x2), region = 62 }

// kernel: efficientnet_forward.39
= control target key start
LH: loop header
LB: loop body
LE: loop exit
PB: predicated region body
PF: predicated region fallthrough
CT: control target
= control target key end

     0   :  { %s937_s12 = smov 0   ;;  %s939_s13 = smov 0   ;;  %s1388_s0 = inlined_call_operand.vmem [shape: f32[9,2,16,384], index: 0, kind: input, shape index: {}]   ;;  %s1389_s1 = inlined_call_operand.vmem [shape: f32[9,384], index: 1, kind: input, shape index: {}]   ;;  %s1390_s2 = inlined_call_operand.vmem [shape: f32[1,384], index: 2, kind: input, shape index: {}]   ;;  %s1391_s3 = inlined_call_operand.vmem [shape: f32[2,16,384], index: 3, kind: output, shape index: {}]  }
   0x1   :  { %s941_s14 = smov 0   ;;  %s943_s15 = smov 0  }
   0x2   :  { %s945_s16 = smov 0  }
   0x3 LB: > { %s25_s17 = sadd.s32 1, %s911_s15  ;;  %p41_p1 = scmp.ne.s32.totalorder %s903_s13, %s899_s12  ;;  %s915_s16 = sphi %s945_s16, %s13_s16   ;;  %s911_s15 = sphi %s943_s15, %s1395_s15   ;;  %s907_s14 = sphi %s941_s14, %s1394_s14   ;;  %s903_s13 = sphi %s939_s13, %s1393_s13   ;;  %s899_s12 = sphi %s937_s12, %s1392_s12  }
   0x4   : > { %p27_p0 = scmp.ge.s32.totalorder %s25_s17, 2  ;;  %p42_p2 = scmp.eq.s32.totalorder %s915_s16, 0 }
   0x5   : > { %s34_s19 = sadd.s32 1, %s903_s13  ;;  %p764_p5 = scmp.ge.s32.totalorder %s915_s16, 2 }
   0x6   : > { %s1397_s17 = smov (%p27_p0, %s25_s17), 0  ;;  %p43_p3 = por %p42_p2, %p41_p1 }
   0x7   : > { %s29_s18 = ssub.s32 %s911_s15, %s1397_s17  ;;  %143 = sbr.rel (%p764_p5) target bundleno = 46 (0x2e), region = 24 }
   0x8   : > { %p32_p4 = scmp.eq.s32.totalorder %s29_s18, 0 }
   0xa   : > { %s972_s20 = scalar_select %p32_p4, %s903_s13, %s34_s19  }
   0xe   : > { %146 = sbr.rel (!%p43_p3) target bundleno = 46 (0x2e), region = 28  ;;  %s148_s21 = sand.u32 (%p43_p3), 1, %s903_s13  }
   0xf   : > { %s822_s22 = smul.u32 (%p43_p3), 48, %s911_s15 }
  0x10   : > { %s821_s23 = smul.u32 (%p43_p3), 432, %s148_s21 }
  0x11   : > { %s980_s26 = scalar_lea.vmem (%p43_p3), %s1388_s0, %s822_s22 }
  0x12   : > { %v169_v0 = vld [vmem:[%s980_s26] sm:$0xff] (%p43_p3)  ;;  %v171_v1 = vld [vmem:[%s980_s26 + $0x8] sm:$0xff] (%p43_p3)  ;;  %v173_v2 = vld [vmem:[%s980_s26 + $0x10] sm:$0xff] (%p43_p3)  ;;  %s985_s27 = scalar_lea.vmem (%p43_p3), [#allocation2], %s821_s23 }
  0x13   : > { %170 = vst [vmem:[%s985_s27] sm:$0xff] (%p43_p3), %v169_v0  ;;  %172 = vst [vmem:[%s985_s27 + $0x8] sm:$0xff] (%p43_p3), %v171_v1  ;;  %v175_v3 = vld [vmem:[%s980_s26 + $0x18] sm:$0xff] (%p43_p3)  ;;  %v177_v4 = vld [vmem:[%s980_s26 + $0x20] sm:$0xff] (%p43_p3) }
  0x14   : > { %174 = vst [vmem:[%s985_s27 + $0x10] sm:$0xff] (%p43_p3), %v173_v2  ;;  %v179_v5 = vld [vmem:[%s980_s26 + $0x28] sm:$0xff] (%p43_p3)  ;;  %176 = vst [vmem:[%s985_s27 + $0x18] sm:$0xff] (%p43_p3), %v175_v3  ;;  %v181_v6 = vld [vmem:[%s980_s26 + $0x60] sm:$0xff] (%p43_p3) }
  0x15   : > { %178 = vst [vmem:[%s985_s27 + $0x20] sm:$0xff] %v177_v4  ;;  %180 = vst [vmem:[%s985_s27 + $0x28] sm:$0xff] %v179_v5  ;;  %v183_v7 = vld [vmem:[%s980_s26 + $0x68] sm:$0xff]  ;;  %v185_v8 = vld [vmem:[%s980_s26 + $0x70] sm:$0xff] }
  0x16   : > { %182 = vst [vmem:[%s985_s27 + $0x30] sm:$0xff] %v181_v6  ;;  %184 = vst [vmem:[%s985_s27 + $0x38] sm:$0xff] %v183_v7  ;;  %v187_v9 = vld [vmem:[%s980_s26 + $0x78] sm:$0xff]  ;;  %v189_v10 = vld [vmem:[%s980_s26 + $0x80] sm:$0xff] }
  0x17   : > { %186 = vst [vmem:[%s985_s27 + $0x40] sm:$0xff] %v185_v8  ;;  %v191_v11 = vld [vmem:[%s980_s26 + $0x88] sm:$0xff]  ;;  %188 = vst [vmem:[%s985_s27 + $0x48] sm:$0xff] %v187_v9  ;;  %v193_v12 = vld [vmem:[%s980_s26 + $0xc0] sm:$0xff] }
  0x18   : > { %190 = vst [vmem:[%s985_s27 + $0x50] sm:$0xff] %v189_v10  ;;  %192 = vst [vmem:[%s985_s27 + $0x58] sm:$0xff] %v191_v11  ;;  %v195_v13 = vld [vmem:[%s980_s26 + $0xc8] sm:$0xff]  ;;  %v197_v14 = vld [vmem:[%s980_s26 + $0xd0] sm:$0xff] }
  0x19   : > { %194 = vst [vmem:[%s985_s27 + $0x60] sm:$0xff] %v193_v12  ;;  %196 = vst [vmem:[%s985_s27 + $0x68] sm:$0xff] %v195_v13  ;;  %v199_v15 = vld [vmem:[%s980_s26 + $0xd8] sm:$0xff]  ;;  %v201_v16 = vld [vmem:[%s980_s26 + $0xe0] sm:$0xff] }
  0x1a   : > { %198 = vst [vmem:[%s985_s27 + $0x70] sm:$0xff] %v197_v14  ;;  %v203_v17 = vld [vmem:[%s980_s26 + $0xe8] sm:$0xff]  ;;  %200 = vst [vmem:[%s985_s27 + $0x78] sm:$0xff] %v199_v15  ;;  %v205_v18 = vld [vmem:[%s980_s26 + $0x120] sm:$0xff] }
  0x1b   : > { %202 = vst [vmem:[%s985_s27 + $0x80] sm:$0xff] %v201_v16  ;;  %204 = vst [vmem:[%s985_s27 + $0x88] sm:$0xff] %v203_v17  ;;  %v207_v19 = vld [vmem:[%s980_s26 + $0x128] sm:$0xff]  ;;  %v209_v20 = vld [vmem:[%s980_s26 + $0x130] sm:$0xff] }
  0x1c   : > { %206 = vst [vmem:[%s985_s27 + $0x90] sm:$0xff] %v205_v18  ;;  %208 = vst [vmem:[%s985_s27 + $0x98] sm:$0xff] %v207_v19  ;;  %v211_v21 = vld [vmem:[%s980_s26 + $0x138] sm:$0xff]  ;;  %v213_v22 = vld [vmem:[%s980_s26 + $0x140] sm:$0xff] }
  0x1d   : > { %210 = vst [vmem:[%s985_s27 + $0xa0] sm:$0xff] %v209_v20  ;;  %v215_v23 = vld [vmem:[%s980_s26 + $0x148] sm:$0xff]  ;;  %212 = vst [vmem:[%s985_s27 + $0xa8] sm:$0xff] %v211_v21  ;;  %v217_v24 = vld [vmem:[%s980_s26 + $0x180] sm:$0xff] }
  0x1e   : > { %214 = vst [vmem:[%s985_s27 + $0xb0] sm:$0xff] %v213_v22  ;;  %216 = vst [vmem:[%s985_s27 + $0xb8] sm:$0xff] %v215_v23  ;;  %v219_v25 = vld [vmem:[%s980_s26 + $0x188] sm:$0xff]  ;;  %v221_v26 = vld [vmem:[%s980_s26 + $0x190] sm:$0xff] }
  0x1f   : > { %218 = vst [vmem:[%s985_s27 + $0xc0] sm:$0xff] %v217_v24  ;;  %220 = vst [vmem:[%s985_s27 + $0xc8] sm:$0xff] %v219_v25  ;;  %v223_v27 = vld [vmem:[%s980_s26 + $0x198] sm:$0xff]  ;;  %v225_v28 = vld [vmem:[%s980_s26 + $0x1a0] sm:$0xff] }
  0x20   : > { %222 = vst [vmem:[%s985_s27 + $0xd0] sm:$0xff] %v221_v26  ;;  %v227_v29 = vld [vmem:[%s980_s26 + $0x1a8] sm:$0xff]  ;;  %224 = vst [vmem:[%s985_s27 + $0xd8] sm:$0xff] %v223_v27  ;;  %v229_v30 = vld [vmem:[%s980_s26 + $0x1e0] sm:$0xff] }
  0x21   : > { %226 = vst [vmem:[%s985_s27 + $0xe0] sm:$0xff] %v225_v28  ;;  %228 = vst [vmem:[%s985_s27 + $0xe8] sm:$0xff] %v227_v29  ;;  %v231_v31 = vld [vmem:[%s980_s26 + $0x1e8] sm:$0xff]  ;;  %v233_v32 = vld [vmem:[%s980_s26 + $0x1f0] sm:$0xff] }
  0x22   : > { %230 = vst [vmem:[%s985_s27 + $0xf0] sm:$0xff] %v229_v30  ;;  %232 = vst [vmem:[%s985_s27 + $0xf8] sm:$0xff] %v231_v31  ;;  %v235_v33 = vld [vmem:[%s980_s26 + $0x1f8] sm:$0xff]  ;;  %v237_v34 = vld [vmem:[%s980_s26 + $0x200] sm:$0xff] }
  0x23   : > { %234 = vst [vmem:[%s985_s27 + $0x100] sm:$0xff] %v233_v32  ;;  %v239_v35 = vld [vmem:[%s980_s26 + $0x208] sm:$0xff]  ;;  %236 = vst [vmem:[%s985_s27 + $0x108] sm:$0xff] %v235_v33  ;;  %v241_v36 = vld [vmem:[%s980_s26 + $0x240] sm:$0xff] }
  0x24   : > { %238 = vst [vmem:[%s985_s27 + $0x110] sm:$0xff] %v237_v34  ;;  %240 = vst [vmem:[%s985_s27 + $0x118] sm:$0xff] %v239_v35  ;;  %v243_v37 = vld [vmem:[%s980_s26 + $0x248] sm:$0xff]  ;;  %v245_v38 = vld [vmem:[%s980_s26 + $0x250] sm:$0xff] }
  0x25   : > { %242 = vst [vmem:[%s985_s27 + $0x120] sm:$0xff] %v241_v36  ;;  %244 = vst [vmem:[%s985_s27 + $0x128] sm:$0xff] %v243_v37  ;;  %v247_v39 = vld [vmem:[%s980_s26 + $0x258] sm:$0xff]  ;;  %v249_v40 = vld [vmem:[%s980_s26 + $0x260] sm:$0xff] }
  0x26   : > { %246 = vst [vmem:[%s985_s27 + $0x130] sm:$0xff] %v245_v38  ;;  %v251_v41 = vld [vmem:[%s980_s26 + $0x268] sm:$0xff]  ;;  %248 = vst [vmem:[%s985_s27 + $0x138] sm:$0xff] %v247_v39  ;;  %v253_v42 = vld [vmem:[%s980_s26 + $0x2a0] sm:$0xff] }
  0x27   : > { %250 = vst [vmem:[%s985_s27 + $0x140] sm:$0xff] %v249_v40  ;;  %252 = vst [vmem:[%s985_s27 + $0x148] sm:$0xff] %v251_v41  ;;  %v255_v43 = vld [vmem:[%s980_s26 + $0x2a8] sm:$0xff]  ;;  %v257_v44 = vld [vmem:[%s980_s26 + $0x2b0] sm:$0xff] }
  0x28   : > { %254 = vst [vmem:[%s985_s27 + $0x150] sm:$0xff] %v253_v42  ;;  %256 = vst [vmem:[%s985_s27 + $0x158] sm:$0xff] %v255_v43  ;;  %v259_v45 = vld [vmem:[%s980_s26 + $0x2b8] sm:$0xff]  ;;  %v261_v46 = vld [vmem:[%s980_s26 + $0x2c0] sm:$0xff] }
  0x29   : > { %258 = vst [vmem:[%s985_s27 + $0x160] sm:$0xff] %v257_v44  ;;  %v263_v47 = vld [vmem:[%s980_s26 + $0x2c8] sm:$0xff]  ;;  %260 = vst [vmem:[%s985_s27 + $0x168] sm:$0xff] %v259_v45  ;;  %v265_v48 = vld [vmem:[%s980_s26 + $0x300] sm:$0xff] }
  0x2a   : > { %262 = vst [vmem:[%s985_s27 + $0x170] sm:$0xff] %v261_v46  ;;  %264 = vst [vmem:[%s985_s27 + $0x178] sm:$0xff] %v263_v47  ;;  %v267_v49 = vld [vmem:[%s980_s26 + $0x308] sm:$0xff]  ;;  %v269_v50 = vld [vmem:[%s980_s26 + $0x310] sm:$0xff] }
  0x2b   : > { %266 = vst [vmem:[%s985_s27 + $0x180] sm:$0xff] %v265_v48  ;;  %268 = vst [vmem:[%s985_s27 + $0x188] sm:$0xff] %v267_v49  ;;  %v271_v51 = vld [vmem:[%s980_s26 + $0x318] sm:$0xff]  ;;  %v273_v52 = vld [vmem:[%s980_s26 + $0x320] sm:$0xff] }
  0x2c   : > { %270 = vst [vmem:[%s985_s27 + $0x190] sm:$0xff] %v269_v50  ;;  %v275_v53 = vld [vmem:[%s980_s26 + $0x328] sm:$0xff]  ;;  %272 = vst [vmem:[%s985_s27 + $0x198] sm:$0xff] %v271_v51 }
  0x2d   : > { %274 = vst [vmem:[%s985_s27 + $0x1a0] sm:$0xff] %v273_v52  ;;  %276 = vst [vmem:[%s985_s27 + $0x1a8] sm:$0xff] %v275_v53 }
  0x2e PF: > { %p766_p6 = scmp.ge.s32.totalorder %s915_s16, 1  ;;  %p281_p7 = scmp.lt.s32.totalorder %s915_s16, 3 }
  0x30   : > { %p282_p8 = pnand %p766_p6, %p281_p7 }
  0x31   : > { %s288_s28 = sand.u32 (!%p282_p8), 1, %s899_s12   ;;  %v340_v54 = vlaneseq (!%p282_p8)  ;;  %v328_v56 = vld [vmem:[%s1389_s1] sm:$0xff] (!%p282_p8)  ;;  %v329_v57 = vld [vmem:[%s1389_s1 + $0x8] sm:$0xff] (!%p282_p8)  ;;  %v1124_v5 = vld [vmem:[%s1389_s1 + $0x10] sm:$0xff] (!%p282_p8)  ;;  %p318_p9 = scmp.lt.s32.totalorder (!%p282_p8), %s907_s14, 1 }
  0x32   : > { %285 = sbr.rel (%p282_p8) target bundleno = 120 (0x78), region = 51  ;;  %v1149_v17 = vld [vmem:[%s1389_s1 + $0x18] ss:$0 sm:$0xff] (!%p282_p8)  ;;  %v1169_v28 = vld [vmem:[%s1390_s2] sm:$0x7] (!%p282_p8) }
  0x33   : > { %s823_s29 = smul.u32 (!%p282_p8), 432, %s288_s28  ;;  %v341_v55 = vshrl.u32 (!%p282_p8), %v340_v54, 7 }
  0x35   : > { %v342_v58 = vsub.s32 (!%p282_p8), 0, %v341_v55  ;;  %v1101_v59 = vsub.s32 (!%p282_p8), 1, %v341_v55  ;;  %s1103_s7 = scalar_lea.vmem (!%p282_p8), [#allocation2], %s823_s29  ;;  %v1107_v62 = vsub.s32 (!%p282_p8), 2, %v341_v55  ;;  %v1109_v63 = vsub.s32 (!%p282_p8), 3, %v341_v55 }
  0x36   : > { %v334_v60 = vld [vmem:[%s1103_s7] sm:$0xff] (!%p282_p8)  ;;  %v768_v61 = vld [vmem:[%s1103_s7 + $0x30] sm:$0xff] (!%p282_p8)  ;;  %v1111_v0 = vsub.s32 (!%p282_p8), 4, %v341_v55  ;;  %v1136_v10 = vsub.s32 (!%p282_p8), 5, %v341_v55  ;;  %v1141_v14 = vsub.s32 (!%p282_p8), 6, %v341_v55  ;;  %v1143_v15 = vsub.s32 (!%p282_p8), 7, %v341_v55 }
  0x37   : > { %v1113_v1 = vrot.slane (!%p282_p8), %v328_v56, %v342_v58  ;;  %v1115_v2 = vrot.slane (!%p282_p8), %v329_v57, %v342_v58  ;;  %v1118_v3 = vrot.slane (!%p282_p8), %v328_v56, %v1101_v59  ;;  %v774_v4 = vld [vmem:[%s1103_s7 + $0x60] sm:$0xff] (!%p282_p8)  ;;  %v1127_v6 = vrot.slane (!%p282_p8), %v328_v56, %v1107_v62  ;;  %v780_v7 = vld [vmem:[%s1103_s7 + $0x90] sm:$0xff] (!%p282_p8)  ;;  %v335_v16 = vld [vmem:[%s1103_s7 + $0x8] sm:$0xff] (!%p282_p8) }
  0x38   : > { %v1131_v8 = vrot.slane (!%p282_p8), %v328_v56, %v1109_v63  ;;  %v1134_v9 = vrot.slane (!%p282_p8), %v328_v56, %v1111_v0  ;;  %v786_v13 = vld [vmem:[%s1103_s7 + $0xc0] sm:$0xff] (!%p282_p8)  ;;  %v1154_v20 = vrot.slane (!%p282_p8), %v1124_v5, %v342_v58  ;;  %v1158_v23 = vrot.slane (!%p282_p8), %v328_v56, %v1136_v10  ;;  %v769_v24 = vld [vmem:[%s1103_s7 + $0x38] sm:$0xff] (!%p282_p8)  ;;  %v792_v26 = vld [vmem:[%s1103_s7 + $0xf0] sm:$0xff] (!%p282_p8) }
  0x39   : > { %v352_v11 = vmul.f32 %v1113_v1, %v334_v60  ;;  %v377_v12 = vmul.f32 %v768_v61, %v1118_v3  ;;  %v408_v18 = vmul.f32 %v774_v4, %v1127_v6  ;;  %v810_v19 = vld [vmem:[%s1103_s7 + $0x180] sm:$0xff]  ;;  %v1164_v27 = vrot.slane %v328_v56, %v1141_v14  ;;  %v775_v31 = vld [vmem:[%s1103_s7 + $0x68] sm:$0xff]  ;;  %v781_v36 = vld [vmem:[%s1103_s7 + $0x98] sm:$0xff]  ;;  %s1399_s14 = smov (!%p318_p9, %s907_s14), 1 }
  0x3a   : > { %v439_v22 = vmul.f32 %v780_v7, %v1131_v8  ;;  %v470_v25 = vmul.f32 %v786_v13, %v1134_v9  ;;  %v353_v29 = vmul.f32 %v1115_v2, %v335_v16  ;;  %v1173_v30 = vrot.slane %v329_v57, %v1101_v59  ;;  %v798_v37 = vld [vmem:[%s1103_s7 + $0x120] sm:$0xff]  ;;  %v804_v38 = vld [vmem:[%s1103_s7 + $0x150] sm:$0xff]  ;;  %v787_v41 = vld [vmem:[%s1103_s7 + $0xc8] sm:$0xff]  ;;  %s824_s24 = smul.u32 48, %s1399_s14 }
  0x3b   : > { %v383_v21 = vadd.f32 %v377_v12, %v352_v11  ;;  %v1177_v33 = vrot.slane %v328_v56, %v1143_v15  ;;  %v1180_v34 = vmul.f32 %v1149_v17, %v810_v19  ;;  %v1183_v35 = vrot.slane %v329_v57, %v1107_v62  ;;  %v793_v48 = vld [vmem:[%s1103_s7 + $0xf8] sm:$0xff]  ;;  %v336_v49 = vld [vmem:[%s1103_s7 + $0x10] sm:$0xff]  ;;  %v799_v60 = vld [vmem:[%s1103_s7 + $0x128] sm:$0xff] }
  0x3c   : > { %v378_v39 = vmul.f32 %v769_v24, %v1173_v30  ;;  %v1190_v40 = vrot.slane %v329_v57, %v1109_v63  ;;  %v1194_v42 = vrot.slane %v329_v57, %v1111_v0  ;;  %v1197_v43 = vrot.slane %v329_v57, %v1136_v10  ;;  %v805_v61 = vld [vmem:[%s1103_s7 + $0x158] sm:$0xff]  ;;  %v770_v4 = vld [vmem:[%s1103_s7 + $0x40] sm:$0xff]  ;;  %v776_v13 = vld [vmem:[%s1103_s7 + $0x70] sm:$0xff]  ;;  %s1360_s26 = scalar_lea.vmem %s1391_s3, %s824_s24 }
  0x3d   : > { %v414_v32 = vadd.f32 %v408_v18, %v383_v21  ;;  %v501_v45 = vmul.f32 %v792_v26, %v1158_v23  ;;  %v1201_v46 = vrot.slane %v1169_v28, %v342_v58  ;;  %v409_v47 = vmul.f32 %v775_v31, %v1183_v35  ;;  %v1229_v18 = vld [vmem:[%s1389_s1 + $0x20] ss:$0 sm:$0xff]  ;;  %v811_v19 = vld [vmem:[%s1103_s7 + $0x188] sm:$0xff] }
  0x3e   : > { %v384_v50 = vadd.f32 %v378_v39, %v353_v29  ;;  %v440_v51 = vmul.f32 %v781_v36, %v1190_v40  ;;  %v1208_v52 = vrot.slane %v329_v57, %v1141_v14  ;;  %v1211_v53 = vrot.slane %v329_v57, %v1143_v15  ;;  %v788_v36 = vld [vmem:[%s1103_s7 + $0xd0] sm:$0xff]  ;;  %v337_v39 = vld [vmem:[%s1103_s7 + $0x18] sm:$0xff] }
  0x3f   : > { %v445_v44 = vadd.f32 %v439_v22, %v414_v32  ;;  %v532_v55 = vmul.f32 %v798_v37, %v1164_v27  ;;  %v563_v56 = vmul.f32 %v804_v38, %v1177_v33  ;;  %v471_v58 = vmul.f32 %v787_v41, %v1194_v42  ;;  %v782_v22 = vld [vmem:[%s1103_s7 + $0xa0] sm:$0xff]  ;;  %v771_v41 = vld [vmem:[%s1103_s7 + $0x48] sm:$0xff] }
  0x40   : > { %v415_v7 = vadd.f32 %v409_v47, %v384_v50  ;;  %v502_v11 = vmul.f32 %v793_v48, %v1197_v43  ;;  %v354_v12 = vmul.f32 %v1154_v20, %v336_v49  ;;  %v1223_v57 = vrot.slane %v1124_v5, %v1101_v59  ;;  %v794_v49 = vld [vmem:[%s1103_s7 + $0x100] sm:$0xff]  ;;  %v800_v50 = vld [vmem:[%s1103_s7 + $0x130] sm:$0xff] }
  0x41   : > { %v476_v54 = vadd.f32 %v470_v25, %v445_v44  ;;  %v1234_v21 = vrot.slane %v1124_v5, %v1107_v62  ;;  %v1239_v24 = vrot.slane %v1124_v5, %v1109_v63  ;;  %v1243_v25 = vrot.slane %v1124_v5, %v1111_v0 }
  0x42   : > { %v446_v26 = vadd.f32 %v440_v51, %v415_v7  ;;  %v533_v29 = vmul.f32 %v799_v60, %v1208_v52  ;;  %v564_v31 = vmul.f32 %v805_v61, %v1211_v53  ;;  %v379_v32 = vmul.f32 %v770_v4, %v1223_v57  ;;  %v777_v51 = vld [vmem:[%s1103_s7 + $0x78] sm:$0xff]  ;;  %v806_v4 = vld [vmem:[%s1103_s7 + $0x160] sm:$0xff] }
  0x43   : > { %v507_v16 = vadd.f32 %v501_v45, %v476_v54  ;;  %v410_v38 = vmul.f32 %v776_v13, %v1234_v21  ;;  %v1252_v63 = vrot.slane %v1124_v5, %v1136_v10  ;;  %v1256_v0 = vrot.slane %v1124_v5, %v1141_v14  ;;  %v1278_v61 = vld [vmem:[%s1389_s1 + $0x28] ss:$0 sm:$0xff] }
  0x44   : > { %v477_v44 = vadd.f32 %v471_v58, %v446_v26  ;;  %v595_v45 = vmul.f32 %v1229_v18, %v811_v19  ;;  %v385_v47 = vadd.f32 %v379_v32, %v354_v12  ;;  %v441_v48 = vmul.f32 %v782_v22, %v1239_v24  ;;  %v783_v58 = vld [vmem:[%s1103_s7 + $0xa8] sm:$0xff] }
  0x45   : > { %v538_v37 = vadd.f32 %v532_v55, %v507_v16  ;;  %v1267_v10 = vrot.slane %v1169_v28, %v1101_v59  ;;  %v472_v14 = vmul.f32 %v788_v36, %v1243_v25  ;;  %v1272_v55 = vrot.slane %v1124_v5, %v1143_v15  ;;  %v812_v59 = vld [vmem:[%s1103_s7 + $0x190] sm:$0xff]  ;;  %v789_v16 = vld [vmem:[%s1103_s7 + $0xd8] sm:$0xff]  ;;  %v778_v36 = vld [vmem:[%s1103_s7 + $0x80] sm:$0xff] }
  0x46   : > { %v508_v60 = vadd.f32 %v502_v11, %v477_v44  ;;  %v355_v7 = vmul.f32 %v1113_v1, %v337_v39  ;;  %v380_v12 = vmul.f32 %v771_v41, %v1118_v3  ;;  %v503_v15 = vmul.f32 %v794_v49, %v1252_v63  ;;  %v338_v1 = vld [vmem:[%s1103_s7 + $0x20] sm:$0xff]  ;;  %v772_v3 = vld [vmem:[%s1103_s7 + $0x50] sm:$0xff] }
  0x47   : > { %v569_v54 = vadd.f32 %v563_v56, %v538_v37  ;;  %v416_v56 = vadd.f32 %v410_v38, %v385_v47  ;;  %v534_v11 = vmul.f32 %v800_v50, %v1256_v0  ;;  %v411_v13 = vmul.f32 %v777_v51, %v1127_v6  ;;  %v801_v47 = vld [vmem:[%s1103_s7 + $0x138] sm:$0xff]  ;;  %v807_v50 = vld [vmem:[%s1103_s7 + $0x168] sm:$0xff] }
  0x48   : > { %v539_v19 = vadd.f32 %v533_v29, %v508_v60  ;;  %v386_v26 = vadd.f32 %v380_v12, %v355_v7  ;;  %v442_v32 = vmul.f32 %v783_v58, %v1131_v8  ;;  %v565_v37 = vmul.f32 %v806_v4, %v1272_v55  ;;  %v795_v29 = vld [vmem:[%s1103_s7 + $0x108] sm:$0xff]  ;;  %v813_v58 = vld [vmem:[%s1103_s7 + $0x198] sm:$0xff]  ;;  %v790_v60 = vld [vmem:[%s1103_s7 + $0xe0] sm:$0xff] }
  0x49   : > { %v600_v5 = vadd.f32 %v1180_v34, %v569_v54  ;;  %v447_v22 = vadd.f32 %v441_v48, %v416_v56  ;;  %v596_v38 = vmul.f32 %v1278_v61, %v812_v59  ;;  %v1300_v6 = vrot.slane %v1169_v28, %v1107_v62  ;;  %v784_v48 = vld [vmem:[%s1103_s7 + $0xb0] sm:$0xff]  ;;  %v339_v56 = vld [vmem:[%s1103_s7 + $0x28] sm:$0xff]  ;;  %v773_v59 = vld [vmem:[%s1103_s7 + $0x58] sm:$0xff] }
  0x4a   : > { %v570_v39 = vadd.f32 %v564_v31, %v539_v19  ;;  %v417_v41 = vadd.f32 %v411_v13, %v386_v26  ;;  %v473_v44 = vmul.f32 %v789_v16, %v1134_v9  ;;  %v356_v51 = vmul.f32 %v1115_v2, %v338_v1 }
  0x4b   : > { %v1294_v34 = vadd.f32 %v1201_v46, %v600_v5  ;;  %v478_v8 = vadd.f32 %v472_v14, %v447_v22  ;;  %v381_v62 = vmul.f32 %v772_v3, %v1173_v30  ;;  %v412_v28 = vmul.f32 %v778_v36, %v1183_v35  ;;  %v779_v5 = vld [vmem:[%s1103_s7 + $0x88] sm:$0xff] }
  0x4c   : > { %v601_v54 = vadd.f32 %v595_v45, %v570_v39  ;;  %v448_v14 = vadd.f32 %v442_v32, %v417_v41  ;;  %v504_v9 = vmul.f32 %v795_v29, %v1158_v23  ;;  %v535_v4 = vmul.f32 %v801_v47, %v1164_v27  ;;  %v796_v23 = vld [vmem:[%s1103_s7 + $0x110] sm:$0xff] }
  0x4d   : > { %v629_v49 = vmul.f32 0.5, %v1294_v34  ;;  %v509_v31 = vadd.f32 %v503_v15, %v478_v8  ;;  %v387_v2 = vadd.f32 %v381_v62, %v356_v51  ;;  %v443_v30 = vmul.f32 %v784_v48, %v1190_v40  ;;  %v785_v15 = vld [vmem:[%s1103_s7 + $0xb8] sm:$0xff]  ;;  %v808_v29 = vld [vmem:[%s1103_s7 + $0x170] sm:$0xff] }
  0x4e   : > { %v1319_v35 = vadd.f32 %v1267_v10, %v601_v54  ;;  %v479_v7 = vadd.f32 %v473_v44, %v448_v14  ;;  %v566_v12 = vmul.f32 %v807_v50, %v1177_v33  ;;  %v597_v13 = vmul.f32 %v1149_v17, %v813_v58  ;;  %v802_v33 = vld [vmem:[%s1103_s7 + $0x140] sm:$0xff]  ;;  %v797_v8 = vld [vmem:[%s1103_s7 + $0x118] sm:$0xff] }
  0x4f   : > { %865 = vtanh.f32 %v629_v49  ;;  %v540_v45 = vadd.f32 %v534_v11, %v509_v31  ;;  %v418_v27 = vadd.f32 %v412_v28, %v387_v2  ;;  %v474_v40 = vmul.f32 %v790_v60, %v1194_v42  ;;  %v809_v14 = vld [vmem:[%s1103_s7 + $0x178] sm:$0xff]  ;;  %v815_v60 = vld [vmem:[%s1103_s7 + $0x1a8] sm:$0xff] }
  0x50   : > { %v357_v16 = vmul.f32 %v1154_v20, %v339_v56  ;;  %v630_v11 = vmul.f32 0.5, %v1319_v35  ;;  %v510_v22 = vadd.f32 %v504_v9, %v479_v7  ;;  %v382_v26 = vmul.f32 %v773_v59, %v1223_v57  ;;  %v791_v20 = vld [vmem:[%s1103_s7 + $0xe8] sm:$0xff] }
  0x51   : > { %v571_v19 = vadd.f32 %v565_v37, %v540_v45  ;;  %v449_v32 = vadd.f32 %v443_v30, %v418_v27  ;;  %v505_v17 = vmul.f32 %v796_v23, %v1197_v43  ;;  %v413_v1 = vmul.f32 %v779_v5, %v1234_v21 }
  0x52   : > { %v444_v42 = vmul.f32 %v785_v15, %v1239_v24  ;;  %867 = vtanh.f32 %v630_v11  ;;  %v541_v36 = vadd.f32 %v535_v4, %v510_v22  ;;  %v388_v37 = vadd.f32 %v382_v26, %v357_v16  ;;  %v814_v24 = vld [vmem:[%s1103_s7 + $0x1a0] sm:$0xff] }
  0x53   : > { %v602_v3 = vadd.f32 %v596_v38, %v571_v19  ;;  %v480_v39 = vadd.f32 %v474_v40, %v449_v32  ;;  %v536_v57 = vmul.f32 %v802_v33, %v1208_v52  ;;  %v475_v44 = vmul.f32 %v791_v20, %v1243_v25  ;;  %v803_v38 = vld [vmem:[%s1103_s7 + $0x148] sm:$0xff] }
  0x54   : > { %v572_v21 = vadd.f32 %v566_v12, %v541_v36  ;;  %v419_v41 = vadd.f32 %v413_v1, %v388_v37  ;;  %v567_v48 = vmul.f32 %v808_v29, %v1211_v53  ;;  %v506_v62 = vmul.f32 %v797_v8, %v1252_v63 }
  0x55   : > { %v625_v43 = vadd.f32 %v1300_v6, %v602_v3  ;;  %v511_v47 = vadd.f32 %v505_v17, %v480_v39  ;;  %v598_v54 = vmul.f32 %v1229_v18, %v814_v24  ;;  %v537_v31 = vmul.f32 %v803_v38, %v1256_v0 }
  0x56   : > { %v603_v50 = vadd.f32 %v597_v13, %v572_v21  ;;  %v450_v51 = vadd.f32 %v444_v42, %v419_v41  ;;  %v568_v63 = vmul.f32 %v809_v14, %v1272_v55  ;;  %v599_v59 = vmul.f32 %v1278_v61, %v815_v60 }
  0x57   : > { %v631_v49 = vmul.f32 0.5, %v625_v43  ;;  %v542_v28 = vadd.f32 %v536_v57, %v511_v47 }
  0x58   : > { %v626_v25 = vadd.f32 %v1201_v46, %v603_v50  ;;  %v481_v58 = vadd.f32 %v475_v44, %v450_v51 }
  0x59   : > { %v866_v52 = vpop.eup %865  ;;  %869 = vtanh.f32 %v631_v49  ;;  %v573_v53 = vadd.f32 %v567_v48, %v542_v28 }
  0x5a   : > { %v641_v9 = vadd.f32 1.0, %v866_v52  ;;  %v632_v4 = vmul.f32 0.5, %v626_v25  ;;  %v512_v2 = vadd.f32 %v506_v62, %v481_v58 }
  0x5b   : > { %v604_v18 = vadd.f32 %v598_v54, %v573_v53 }
  0x5c   : > { %v647_v56 = vmul.f32 0.5, %v641_v9  ;;  %v868_v0 = vpop.eup %867  ;;  %871 = vtanh.f32 %v632_v4  ;;  %v543_v46 = vadd.f32 %v537_v31, %v512_v2 }
  0x5d   : > { %v642_v45 = vadd.f32 1.0, %v868_v0  ;;  %v627_v7 = vadd.f32 %v1267_v10, %v604_v18 }
  0x5e   : > { %v653_v30 = vmul.f32 %v647_v56, %v1294_v34  ;;  %v574_v55 = vadd.f32 %v568_v63, %v543_v46 }
  0x5f   : > { %v648_v12 = vmul.f32 0.5, %v642_v45  ;;  %v633_v23 = vmul.f32 0.5, %v627_v7 }
  0x60   : > { %659 = vst [vmem:[%s1360_s26] sm:$0xff] %v653_v30  ;;  %v605_v5 = vadd.f32 %v599_v59, %v574_v55 }
  0x61   : > { %v654_v15 = vmul.f32 %v648_v12, %v1319_v35  ;;  %873 = vtanh.f32 %v633_v23 }
  0x62   : > { %v628_v34 = vadd.f32 %v1300_v6, %v605_v5 }
  0x63   : > { %v870_v13 = vpop.eup %869  ;;  %660 = vst [vmem:[%s1360_s26 + $0x8] sm:$0xff] %v654_v15 }
  0x64   : > { %v643_v27 = vadd.f32 1.0, %v870_v13  ;;  %v634_v40 = vmul.f32 0.5, %v628_v34 }
  0x66   : > { %v649_v61 = vmul.f32 0.5, %v643_v27  ;;  %v872_v16 = vpop.eup %871  ;;  %875 = vtanh.f32 %v634_v40 }
  0x67   : > { %v644_v11 = vadd.f32 1.0, %v872_v16 }
  0x68   : > { %v655_v10 = vmul.f32 %v649_v61, %v625_v43 }
  0x69   : > { %v650_v19 = vmul.f32 0.5, %v644_v11 }
  0x6a   : > { %661 = vst [vmem:[%s1360_s26 + $0x10] sm:$0xff] %v655_v10 }
  0x6b   : > { %v874_v22 = vpop.eup %873  ;;  %v656_v33 = vmul.f32 %v650_v19, %v626_v25 }
  0x6c   : > { %v645_v35 = vadd.f32 1.0, %v874_v22 }
  0x6d   : > { %662 = vst [vmem:[%s1360_s26 + $0x18] sm:$0xff] %v656_v33 }
  0x6e   : > { %v651_v26 = vmul.f32 0.5, %v645_v35 }
  0x70   : > { %v876_v32 = vpop.eup %875  ;;  %v657_v17 = vmul.f32 %v651_v26, %v627_v7 }
  0x71   : > { %v646_v6 = vadd.f32 1.0, %v876_v32 }
  0x72   : > { %663 = vst [vmem:[%s1360_s26 + $0x20] sm:$0xff] %v657_v17 }
  0x73   : > { %v652_v1 = vmul.f32 0.5, %v646_v6 }
  0x75   : > { %v658_v42 = vmul.f32 %v652_v1, %v628_v34 }
  0x77   : > { %664 = vst [vmem:[%s1360_s26 + $0x28] sm:$0xff] %v658_v42 }
  0x78 PF: > { %s13_s16 = sadd.s32 1, %s915_s16   ;;  %s1392_s12 = smov %s903_s13 }
  0x79   : > { %p10_p10 = scmp.ge.s32.totalorder %s13_s16, 4   ;;  %s1393_s13 = smov %s972_s20 }
  0x7a   : > { %s1394_s14 = smov %s911_s15  ;;  %s1395_s15 = smov %s1397_s17 }
  0x7b   :  { %12 = sbr.rel (!%p10_p10) target bundleno = 3 (0x3), region = 98 }

// kernel: efficientnet_forward.41
= control target key start
LH: loop header
LB: loop body
LE: loop exit
PB: predicated region body
PF: predicated region fallthrough
CT: control target
= control target key end

     0   :  { %s791_s18 = smov 0   ;;  %s793_s19 = smov 0   ;;  %s1005_s0 = inlined_call_operand.vmem [shape: f32[2,16,384], index: 0, kind: input, shape index: {}]   ;;  %s1006_s1 = inlined_call_operand.vmem [shape: f32[384,64], index: 1, kind: input, shape index: {}]   ;;  %s1007_s2 = inlined_call_operand.vmem [shape: f32[1,64], index: 2, kind: input, shape index: {}]   ;;  %s1008_s3 = inlined_call_operand.vmem [shape: f32[2,1,384], index: 3, kind: input, shape index: {}]   ;;  %s1009_s4 = inlined_call_operand.vmem [shape: f32[2,16,64], index: 4, kind: input, shape index: {}]   ;;  %s1010_s5 = inlined_call_operand.vmem [shape: f32[2,16,64], index: 5, kind: output, shape index: {}]  }
   0x1   :  { %s795_s20 = smov 0  }
   0x2 LB: > { %s27_s21 = sadd.s32 1, %s753_s19  ;;  %p645_p0 = scmp.ge.s32.totalorder %s757_s20, 1  ;;  %s757_s20 = sphi %s795_s20, %s15_s20   ;;  %s753_s19 = sphi %s793_s19, %s1012_s19   ;;  %s749_s18 = sphi %s791_s18, %s1011_s18  }
   0x3   : > { %p29_p1 = scmp.ge.s32.totalorder %s27_s21, 2  ;;  %p235_p2 = scmp.lt.s32.totalorder %s757_s20, 3 }
   0x5   : > { %s1014_s21 = smov (%p29_p1, %s27_s21), 0  ;;  %p236_p3 = pnand %p645_p0, %p235_p2 }
   0x6   : > { %v369_v0 = vld [vmem:[%s1006_s1 + $0x80] sm:$0xff] (!%p236_p3)  ;;  %v370_v1 = vld [vmem:[%s1006_s1 + $0x88] sm:$0xff] (!%p236_p3)  ;;  %v759_v5 = vmov (!%p236_p3), 0.0   ;;  %p286_p4 = scmp.lt.s32.totalorder (!%p236_p3), %s749_s18, 1  ;;  %vm760_vm0 = vmmov (!%p236_p3), 0   ;;  %v371_v10 = vld [vmem:[%s1006_s1 + $0x90] sm:$0xff] (!%p236_p3)  ;;  %v329_v26 = vlaneseq (!%p236_p3) }
   0x7   : > { %239 = sbr.rel (%p236_p3) target bundleno = 265 (0x109), region = 40  ;;  %v353_v2 = vld [vmem:[%s1006_s1] sm:$0xff] (!%p236_p3)  ;;  %v409_v3 = vpack.c.bf16 (!%p236_p3), %v370_v1, %v369_v0  ;;  %v354_v4 = vld [vmem:[%s1006_s1 + $0x8] sm:$0xff] (!%p236_p3)  ;;  %687 = vmatprep.subr.bf16.mxu1 (!%p236_p3), %v759_v5  ;;  %703 = vmatprep.mubr.msk.bf16.mxu1 (!%p236_p3), %vm760_vm0, %v759_v5  ;;  %v372_v11 = vld [vmem:[%s1006_s1 + $0x98] sm:$0xff] (!%p236_p3)  ;;  %vm518_vm1 = vcmask (!%p236_p3), 523264  }
   0x8   : > { %v385_v6 = vld [vmem:[%s1006_s1 + $0x100] sm:$0xff] (!%p236_p3)  ;;  %v386_v7 = vld [vmem:[%s1006_s1 + $0x108] sm:$0xff] (!%p236_p3)  ;;  %v401_v8 = vpack.c.bf16 (!%p236_p3), %v354_v4, %v353_v2  ;;  %v355_v12 = vld [vmem:[%s1006_s1 + $0x10] sm:$0xff] (!%p236_p3)  ;;  %v410_v13 = vpack.c.bf16 (!%p236_p3), %v372_v11, %v371_v10  ;;  %v330_v36 = vshrl.u32 (!%p236_p3), %v329_v26, 7 }
   0x9   : > { %v417_v9 = vpack.c.bf16 (!%p236_p3), %v386_v7, %v385_v6  ;;  %656 = vmatprep.subr.bf16.mxu0 (!%p236_p3), %v409_v3  ;;  %v356_v14 = vld [vmem:[%s1006_s1 + $0x18] sm:$0xff] (!%p236_p3)  ;;  %v387_v15 = vld [vmem:[%s1006_s1 + $0x110] sm:$0xff] (!%p236_p3)  ;;  %v373_v19 = vld [vmem:[%s1006_s1 + $0xa0] sm:$0xff] (!%p236_p3) }
   0xa   : > { %v388_v16 = vld [vmem:[%s1006_s1 + $0x118] sm:$0xff] (!%p236_p3)  ;;  %657 = vmatpush3.bf16.msra.mxu0 (!%p236_p3), %v401_v8  ;;  %v402_v17 = vpack.c.bf16 (!%p236_p3), %v356_v14, %v355_v12  ;;  %v374_v20 = vld [vmem:[%s1006_s1 + $0xa8] sm:$0xff] (!%p236_p3)  ;;  %v357_v21 = vld [vmem:[%s1006_s1 + $0x20] sm:$0xff] (!%p236_p3)  ;;  %v335_v46 = vsub.s32 (!%p236_p3), 1, %v330_v36  ;;  %v331_v0 = vsub.s32 (!%p236_p3), 0, %v330_v36  ;;  %v339_v1 = vsub.s32 (!%p236_p3), 2, %v330_v36 }
   0xb   : > { %688 = vmatpush3.bf16.msra.mxu1 (!%p236_p3), %v417_v9  ;;  %v418_v18 = vpack.c.bf16 (!%p236_p3), %v388_v16, %v387_v15  ;;  %658 = vmatprep.subr.bf16.mxu0 (!%p236_p3), %v410_v13  ;;  %v411_v22 = vpack.c.bf16 (!%p236_p3), %v374_v20, %v373_v19  ;;  %v358_v23 = vld [vmem:[%s1006_s1 + $0x28] sm:$0xff] (!%p236_p3)  ;;  %v389_v24 = vld [vmem:[%s1006_s1 + $0x120] sm:$0xff] (!%p236_p3)  ;;  %v375_v27 = vld [vmem:[%s1006_s1 + $0xb0] sm:$0xff] (!%p236_p3) }
   0xc   : > { %689 = vmatprep.subr.bf16.mxu1 (!%p236_p3), %v759_v5  ;;  %v390_v25 = vld [vmem:[%s1006_s1 + $0x128] sm:$0xff] (!%p236_p3)  ;;  %v376_v28 = vld [vmem:[%s1006_s1 + $0xb8] sm:$0xff] (!%p236_p3)  ;;  %v403_v29 = vpack.c.bf16 (!%p236_p3), %v358_v23, %v357_v21  ;;  %v359_v31 = vld [vmem:[%s1006_s1 + $0x30] sm:$0xff] (!%p236_p3) }
   0xd   : > { %v419_v30 = vpack.c.bf16 (!%p236_p3), %v390_v25, %v389_v24  ;;  %v412_v32 = vpack.c.bf16 (!%p236_p3), %v376_v28, %v375_v27  ;;  %v360_v33 = vld [vmem:[%s1006_s1 + $0x38] sm:$0xff] (!%p236_p3)  ;;  %v391_v34 = vld [vmem:[%s1006_s1 + $0x130] sm:$0xff] (!%p236_p3)  ;;  %v377_v37 = vld [vmem:[%s1006_s1 + $0xc0] sm:$0xff] (!%p236_p3) }
   0xe   : > { %s1016_s18 = smov (!%p286_p4, %s749_s18), 1  ;;  %659 = vmatpush3.bf16.msra.mxu0 %v402_v17  ;;  %v392_v35 = vld [vmem:[%s1006_s1 + $0x138] sm:$0xff]  ;;  %v378_v38 = vld [vmem:[%s1006_s1 + $0xc8] sm:$0xff]  ;;  %v404_v39 = vpack.c.bf16 %v360_v33, %v359_v31  ;;  %v361_v41 = vld [vmem:[%s1006_s1 + $0x40] sm:$0xff] }
   0xf   : > { %690 = vmatpush3.bf16.msra.mxu1 %v418_v18  ;;  %s707_s22 = smul.u32 48, %s1016_s18  ;;  %660 = vmatprep.subr.bf16.mxu0 %v411_v22  ;;  %v420_v40 = vpack.c.bf16 %v392_v35, %v391_v34  ;;  %v413_v42 = vpack.c.bf16 %v378_v38, %v377_v37  ;;  %v362_v43 = vld [vmem:[%s1006_s1 + $0x48] sm:$0xff]  ;;  %v393_v44 = vld [vmem:[%s1006_s1 + $0x140] sm:$0xff]  ;;  %v379_v47 = vld [vmem:[%s1006_s1 + $0xd0] sm:$0xff] }
  0x10   : > { %691 = vmatprep.subr.bf16.mxu1 %v759_v5  ;;  %s708_s29 = smul.u32 3, %s1016_s18  ;;  %v394_v45 = vld [vmem:[%s1006_s1 + $0x148] sm:$0xff]  ;;  %v380_v48 = vld [vmem:[%s1006_s1 + $0xd8] sm:$0xff]  ;;  %v363_v49 = vld [vmem:[%s1006_s1 + $0x50] sm:$0xff]  ;;  %v405_v50 = vpack.c.bf16 %v362_v43, %v361_v41 }
  0x11   : > { %s917_s24 = scalar_lea.vmem %s1005_s0, %s707_s22  ;;  %v421_v51 = vpack.c.bf16 %v394_v45, %v393_v44  ;;  %v414_v55 = vpack.c.bf16 %v380_v48, %v379_v47  ;;  %v364_v56 = vld [vmem:[%s1006_s1 + $0x58] sm:$0xff]  ;;  %v395_v57 = vld [vmem:[%s1006_s1 + $0x150] sm:$0xff]  ;;  %v381_v60 = vld [vmem:[%s1006_s1 + $0xe0] sm:$0xff] }
  0x12   : > { %661 = vmatpush3.bf16.msra.mxu0 %v403_v29  ;;  %s299_s27 = scalar_lea.vmem %s1008_s3, %s708_s29  ;;  %v322_v52 = vld [vmem:[%s917_s24 + $0x8] sm:$0xff]  ;;  %v325_v53 = vld [vmem:[%s917_s24 + $0x20] sm:$0xff]  ;;  %v396_v58 = vld [vmem:[%s1006_s1 + $0x158] sm:$0xff]  ;;  %v406_v2 = vpack.c.bf16 %v364_v56, %v363_v49 }
  0x13   : > { %692 = vmatpush3.bf16.msra.mxu1 %v419_v30  ;;  %662 = vmatprep.subr.bf16.mxu0 %v412_v32  ;;  %v327_v54 = vld [vmem:[%s299_s27] sm:$0x7]  ;;  %v382_v61 = vld [vmem:[%s1006_s1 + $0xe8] sm:$0xff]  ;;  %v422_v3 = vpack.c.bf16 %v396_v58, %v395_v57  ;;  %v383_v11 = vld [vmem:[%s1006_s1 + $0xf0] sm:$0xff] }
  0x14   : > { %693 = vmatprep.subr.bf16.mxu1 %v759_v5  ;;  %v336_v59 = vrot.slane %v327_v54, %v335_v46  ;;  %v365_v4 = vld [vmem:[%s1006_s1 + $0x60] sm:$0xff]  ;;  %v415_v6 = vpack.c.bf16 %v382_v61, %v381_v60  ;;  %v366_v7 = vld [vmem:[%s1006_s1 + $0x68] sm:$0xff]  ;;  %v384_v12 = vld [vmem:[%s1006_s1 + $0xf8] sm:$0xff]  ;;  %v332_v15 = vrot.slane %v327_v54, %v331_v0  ;;  %v340_v16 = vrot.slane %v327_v54, %v339_v1 }
  0x15   : > { %v397_v8 = vld [vmem:[%s1006_s1 + $0x160] sm:$0xff]  ;;  %v398_v9 = vld [vmem:[%s1006_s1 + $0x168] sm:$0xff]  ;;  %v367_v13 = vld [vmem:[%s1006_s1 + $0x70] sm:$0xff]  ;;  %v407_v17 = vpack.c.bf16 %v366_v7, %v365_v4  ;;  %v416_v22 = vpack.c.bf16 %v384_v12, %v383_v11 }
  0x16   : > { %663 = vmatpush3.bf16.msra.mxu0 %v404_v39  ;;  %v345_v62 = vmul.f32 %v336_v59, %v322_v52  ;;  %v348_v63 = vmul.f32 %v336_v59, %v325_v53  ;;  %v321_v14 = vld [vmem:[%s917_s24] sm:$0xff]  ;;  %v423_v18 = vpack.c.bf16 %v398_v9, %v397_v8  ;;  %v324_v19 = vld [vmem:[%s917_s24 + $0x18] sm:$0xff]  ;;  %v323_v20 = vld [vmem:[%s917_s24 + $0x10] sm:$0xff] }
  0x17   : > { %694 = vmatpush3.bf16.msra.mxu1 %v420_v40  ;;  %664 = vmatprep.subr.bf16.mxu0 %v413_v42  ;;  %v326_v21 = vld [vmem:[%s917_s24 + $0x28] sm:$0xff]  ;;  %v368_v23 = vld [vmem:[%s1006_s1 + $0x78] sm:$0xff]  ;;  %v399_v24 = vld [vmem:[%s1006_s1 + $0x170] sm:$0xff]  ;;  %v344_v26 = vmul.f32 %v332_v15, %v321_v14  ;;  %v347_v27 = vmul.f32 %v332_v15, %v324_v19  ;;  %v346_v28 = vmul.f32 %v340_v16, %v323_v20  ;;  %s654_s24 = sshll.u32 %s1016_s18, 4 }
  0x18   : > { %695 = vmatprep.subr.bf16.mxu1 %v759_v5  ;;  %v351_v10 = vpack.c.bf16 %v348_v63, %v345_v62  ;;  %v400_v25 = vld [vmem:[%s1006_s1 + $0x178] sm:$0xff]  ;;  %v349_v29 = vmul.f32 %v340_v16, %v326_v21  ;;  %v408_v30 = vpack.c.bf16 %v368_v23, %v367_v13  ;;  %v651_v37 = vld [vmem:[%s1007_s2] ss:$0 sm:$0xff]  ;;  %s308_s28 = scalar_lea.vmem %s1009_s4, %s654_s24  ;;  %s318_s6 = scalar_lea.vmem %s1010_s5, %s654_s24 }
  0x19   : > { %v424_v31 = vpack.c.bf16 %v400_v25, %v399_v24  ;;  %v350_v32 = vpack.c.bf16 %v347_v27, %v344_v26  ;;  %v514_v45 = vld [vmem:[%s308_s28] sm:$0xff]  ;;  %v515_v48 = vld [vmem:[%s308_s28 + $0x8] sm:$0xff] }
  0x1a   : > { %665 = vmatpush3.bf16.msra.mxu0 %v405_v50  ;;  %464 = vmatprep.mubr.bf16.mxu0 %v351_v10  ;;  %v352_v33 = vpack.c.bf16 %v349_v29, %v346_v28 }
  0x1b   : > { %696 = vmatpush3.bf16.msra.mxu1 %v421_v51  ;;  %666 = vmatprep.subr.bf16.mxu0 %v414_v55 }
  0x1c   : > { %697 = vmatprep.subr.bf16.mxu1 %v759_v5 }
  0x1e   : > { %667 = vmatpush3.bf16.msra.mxu0 %v406_v2 }
  0x1f   : > { %698 = vmatpush3.bf16.msra.mxu1 %v422_v3  ;;  %668 = vmatprep.subr.bf16.mxu0 %v415_v6 }
  0x20   : > { %699 = vmatprep.subr.bf16.mxu1 %v759_v5 }
  0x22   : > { %669 = vmatpush3.bf16.msra.mxu0 %v407_v17 }
  0x23   : > { %700 = vmatpush3.bf16.msra.mxu1 %v423_v18  ;;  %670 = vmatprep.subr.bf16.mxu0 %v416_v22 }
  0x24   : > { %701 = vmatprep.subr.bf16.mxu1 %v759_v5 }
  0x26   : > { %671 = vmatpush3.bf16.msra.mxu0 %v408_v30 }
  0x27   : > { %702 = vmatpush3.bf16.msra.mxu1 %v424_v31 }
  0x29   : > { %465 = vmatmul.mubr.bf16.vlgmr.msra.gmra.mrb[0].mxu0 %v350_v32 }
  0x2a   : > { %704 = vmatmul.mubr.bf16.vlgmr.msra.gmra.mrb[0].mxu1 %v352_v33 }
  0xfc   : > { %v672_v34 = vpop.f32.mrb[0].mxu0 }
  0xfd   : > { %v507_v35 = vpop.f32.mrb[0].mxu1  ;;  %v673_v36 = vpop.f32.mrb[1].mxu0 }
  0xfe   : > { %v705_v38 = vpop.f32.mrb[1].mxu1  ;;  %v674_v39 = vadd.f32 %v673_v36, %v672_v34  ;;  %v675_v40 = vpop.f32.mrb[2].mxu0 }
  0xff   : > { %v510_v5 = vpop.f32.mrb[2].mxu1  ;;  %v676_v41 = vpop.f32.mrb[3].mxu0 }
 0x100   : > { %v706_v42 = vpop.f32.mrb[3].mxu1  ;;  %v467_v43 = vadd.f32 %v674_v39, %v651_v37  ;;  %v677_v44 = vadd.f32 %v676_v41, %v675_v40 }
 0x102   : > { %v508_v46 = vadd.f32 %v507_v35, %v467_v43  ;;  %v470_v47 = vadd.f32 %v677_v44, %v651_v37 }
 0x104   : > { %v516_v49 = vadd.f32 %v514_v45, %v508_v46  ;;  %v511_v50 = vadd.f32 %v510_v5, %v470_v47 }
 0x106   : > { %519 = vst.msk [vmem:[%s318_s6] sm:$0xff] %vm518_vm1, %v516_v49  ;;  %v517_v51 = vadd.f32 %v515_v48, %v511_v50 }
 0x108   : > { %520 = vst.msk [vmem:[%s318_s6 + $0x8] sm:$0xff] %vm518_vm1, %v517_v51 }
 0x109 PF: > { %s15_s20 = sadd.s32 1, %s757_s20   ;;  %s1011_s18 = smov %s753_s19 }
 0x10a   : > { %p12_p5 = scmp.ge.s32.totalorder %s15_s20, 4   ;;  %s1012_s19 = smov %s1014_s21 }
 0x10c   :  { %14 = sbr.rel (!%p12_p5) target bundleno = 2 (0x2), region = 76 }

// kernel: efficientnet_forward.42
= control target key start
LH: loop header
LB: loop body
LE: loop exit
PB: predicated region body
PF: predicated region fallthrough
CT: control target
= control target key end

     0   :  { %s508_s12 = smov 0   ;;  %s510_s13 = smov 0   ;;  %s596_s0 = inlined_call_operand.vmem [shape: f32[2,16,64], index: 0, kind: input, shape index: {}]   ;;  %s597_s1 = inlined_call_operand.vmem [shape: f32[64,256], index: 1, kind: input, shape index: {}]   ;;  %s598_s2 = inlined_call_operand.vmem [shape: f32[1,256], index: 2, kind: input, shape index: {}]   ;;  %s599_s3 = inlined_call_operand.vmem [shape: f32[2,16,256], index: 3, kind: output, shape index: {}]  }
   0x1   :  { %s512_s14 = smov 0  }
   0x2 LB: > { %s25_s15 = sadd.s32 1, %s481_s13  ;;  %p420_p0 = scmp.ge.s32.totalorder %s485_s14, 1  ;;  %s485_s14 = sphi %s512_s14, %s13_s14   ;;  %s481_s13 = sphi %s510_s13, %s601_s13   ;;  %s477_s12 = sphi %s508_s12, %s600_s12  }
   0x3   : > { %p27_p1 = scmp.ge.s32.totalorder %s25_s15, 2  ;;  %p158_p2 = scmp.lt.s32.totalorder %s485_s14, 3 }
   0x5   : > { %s603_s15 = smov (%p27_p1, %s25_s15), 0  ;;  %p159_p3 = pnand %p420_p0, %p158_p2 }
   0x6   : > { %v217_v0 = vld [vmem:[%s597_s1 + $0x8] sm:$0xff] (!%p159_p3)  ;;  %v219_v1 = vld [vmem:[%s597_s1 + $0x18] sm:$0xff] (!%p159_p3)  ;;  %v216_v2 = vld [vmem:[%s597_s1] sm:$0xff] (!%p159_p3)  ;;  %p192_p4 = scmp.lt.s32.totalorder (!%p159_p3), %s477_s12, 1  ;;  %v487_v7 = vmov (!%p159_p3), 0   ;;  %vm252_vm0 = vcmask (!%p159_p3), 523264   ;;  %v242_v28 = vlaneseq (!%p159_p3) }
   0x7   : > { %162 = sbr.rel (%p159_p3) target bundleno = 262 (0x106), region = 32  ;;  %v233_v3 = vpack.c.bf16 (!%p159_p3), %v219_v1, %v217_v0  ;;  %v218_v4 = vld [vmem:[%s597_s1 + $0x10] sm:$0xff] (!%p159_p3)  ;;  %v221_v5 = vld [vmem:[%s597_s1 + $0x28] sm:$0xff] (!%p159_p3)  ;;  %v223_v6 = vld [vmem:[%s597_s1 + $0x38] sm:$0xff] (!%p159_p3)  ;;  %288 = vmatprep.mubr.bf16.mxu0 (!%p159_p3), %v487_v7 }
   0x8   : > { %v232_v8 = vpack.c.bf16 (!%p159_p3), %v218_v4, %v216_v2  ;;  %v235_v9 = vpack.c.bf16 (!%p159_p3), %v223_v6, %v221_v5  ;;  %v220_v10 = vld [vmem:[%s597_s1 + $0x20] sm:$0xff] (!%p159_p3)  ;;  %v222_v11 = vld [vmem:[%s597_s1 + $0x30] sm:$0xff] (!%p159_p3)  ;;  %v225_v12 = vld [vmem:[%s597_s1 + $0x48] sm:$0xff] (!%p159_p3)  ;;  %v243_v29 = vshrl.u32 (!%p159_p3), %v242_v28, 7 }
   0x9   : > { %256 = vmatprep.subr.bf16.mxu0 (!%p159_p3), %v233_v3  ;;  %v227_v13 = vld [vmem:[%s597_s1 + $0x58] sm:$0xff] (!%p159_p3)  ;;  %v234_v14 = vpack.c.bf16 (!%p159_p3), %v222_v11, %v220_v10  ;;  %v224_v16 = vld [vmem:[%s597_s1 + $0x40] sm:$0xff] (!%p159_p3)  ;;  %v226_v17 = vld [vmem:[%s597_s1 + $0x50] sm:$0xff] (!%p159_p3) }
   0xa   : > { %257 = vmatpush1.bf16.msra.mxu0 (!%p159_p3), %v232_v8  ;;  %v237_v15 = vpack.c.bf16 (!%p159_p3), %v227_v13, %v225_v12  ;;  %v229_v18 = vld [vmem:[%s597_s1 + $0x68] sm:$0xff] (!%p159_p3)  ;;  %v231_v19 = vld [vmem:[%s597_s1 + $0x78] sm:$0xff] (!%p159_p3)  ;;  %v236_v20 = vpack.c.bf16 (!%p159_p3), %v226_v17, %v224_v16  ;;  %v228_v22 = vld [vmem:[%s597_s1 + $0x60] sm:$0xff] (!%p159_p3)  ;;  %v244_v30 = vsub.s32 (!%p159_p3), 0, %v243_v29  ;;  %v248_v32 = vsub.s32 (!%p159_p3), 1, %v243_v29 }
   0xb   : > { %258 = vmatprep.subr.bf16.mxu0 (!%p159_p3), %v235_v9  ;;  %v239_v21 = vpack.c.bf16 (!%p159_p3), %v231_v19, %v229_v18  ;;  %v230_v23 = vld [vmem:[%s597_s1 + $0x70] sm:$0xff] (!%p159_p3)  ;;  %v240_v31 = vld [vmem:[%s598_s2] sm:$0x3] (!%p159_p3) }
   0xc   : > { %v238_v24 = vpack.c.bf16 (!%p159_p3), %v230_v23, %v228_v22  ;;  %v245_v33 = vrot.slane (!%p159_p3), %v240_v31, %v244_v30  ;;  %v249_v34 = vrot.slane (!%p159_p3), %v240_v31, %v248_v32 }
   0xe   : > { %s605_s12 = smov (!%p192_p4, %s477_s12), 1  ;;  %259 = vmatpush1.bf16.msra.mxu0 %v234_v14 }
   0xf   : > { %s428_s21 = sshll.u32 %s605_s12, 4  ;;  %260 = vmatprep.subr.bf16.mxu0 %v237_v15  ;;  %s429_s4 = sshll.u32 %s605_s12, 5 }
  0x10   : > { %s199_s28 = scalar_lea.vmem %s596_s0, %s428_s21  ;;  %s210_s7 = scalar_lea.vmem %s599_s3, %s429_s4 }
  0x11   : > { %v213_v25 = vld [vmem:[%s199_s28] sm:$0xff]  ;;  %v214_v26 = vld [vmem:[%s199_s28 + $0x8] sm:$0xff] }
  0x12   : > { %261 = vmatpush1.bf16.msra.mxu0 %v236_v20  ;;  %v215_v27 = vpack.c.bf16 %v214_v26, %v213_v25 }
  0x13   : > { %262 = vmatprep.subr.bf16.mxu0 %v239_v21 }
  0x16   : > { %263 = vmatpush1.bf16.msra.mxu0 %v238_v24 }
  0x19   : > { %425 = vmatmul.mubr.msk.bf16.vlgmr.msra.gmra.mrb[0].mxu0 %vm252_vm0, %v215_v27 }
  0xec   : > { %v290_v35 = vpop.f32.mrb[0].mxu0 }
  0xed   : > { %v291_v36 = vadd.f32 %v290_v35, %v245_v33  ;;  %v292_v37 = vpop.f32.mrb[1].mxu0 }
  0xee   : > { %v293_v38 = vadd.f32 %v292_v37, %v249_v34  ;;  %v294_v39 = vpop.f32.mrb[2].mxu0 }
  0xef   : > { %v299_v40 = vmul.f32 0.5, %v291_v36  ;;  %v295_v41 = vadd.f32 %v294_v39, %v245_v33  ;;  %v296_v42 = vpop.f32.mrb[3].mxu0 }
  0xf0   : > { %v300_v43 = vmul.f32 0.5, %v293_v38  ;;  %v297_v44 = vadd.f32 %v296_v42, %v249_v34 }
  0xf1   : > { %455 = vtanh.f32 %v299_v40  ;;  %v301_v45 = vmul.f32 0.5, %v295_v41 }
  0xf2   : > { %457 = vtanh.f32 %v300_v43  ;;  %v302_v46 = vmul.f32 0.5, %v297_v44 }
  0xf3   : > { %459 = vtanh.f32 %v301_v45 }
  0xf4   : > { %461 = vtanh.f32 %v302_v46 }
  0xfb   : > { %v456_v47 = vpop.eup %455 }
  0xfc   : > { %v458_v48 = vpop.eup %457  ;;  %v307_v49 = vadd.f32 1.0, %v456_v47 }
  0xfd   : > { %v460_v50 = vpop.eup %459  ;;  %v308_v51 = vadd.f32 1.0, %v458_v48 }
  0xfe   : > { %v462_v52 = vpop.eup %461  ;;  %v311_v53 = vmul.f32 0.5, %v307_v49  ;;  %v309_v54 = vadd.f32 1.0, %v460_v50 }
  0xff   : > { %v312_v55 = vmul.f32 0.5, %v308_v51  ;;  %v310_v56 = vadd.f32 1.0, %v462_v52 }
 0x100   : > { %v315_v57 = vmul.f32 %v311_v53, %v291_v36  ;;  %v313_v58 = vmul.f32 0.5, %v309_v54 }
 0x101   : > { %v316_v59 = vmul.f32 %v312_v55, %v293_v38  ;;  %v314_v60 = vmul.f32 0.5, %v310_v56 }
 0x102   : > { %319 = vst [vmem:[%s210_s7] sm:$0xff] %v315_v57  ;;  %v317_v61 = vmul.f32 %v313_v58, %v295_v41 }
 0x103   : > { %320 = vst [vmem:[%s210_s7 + $0x8] sm:$0xff] %v316_v59  ;;  %v318_v62 = vmul.f32 %v314_v60, %v297_v44 }
 0x104   : > { %321 = vst [vmem:[%s210_s7 + $0x10] sm:$0xff] %v317_v61 }
 0x105   : > { %322 = vst [vmem:[%s210_s7 + $0x18] sm:$0xff] %v318_v62 }
 0x106 PF: > { %s13_s14 = sadd.s32 1, %s485_s14   ;;  %s600_s12 = smov %s481_s13 }
 0x107   : > { %p10_p5 = scmp.ge.s32.totalorder %s13_s14, 4   ;;  %s601_s13 = smov %s603_s15 }
 0x109   :  { %12 = sbr.rel (!%p10_p5) target bundleno = 2 (0x2), region = 62 }

// kernel: efficientnet_forward.40
= control target key start
LH: loop header
LB: loop body
LE: loop exit
PB: predicated region body
PF: predicated region fallthrough
CT: control target
= control target key end

     0   :  { %v622_v3 = vmov 0.0|0.0   ;;  %vm623_vm0 = vmmov 0   ;;  %v624_v8 = vmov 0.0   ;;  %v625_v20 = vmov 1983009808   ;;  %s856_s1 = inlined_call_operand.vmem [shape: f32[384,16], index: 1, kind: input, shape index: {}]   ;;  %s857_s0 = inlined_call_operand.vmem [shape: f32[2,384], index: 0, kind: input, shape index: {}]   ;;  %s858_s3 = inlined_call_operand.vmem [shape: f32[16,384], index: 3, kind: input, shape index: {}]   ;;  %s859_s2 = inlined_call_operand.vmem [shape: f32[1,16], index: 2, kind: input, shape index: {}]   ;;  %s860_s4 = inlined_call_operand.vmem [shape: f32[1,384], index: 4, kind: input, shape index: {}]   ;;  %s861_s5 = inlined_call_operand.vmem [shape: f32[2,384], index: 5, kind: output, shape index: {}]  }
   0x1   :  { %v37_v0 = vld [vmem:[%s856_s1 + $0x80] sm:$0xff]  ;;  %v38_v1 = vld [vmem:[%s856_s1 + $0x88] sm:$0xff]  ;;  %578 = vmatprep.subr.bf16.mxu1 %v622_v3  ;;  %v39_v6 = vld [vmem:[%s856_s1 + $0x90] sm:$0xff]  ;;  %536 = vmatprep.mubr.msk.f32.mxu1 %vm623_vm0, %v624_v8  ;;  %v79_v21 = vunpack.c.l.s4 %v625_v20  ;;  %v81_v22 = vlaneseq  ;;  %vm264_vm1 = vcmask 130048  }
   0x2   :  { %v21_v2 = vld [vmem:[%s856_s1] sm:$0xff]  ;;  %v546_v4 = vpack.c.bf16 %v38_v1, %v37_v0  ;;  %v22_v5 = vld [vmem:[%s856_s1 + $0x8] sm:$0xff]  ;;  %v40_v7 = vld [vmem:[%s856_s1 + $0x98] sm:$0xff] }
   0x3   :  { %v548_v9 = vpack.c.bf16 %v22_v5, %v21_v2  ;;  %v550_v10 = vpack.c.bf16 %v40_v7, %v39_v6  ;;  %v23_v11 = vld [vmem:[%s856_s1 + $0x10] sm:$0xff]  ;;  %v24_v12 = vld [vmem:[%s856_s1 + $0x18] sm:$0xff]  ;;  %v53_v13 = vld [vmem:[%s856_s1 + $0x100] sm:$0xff]  ;;  %v80_v33 = vunpack.c.0.s8 %v79_v21  ;;  %v720_v34 = vshrl.u32 %v81_v22, 7 }
   0x4   :  { %547 = vmatprep.subr.bf16.mxu0 %v546_v4  ;;  %v54_v14 = vld [vmem:[%s856_s1 + $0x108] sm:$0xff]  ;;  %v41_v15 = vld [vmem:[%s856_s1 + $0xa0] sm:$0xff]  ;;  %v552_v17 = vpack.c.bf16 %v24_v12, %v23_v11  ;;  %v55_v19 = vld [vmem:[%s856_s1 + $0x110] sm:$0xff] }
   0x5   :  { %v42_v16 = vld [vmem:[%s856_s1 + $0xa8] sm:$0xff]  ;;  %549 = vmatpush3.bf16.msra.mxu0 %v548_v9  ;;  %v579_v18 = vpack.c.bf16 %v54_v14, %v53_v13  ;;  %v25_v24 = vld [vmem:[%s856_s1 + $0x20] sm:$0xff]  ;;  %v56_v26 = vld [vmem:[%s856_s1 + $0x118] sm:$0xff]  ;;  %v742_v44 = vsub.s32 %v80_v33, %v720_v34 }
   0x6   :  { %551 = vmatprep.subr.bf16.mxu0 %v550_v10  ;;  %v554_v23 = vpack.c.bf16 %v42_v16, %v41_v15  ;;  %v26_v25 = vld [vmem:[%s856_s1 + $0x28] sm:$0xff]  ;;  %v582_v27 = vpack.c.bf16 %v56_v26, %v55_v19  ;;  %v43_v28 = vld [vmem:[%s856_s1 + $0xb0] sm:$0xff]  ;;  %v44_v29 = vld [vmem:[%s856_s1 + $0xb8] sm:$0xff] }
   0x7   :  { %580 = vmatpush3.bf16.msra.mxu1 %v579_v18  ;;  %v57_v30 = vld [vmem:[%s856_s1 + $0x120] sm:$0xff]  ;;  %v58_v31 = vld [vmem:[%s856_s1 + $0x128] sm:$0xff]  ;;  %v556_v32 = vpack.c.bf16 %v26_v25, %v25_v24  ;;  %v558_v35 = vpack.c.bf16 %v44_v29, %v43_v28  ;;  %v27_v36 = vld [vmem:[%s856_s1 + $0x30] sm:$0xff] }
   0x8   :  { %581 = vmatprep.subr.bf16.mxu1 %v622_v3  ;;  %v28_v37 = vld [vmem:[%s856_s1 + $0x38] sm:$0xff]  ;;  %v585_v38 = vpack.c.bf16 %v58_v31, %v57_v30  ;;  %v45_v39 = vld [vmem:[%s856_s1 + $0xc0] sm:$0xff]  ;;  %v46_v40 = vld [vmem:[%s856_s1 + $0xc8] sm:$0xff] }
   0x9   :  { %553 = vmatpush3.bf16.msra.mxu0 %v552_v17  ;;  %v59_v41 = vld [vmem:[%s856_s1 + $0x130] sm:$0xff]  ;;  %v60_v42 = vld [vmem:[%s856_s1 + $0x138] sm:$0xff]  ;;  %v560_v43 = vpack.c.bf16 %v28_v37, %v27_v36  ;;  %v562_v45 = vpack.c.bf16 %v46_v40, %v45_v39  ;;  %v29_v46 = vld [vmem:[%s856_s1 + $0x40] sm:$0xff] }
   0xa   :  { %555 = vmatprep.subr.bf16.mxu0 %v554_v23  ;;  %v30_v47 = vld [vmem:[%s856_s1 + $0x48] sm:$0xff]  ;;  %v588_v48 = vpack.c.bf16 %v60_v42, %v59_v41  ;;  %v47_v49 = vld [vmem:[%s856_s1 + $0xd0] sm:$0xff]  ;;  %v48_v50 = vld [vmem:[%s856_s1 + $0xd8] sm:$0xff] }
   0xb   :  { %583 = vmatpush3.bf16.msra.mxu1 %v582_v27  ;;  %v61_v51 = vld [vmem:[%s856_s1 + $0x140] sm:$0xff]  ;;  %v62_v52 = vld [vmem:[%s856_s1 + $0x148] sm:$0xff]  ;;  %v564_v54 = vpack.c.bf16 %v30_v47, %v29_v46  ;;  %v566_v56 = vpack.c.bf16 %v48_v50, %v47_v49  ;;  %v31_v57 = vld [vmem:[%s856_s1 + $0x50] sm:$0xff]  ;;  %v259_v46 = vsub.s32 2, %v720_v34 }
   0xc   :  { %584 = vmatprep.subr.bf16.mxu1 %v622_v3  ;;  %v20_v53 = vld [vmem:[%s857_s0] sm:$0x3f]  ;;  %v32_v58 = vld [vmem:[%s856_s1 + $0x58] sm:$0xff]  ;;  %v591_v59 = vpack.c.bf16 %v62_v52, %v61_v51  ;;  %v50_v61 = vld [vmem:[%s856_s1 + $0xe8] sm:$0xff] }
   0xd   :  { %557 = vmatpush3.bf16.msra.mxu0 %v556_v32  ;;  %v84_v55 = vrot.slane %v20_v53, %v742_v44  ;;  %v49_v60 = vld [vmem:[%s856_s1 + $0xe0] sm:$0xff]  ;;  %v63_v63 = vld [vmem:[%s856_s1 + $0x150] sm:$0xff]  ;;  %v64_v0 = vld [vmem:[%s856_s1 + $0x158] sm:$0xff]  ;;  %v568_v1 = vpack.c.bf16 %v32_v58, %v31_v57  ;;  %v77_v20 = vcombine.high %v20_v53, %v20_v53 }
   0xe   :  { %559 = vmatprep.subr.bf16.mxu0 %v558_v35  ;;  %v570_v2 = vpack.c.bf16 %v50_v61, %v49_v60  ;;  %v33_v4 = vld [vmem:[%s856_s1 + $0x60] sm:$0xff]  ;;  %v34_v5 = vld [vmem:[%s856_s1 + $0x68] sm:$0xff]  ;;  %v594_v6 = vpack.c.bf16 %v64_v0, %v63_v63  ;;  %v51_v7 = vld [vmem:[%s856_s1 + $0xf0] sm:$0xff] }
   0xf   :  { %586 = vmatpush3.bf16.msra.mxu1 %v585_v38  ;;  %v92_v62 = vcombine.high %v84_v55, %v84_v55  ;;  %v52_v9 = vld [vmem:[%s856_s1 + $0xf8] sm:$0xff]  ;;  %v65_v10 = vld [vmem:[%s856_s1 + $0x160] sm:$0xff]  ;;  %v66_v11 = vld [vmem:[%s856_s1 + $0x168] sm:$0xff]  ;;  %v572_v12 = vpack.c.bf16 %v34_v5, %v33_v4  ;;  %v91_v22 = vrot.slane %v77_v20, %v742_v44 }
  0x10   :  { %587 = vmatprep.subr.bf16.mxu1 %v622_v3  ;;  %v574_v13 = vpack.c.bf16 %v52_v9, %v51_v7  ;;  %v35_v14 = vld [vmem:[%s856_s1 + $0x70] sm:$0xff]  ;;  %v36_v15 = vld [vmem:[%s856_s1 + $0x78] sm:$0xff]  ;;  %v597_v16 = vpack.c.bf16 %v66_v11, %v65_v10  ;;  %v242_v23 = vld [vmem:[%s858_s3 + $0x8] sm:$0xff] }
  0x11   :  { %561 = vmatpush3.bf16.msra.mxu0 %v560_v43  ;;  %160 = vmatprep.mubr.f32.mxu0 %v92_v62  ;;  %v67_v17 = vld [vmem:[%s856_s1 + $0x170] sm:$0xff]  ;;  %v68_v18 = vld [vmem:[%s856_s1 + $0x178] sm:$0xff]  ;;  %v576_v19 = vpack.c.bf16 %v36_v15, %v35_v14  ;;  %v245_v24 = vld [vmem:[%s858_s3 + $0x20] sm:$0xff] }
  0x12   :  { %563 = vmatprep.subr.bf16.mxu0 %v562_v45  ;;  %v600_v21 = vpack.c.bf16 %v68_v18, %v67_v17  ;;  %v602_v25 = vpack.c.bf16 %v245_v24, %v242_v23  ;;  %v241_v26 = vld [vmem:[%s858_s3] sm:$0xff]  ;;  %v246_v28 = vld [vmem:[%s858_s3 + $0x28] sm:$0xff]  ;;  %v251_v45 = vsub.s32 0, %v720_v34 }
  0x13   :  { %589 = vmatpush3.bf16.msra.mxu1 %v588_v48  ;;  %v446_v32 = vld [vmem:[%s859_s2] ss:$0 sm:$0xff]  ;;  %v255_v48 = vsub.s32 1, %v720_v34 }
  0x14   :  { %590 = vmatprep.subr.bf16.mxu1 %v622_v3  ;;  %v247_v47 = vld [vmem:[%s860_s4] sm:$0x7] }
  0x15   :  { %565 = vmatpush3.bf16.msra.mxu0 %v564_v54  ;;  %v252_v49 = vrot.slane %v247_v47, %v251_v45  ;;  %v260_v50 = vrot.slane %v247_v47, %v259_v46  ;;  %v256_v51 = vrot.slane %v247_v47, %v255_v48 }
  0x16   :  { %567 = vmatprep.subr.bf16.mxu0 %v566_v56 }
  0x17   :  { %592 = vmatpush3.bf16.msra.mxu1 %v591_v59 }
  0x18   :  { %593 = vmatprep.subr.bf16.mxu1 %v622_v3 }
  0x19   :  { %569 = vmatpush3.bf16.msra.mxu0 %v568_v1 }
  0x1a   :  { %571 = vmatprep.subr.bf16.mxu0 %v570_v2 }
  0x1b   :  { %595 = vmatpush3.bf16.msra.mxu1 %v594_v6 }
  0x1c   :  { %596 = vmatprep.subr.bf16.mxu1 %v622_v3 }
  0x1d   :  { %573 = vmatpush3.bf16.msra.mxu0 %v572_v12 }
  0x1e   :  { %575 = vmatprep.subr.bf16.mxu0 %v574_v13 }
  0x1f   :  { %598 = vmatpush3.bf16.msra.mxu1 %v597_v16 }
  0x20   :  { %599 = vmatprep.subr.bf16.mxu1 %v622_v3 }
  0x21   :  { %577 = vmatpush3.bf16.msra.mxu0 %v576_v19 }
  0x22   :  { %603 = vmatprep.subr.bf16.mxu0 %v602_v25 }
  0x23   :  { %601 = vmatpush3.bf16.msra.mxu1 %v600_v21 }
  0x24   :  { %161 = vmatmul.mubr.f32.vlgmr.msra.gmra.mrb[0].mxu0 %v84_v55  ;;  %606 = vmatprep.subr.bf16.mxu1 %v622_v3  ;;  %v244_v3 = vld [vmem:[%s858_s3 + $0x18] sm:$0xff] }
  0x25   :  { %332 = vmatprep.mubr.f32.mxu0 %v624_v8  ;;  %v604_v27 = vpack.c.bf16 %v244_v3, %v241_v26 }
  0x26   :  { %537 = vmatmul.mubr.f32.vlgmr.msra.gmra.mrb[0].mxu1 %v91_v22 }
  0x27   :  { %543 = vmatprep.mubr.msk.f32.mxu1 %vm623_vm0, %v624_v8  ;;  %v243_v8 = vld [vmem:[%s858_s3 + $0x10] sm:$0xff]  ;;  %605 = vmatpush1.bf16.msra.mxu0 %v604_v27 }
  0x28   :  { %v607_v29 = vpack.c.bf16 %v246_v28, %v243_v8 }
  0x2a   :  { %608 = vmatpush3.bf16.msra.mxu1 %v607_v29 }
  0xf7   :  { %v481_v30 = vpop.f32.mrb[0].mxu0 }
  0xf8   :  { %v482_v31 = vpop.f32.mrb[1].mxu0 }
  0xf9   :  { %v483_v33 = vadd.f32 %v482_v31, %v481_v30  ;;  %v232_v35 = vpop.f32.mrb[0].mxu1 }
  0xfa   :  { %v538_v36 = vpop.f32.mrb[1].mxu1 }
  0xfb   :  { %v163_v37 = vadd.f32 %v483_v33, %v446_v32 }
  0xfd   :  { %v233_v38 = vadd.f32 %v232_v35, %v163_v37 }
  0xff   :  { %v236_v39 = vmul.f32 0.5, %v233_v38 }
 0x101   :  { %614 = vtanh.f32 %v236_v39 }
 0x10b   :  { %v615_v40 = vpop.eup %614 }
 0x10c   :  { %v238_v41 = vadd.f32 1.0, %v615_v40 }
 0x10e   :  { %v239_v42 = vmul.f32 0.5, %v238_v41 }
 0x110   :  { %v240_v43 = vmul.f32 %v239_v42, %v233_v38 }
 0x112   :  { %447 = vmatmul.mubr.msk.f32.vlgmr.msra.gmra.mrb[2].mxu0 %vm264_vm1, %v240_v43  ;;  %544 = vmatmul.mubr.msk.f32.vlgmr.msra.gmra.mrb[2].mxu1 %vm264_vm1, %v240_v43 }
 0x1e5   :  { %v334_v52 = vpop.f32.mrb[2].mxu0  ;;  %v405_v53 = vpop.f32.mrb[2].mxu1 }
 0x1e6   :  { %v335_v54 = vadd.f32 %v334_v52, %v252_v49  ;;  %v406_v55 = vadd.f32 %v405_v53, %v260_v50  ;;  %v336_v56 = vpop.f32.mrb[3].mxu0  ;;  %v545_v57 = vpop.f32.mrb[3].mxu1 }
 0x1e7   :  { %v337_v58 = vadd.f32 %v336_v56, %v256_v51 }
 0x1e8   :  { %v409_v59 = vmul.f32 0.5, %v335_v54  ;;  %v411_v60 = vmul.f32 0.5, %v406_v55 }
 0x1e9   :  { %v410_v61 = vmul.f32 0.5, %v337_v58 }
 0x1ea   :  { %616 = vtanh.f32 %v409_v59 }
 0x1eb   :  { %618 = vtanh.f32 %v411_v60 }
 0x1ec   :  { %620 = vtanh.f32 %v410_v61 }
 0x1f4   :  { %v617_v62 = vpop.eup %616 }
 0x1f5   :  { %v619_v63 = vpop.eup %618  ;;  %v415_v0 = vadd.f32 1.0, %v617_v62 }
 0x1f6   :  { %v621_v34 = vpop.eup %620  ;;  %v417_v1 = vadd.f32 1.0, %v619_v63 }
 0x1f7   :  { %v418_v2 = vmul.f32 0.5, %v415_v0  ;;  %v416_v4 = vadd.f32 1.0, %v621_v34 }
 0x1f8   :  { %v420_v5 = vmul.f32 0.5, %v417_v1 }
 0x1f9   :  { %v419_v6 = vmul.f32 0.5, %v416_v4 }
 0x1fa   :  { %v438_v9 = vrot.slane %v420_v5, %v742_v44 }
 0x1fb   :  { %v424_v7 = vcombine.low %v418_v2, %v419_v6 }
 0x1fd   :  { %v431_v10 = vrot.slane %v424_v7, %v742_v44 }
 0x1ff   :  { %v439_v11 = vcombine.low %v431_v10, %v438_v9 }
 0x201   :  { %441 = vst [vmem:[%s861_s5] sm:$0x3f] %v439_v11 }

// kernel: efficientnet_forward.43
= control target key start
LH: loop header
LB: loop body
LE: loop exit
PB: predicated region body
PF: predicated region fallthrough
CT: control target
= control target key end

     0   :  { %s325_s0 = inlined_call_operand.vmem [shape: f32[2,256], index: 0, kind: input, shape index: {}]   ;;  %s326_s1 = inlined_call_operand.vmem [shape: f32[256,18], index: 1, kind: input, shape index: {}]   ;;  %s327_s2 = inlined_call_operand.vmem [shape: f32[1,18], index: 2, kind: input, shape index: {}]   ;;  %s328_s3 = inlined_call_operand.hbm [shape: f32[2,18], index: 3, kind: output, shape index: {}]  }
   0x1   :  { %v46_v0 = vld [vmem:[%s326_s1 + $0x80] sm:$0xff]  ;;  %v47_v1 = vld [vmem:[%s326_s1 + $0x88] sm:$0xff]  ;;  %v48_v5 = vld [vmem:[%s326_s1 + $0x90] sm:$0xff] }
   0x2   :  { %v30_v2 = vld [vmem:[%s326_s1] sm:$0xff]  ;;  %v70_v3 = vpack.c.bf16 %v47_v1, %v46_v0  ;;  %v31_v4 = vld [vmem:[%s326_s1 + $0x8] sm:$0xff]  ;;  %v49_v6 = vld [vmem:[%s326_s1 + $0x98] sm:$0xff] }
   0x3   :  { %v62_v7 = vpack.c.bf16 %v31_v4, %v30_v2  ;;  %v71_v8 = vpack.c.bf16 %v49_v6, %v48_v5  ;;  %v32_v9 = vld [vmem:[%s326_s1 + $0x10] sm:$0xff]  ;;  %v33_v10 = vld [vmem:[%s326_s1 + $0x18] sm:$0xff]  ;;  %v50_v11 = vld [vmem:[%s326_s1 + $0xa0] sm:$0xff] }
   0x4   :  { %143 = vmatprep.subr.bf16.mxu0 %v70_v3  ;;  %v51_v12 = vld [vmem:[%s326_s1 + $0xa8] sm:$0xff]  ;;  %v63_v13 = vpack.c.bf16 %v33_v10, %v32_v9  ;;  %v34_v15 = vld [vmem:[%s326_s1 + $0x20] sm:$0xff]  ;;  %v52_v17 = vld [vmem:[%s326_s1 + $0xb0] sm:$0xff] }
   0x5   :  { %144 = vmatpush3.bf16.msra.mxu0 %v62_v7  ;;  %v72_v14 = vpack.c.bf16 %v51_v12, %v50_v11  ;;  %v35_v16 = vld [vmem:[%s326_s1 + $0x28] sm:$0xff]  ;;  %v53_v18 = vld [vmem:[%s326_s1 + $0xb8] sm:$0xff]  ;;  %v36_v21 = vld [vmem:[%s326_s1 + $0x30] sm:$0xff] }
   0x6   :  { %145 = vmatprep.subr.bf16.mxu0 %v71_v8  ;;  %v64_v19 = vpack.c.bf16 %v35_v16, %v34_v15  ;;  %v73_v20 = vpack.c.bf16 %v53_v18, %v52_v17  ;;  %v37_v22 = vld [vmem:[%s326_s1 + $0x38] sm:$0xff]  ;;  %v54_v23 = vld [vmem:[%s326_s1 + $0xc0] sm:$0xff]  ;;  %v55_v24 = vld [vmem:[%s326_s1 + $0xc8] sm:$0xff] }
   0x7   :  { %v141_v25 = vld.sshfl [vmem:[%s325_s0] sm:$0x33 pattern:$0x76325410] }
   0x8   :  { %v25_v26 = vcombine.high %v141_v25, %v141_v25 }
   0x9   :  { %146 = vmatpush3.bf16.msra.mxu0 %v63_v13 }
   0xa   :  { %147 = vmatprep.subr.bf16.mxu0 %v72_v14 }
   0xb   :  { %8 = vsyncpa [#allocation3], 0  ;;  %v65_v27 = vpack.c.bf16 %v37_v22, %v36_v21  ;;  %v74_v28 = vpack.c.bf16 %v55_v24, %v54_v23  ;;  %v38_v29 = vld [vmem:[%s326_s1 + $0x40] sm:$0xff]  ;;  %v39_v30 = vld [vmem:[%s326_s1 + $0x48] sm:$0xff]  ;;  %v29_v31 = vpack.c.bf16 %v25_v26, %v25_v26  ;;  %v28_v51 = vpack.c.bf16 %v141_v25, %v141_v25  ;;  %s190_s25 = smov [#allocation2]  }
   0xc   :  { %v56_v32 = vld [vmem:[%s326_s1 + $0xd0] sm:$0xff]  ;;  %v57_v33 = vld [vmem:[%s326_s1 + $0xd8] sm:$0xff]  ;;  %v66_v34 = vpack.c.bf16 %v39_v30, %v38_v29  ;;  %v58_v38 = vld [vmem:[%s326_s1 + $0xe0] sm:$0xff]  ;;  %s133_s26 = sshll.u32 %s190_s25, 4  ;;  %vm125_vm0 = vcmask 140288   ;;  %s134_s26 = int_to_ptr.vmem [resolvable:$true] %s133_s26 }
   0xd   :  { %148 = vmatpush3.bf16.msra.mxu0 %v64_v19  ;;  %117 = vmatprep.mubr.bf16.mxu0 %v29_v31  ;;  %v75_v35 = vpack.c.bf16 %v57_v33, %v56_v32  ;;  %v40_v36 = vld [vmem:[%s326_s1 + $0x50] sm:$0xff]  ;;  %v41_v37 = vld [vmem:[%s326_s1 + $0x58] sm:$0xff]  ;;  %v59_v39 = vld [vmem:[%s326_s1 + $0xe8] sm:$0xff]  ;;  %p171_p1 = scmp.lt.s32.totalorder %s134_s26, %s134_s26 }
   0xe   :  { %149 = vmatprep.subr.bf16.mxu0 %v73_v20  ;;  %v67_v40 = vpack.c.bf16 %v41_v37, %v40_v36  ;;  %v76_v41 = vpack.c.bf16 %v59_v39, %v58_v38  ;;  %v42_v42 = vld [vmem:[%s326_s1 + $0x60] sm:$0xff]  ;;  %v43_v43 = vld [vmem:[%s326_s1 + $0x68] sm:$0xff]  ;;  %v60_v44 = vld [vmem:[%s326_s1 + $0xf0] sm:$0xff] }
   0xf   :  { %v61_v45 = vld [vmem:[%s326_s1 + $0xf8] sm:$0xff]  ;;  %v68_v46 = vpack.c.bf16 %v43_v43, %v42_v42  ;;  %v44_v48 = vld [vmem:[%s326_s1 + $0x70] sm:$0xff]  ;;  %v142_v53 = vld [vmem:[%s327_s2] ss:$0 sm:$0xff] }
  0x10   :  { %v77_v47 = vpack.c.bf16 %v61_v45, %v60_v44  ;;  %v45_v49 = vld [vmem:[%s326_s1 + $0x78] sm:$0xff]  ;;  %s166_s1 = scalar_lea.vmem %s134_s26, 32 }
  0x11   :  { %150 = vmatpush3.bf16.msra.mxu0 %v65_v27  ;;  %v69_v50 = vpack.c.bf16 %v45_v49, %v44_v48  ;;  %p167_p0 = scmp.ne.s32.totalorder %s134_s26, %s166_s1  ;;  %p172_p2 = scmp.lt.s32.totalorder %s166_s1, %s166_s1 }
  0x12   :  { %151 = vmatprep.subr.bf16.mxu0 %v74_v28 }
  0x13   :  { %p173_p3 = por %p172_p2, %p171_p1 }
  0x15   :  { %152 = vmatpush3.bf16.msra.mxu0 %v66_v34  ;;  %p174_p4 = pnand %p173_p3, %p167_p0 }
  0x16   :  { %153 = vmatprep.subr.bf16.mxu0 %v75_v35 }
  0x19   :  { %154 = vmatpush3.bf16.msra.mxu0 %v67_v40 }
  0x1a   :  { %155 = vmatprep.subr.bf16.mxu0 %v76_v41 }
  0x1d   :  { %156 = vmatpush3.bf16.msra.mxu0 %v68_v46 }
  0x1e   :  { %157 = vmatprep.subr.bf16.mxu0 %v77_v47 }
  0x21   :  { %158 = vmatpush3.bf16.msra.mxu0 %v69_v50 }
  0x24   :  { %118 = vmatmul.mubr.bf16.vlgmr.msra.gmra.mrb[0].mxu0 %v28_v51 }
  0xf7   :  { %v159_v52 = vpop.f32.mrb[0].mxu0 }
  0xf8   :  { %v160_v54 = vpop.f32.mrb[1].mxu0 }
  0xf9   :  { %v161_v55 = vadd.f32 %v160_v54, %v159_v52  ;;  %v162_v56 = vpop.f32.mrb[2].mxu0 }
  0xfa   :  { %v163_v57 = vpop.f32.mrb[3].mxu0 }
  0xfb   :  { %v120_v58 = vadd.f32 %v161_v55, %v142_v53 }
  0xfd   :  { %126 = vst.msk [vmem:[#allocation2] sm:$0x3] %vm125_vm0, %v120_v58 }
  0xfe   :  { %177 = shalt.err (!%p174_p4)
}
  0xff   :  { %s178_s2 = scalar_lea.hbm %s328_s3, 32 }
 0x100   :  { %p179_p5 = scmp.ne.s32.totalorder %s328_s3, %s178_s2  ;;  %p182_p6 = scmp.lt.u32.totalorder %s178_s2, %s328_s3 }
 0x102   :  { %p184_p7 = pnand %p182_p6, %p179_p5 }
 0x104   :  { %187 = shalt.err (!%p184_p7)
}
 0x105   :  { %136 = dma.vmem_to_hbm [thread:$0]  %s134_s26, 32, %s328_s3, [#allocation3]  }
 0x106   :  { %188 = dma.done.wait [#allocation3], 32  }
 0x107   :  { %189 = vsyncadd [#allocation3], 4294967264 }
 0x108   :  { %140 = vsyncpa [#allocation3], 1 }

</bundles_post_ra>
